<compile_context>
chip_gen: v6e
topology: v6e:2x2x1
jax: 0.10.0
libtpu: 0.0.40
codegen_flags: <defaults>
</compile_context>

<pallas_src>
import functools

import jax
import jax.numpy as jnp
from jax.experimental import pallas as pl
from jax.experimental.pallas import tpu as pltpu


# ----------------------------------------------------------------------------
# Pallas kernel 1: fused matmul + bias + activation (conv / linear hot path)
# ----------------------------------------------------------------------------
def _mm_bias_act_kernel(a_ref, w_ref, b_ref, o_ref, *, act):
    acc = jnp.dot(a_ref[...], w_ref[...], preferred_element_type=jnp.float32)
    acc = acc + b_ref[...]
    if act == "relu":
        acc = jnp.maximum(acc, 0.0)
    o_ref[...] = acc.astype(o_ref.dtype)


def matmul_bias_act(a, w, b, act="none", out_dtype=jnp.float32):
    """act(a @ w + b).  a: (M, K), w: (K, N) bf16 (pre-prepared), b: (1, N) f32.

    Single-block call: the whole operands live in VMEM (every layer of this
    batch-2 VAE is far below VMEM capacity), so there is no per-call padding,
    no grid, and minimal launch overhead.
    """
    a = a.astype(jnp.bfloat16)          # full-rate MXU; accumulation stays f32
    M, _ = a.shape
    _, N = w.shape
    return pl.pallas_call(
        functools.partial(_mm_bias_act_kernel, act=act),
        out_shape=jax.ShapeDtypeStruct((M, N), out_dtype),
        in_specs=[pl.BlockSpec(memory_space=pltpu.MemorySpace.VMEM)] * 3,
        out_specs=pl.BlockSpec(memory_space=pltpu.MemorySpace.VMEM),
    )(a, w, b)


# ----------------------------------------------------------------------------
# Pallas kernel 2: final deconv (OC=1) + sigmoid + BCE(sum) + KL, fused
# ----------------------------------------------------------------------------
def _dc3_sigmoid_bce_kl_kernel(cols_ref, w_ref, b_ref, x_ref, mu_ref, lv_ref,
                               o_ref, acc_ref):
    step = pl.program_id(0)

    @pl.when(step == 0)
    def _():
        acc_ref[...] = jnp.zeros_like(acc_ref)

    # last 4x4 stride-1 (de)conv, single real output channel -> logits
    s = jnp.dot(cols_ref[...], w_ref[...], preferred_element_type=jnp.float32)
    logit = s[:, :1] + b_ref[...]                                   # (TM, 1)
    x = x_ref[...]
    # BCE with logits (== sigmoid followed by binary_cross_entropy, but stable):
    #   softplus(l) - x*l  with softplus(l) = max(l,0) + log1p(exp(-|l|))
    bce = (jnp.maximum(logit, 0.0) - logit * x
           + jnp.log1p(jnp.exp(-jnp.abs(logit))))
    acc_ref[...] += jnp.sum(bce, keepdims=True)

    @pl.when(step == pl.num_programs(0) - 1)
    def _():
        mu = mu_ref[...]
        lv = lv_ref[...]
        kl = jnp.sum(-0.5 * (1.0 + lv - mu * mu - jnp.exp(lv)), keepdims=True)
        o_ref[...] = acc_ref[...] + kl


def dc3_sigmoid_bce_kl(cols, w_pad, b, x_t, mu, logvar):
    """cols: (M, K) im2col of the last deconv input; w_pad: (K, 128) with only
    column 0 real; x_t: (M, 1) BCE target; returns scalar BCE_sum + KL."""
    cols = cols.astype(jnp.bfloat16)
    M, K = cols.shape
    # block rows: multiple of 16 (bf16 sublane packing); fall back to one block.
    TM = M
    for parts in (4, 2):
        if M % parts == 0 and (M // parts) % 16 == 0:
            TM = M // parts
            break
    Nb, L = mu.shape
    out = pl.pallas_call(
        _dc3_sigmoid_bce_kl_kernel,
        out_shape=jax.ShapeDtypeStruct((1, 1), jnp.float32),
        grid=(M // TM,),
        in_specs=[
            pl.BlockSpec((TM, K), lambda i: (i, 0)),        # cols (bf16)
            pl.BlockSpec((K, 128), lambda i: (0, 0)),       # weight (bf16)
            pl.BlockSpec((1, 1), lambda i: (0, 0)),         # bias scalar
            pl.BlockSpec((TM, 1), lambda i: (i, 0)),        # BCE target
            pl.BlockSpec((Nb, L), lambda i: (0, 0)),        # mu
            pl.BlockSpec((Nb, L), lambda i: (0, 0)),        # logvar
        ],
        out_specs=pl.BlockSpec((1, 1), lambda i: (0, 0)),
        scratch_shapes=[pltpu.VMEM((1, 1), jnp.float32)],
        compiler_params=pltpu.CompilerParams(dimension_semantics=("arbitrary",)),
    )(cols, w_pad, b, x_t, mu, logvar)
    return out[0, 0]


# ----------------------------------------------------------------------------
# NHWC im2col + conv / sub-pixel deconv wrappers (plain-JAX glue around kernels)
# ----------------------------------------------------------------------------
def _im2col(x, k, stride, pad_lo, pad_hi):
    """NHWC im2col: (N,H,W,C) -> ((N*OH*OW), k*k*C) with (kh,kw,C) patch order
    (C stays on the fast/lane axis, so no relayout transpose is needed)."""
    N, H, W, C = x.shape
    xp = jnp.pad(x, ((0, 0), (pad_lo, pad_hi), (pad_lo, pad_hi), (0, 0)))
    Hp, Wp = xp.shape[1], xp.shape[2]
    OH = (Hp - k) // stride + 1
    OW = (Wp - k) // stride + 1
    slabs = []
    for i in range(k):
        for j in range(k):
            slabs.append(xp[:, i:i + stride * OH:stride,
                            j:j + stride * OW:stride, :])
    cols = jnp.concatenate(slabs, axis=-1)
    return cols.reshape(N * OH * OW, k * k * C), OH, OW


def conv2d_nhwc(x, w_mat, b_row, k, stride, pad, act):
    N, C_out = x.shape[0], w_mat.shape[1]
    cols, OH, OW = _im2col(x, k, stride, pad, pad)
    y = matmul_bias_act(cols, w_mat, b_row, act=act, out_dtype=jnp.bfloat16)
    return y.reshape(N, OH, OW, C_out)


def deconv_s2_nhwc(x, w_comb, b_comb, out_pad, act):
    """ConvTranspose2d(k=4, stride=2, pad=1, output_padding=out_pad) via
    sub-pixel decomposition: a 3x3 stride-1 conv on the UN-dilated input whose
    128-wide output holds the (2,2,OC) sub-pixel values, followed by a pixel
    shuffle.  No zero-dilated im2col, no structural-zero MXU work."""
    N, H, W, _ = x.shape
    OC = w_comb.shape[1] // 4
    cols, OH, OW = _im2col(x, 3, 1, 1, 1 + out_pad)
    y = matmul_bias_act(cols, w_comb, b_comb, act=act, out_dtype=jnp.bfloat16)
    y = y.reshape(N, OH, OW, 2, 2, OC).transpose(0, 1, 3, 2, 4, 5)
    y = y.reshape(N, 2 * OH, 2 * OW, OC)
    return y[:, :2 * H + out_pad, :2 * W + out_pad, :]


# ----------------------------------------------------------------------------
# parameters: PyTorch-layout init + one-time preparation into kernel layout
# ----------------------------------------------------------------------------
def init_params(key, latent_dim):
    ks = jax.random.split(key, 18)

    def u(k, shape, fan_in):
        bound = 1.0 / (fan_in ** 0.5)
        return jax.random.uniform(k, shape, jnp.float32, -bound, bound)

    p = {}
    p["ec1_w"] = u(ks[0], (32, 1, 4, 4), 1 * 16);    p["ec1_b"] = u(ks[1], (32,), 1 * 16)
    p["ec2_w"] = u(ks[2], (32, 32, 4, 4), 32 * 16);  p["ec2_b"] = u(ks[3], (32,), 32 * 16)
    p["ec3_w"] = u(ks[4], (64, 32, 4, 4), 32 * 16);  p["ec3_b"] = u(ks[5], (64,), 32 * 16)
    p["mu_w"] = u(ks[6], (latent_dim, 3136), 3136);  p["mu_b"] = u(ks[7], (latent_dim,), 3136)
    p["lv_w"] = u(ks[8], (latent_dim, 3136), 3136);  p["lv_b"] = u(ks[9], (latent_dim,), 3136)
    p["dl_w"] = u(ks[10], (3136, latent_dim), latent_dim)
    p["dl_b"] = u(ks[11], (3136,), latent_dim)
    p["dc1_w"] = u(ks[12], (64, 32, 4, 4), 32 * 16); p["dc1_b"] = u(ks[13], (32,), 32 * 16)
    p["dc2_w"] = u(ks[14], (32, 32, 4, 4), 32 * 16); p["dc2_b"] = u(ks[15], (32,), 32 * 16)
    p["dc3_w"] = u(ks[16], (32, 1, 4, 4), 1 * 16);   p["dc3_b"] = u(ks[17], (1,), 1 * 16)
    return p


def prepare_params(p, latent_dim):
    """One-time transform of PyTorch-layout weights into matmul-ready bf16
    matrices matching the NHWC im2col patch ordering.  Run once, outside jit."""
    L = latent_dim

    def conv_w(w):                       # Conv2d (OC,IC,KH,KW) -> (KH*KW*IC, OC)
        OC, IC, KH, KW = w.shape
        return jnp.transpose(w, (2, 3, 1, 0)).reshape(KH * KW * IC, OC).astype(jnp.bfloat16)

    def subpix_w(w):                     # ConvTranspose2d s=2 (IC,OC,4,4) -> (9*IC, 4*OC)
        IC, OC = w.shape[0], w.shape[1]
        # conv-equivalent (flipped, channel-swapped) kernel: wflip[dy,dx,ic,oc]
        wflip = jnp.transpose(jnp.flip(w, axis=(2, 3)), (2, 3, 0, 1))
        Wc = jnp.zeros((3, 3, IC, 2, 2, OC), jnp.float32)
        for r in range(2):
            for c in range(2):
                for u in range(3):
                    dy = 2 * u if r == 0 else 2 * u - 1
                    if dy < 0 or dy > 3:
                        continue
                    for v in range(3):
                        dx = 2 * v if c == 0 else 2 * v - 1
                        if dx < 0 or dx > 3:
                            continue
                        Wc = Wc.at[u, v, :, r, c, :].set(wflip[dy, dx])
        return Wc.reshape(9 * IC, 4 * OC).astype(jnp.bfloat16)

    def head_w(w):                       # Linear (L, 3136 CHW) -> (3136 HWC, L)
        return jnp.transpose(w.reshape(L, 64, 7, 7), (2, 3, 1, 0)).reshape(3136, L)

    q = {}
    q["ec1_w"] = conv_w(p["ec1_w"]); q["ec1_b"] = p["ec1_b"].reshape(1, -1)
    q["ec2_w"] = conv_w(p["ec2_w"]); q["ec2_b"] = p["ec2_b"].reshape(1, -1)
    q["ec3_w"] = conv_w(p["ec3_w"]); q["ec3_b"] = p["ec3_b"].reshape(1, -1)
    # fused mu/logvar head (single matmul), input axis permuted CHW -> HWC
    q["mulv_w"] = jnp.concatenate([head_w(p["mu_w"]), head_w(p["lv_w"])],
                                  axis=1).astype(jnp.bfloat16)       # (3136, 2L)
    q["mulv_b"] = jnp.concatenate([p["mu_b"], p["lv_b"]]).reshape(1, -1)
    # decoder Linear, output axis permuted CHW -> HWC
    q["dl_w"] = jnp.transpose(
        jnp.transpose(p["dl_w"].reshape(64, 7, 7, L), (1, 2, 0, 3)).reshape(3136, L)
    ).astype(jnp.bfloat16)                                           # (L, 3136)
    q["dl_b"] = jnp.transpose(p["dl_b"].reshape(64, 7, 7), (1, 2, 0)).reshape(1, 3136)
    # stride-2 deconvs: combined sub-pixel weights; bias repeated per sub-pixel
    q["dc1_w"] = subpix_w(p["dc1_w"]); q["dc1_b"] = jnp.tile(p["dc1_b"], 4).reshape(1, -1)
    q["dc2_w"] = subpix_w(p["dc2_w"]); q["dc2_b"] = jnp.tile(p["dc2_b"], 4).reshape(1, -1)
    # final stride-1 deconv == plain conv with flipped/channel-swapped kernel;
    # lane-pad the single output channel to 128 once (zero columns).
    w3 = jnp.transpose(jnp.flip(p["dc3_w"], axis=(2, 3)), (2, 3, 0, 1)).reshape(4 * 4 * 32, 1)
    q["dc3_w"] = jnp.zeros((4 * 4 * 32, 128), jnp.bfloat16).at[:, :1].set(
        w3.astype(jnp.bfloat16))
    q["dc3_b"] = p["dc3_b"].reshape(1, 1).astype(jnp.float32)
    return q


# ----------------------------------------------------------------------------
# VAE forward: conv encoder -> mu/logvar -> reparameterize -> deconv decoder
#              -> fused sigmoid+BCE(sum)+KL loss
# ----------------------------------------------------------------------------
def vae_forward(prep, x, eps_key):
    """x: (N, 1, 28, 28) in [0,1].  Returns scalar loss = BCE_sum + KL."""
    N = x.shape[0]
    L = prep["mulv_w"].shape[1] // 2
    xh = jnp.transpose(x, (0, 2, 3, 1))                  # NHWC; C=1 -> trivial

    # ---- encoder ----
    h = conv2d_nhwc(xh, prep["ec1_w"], prep["ec1_b"], k=4, stride=1, pad=2, act="relu")  # (N,29,29,32)
    h = conv2d_nhwc(h, prep["ec2_w"], prep["ec2_b"], k=4, stride=2, pad=1, act="relu")   # (N,14,14,32)
    h = conv2d_nhwc(h, prep["ec3_w"], prep["ec3_b"], k=4, stride=2, pad=1, act="none")   # (N,7,7,64)
    enc = h.reshape(N, 7 * 7 * 64)

    # ---- fused mu / logvar heads (single matmul) ----
    mulv = matmul_bias_act(enc, prep["mulv_w"], prep["mulv_b"],
                           act="none", out_dtype=jnp.float32)        # (N, 2L)
    mu, logvar = mulv[:, :L], mulv[:, L:]

    # ---- reparameterization (tiny elementwise; plain-JAX glue) ----
    # TODO(synk): torch.randn_like replaced by deterministic jax.random.normal.
    eps = jax.random.normal(eps_key, mu.shape, jnp.float32)
    z = mu + eps * jnp.exp(0.5 * logvar)

    # ---- decoder ----
    d = matmul_bias_act(z, prep["dl_w"], prep["dl_b"],
                        act="none", out_dtype=jnp.bfloat16).reshape(N, 7, 7, 64)
    d = deconv_s2_nhwc(d, prep["dc1_w"], prep["dc1_b"], out_pad=0, act="relu")   # (N,14,14,32)
    d = deconv_s2_nhwc(d, prep["dc2_w"], prep["dc2_b"], out_pad=1, act="relu")   # (N,29,29,32)

    # ---- final stride-1 deconv (pad 2) + sigmoid + BCE(sum) + KL, fused ----
    # conv-equivalent padding = k - 1 - p = 1
    cols, _, _ = _im2col(d, 4, 1, 1, 1)                                          # (N*28*28, 512)
    # TODO(synk): whole-encoder / whole-decoder single-kernel fusion not done;
    # each layer remains one fused matmul+bias+act pallas_call.
    return dc3_sigmoid_bce_kl(cols, prep["dc3_w"], prep["dc3_b"],
                              xh.reshape(N * 28 * 28, 1), mu, logvar)


if __name__ == "__main__":
    key = jax.random.PRNGKey(0)
    pkey, xkey, ekey = jax.random.split(key, 3)
    latent_dim = 16
    params = init_params(pkey, latent_dim)
    prep = prepare_params(params, latent_dim)     # one-time weight prep, outside jit
    # BCE target must live in [0,1]; 28x28 is forced by the 64*7*7 Linear.
    x = jax.random.uniform(xkey, (2, 1, 28, 28), jnp.float32)
    loss = jax.jit(vae_forward)(prep, x, ekey)
    loss = jax.block_until_ready(loss)
    assert loss.shape == () and bool(jnp.isfinite(loss))
    print("KERNEL_OK")
</pallas_src>

<mosaic_0001>
module attributes {stable_mosaic.version = 11 : i64} {
  func.func @_mm_bias_act_kernel(%arg0: memref<1682x16xbf16, #tpu.memory_space<vmem>>, %arg1: memref<16x32xbf16, #tpu.memory_space<vmem>>, %arg2: memref<1x32xf32, #tpu.memory_space<vmem>>, %arg3: memref<1682x32xbf16, #tpu.memory_space<vmem>>) attributes {dimension_semantics = [], scalar_prefetch = 0 : i64, scratch_operands = 0 : i64, tpu.core_type = #tpu.core_type<tc>} {
    %c0 = arith.constant 0 : index
    %c0_0 = arith.constant 0 : index
    %0 = vector.load %arg0[%c0, %c0_0] : memref<1682x16xbf16, #tpu.memory_space<vmem>>, vector<1682x16xbf16>
    %c0_1 = arith.constant 0 : index
    %c0_2 = arith.constant 0 : index
    %1 = vector.load %arg1[%c0_1, %c0_2] : memref<16x32xbf16, #tpu.memory_space<vmem>>, vector<16x32xbf16>
    %cst = arith.constant dense<0.000000e+00> : vector<1682x32xf32>
    %2 = tpu.matmul %0, %1, %cst {dimension_numbers = #tpu.dot_dimension_numbers<[1], [0], [0], [1], [0, 0, 1, 1], [], []>} : vector<1682x16xbf16>, vector<16x32xbf16>, vector<1682x32xf32> -> vector<1682x32xf32>
    %c0_3 = arith.constant 0 : index
    %c0_4 = arith.constant 0 : index
    %3 = vector.load %arg2[%c0_3, %c0_4] : memref<1x32xf32, #tpu.memory_space<vmem>>, vector<1x32xf32>
    %4 = vector.broadcast %3 : vector<1x32xf32> to vector<1682x32xf32>
    %5 = arith.addf %2, %4 : vector<1682x32xf32>
    %cst_5 = arith.constant 0.000000e+00 : f32
    %6 = vector.broadcast %cst_5 : f32 to vector<1682x32xf32>
    %7 = arith.maximumf %5, %6 : vector<1682x32xf32>
    %8 = arith.truncf %7 : vector<1682x32xf32> to vector<1682x32xbf16>
    %c0_6 = arith.constant 0 : index
    %c0_7 = arith.constant 0 : index
    %9 = vector.load %arg3[%c0_6, %c0_7] : memref<1682x32xbf16, #tpu.memory_space<vmem>>, vector<1682x32xbf16>
    tpu.vector_store %arg3[%c0_6, %c0_7], %8 {strides = array<i32>} : memref<1682x32xbf16, #tpu.memory_space<vmem>>, vector<1682x32xbf16>,
    return
  }
}

module attributes {stable_mosaic.version = 11 : i64} {
  func.func @_mm_bias_act_kernel(%arg0: memref<392x512xbf16, #tpu.memory_space<vmem>>, %arg1: memref<512x32xbf16, #tpu.memory_space<vmem>>, %arg2: memref<1x32xf32, #tpu.memory_space<vmem>>, %arg3: memref<392x32xbf16, #tpu.memory_space<vmem>>) attributes {dimension_semantics = [], scalar_prefetch = 0 : i64, scratch_operands = 0 : i64, tpu.core_type = #tpu.core_type<tc>} {
    %c0 = arith.constant 0 : index
    %c0_0 = arith.constant 0 : index
    %0 = vector.load %arg0[%c0, %c0_0] : memref<392x512xbf16, #tpu.memory_space<vmem>>, vector<392x512xbf16>
    %c0_1 = arith.constant 0 : index
    %c0_2 = arith.constant 0 : index
    %1 = vector.load %arg1[%c0_1, %c0_2] : memref<512x32xbf16, #tpu.memory_space<vmem>>, vector<512x32xbf16>
    %cst = arith.constant dense<0.000000e+00> : vector<392x32xf32>
    %2 = tpu.matmul %0, %1, %cst {dimension_numbers = #tpu.dot_dimension_numbers<[1], [0], [0], [1], [0, 0, 1, 1], [], []>} : vector<392x512xbf16>, vector<512x32xbf16>, vector<392x32xf32> -> vector<392x32xf32>
    %c0_3 = arith.constant 0 : index
    %c0_4 = arith.constant 0 : index
    %3 = vector.load %arg2[%c0_3, %c0_4] : memref<1x32xf32, #tpu.memory_space<vmem>>, vector<1x32xf32>
    %4 = vector.broadcast %3 : vector<1x32xf32> to vector<392x32xf32>
    %5 = arith.addf %2, %4 : vector<392x32xf32>
    %cst_5 = arith.constant 0.000000e+00 : f32
    %6 = vector.broadcast %cst_5 : f32 to vector<392x32xf32>
    %7 = arith.maximumf %5, %6 : vector<392x32xf32>
    %8 = arith.truncf %7 : vector<392x32xf32> to vector<392x32xbf16>
    %c0_6 = arith.constant 0 : index
    %c0_7 = arith.constant 0 : index
    %9 = vector.load %arg3[%c0_6, %c0_7] : memref<392x32xbf16, #tpu.memory_space<vmem>>, vector<392x32xbf16>
    tpu.vector_store %arg3[%c0_6, %c0_7], %8 {strides = array<i32>} : memref<392x32xbf16, #tpu.memory_space<vmem>>, vector<392x32xbf16>,
    return
  }
}

module attributes {stable_mosaic.version = 11 : i64} {
  func.func @_mm_bias_act_kernel(%arg0: memref<98x512xbf16, #tpu.memory_space<vmem>>, %arg1: memref<512x64xbf16, #tpu.memory_space<vmem>>, %arg2: memref<1x64xf32, #tpu.memory_space<vmem>>, %arg3: memref<98x64xbf16, #tpu.memory_space<vmem>>) attributes {dimension_semantics = [], scalar_prefetch = 0 : i64, scratch_operands = 0 : i64, tpu.core_type = #tpu.core_type<tc>} {
    %c0 = arith.constant 0 : index
    %c0_0 = arith.constant 0 : index
    %0 = vector.load %arg0[%c0, %c0_0] : memref<98x512xbf16, #tpu.memory_space<vmem>>, vector<98x512xbf16>
    %c0_1 = arith.constant 0 : index
    %c0_2 = arith.constant 0 : index
    %1 = vector.load %arg1[%c0_1, %c0_2] : memref<512x64xbf16, #tpu.memory_space<vmem>>, vector<512x64xbf16>
    %cst = arith.constant dense<0.000000e+00> : vector<98x64xf32>
    %2 = tpu.matmul %0, %1, %cst {dimension_numbers = #tpu.dot_dimension_numbers<[1], [0], [0], [1], [0, 0, 1, 1], [], []>} : vector<98x512xbf16>, vector<512x64xbf16>, vector<98x64xf32> -> vector<98x64xf32>
    %c0_3 = arith.constant 0 : index
    %c0_4 = arith.constant 0 : index
    %3 = vector.load %arg2[%c0_3, %c0_4] : memref<1x64xf32, #tpu.memory_space<vmem>>, vector<1x64xf32>
    %4 = vector.broadcast %3 : vector<1x64xf32> to vector<98x64xf32>
    %5 = arith.addf %2, %4 : vector<98x64xf32>
    %6 = arith.truncf %5 : vector<98x64xf32> to vector<98x64xbf16>
    %c0_5 = arith.constant 0 : index
    %c0_6 = arith.constant 0 : index
    %7 = vector.load %arg3[%c0_5, %c0_6] : memref<98x64xbf16, #tpu.memory_space<vmem>>, vector<98x64xbf16>
    tpu.vector_store %arg3[%c0_5, %c0_6], %6 {strides = array<i32>} : memref<98x64xbf16, #tpu.memory_space<vmem>>, vector<98x64xbf16>,
    return
  }
}

module attributes {stable_mosaic.version = 11 : i64} {
  func.func @_mm_bias_act_kernel(%arg0: memref<2x3136xbf16, #tpu.memory_space<vmem>>, %arg1: memref<3136x32xbf16, #tpu.memory_space<vmem>>, %arg2: memref<1x32xf32, #tpu.memory_space<vmem>>, %arg3: memref<2x32xf32, #tpu.memory_space<vmem>>) attributes {dimension_semantics = [], scalar_prefetch = 0 : i64, scratch_operands = 0 : i64, tpu.core_type = #tpu.core_type<tc>} {
    %c0 = arith.constant 0 : index
    %c0_0 = arith.constant 0 : index
    %0 = vector.load %arg0[%c0, %c0_0] : memref<2x3136xbf16, #tpu.memory_space<vmem>>, vector<2x3136xbf16>
    %c0_1 = arith.constant 0 : index
    %c0_2 = arith.constant 0 : index
    %1 = vector.load %arg1[%c0_1, %c0_2] : memref<3136x32xbf16, #tpu.memory_space<vmem>>, vector<3136x32xbf16>
    %cst = arith.constant dense<0.000000e+00> : vector<2x32xf32>
    %2 = tpu.matmul %0, %1, %cst {dimension_numbers = #tpu.dot_dimension_numbers<[1], [0], [0], [1], [0, 0, 1, 1], [], []>} : vector<2x3136xbf16>, vector<3136x32xbf16>, vector<2x32xf32> -> vector<2x32xf32>
    %c0_3 = arith.constant 0 : index
    %c0_4 = arith.constant 0 : index
    %3 = vector.load %arg2[%c0_3, %c0_4] : memref<1x32xf32, #tpu.memory_space<vmem>>, vector<1x32xf32>
    %4 = vector.broadcast %3 : vector<1x32xf32> to vector<2x32xf32>
    %5 = arith.addf %2, %4 : vector<2x32xf32>
    %c0_5 = arith.constant 0 : index
    %c0_6 = arith.constant 0 : index
    %6 = vector.load %arg3[%c0_5, %c0_6] : memref<2x32xf32, #tpu.memory_space<vmem>>, vector<2x32xf32>
    tpu.vector_store %arg3[%c0_5, %c0_6], %5 {strides = array<i32>} : memref<2x32xf32, #tpu.memory_space<vmem>>, vector<2x32xf32>,
    return
  }
}

module attributes {stable_mosaic.version = 11 : i64} {
  func.func @_mm_bias_act_kernel(%arg0: memref<2x16xbf16, #tpu.memory_space<vmem>>, %arg1: memref<16x3136xbf16, #tpu.memory_space<vmem>>, %arg2: memref<1x3136xf32, #tpu.memory_space<vmem>>, %arg3: memref<2x3136xbf16, #tpu.memory_space<vmem>>) attributes {dimension_semantics = [], scalar_prefetch = 0 : i64, scratch_operands = 0 : i64, tpu.core_type = #tpu.core_type<tc>} {
    %c0 = arith.constant 0 : index
    %c0_0 = arith.constant 0 : index
    %0 = vector.load %arg0[%c0, %c0_0] : memref<2x16xbf16, #tpu.memory_space<vmem>>, vector<2x16xbf16>
    %c0_1 = arith.constant 0 : index
    %c0_2 = arith.constant 0 : index
    %1 = vector.load %arg1[%c0_1, %c0_2] : memref<16x3136xbf16, #tpu.memory_space<vmem>>, vector<16x3136xbf16>
    %cst = arith.constant dense<0.000000e+00> : vector<2x3136xf32>
    %2 = tpu.matmul %0, %1, %cst {dimension_numbers = #tpu.dot_dimension_numbers<[1], [0], [0], [1], [0, 0, 1, 1], [], []>} : vector<2x16xbf16>, vector<16x3136xbf16>, vector<2x3136xf32> -> vector<2x3136xf32>
    %c0_3 = arith.constant 0 : index
    %c0_4 = arith.constant 0 : index
    %3 = vector.load %arg2[%c0_3, %c0_4] : memref<1x3136xf32, #tpu.memory_space<vmem>>, vector<1x3136xf32>
    %4 = vector.broadcast %3 : vector<1x3136xf32> to vector<2x3136xf32>
    %5 = arith.addf %2, %4 : vector<2x3136xf32>
    %6 = arith.truncf %5 : vector<2x3136xf32> to vector<2x3136xbf16>
    %c0_5 = arith.constant 0 : index
    %c0_6 = arith.constant 0 : index
    %7 = vector.load %arg3[%c0_5, %c0_6] : memref<2x3136xbf16, #tpu.memory_space<vmem>>, vector<2x3136xbf16>
    tpu.vector_store %arg3[%c0_5, %c0_6], %6 {strides = array<i32>} : memref<2x3136xbf16, #tpu.memory_space<vmem>>, vector<2x3136xbf16>,
    return
  }
}

module attributes {stable_mosaic.version = 11 : i64} {
  func.func @_mm_bias_act_kernel(%arg0: memref<98x576xbf16, #tpu.memory_space<vmem>>, %arg1: memref<576x128xbf16, #tpu.memory_space<vmem>>, %arg2: memref<1x128xf32, #tpu.memory_space<vmem>>, %arg3: memref<98x128xbf16, #tpu.memory_space<vmem>>) attributes {dimension_semantics = [], scalar_prefetch = 0 : i64, scratch_operands = 0 : i64, tpu.core_type = #tpu.core_type<tc>} {
    %c0 = arith.constant 0 : index
    %c0_0 = arith.constant 0 : index
    %0 = vector.load %arg0[%c0, %c0_0] : memref<98x576xbf16, #tpu.memory_space<vmem>>, vector<98x576xbf16>
    %c0_1 = arith.constant 0 : index
    %c0_2 = arith.constant 0 : index
    %1 = vector.load %arg1[%c0_1, %c0_2] : memref<576x128xbf16, #tpu.memory_space<vmem>>, vector<576x128xbf16>
    %cst = arith.constant dense<0.000000e+00> : vector<98x128xf32>
    %2 = tpu.matmul %0, %1, %cst {dimension_numbers = #tpu.dot_dimension_numbers<[1], [0], [0], [1], [0, 0, 1, 1], [], []>} : vector<98x576xbf16>, vector<576x128xbf16>, vector<98x128xf32> -> vector<98x128xf32>
    %c0_3 = arith.constant 0 : index
    %c0_4 = arith.constant 0 : index
    %3 = vector.load %arg2[%c0_3, %c0_4] : memref<1x128xf32, #tpu.memory_space<vmem>>, vector<1x128xf32>
    %4 = vector.broadcast %3 : vector<1x128xf32> to vector<98x128xf32>
    %5 = arith.addf %2, %4 : vector<98x128xf32>
    %cst_5 = arith.constant 0.000000e+00 : f32
    %6 = vector.broadcast %cst_5 : f32 to vector<98x128xf32>
    %7 = arith.maximumf %5, %6 : vector<98x128xf32>
    %8 = arith.truncf %7 : vector<98x128xf32> to vector<98x128xbf16>
    %c0_6 = arith.constant 0 : index
    %c0_7 = arith.constant 0 : index
    %9 = vector.load %arg3[%c0_6, %c0_7] : memref<98x128xbf16, #tpu.memory_space<vmem>>, vector<98x128xbf16>
    tpu.vector_store %arg3[%c0_6, %c0_7], %8 {strides = array<i32>} : memref<98x128xbf16, #tpu.memory_space<vmem>>, vector<98x128xbf16>,
    return
  }
}

module attributes {stable_mosaic.version = 11 : i64} {
  func.func @_mm_bias_act_kernel(%arg0: memref<450x288xbf16, #tpu.memory_space<vmem>>, %arg1: memref<288x128xbf16, #tpu.memory_space<vmem>>, %arg2: memref<1x128xf32, #tpu.memory_space<vmem>>, %arg3: memref<450x128xbf16, #tpu.memory_space<vmem>>) attributes {dimension_semantics = [], scalar_prefetch = 0 : i64, scratch_operands = 0 : i64, tpu.core_type = #tpu.core_type<tc>} {
    %c0 = arith.constant 0 : index
    %c0_0 = arith.constant 0 : index
    %0 = vector.load %arg0[%c0, %c0_0] : memref<450x288xbf16, #tpu.memory_space<vmem>>, vector<450x288xbf16>
    %c0_1 = arith.constant 0 : index
    %c0_2 = arith.constant 0 : index
    %1 = vector.load %arg1[%c0_1, %c0_2] : memref<288x128xbf16, #tpu.memory_space<vmem>>, vector<288x128xbf16>
    %cst = arith.constant dense<0.000000e+00> : vector<450x128xf32>
    %2 = tpu.matmul %0, %1, %cst {dimension_numbers = #tpu.dot_dimension_numbers<[1], [0], [0], [1], [0, 0, 1, 1], [], []>} : vector<450x288xbf16>, vector<288x128xbf16>, vector<450x128xf32> -> vector<450x128xf32>
    %c0_3 = arith.constant 0 : index
    %c0_4 = arith.constant 0 : index
    %3 = vector.load %arg2[%c0_3, %c0_4] : memref<1x128xf32, #tpu.memory_space<vmem>>, vector<1x128xf32>
    %4 = vector.broadcast %3 : vector<1x128xf32> to vector<450x128xf32>
    %5 = arith.addf %2, %4 : vector<450x128xf32>
    %cst_5 = arith.constant 0.000000e+00 : f32
    %6 = vector.broadcast %cst_5 : f32 to vector<450x128xf32>
    %7 = arith.maximumf %5, %6 : vector<450x128xf32>
    %8 = arith.truncf %7 : vector<450x128xf32> to vector<450x128xbf16>
    %c0_6 = arith.constant 0 : index
    %c0_7 = arith.constant 0 : index
    %9 = vector.load %arg3[%c0_6, %c0_7] : memref<450x128xbf16, #tpu.memory_space<vmem>>, vector<450x128xbf16>
    tpu.vector_store %arg3[%c0_6, %c0_7], %8 {strides = array<i32>} : memref<450x128xbf16, #tpu.memory_space<vmem>>, vector<450x128xbf16>,
    return
  }
}

module attributes {stable_mosaic.version = 11 : i64} {
  func.func @_dc3_sigmoid_bce_kl_kernel(%arg0: i32, %arg1: memref<784x512xbf16, #tpu.memory_space<vmem>>, %arg2: memref<512x128xbf16, #tpu.memory_space<vmem>>, %arg3: memref<1x1xf32, #tpu.memory_space<vmem>>, %arg4: memref<784x1xf32, #tpu.memory_space<vmem>>, %arg5: memref<2x16xf32, #tpu.memory_space<vmem>>, %arg6: memref<2x16xf32, #tpu.memory_space<vmem>>, %arg7: memref<1x1xf32, #tpu.memory_space<vmem>>, %arg8: memref<1x1xf32, #tpu.memory_space<vmem>>) attributes {dimension_semantics = [#tpu.dimension_semantics<arbitrary>], iteration_bounds = array<i64: 2>, scalar_prefetch = 0 : i64, scratch_operands = 1 : i64, tpu.core_type = #tpu.core_type<tc>, window_params = [{transform_indices = @transform_0, window_bounds = array<i64: 784, 512>}, {pipeline_mode = #tpu.pipeline_mode<synchronous>, transform_indices = @transform_1, window_bounds = array<i64: 512, 128>}, {pipeline_mode = #tpu.pipeline_mode<synchronous>, transform_indices = @transform_2, window_bounds = array<i64: 1, 1>}, {transform_indices = @transform_3, window_bounds = array<i64: 784, 1>}, {pipeline_mode = #tpu.pipeline_mode<synchronous>, transform_indices = @transform_4, window_bounds = array<i64: 2, 16>}, {pipeline_mode = #tpu.pipeline_mode<synchronous>, transform_indices = @transform_5, window_bounds = array<i64: 2, 16>}, {pipeline_mode = #tpu.pipeline_mode<synchronous>, transform_indices = @transform_6, window_bounds = array<i64: 1, 1>}]} {
    %c0_i32 = arith.constant 0 : i32
    %0 = arith.cmpi eq, %arg0, %c0_i32 : i32
    %1 = arith.extui %0 : i1 to i32
    %c0_i32_0 = arith.constant 0 : i32
    %2 = arith.cmpi ne, %1, %c0_i32_0 : i32
    scf.if %2 {
      %cst_16 = arith.constant 0.000000e+00 : f32
      %32 = vector.broadcast %cst_16 : f32 to vector<1x1xf32>
      %c0_17 = arith.constant 0 : index
      %c0_18 = arith.constant 0 : index
      %33 = vector.load %arg8[%c0_17, %c0_18] : memref<1x1xf32, #tpu.memory_space<vmem>>, vector<1x1xf32>
      tpu.vector_store %arg8[%c0_17, %c0_18], %32 {strides = array<i32>} : memref<1x1xf32, #tpu.memory_space<vmem>>, vector<1x1xf32>,
    } else {
    }
    %c0 = arith.constant 0 : index
    %c0_1 = arith.constant 0 : index
    %3 = vector.load %arg1[%c0, %c0_1] : memref<784x512xbf16, #tpu.memory_space<vmem>>, vector<784x512xbf16>
    %c0_2 = arith.constant 0 : index
    %c0_3 = arith.constant 0 : index
    %4 = vector.load %arg2[%c0_2, %c0_3] : memref<512x128xbf16, #tpu.memory_space<vmem>>, vector<512x128xbf16>
    %cst = arith.constant dense<0.000000e+00> : vector<784x128xf32>
    %5 = tpu.matmul %3, %4, %cst {dimension_numbers = #tpu.dot_dimension_numbers<[1], [0], [0], [1], [0, 0, 1, 1], [], []>} : vector<784x512xbf16>, vector<512x128xbf16>, vector<784x128xf32> -> vector<784x128xf32>
    %6 = vector.extract_strided_slice %5 {offsets = [0, 0], sizes = [784, 1], strides = [1, 1]} : vector<784x128xf32> to vector<784x1xf32>
    %c0_4 = arith.constant 0 : index
    %c0_5 = arith.constant 0 : index
    %7 = vector.load %arg3[%c0_4, %c0_5] : memref<1x1xf32, #tpu.memory_space<vmem>>, vector<1x1xf32>
    %8 = vector.broadcast %7 : vector<1x1xf32> to vector<784x1xf32>
    %9 = arith.addf %6, %8 : vector<784x1xf32>
    %c0_6 = arith.constant 0 : index
    %c0_7 = arith.constant 0 : index
    %10 = vector.load %arg4[%c0_6, %c0_7] : memref<784x1xf32, #tpu.memory_space<vmem>>, vector<784x1xf32>
    %cst_8 = arith.constant 0.000000e+00 : f32
    %11 = vector.broadcast %cst_8 : f32 to vector<784x1xf32>
    %12 = arith.maximumf %9, %11 : vector<784x1xf32>
    %13 = arith.mulf %9, %10 : vector<784x1xf32>
    %14 = arith.subf %12, %13 : vector<784x1xf32>
    %15 = math.absf %9 : vector<784x1xf32>
    %cst_9 = arith.constant 0.000000e+00 : f32
    %16 = vector.broadcast %cst_9 : f32 to vector<784x1xf32>
    %17 = arith.subf %16, %15 : vector<784x1xf32>
    %18 = math.exp %17 : vector<784x1xf32>
    %19 = math.log1p %18 : vector<784x1xf32>
    %20 = arith.addf %14, %19 : vector<784x1xf32>
    %c0_10 = arith.constant 0 : index
    %c0_11 = arith.constant 0 : index
    %21 = vector.load %arg8[%c0_10, %c0_11] : memref<1x1xf32, #tpu.memory_space<vmem>>, vector<1x1xf32>
    %22 = vector.shape_cast %20 : vector<784x1xf32> to vector<1x784x1xf32>
    %cst_12 = arith.constant dense<0.000000e+00> : vector<1xf32>
    %23 = vector.multi_reduction <add>, %22, %cst_12 [1, 2] : vector<1x784x1xf32> to vector<1xf32>
    %24 = vector.shape_cast %23 : vector<1xf32> to vector<1x1x1xf32>
    %25 = vector.extract %24[0, 0, 0] : f32 from vector<1x1x1xf32>
    %26 = vector.broadcast %25 : f32 to vector<1x1xf32>
    %27 = arith.addf %21, %26 : vector<1x1xf32>
    %c0_13 = arith.constant 0 : index
    %c0_14 = arith.constant 0 : index
    %28 = vector.load %arg8[%c0_13, %c0_14] : memref<1x1xf32, #tpu.memory_space<vmem>>, vector<1x1xf32>
    tpu.vector_store %arg8[%c0_13, %c0_14], %27 {strides = array<i32>} : memref<1x1xf32, #tpu.memory_space<vmem>>, vector<1x1xf32>,
    %c1_i32 = arith.constant 1 : i32
    %29 = arith.cmpi eq, %arg0, %c1_i32 : i32
    %30 = arith.extui %29 : i1 to i32
    %c0_i32_15 = arith.constant 0 : i32
    %31 = arith.cmpi ne, %30, %c0_i32_15 : i32
    scf.if %31 {
      %c0_16 = arith.constant 0 : index
      %c0_17 = arith.constant 0 : index
      %32 = vector.load %arg5[%c0_16, %c0_17] : memref<2x16xf32, #tpu.memory_space<vmem>>, vector<2x16xf32>
      %c0_18 = arith.constant 0 : index
      %c0_19 = arith.constant 0 : index
      %33 = vector.load %arg6[%c0_18, %c0_19] : memref<2x16xf32, #tpu.memory_space<vmem>>, vector<2x16xf32>
      %cst_20 = arith.constant 1.000000e+00 : f32
      %34 = vector.broadcast %cst_20 : f32 to vector<2x16xf32>
      %35 = arith.addf %34, %33 : vector<2x16xf32>
      %36 = arith.mulf %32, %32 : vector<2x16xf32>
      %37 = arith.subf %35, %36 : vector<2x16xf32>
      %38 = math.exp %33 : vector<2x16xf32>
      %39 = arith.subf %37, %38 : vector<2x16xf32>
      %cst_21 = arith.constant -5.000000e-01 : f32
      %40 = vector.broadcast %cst_21 : f32 to vector<2x16xf32>
      %41 = arith.mulf %40, %39 : vector<2x16xf32>
      %42 = vector.shape_cast %41 : vector<2x16xf32> to vector<1x2x16xf32>
      %cst_22 = arith.constant dense<0.000000e+00> : vector<1xf32>
      %43 = vector.multi_reduction <add>, %42, %cst_22 [1, 2] : vector<1x2x16xf32> to vector<1xf32>
      %44 = vector.shape_cast %43 : vector<1xf32> to vector<1x1x1xf32>
      %45 = vector.extract %44[0, 0, 0] : f32 from vector<1x1x1xf32>
      %46 = vector.broadcast %45 : f32 to vector<1x1xf32>
      %c0_23 = arith.constant 0 : index
      %c0_24 = arith.constant 0 : index
      %47 = vector.load %arg8[%c0_23, %c0_24] : memref<1x1xf32, #tpu.memory_space<vmem>>, vector<1x1xf32>
      %48 = arith.addf %47, %46 : vector<1x1xf32>
      %c0_25 = arith.constant 0 : index
      %c0_26 = arith.constant 0 : index
      %49 = vector.load %arg7[%c0_25, %c0_26] : memref<1x1xf32, #tpu.memory_space<vmem>>, vector<1x1xf32>
      tpu.vector_store %arg7[%c0_25, %c0_26], %48 {strides = array<i32>} : memref<1x1xf32, #tpu.memory_space<vmem>>, vector<1x1xf32>,
    } else {
    }
    return
  }
  func.func @transform_0(%arg0: i32) -> (i32, i32) {
    %c0_i32 = arith.constant 0 : i32
    %c0_i32_0 = arith.constant 0 : i32
    return %arg0, %c0_i32 : i32, i32
  }
  func.func @transform_1(%arg0: i32) -> (i32, i32) {
    %c0_i32 = arith.constant 0 : i32
    %c0_i32_0 = arith.constant 0 : i32
    %c0_i32_1 = arith.constant 0 : i32
    return %c0_i32, %c0_i32_0 : i32, i32
  }
  func.func @transform_2(%arg0: i32) -> (i32, i32) {
    %c0_i32 = arith.constant 0 : i32
    %c0_i32_0 = arith.constant 0 : i32
    %c0_i32_1 = arith.constant 0 : i32
    return %c0_i32, %c0_i32_0 : i32, i32
  }
  func.func @transform_3(%arg0: i32) -> (i32, i32) {
    %c0_i32 = arith.constant 0 : i32
    %c0_i32_0 = arith.constant 0 : i32
    return %arg0, %c0_i32 : i32, i32
  }
  func.func @transform_4(%arg0: i32) -> (i32, i32) {
    %c0_i32 = arith.constant 0 : i32
    %c0_i32_0 = arith.constant 0 : i32
    %c0_i32_1 = arith.constant 0 : i32
    return %c0_i32, %c0_i32_0 : i32, i32
  }
  func.func @transform_5(%arg0: i32) -> (i32, i32) {
    %c0_i32 = arith.constant 0 : i32
    %c0_i32_0 = arith.constant 0 : i32
    %c0_i32_1 = arith.constant 0 : i32
    return %c0_i32, %c0_i32_0 : i32, i32
  }
  func.func @transform_6(%arg0: i32) -> (i32, i32) {
    %c0_i32 = arith.constant 0 : i32
    %c0_i32_0 = arith.constant 0 : i32
    %c0_i32_1 = arith.constant 0 : i32
    return %c0_i32, %c0_i32_0 : i32, i32
  }
}

</mosaic_0001>

<bundles_post_ra>
// kernel: vae_forward.8
= control target key start
LH: loop header
LB: loop body
LE: loop exit
PB: predicated region body
PF: predicated region fallthrough
CT: control target
= control target key end

     0   :  { %8 = vsyncpa [#allocation3], 0  ;;  %s5890_s0 = inlined_call_operand.vmem [shape: bf16[1682,16], index: 0, kind: input, shape index: {}]   ;;  %s5891_s1 = inlined_call_operand.hbm [shape: bf16[16,32], index: 1, kind: input, shape index: {}]   ;;  %s5892_s2 = inlined_call_operand.hbm [shape: f32[1,32], index: 2, kind: input, shape index: {}]   ;;  %s5893_s3 = inlined_call_operand.vmem [shape: bf16[1682,32], index: 3, kind: output, shape index: {}]  }
   0x1   :  { %9 = vsyncpa [#allocation5], 0  ;;  %s4385_s12 = smov [#allocation2]  }
   0x2   :  { %s17_s13 = sshll.u32 %s4385_s12, 4  ;;  %s18_s13 = int_to_ptr.vmem [resolvable:$true] %s17_s13 }
   0x3   :  { %s4349_s14 = scalar_lea.vmem %s18_s13, 128  ;;  %p4354_p1 = scmp.lt.s32.totalorder %s18_s13, %s18_s13 }
   0x4   :  { %p4350_p0 = scmp.ne.s32.totalorder %s18_s13, %s4349_s14  ;;  %p4355_p2 = scmp.lt.s32.totalorder %s4349_s14, %s4349_s14 }
   0x6   :  { %p4356_p3 = por %p4355_p2, %p4354_p1 }
   0x8   :  { %p4357_p4 = pnand %p4356_p3, %p4350_p0 }
   0xa   :  { %4360 = shalt.err (!%p4357_p4)
}
   0xb   :  { %s4386_s15 = smov 64   ;;  %s4387_s16 = smov 4  }
   0xc   :  { %23 = dma.hbm_to_vmem [thread:$0]  %s5891_s1, 128, %s18_s13, [#allocation3], %s4386_s15, %s4386_s15, %s4387_s16  }
   0xd   :  { %s4388_s19 = smov [#allocation4]  }
   0xe   :  { %s30_s20 = sshll.u32 %s4388_s19, 4  ;;  %s31_s20 = int_to_ptr.vmem [resolvable:$true] %s30_s20 }
   0xf   :  { %s4369_s21 = scalar_lea.vmem %s31_s20, 16  ;;  %s4373_s22 = scalar_lea.vmem %s31_s20, 32 }
  0x10   :  { %p4370_p5 = scmp.ne.s32.totalorder %s31_s20, %s4369_s21  ;;  %p4374_p6 = scmp.lt.s32.totalorder %s31_s20, %s31_s20 }
  0x11   :  { %p4375_p7 = scmp.lt.s32.totalorder %s4373_s22, %s4369_s21 }
  0x13   :  { %p4376_p8 = por %p4375_p7, %p4374_p6 }
  0x15   :  { %p4377_p9 = pnand %p4376_p8, %p4370_p5 }
  0x17   :  { %4380 = shalt.err (!%p4377_p9)
}
  0x18   :  { %33 = dma.hbm_to_vmem [thread:$0]  %s5892_s2, 16, %s31_s20, [#allocation5]  }
  0x19   :  { %4381 = dma.done.wait [#allocation3], 128  }
  0x1a   :  { %4382 = vsyncadd [#allocation3], 4294967168 }
  0x1b   :  { %4383 = dma.done.wait [#allocation5], 16  }
  0x1c   :  { %4384 = vsyncadd [#allocation5], 4294967280  ;;  %v4232_v0 = vld [vmem:[#allocation2] sm:$0xff]   ;;  %vm795_vm0 = vcmask 130048   ;;  %v4234_v2 = vld [vmem:[%s5890_s0 + $0x8] sm:$0xff]   ;;  %vm3050_vm1 = vcmask 257024  }
  0x1d   :  { %v4233_v1 = vld [vmem:[%s5890_s0] sm:$0xff]   ;;  %4012 = vmatprep.subr.bf16.mxu0 %v4232_v0  ;;  %4226 = vmatprep.subr.bf16.mxu1 %v4232_v0  ;;  %v4235_v3 = vld [vmem:[%s5890_s0 + $0x1b0] sm:$0xff]   ;;  %v4236_v4 = vld [vmem:[%s5890_s0 + $0x1b8] sm:$0xff]   ;;  %vm3261_vm2 = vcmask 253952  }
  0x1e   :  { %4013 = vmatpush3.bf16.msra.mxu0 %v4232_v0  ;;  %4227 = vmatpush3.bf16.msra.mxu1 %v4232_v0  ;;  %v4237_v5 = vld [vmem:[%s5890_s0 + $0x10] sm:$0xff]   ;;  %v4239_v6 = vld [vmem:[%s5890_s0 + $0x1c0] sm:$0xff]   ;;  %v4238_v7 = vld [vmem:[%s5890_s0 + $0x18] sm:$0xff]  }
  0x1f   :  { %4014 = vmatprep.mubr.msk.bf16.mxu0 %vm795_vm0, %v4233_v1  ;;  %4122 = vmatprep.mubr.msk.bf16.mxu1 %vm795_vm0, %v4235_v3  ;;  %v4240_v8 = vld [vmem:[%s5890_s0 + $0x1c8] sm:$0xff]   ;;  %v4241_v9 = vld [vmem:[%s5890_s0 + $0x20] sm:$0xff]   ;;  %v4243_v10 = vld [vmem:[%s5890_s0 + $0x1d0] sm:$0xff]  }
  0x20   :  { %v4242_v11 = vld [vmem:[%s5890_s0 + $0x28] sm:$0xff]   ;;  %v4244_v12 = vld [vmem:[%s5890_s0 + $0x1d8] sm:$0xff]   ;;  %v4245_v13 = vld [vmem:[%s5890_s0 + $0x30] sm:$0xff]  }
  0x21   :  { %4015 = vmatmul.mubr.msk.bf16.vlgmr.msra.gmra.mxu0 %vm795_vm0, %v4234_v2  ;;  %4123 = vmatmul.mubr.msk.bf16.vlgmr.msra.gmra.mxu1 %vm795_vm0, %v4236_v4  ;;  %v4247_v14 = vld [vmem:[%s5890_s0 + $0x1e0] sm:$0xff]   ;;  %v4246_v15 = vld [vmem:[%s5890_s0 + $0x38] sm:$0xff]   ;;  %v4248_v16 = vld [vmem:[%s5890_s0 + $0x1e8] sm:$0xff]  }
  0x22   :  { %4018 = vmatprep.mubr.msk.bf16.mxu0 %vm795_vm0, %v4237_v5  ;;  %4126 = vmatprep.mubr.msk.bf16.mxu1 %vm795_vm0, %v4239_v6  ;;  %v4249_v17 = vld [vmem:[%s5890_s0 + $0x40] sm:$0xff]   ;;  %v4251_v18 = vld [vmem:[%s5890_s0 + $0x1f0] sm:$0xff]   ;;  %v4250_v19 = vld [vmem:[%s5890_s0 + $0x48] sm:$0xff]  }
  0x23   :  { %v4252_v20 = vld [vmem:[%s5890_s0 + $0x1f8] sm:$0xff]   ;;  %v4253_v21 = vld [vmem:[%s5890_s0 + $0x50] sm:$0xff]   ;;  %v4255_v22 = vld [vmem:[%s5890_s0 + $0x200] sm:$0xff]  }
  0x24   :  { %v4254_v23 = vld [vmem:[%s5890_s0 + $0x58] sm:$0xff]   ;;  %v4256_v24 = vld [vmem:[%s5890_s0 + $0x208] sm:$0xff]   ;;  %v4257_v25 = vld [vmem:[%s5890_s0 + $0x60] sm:$0xff]  }
  0x25   :  { %v4259_v26 = vld [vmem:[%s5890_s0 + $0x210] sm:$0xff]   ;;  %v4258_v27 = vld [vmem:[%s5890_s0 + $0x68] sm:$0xff]   ;;  %v4260_v28 = vld [vmem:[%s5890_s0 + $0x218] sm:$0xff]  }
  0x26   :  { %v4261_v29 = vld [vmem:[%s5890_s0 + $0x70] sm:$0xff]   ;;  %v4263_v30 = vld [vmem:[%s5890_s0 + $0x220] sm:$0xff]   ;;  %v4262_v31 = vld [vmem:[%s5890_s0 + $0x78] sm:$0xff]  }
  0x27   :  { %v4264_v32 = vld [vmem:[%s5890_s0 + $0x228] sm:$0xff]   ;;  %v4265_v33 = vld [vmem:[%s5890_s0 + $0x80] sm:$0xff]   ;;  %v4267_v34 = vld [vmem:[%s5890_s0 + $0x230] sm:$0xff]  }
  0x28   :  { %v4266_v35 = vld [vmem:[%s5890_s0 + $0x88] sm:$0xff]   ;;  %v4268_v36 = vld [vmem:[%s5890_s0 + $0x238] sm:$0xff]   ;;  %v4269_v37 = vld [vmem:[%s5890_s0 + $0x90] sm:$0xff]  }
  0x29   :  { %4019 = vmatmul.mubr.msk.bf16.gmra.mxu0 %vm795_vm0, %v4238_v7  ;;  %4127 = vmatmul.mubr.msk.bf16.gmra.mxu1 %vm795_vm0, %v4240_v8  ;;  %v4271_v38 = vld [vmem:[%s5890_s0 + $0x240] sm:$0xff]   ;;  %v4270_v39 = vld [vmem:[%s5890_s0 + $0x98] sm:$0xff]   ;;  %v4272_v40 = vld [vmem:[%s5890_s0 + $0x248] sm:$0xff]  }
  0x2a   :  { %4022 = vmatprep.mubr.msk.bf16.mxu0 %vm795_vm0, %v4241_v9  ;;  %4130 = vmatprep.mubr.msk.bf16.mxu1 %vm795_vm0, %v4243_v10  ;;  %v4273_v41 = vld [vmem:[%s5890_s0 + $0xa0] sm:$0xff]   ;;  %v4275_v42 = vld [vmem:[%s5890_s0 + $0x250] sm:$0xff]   ;;  %v4274_v43 = vld [vmem:[%s5890_s0 + $0xa8] sm:$0xff]  }
  0x2b   :  { %v4276_v44 = vld [vmem:[%s5890_s0 + $0x258] sm:$0xff]   ;;  %v4277_v45 = vld [vmem:[%s5890_s0 + $0xb0] sm:$0xff]   ;;  %v4279_v46 = vld [vmem:[%s5890_s0 + $0x260] sm:$0xff]  }
  0x2c   :  { %v4278_v47 = vld [vmem:[%s5890_s0 + $0xb8] sm:$0xff]   ;;  %v4280_v48 = vld [vmem:[%s5890_s0 + $0x268] sm:$0xff]   ;;  %v4281_v49 = vld [vmem:[%s5890_s0 + $0xc0] sm:$0xff]  }
  0x2d   :  { %v4283_v50 = vld [vmem:[%s5890_s0 + $0x270] sm:$0xff]   ;;  %v4282_v51 = vld [vmem:[%s5890_s0 + $0xc8] sm:$0xff]   ;;  %v4284_v52 = vld [vmem:[%s5890_s0 + $0x278] sm:$0xff]  }
  0x2e   :  { %v4285_v53 = vld [vmem:[%s5890_s0 + $0xd0] sm:$0xff]   ;;  %v4287_v54 = vld [vmem:[%s5890_s0 + $0x280] sm:$0xff]   ;;  %v4286_v55 = vld [vmem:[%s5890_s0 + $0xd8] sm:$0xff]  }
  0x2f   :  { %v4288_v56 = vld [vmem:[%s5890_s0 + $0x288] sm:$0xff]   ;;  %v4289_v57 = vld [vmem:[%s5890_s0 + $0xe0] sm:$0xff]   ;;  %v4291_v58 = vld [vmem:[%s5890_s0 + $0x290] sm:$0xff]  }
  0x30   :  { %v4290_v59 = vld [vmem:[%s5890_s0 + $0xe8] sm:$0xff]   ;;  %v4292_v60 = vld [vmem:[%s5890_s0 + $0x298] sm:$0xff]   ;;  %v4293_v61 = vld [vmem:[%s5890_s0 + $0xf0] sm:$0xff]  }
  0x31   :  { %4023 = vmatmul.mubr.msk.bf16.gmra.mxu0 %vm795_vm0, %v4242_v11  ;;  %4131 = vmatmul.mubr.msk.bf16.gmra.mxu1 %vm795_vm0, %v4244_v12  ;;  %v4295_v62 = vld [vmem:[%s5890_s0 + $0x2a0] sm:$0xff]   ;;  %v4294_v63 = vld [vmem:[%s5890_s0 + $0xf8] sm:$0xff]   ;;  %v4296_v0 = vld [vmem:[%s5890_s0 + $0x2a8] sm:$0xff]  }
  0x32   :  { %4026 = vmatprep.mubr.msk.bf16.mxu0 %vm795_vm0, %v4245_v13  ;;  %4134 = vmatprep.mubr.msk.bf16.mxu1 %vm795_vm0, %v4247_v14  ;;  %v4297_v1 = vld [vmem:[%s5890_s0 + $0x100] sm:$0xff]   ;;  %v4299_v2 = vld [vmem:[%s5890_s0 + $0x2b0] sm:$0xff]   ;;  %v4298_v3 = vld [vmem:[%s5890_s0 + $0x108] sm:$0xff]  }
  0x33   :  { %v4300_v4 = vld [vmem:[%s5890_s0 + $0x2b8] sm:$0xff]   ;;  %v4301_v5 = vld [vmem:[%s5890_s0 + $0x110] sm:$0xff]   ;;  %v4303_v6 = vld [vmem:[%s5890_s0 + $0x2c0] sm:$0xff]  }
  0x34   :  { %v4302_v7 = vld [vmem:[%s5890_s0 + $0x118] sm:$0xff]   ;;  %v4304_v8 = vld [vmem:[%s5890_s0 + $0x2c8] sm:$0xff]   ;;  %v4305_v9 = vld [vmem:[%s5890_s0 + $0x120] sm:$0xff]  }
  0x35   :  { %v4307_v10 = vld [vmem:[%s5890_s0 + $0x2d0] sm:$0xff]   ;;  %v4306_v11 = vld [vmem:[%s5890_s0 + $0x128] sm:$0xff]   ;;  %v4308_v12 = vld [vmem:[%s5890_s0 + $0x2d8] sm:$0xff]  }
  0x36   :  { %v4309_v13 = vld [vmem:[%s5890_s0 + $0x130] sm:$0xff]   ;;  %v4311_v14 = vld [vmem:[%s5890_s0 + $0x2e0] sm:$0xff]  }
  0x39   :  { %4027 = vmatmul.mubr.msk.bf16.gmra.mxu0 %vm795_vm0, %v4246_v15  ;;  %4135 = vmatmul.mubr.msk.bf16.gmra.mxu1 %vm795_vm0, %v4248_v16  ;;  %v4310_v15 = vld [vmem:[%s5890_s0 + $0x138] sm:$0xff]   ;;  %v4312_v16 = vld [vmem:[%s5890_s0 + $0x2e8] sm:$0xff]  }
  0x3a   :  { %4030 = vmatprep.mubr.msk.bf16.mxu0 %vm795_vm0, %v4249_v17  ;;  %4138 = vmatprep.mubr.msk.bf16.mxu1 %vm795_vm0, %v4251_v18  ;;  %v4313_v17 = vld [vmem:[%s5890_s0 + $0x140] sm:$0xff]   ;;  %v4315_v18 = vld [vmem:[%s5890_s0 + $0x2f0] sm:$0xff]  }
  0x41   :  { %4031 = vmatmul.mubr.msk.bf16.gmra.mxu0 %vm795_vm0, %v4250_v19  ;;  %4139 = vmatmul.mubr.msk.bf16.gmra.mxu1 %vm795_vm0, %v4252_v20  ;;  %v4314_v19 = vld [vmem:[%s5890_s0 + $0x148] sm:$0xff]   ;;  %v4316_v20 = vld [vmem:[%s5890_s0 + $0x2f8] sm:$0xff]  }
  0x42   :  { %4034 = vmatprep.mubr.msk.bf16.mxu0 %vm795_vm0, %v4253_v21  ;;  %4142 = vmatprep.mubr.msk.bf16.mxu1 %vm795_vm0, %v4255_v22  ;;  %v4317_v21 = vld [vmem:[%s5890_s0 + $0x150] sm:$0xff]   ;;  %v4319_v22 = vld [vmem:[%s5890_s0 + $0x300] sm:$0xff]  }
  0x49   :  { %4035 = vmatmul.mubr.msk.bf16.gmra.mxu0 %vm795_vm0, %v4254_v23  ;;  %4143 = vmatmul.mubr.msk.bf16.gmra.mxu1 %vm795_vm0, %v4256_v24  ;;  %v4318_v23 = vld [vmem:[%s5890_s0 + $0x158] sm:$0xff]   ;;  %v4320_v24 = vld [vmem:[%s5890_s0 + $0x308] sm:$0xff]  }
  0x4a   :  { %4038 = vmatprep.mubr.msk.bf16.mxu0 %vm795_vm0, %v4257_v25  ;;  %4146 = vmatprep.mubr.msk.bf16.mxu1 %vm795_vm0, %v4259_v26  ;;  %v4321_v25 = vld [vmem:[%s5890_s0 + $0x160] sm:$0xff]   ;;  %v4323_v26 = vld [vmem:[%s5890_s0 + $0x310] sm:$0xff]  }
  0x51   :  { %4039 = vmatmul.mubr.msk.bf16.gmra.mxu0 %vm795_vm0, %v4258_v27  ;;  %4147 = vmatmul.mubr.msk.bf16.gmra.mxu1 %vm795_vm0, %v4260_v28  ;;  %v4322_v27 = vld [vmem:[%s5890_s0 + $0x168] sm:$0xff]   ;;  %v4324_v28 = vld [vmem:[%s5890_s0 + $0x318] sm:$0xff]  }
  0x52   :  { %4042 = vmatprep.mubr.msk.bf16.mxu0 %vm795_vm0, %v4261_v29  ;;  %4150 = vmatprep.mubr.msk.bf16.mxu1 %vm795_vm0, %v4263_v30  ;;  %v4325_v29 = vld [vmem:[%s5890_s0 + $0x170] sm:$0xff]   ;;  %v4327_v30 = vld [vmem:[%s5890_s0 + $0x320] sm:$0xff]  }
  0x59   :  { %4043 = vmatmul.mubr.msk.bf16.gmra.mxu0 %vm795_vm0, %v4262_v31  ;;  %4151 = vmatmul.mubr.msk.bf16.gmra.mxu1 %vm795_vm0, %v4264_v32  ;;  %v4326_v31 = vld [vmem:[%s5890_s0 + $0x178] sm:$0xff]   ;;  %v4328_v32 = vld [vmem:[%s5890_s0 + $0x328] sm:$0xff]  }
  0x5a   :  { %4046 = vmatprep.mubr.msk.bf16.mxu0 %vm795_vm0, %v4265_v33  ;;  %4154 = vmatprep.mubr.msk.bf16.mxu1 %vm795_vm0, %v4267_v34  ;;  %v4329_v33 = vld [vmem:[%s5890_s0 + $0x180] sm:$0xff]   ;;  %v4331_v34 = vld [vmem:[%s5890_s0 + $0x330] sm:$0xff]  }
  0x61   :  { %4047 = vmatmul.mubr.msk.bf16.gmra.mxu0 %vm795_vm0, %v4266_v35  ;;  %4155 = vmatmul.mubr.msk.bf16.gmra.mxu1 %vm795_vm0, %v4268_v36  ;;  %v4330_v35 = vld [vmem:[%s5890_s0 + $0x188] sm:$0xff]   ;;  %v4332_v36 = vld [vmem:[%s5890_s0 + $0x338] sm:$0xff]  }
  0x62   :  { %4050 = vmatprep.mubr.msk.bf16.mxu0 %vm795_vm0, %v4269_v37  ;;  %4158 = vmatprep.mubr.msk.bf16.mxu1 %vm795_vm0, %v4271_v38  ;;  %v4333_v37 = vld [vmem:[%s5890_s0 + $0x190] sm:$0xff]   ;;  %v4335_v38 = vld [vmem:[%s5890_s0 + $0x340] sm:$0xff]  }
  0x69   :  { %4051 = vmatmul.mubr.msk.bf16.gmra.mxu0 %vm795_vm0, %v4270_v39  ;;  %4159 = vmatmul.mubr.msk.bf16.gmra.mxu1 %vm795_vm0, %v4272_v40  ;;  %v4819_v39 = vld [vmem:[#allocation4] ss:$0 sm:$0xff] }
  0x6a   :  { %4054 = vmatprep.mubr.msk.bf16.mxu0 %vm795_vm0, %v4273_v41  ;;  %4162 = vmatprep.mubr.msk.bf16.mxu1 %vm795_vm0, %v4275_v42 }
  0x71   :  { %4055 = vmatmul.mubr.msk.bf16.gmra.mxu0 %vm795_vm0, %v4274_v43  ;;  %4163 = vmatmul.mubr.msk.bf16.gmra.mxu1 %vm795_vm0, %v4276_v44 }
  0x72   :  { %4058 = vmatprep.mubr.msk.bf16.mxu0 %vm795_vm0, %v4277_v45  ;;  %4166 = vmatprep.mubr.msk.bf16.mxu1 %vm795_vm0, %v4279_v46 }
  0x79   :  { %4059 = vmatmul.mubr.msk.bf16.gmra.mxu0 %vm795_vm0, %v4278_v47  ;;  %4167 = vmatmul.mubr.msk.bf16.gmra.mxu1 %vm795_vm0, %v4280_v48 }
  0x7a   :  { %4062 = vmatprep.mubr.msk.bf16.mxu0 %vm795_vm0, %v4281_v49  ;;  %4170 = vmatprep.mubr.msk.bf16.mxu1 %vm795_vm0, %v4283_v50 }
  0x81   :  { %4063 = vmatmul.mubr.msk.bf16.gmra.mxu0 %vm795_vm0, %v4282_v51  ;;  %4171 = vmatmul.mubr.msk.bf16.gmra.mxu1 %vm795_vm0, %v4284_v52  ;;  %v4334_v52 = vld [vmem:[%s5890_s0 + $0x198] sm:$0xff]  }
  0x82   :  { %4066 = vmatprep.mubr.msk.bf16.mxu0 %vm795_vm0, %v4285_v53  ;;  %4174 = vmatprep.mubr.msk.bf16.mxu1 %vm795_vm0, %v4287_v54  ;;  %v4336_v53 = vld [vmem:[%s5890_s0 + $0x348] ss:$0 sps:$4 sm:$0x11]  }
  0x89   :  { %4067 = vmatmul.mubr.msk.bf16.gmra.mxu0 %vm795_vm0, %v4286_v55  ;;  %4175 = vmatmul.mubr.msk.bf16.gmra.mxu1 %vm795_vm0, %v4288_v56 }
  0x8a   :  { %4070 = vmatprep.mubr.msk.bf16.mxu0 %vm795_vm0, %v4289_v57  ;;  %4178 = vmatprep.mubr.msk.bf16.mxu1 %vm795_vm0, %v4291_v58  ;;  %v4337_v58 = vld [vmem:[%s5890_s0 + $0x1a0] sm:$0xff]  }
  0x91   :  { %4071 = vmatmul.mubr.msk.bf16.gmra.mxu0 %vm795_vm0, %v4290_v59  ;;  %4179 = vmatmul.mubr.msk.bf16.gmra.mxu1 %vm795_vm0, %v4292_v60 }
  0x92   :  { %4074 = vmatprep.mubr.msk.bf16.mxu0 %vm795_vm0, %v4293_v61  ;;  %4182 = vmatprep.mubr.msk.bf16.mxu1 %vm795_vm0, %v4295_v62 }
  0x99   :  { %4075 = vmatmul.mubr.msk.bf16.gmra.mxu0 %vm795_vm0, %v4294_v63  ;;  %4183 = vmatmul.mubr.msk.bf16.gmra.mxu1 %vm795_vm0, %v4296_v0 }
  0x9a   :  { %4078 = vmatprep.mubr.msk.bf16.mxu0 %vm795_vm0, %v4297_v1  ;;  %4186 = vmatprep.mubr.msk.bf16.mxu1 %vm795_vm0, %v4299_v2 }
  0xa1   :  { %4079 = vmatmul.mubr.msk.bf16.gmra.mxu0 %vm795_vm0, %v4298_v3  ;;  %4187 = vmatmul.mubr.msk.bf16.gmra.mxu1 %vm795_vm0, %v4300_v4 }
  0xa2   :  { %4082 = vmatprep.mubr.msk.bf16.mxu0 %vm795_vm0, %v4301_v5  ;;  %4190 = vmatprep.mubr.msk.bf16.mxu1 %vm795_vm0, %v4303_v6 }
  0xa9   :  { %4083 = vmatmul.mubr.msk.bf16.gmra.mxu0 %vm795_vm0, %v4302_v7  ;;  %4191 = vmatmul.mubr.msk.bf16.gmra.mxu1 %vm795_vm0, %v4304_v8 }
  0xaa   :  { %4086 = vmatprep.mubr.msk.bf16.mxu0 %vm795_vm0, %v4305_v9  ;;  %4194 = vmatprep.mubr.msk.bf16.mxu1 %vm795_vm0, %v4307_v10 }
  0xb1   :  { %4087 = vmatmul.mubr.msk.bf16.gmra.mxu0 %vm795_vm0, %v4306_v11  ;;  %4195 = vmatmul.mubr.msk.bf16.gmra.mxu1 %vm795_vm0, %v4308_v12 }
  0xb2   :  { %4090 = vmatprep.mubr.msk.bf16.mxu0 %vm795_vm0, %v4309_v13  ;;  %4198 = vmatprep.mubr.msk.bf16.mxu1 %vm795_vm0, %v4311_v14 }
  0xb9   :  { %4091 = vmatmul.mubr.msk.bf16.gmra.mxu0 %vm795_vm0, %v4310_v15  ;;  %4199 = vmatmul.mubr.msk.bf16.gmra.mxu1 %vm795_vm0, %v4312_v16 }
  0xba   :  { %4094 = vmatprep.mubr.msk.bf16.mxu0 %vm795_vm0, %v4313_v17  ;;  %4202 = vmatprep.mubr.msk.bf16.mxu1 %vm795_vm0, %v4315_v18 }
  0xc1   :  { %4095 = vmatmul.mubr.msk.bf16.gmra.mxu0 %vm795_vm0, %v4314_v19  ;;  %4203 = vmatmul.mubr.msk.bf16.gmra.mxu1 %vm795_vm0, %v4316_v20 }
  0xc2   :  { %4098 = vmatprep.mubr.msk.bf16.mxu0 %vm795_vm0, %v4317_v21  ;;  %4206 = vmatprep.mubr.msk.bf16.mxu1 %vm795_vm0, %v4319_v22 }
  0xc9   :  { %4099 = vmatmul.mubr.msk.bf16.gmra.mxu0 %vm795_vm0, %v4318_v23  ;;  %4207 = vmatmul.mubr.msk.bf16.gmra.mxu1 %vm795_vm0, %v4320_v24  ;;  %v4338_v23 = vld [vmem:[%s5890_s0 + $0x1a8] sm:$0xff]  }
  0xca   :  { %4102 = vmatprep.mubr.msk.bf16.mxu0 %vm795_vm0, %v4321_v25  ;;  %4210 = vmatprep.mubr.msk.bf16.mxu1 %vm795_vm0, %v4323_v26 }
  0xd1   :  { %4103 = vmatmul.mubr.msk.bf16.gmra.mxu0 %vm795_vm0, %v4322_v27  ;;  %4211 = vmatmul.mubr.msk.bf16.gmra.mxu1 %vm795_vm0, %v4324_v28 }
  0xd2   :  { %4106 = vmatprep.mubr.msk.bf16.mxu0 %vm795_vm0, %v4325_v29  ;;  %4214 = vmatprep.mubr.msk.bf16.mxu1 %vm795_vm0, %v4327_v30 }
  0xd9   :  { %4107 = vmatmul.mubr.msk.bf16.gmra.mxu0 %vm795_vm0, %v4326_v31  ;;  %4215 = vmatmul.mubr.msk.bf16.gmra.mxu1 %vm795_vm0, %v4328_v32 }
  0xda   :  { %4110 = vmatprep.mubr.msk.bf16.mxu0 %vm795_vm0, %v4329_v33  ;;  %4218 = vmatprep.mubr.msk.bf16.mxu1 %vm795_vm0, %v4331_v34 }
  0xe1   :  { %v4016_v40 = vpop.f32.mrf.mxu0  ;;  %4111 = vmatmul.mubr.msk.bf16.gmra.mxu0 %vm795_vm0, %v4330_v35  ;;  %v4124_v41 = vpop.f32.mrf.mxu1  ;;  %4219 = vmatmul.mubr.msk.bf16.gmra.mxu1 %vm795_vm0, %v4332_v36 }
  0xe2   :  { %v1157_v42 = vadd.f32 %v4016_v40, %v4819_v39  ;;  %v1589_v43 = vadd.f32 %v4124_v41, %v4819_v39  ;;  %4114 = vmatprep.mubr.msk.bf16.mxu0 %vm795_vm0, %v4333_v37  ;;  %4222 = vmatprep.mubr.msk.bf16.mxu1 %vm795_vm0, %v4335_v38 }
  0xe3   :  { %v1148_v44 = vpop.f32.mrf.mxu0  ;;  %v1580_v45 = vpop.f32.mrf.mxu1 }
  0xe4   :  { %v1996_v46 = vmax.f32 %v1157_v42, 0.0  ;;  %v1149_v47 = vadd.f32 %v4819_v39, %v1148_v44  ;;  %v2104_v48 = vmax.f32 %v1589_v43, 0.0  ;;  %v1581_v49 = vadd.f32 %v4819_v39, %v1580_v45 }
  0xe5   :  { %v4017_v50 = vpop.f32.mrf.mxu0  ;;  %v4125_v51 = vpop.f32.mrf.mxu1 }
  0xe6   :  { %v3696_v54 = vpack.c.bf16 %v1996_v46, %v1996_v46  ;;  %v1994_v55 = vmax.f32 %v1149_v47, 0.0  ;;  %v3804_v56 = vpack.c.bf16 %v2104_v48, %v2104_v48  ;;  %v1160_v57 = vadd.f32 %v4017_v50, %v4819_v39 }
  0xe7   :  { %v2102_v59 = vmax.f32 %v1581_v49, 0.0  ;;  %v1151_v60 = vpop.f32.mrf.mxu0  ;;  %v1592_v61 = vadd.f32 %v4125_v51, %v4819_v39  ;;  %v1583_v62 = vpop.f32.mrf.mxu1 }
  0xe8   :  { %3053 = vst.msk [vmem:[%s5893_s3 + $0x8] sm:$0xf] %vm3050_vm1, %v3696_v54  ;;  %v3694_v63 = vpack.c.bf16 %v1994_v55, %v1994_v55  ;;  %3161 = vst.msk [vmem:[%s5893_s3 + $0x1b8] sm:$0xf] %vm3050_vm1, %v3804_v56  ;;  %v1997_v0 = vmax.f32 %v1160_v57, 0.0  ;;  %v1152_v1 = vadd.f32 %v4819_v39, %v1151_v60  ;;  %v1584_v2 = vadd.f32 %v4819_v39, %v1583_v62 }
  0xe9   :  { %v3802_v3 = vpack.c.bf16 %v2102_v59, %v2102_v59  ;;  %v2105_v4 = vmax.f32 %v1592_v61, 0.0  ;;  %v4020_v5 = vpop.f32.mrf.mxu0  ;;  %4115 = vmatmul.mubr.msk.bf16.gmra.mxu0 %vm795_vm0, %v4334_v52  ;;  %v4128_v6 = vpop.f32.mrf.mxu1  ;;  %4223 = vmatmul.mubr.msk.bf16.gmra.mxu1 %vm795_vm0, %v4336_v53 }
  0xea   :  { %3051 = vst.msk [vmem:[%s5893_s3] sm:$0xf] %vm3050_vm1, %v3694_v63  ;;  %v3697_v7 = vpack.c.bf16 %v1997_v0, %v1997_v0  ;;  %v1995_v8 = vmax.f32 %v1152_v1, 0.0  ;;  %v1173_v9 = vadd.f32 %v4020_v5, %v4819_v39  ;;  %v2103_v10 = vmax.f32 %v1584_v2, 0.0  ;;  %4118 = vmatprep.mubr.msk.bf16.mxu0 %vm795_vm0, %v4337_v58 }
  0xeb   :  { %3159 = vst.msk [vmem:[%s5893_s3 + $0x1b0] sm:$0xf] %vm3050_vm1, %v3802_v3  ;;  %v3805_v11 = vpack.c.bf16 %v2105_v4, %v2105_v4  ;;  %v1164_v12 = vpop.f32.mrf.mxu0  ;;  %v1605_v13 = vadd.f32 %v4128_v6, %v4819_v39  ;;  %v1596_v14 = vpop.f32.mrf.mxu1 }
  0xec   :  { %3054 = vst.msk [vmem:[%s5893_s3 + $0xc] sm:$0xf] %vm3050_vm1, %v3697_v7  ;;  %v3695_v15 = vpack.c.bf16 %v1995_v8, %v1995_v8  ;;  %v2000_v16 = vmax.f32 %v1173_v9, 0.0  ;;  %v3803_v17 = vpack.c.bf16 %v2103_v10, %v2103_v10  ;;  %v1165_v18 = vadd.f32 %v4819_v39, %v1164_v12 }
  0xed   :  { %3162 = vst.msk [vmem:[%s5893_s3 + $0x1bc] sm:$0xf] %vm3050_vm1, %v3805_v11  ;;  %v2108_v19 = vmax.f32 %v1605_v13, 0.0  ;;  %v4021_v20 = vpop.f32.mrf.mxu0  ;;  %v1597_v21 = vadd.f32 %v4819_v39, %v1596_v14  ;;  %v4129_v22 = vpop.f32.mrf.mxu1 }
  0xee   :  { %3052 = vst.msk [vmem:[%s5893_s3 + $0x4] sm:$0xf] %vm3050_vm1, %v3695_v15  ;;  %v3700_v24 = vpack.c.bf16 %v2000_v16, %v2000_v16  ;;  %3160 = vst.msk [vmem:[%s5893_s3 + $0x1b4] sm:$0xf] %vm3050_vm1, %v3803_v17  ;;  %v1998_v25 = vmax.f32 %v1165_v18, 0.0  ;;  %v1176_v26 = vadd.f32 %v4021_v20, %v4819_v39  ;;  %v1608_v27 = vadd.f32 %v4129_v22, %v4819_v39 }
  0xef   :  { %v3808_v28 = vpack.c.bf16 %v2108_v19, %v2108_v19  ;;  %v2106_v29 = vmax.f32 %v1597_v21, 0.0  ;;  %v1167_v30 = vpop.f32.mrf.mxu0  ;;  %v1599_v31 = vpop.f32.mrf.mxu1 }
  0xf0   :  { %3057 = vst.msk [vmem:[%s5893_s3 + $0x18] sm:$0xf] %vm3050_vm1, %v3700_v24  ;;  %v3698_v32 = vpack.c.bf16 %v1998_v25, %v1998_v25  ;;  %v2001_v33 = vmax.f32 %v1176_v26, 0.0  ;;  %v1168_v34 = vadd.f32 %v4819_v39, %v1167_v30  ;;  %v2109_v35 = vmax.f32 %v1608_v27, 0.0 }
  0xf1   :  { %3165 = vst.msk [vmem:[%s5893_s3 + $0x1c8] sm:$0xf] %vm3050_vm1, %v3808_v28  ;;  %v3806_v36 = vpack.c.bf16 %v2106_v29, %v2106_v29  ;;  %v4024_v37 = vpop.f32.mrf.mxu0  ;;  %4119 = vmatmul.mubr.msk.bf16.gmra.mxu0 %vm795_vm0, %v4338_v23  ;;  %v1600_v38 = vadd.f32 %v4819_v39, %v1599_v31  ;;  %v4132_v40 = vpop.f32.mrf.mxu1 }
  0xf2   :  { %3055 = vst.msk [vmem:[%s5893_s3 + $0x10] sm:$0xf] %vm3050_vm1, %v3698_v32  ;;  %v3701_v41 = vpack.c.bf16 %v2001_v33, %v2001_v33  ;;  %v1999_v42 = vmax.f32 %v1168_v34, 0.0  ;;  %v3809_v43 = vpack.c.bf16 %v2109_v35, %v2109_v35  ;;  %v1189_v44 = vadd.f32 %v4024_v37, %v4819_v39 }
  0xf3   :  { %3163 = vst.msk [vmem:[%s5893_s3 + $0x1c0] sm:$0xf] %vm3050_vm1, %v3806_v36  ;;  %v2107_v45 = vmax.f32 %v1600_v38, 0.0  ;;  %v1180_v46 = vpop.f32.mrf.mxu0  ;;  %v1621_v47 = vadd.f32 %v4132_v40, %v4819_v39  ;;  %v1612_v48 = vpop.f32.mrf.mxu1 }
  0xf4   :  { %3058 = vst.msk [vmem:[%s5893_s3 + $0x1c] sm:$0xf] %vm3050_vm1, %v3701_v41  ;;  %v3699_v49 = vpack.c.bf16 %v1999_v42, %v1999_v42  ;;  %3166 = vst.msk [vmem:[%s5893_s3 + $0x1cc] sm:$0xf] %vm3050_vm1, %v3809_v43  ;;  %v2004_v50 = vmax.f32 %v1189_v44, 0.0  ;;  %v1181_v51 = vadd.f32 %v4819_v39, %v1180_v46  ;;  %v1613_v52 = vadd.f32 %v4819_v39, %v1612_v48 }
  0xf5   :  { %v3807_v53 = vpack.c.bf16 %v2107_v45, %v2107_v45  ;;  %v2112_v54 = vmax.f32 %v1621_v47, 0.0  ;;  %v4025_v55 = vpop.f32.mrf.mxu0  ;;  %v4133_v56 = vpop.f32.mrf.mxu1 }
  0xf6   :  { %3056 = vst.msk [vmem:[%s5893_s3 + $0x14] sm:$0xf] %vm3050_vm1, %v3699_v49  ;;  %v3704_v57 = vpack.c.bf16 %v2004_v50, %v2004_v50  ;;  %v2002_v58 = vmax.f32 %v1181_v51, 0.0  ;;  %v1192_v59 = vadd.f32 %v4025_v55, %v4819_v39  ;;  %v2110_v60 = vmax.f32 %v1613_v52, 0.0 }
  0xf7   :  { %3164 = vst.msk [vmem:[%s5893_s3 + $0x1c4] sm:$0xf] %vm3050_vm1, %v3807_v53  ;;  %v3812_v61 = vpack.c.bf16 %v2112_v54, %v2112_v54  ;;  %v1183_v62 = vpop.f32.mrf.mxu0  ;;  %v1624_v63 = vadd.f32 %v4133_v56, %v4819_v39  ;;  %v1615_v0 = vpop.f32.mrf.mxu1 }
  0xf8   :  { %3061 = vst.msk [vmem:[%s5893_s3 + $0x28] sm:$0xf] %vm3050_vm1, %v3704_v57  ;;  %v3702_v1 = vpack.c.bf16 %v2002_v58, %v2002_v58  ;;  %v2005_v2 = vmax.f32 %v1192_v59, 0.0  ;;  %v3810_v3 = vpack.c.bf16 %v2110_v60, %v2110_v60  ;;  %v1184_v4 = vadd.f32 %v4819_v39, %v1183_v62 }
  0xf9   :  { %3169 = vst.msk [vmem:[%s5893_s3 + $0x1d8] sm:$0xf] %vm3050_vm1, %v3812_v61  ;;  %v2113_v5 = vmax.f32 %v1624_v63, 0.0  ;;  %v4028_v6 = vpop.f32.mrf.mxu0  ;;  %v1616_v7 = vadd.f32 %v4819_v39, %v1615_v0  ;;  %v4136_v8 = vpop.f32.mrf.mxu1 }
  0xfa   :  { %3059 = vst.msk [vmem:[%s5893_s3 + $0x20] sm:$0xf] %vm3050_vm1, %v3702_v1  ;;  %v3705_v9 = vpack.c.bf16 %v2005_v2, %v2005_v2  ;;  %3167 = vst.msk [vmem:[%s5893_s3 + $0x1d0] sm:$0xf] %vm3050_vm1, %v3810_v3  ;;  %v2003_v10 = vmax.f32 %v1184_v4, 0.0  ;;  %v1205_v11 = vadd.f32 %v4028_v6, %v4819_v39  ;;  %v1637_v12 = vadd.f32 %v4136_v8, %v4819_v39 }
  0xfb   :  { %v3813_v13 = vpack.c.bf16 %v2113_v5, %v2113_v5  ;;  %v2111_v14 = vmax.f32 %v1616_v7, 0.0  ;;  %v1196_v15 = vpop.f32.mrf.mxu0  ;;  %v1628_v16 = vpop.f32.mrf.mxu1 }
  0xfc   :  { %3062 = vst.msk [vmem:[%s5893_s3 + $0x2c] sm:$0xf] %vm3050_vm1, %v3705_v9  ;;  %v3703_v17 = vpack.c.bf16 %v2003_v10, %v2003_v10  ;;  %v2008_v18 = vmax.f32 %v1205_v11, 0.0  ;;  %v1197_v19 = vadd.f32 %v4819_v39, %v1196_v15  ;;  %v2116_v20 = vmax.f32 %v1637_v12, 0.0 }
  0xfd   :  { %3170 = vst.msk [vmem:[%s5893_s3 + $0x1dc] sm:$0xf] %vm3050_vm1, %v3813_v13  ;;  %v3811_v21 = vpack.c.bf16 %v2111_v14, %v2111_v14  ;;  %v4029_v22 = vpop.f32.mrf.mxu0  ;;  %v1629_v23 = vadd.f32 %v4819_v39, %v1628_v16  ;;  %v4137_v24 = vpop.f32.mrf.mxu1 }
  0xfe   :  { %3060 = vst.msk [vmem:[%s5893_s3 + $0x24] sm:$0xf] %vm3050_vm1, %v3703_v17  ;;  %v3708_v25 = vpack.c.bf16 %v2008_v18, %v2008_v18  ;;  %v2006_v26 = vmax.f32 %v1197_v19, 0.0  ;;  %v3816_v27 = vpack.c.bf16 %v2116_v20, %v2116_v20  ;;  %v1208_v28 = vadd.f32 %v4029_v22, %v4819_v39 }
  0xff   :  { %3168 = vst.msk [vmem:[%s5893_s3 + $0x1d4] sm:$0xf] %vm3050_vm1, %v3811_v21  ;;  %v2114_v29 = vmax.f32 %v1629_v23, 0.0  ;;  %v1199_v30 = vpop.f32.mrf.mxu0  ;;  %v1640_v31 = vadd.f32 %v4137_v24, %v4819_v39  ;;  %v1631_v32 = vpop.f32.mrf.mxu1 }
 0x100   :  { %3065 = vst.msk [vmem:[%s5893_s3 + $0x38] sm:$0xf] %vm3050_vm1, %v3708_v25  ;;  %v3706_v33 = vpack.c.bf16 %v2006_v26, %v2006_v26  ;;  %3173 = vst.msk [vmem:[%s5893_s3 + $0x1e8] sm:$0xf] %vm3050_vm1, %v3816_v27  ;;  %v2009_v34 = vmax.f32 %v1208_v28, 0.0  ;;  %v1200_v35 = vadd.f32 %v4819_v39, %v1199_v30  ;;  %v1632_v36 = vadd.f32 %v4819_v39, %v1631_v32 }
 0x101   :  { %v3814_v37 = vpack.c.bf16 %v2114_v29, %v2114_v29  ;;  %v2117_v38 = vmax.f32 %v1640_v31, 0.0  ;;  %v4032_v40 = vpop.f32.mrf.mxu0  ;;  %v4140_v41 = vpop.f32.mrf.mxu1 }
 0x102   :  { %3063 = vst.msk [vmem:[%s5893_s3 + $0x30] sm:$0xf] %vm3050_vm1, %v3706_v33  ;;  %v3709_v42 = vpack.c.bf16 %v2009_v34, %v2009_v34  ;;  %v2007_v43 = vmax.f32 %v1200_v35, 0.0  ;;  %v1221_v44 = vadd.f32 %v4032_v40, %v4819_v39  ;;  %v2115_v45 = vmax.f32 %v1632_v36, 0.0 }
 0x103   :  { %3171 = vst.msk [vmem:[%s5893_s3 + $0x1e0] sm:$0xf] %vm3050_vm1, %v3814_v37  ;;  %v3817_v46 = vpack.c.bf16 %v2117_v38, %v2117_v38  ;;  %v1212_v47 = vpop.f32.mrf.mxu0  ;;  %v1653_v48 = vadd.f32 %v4140_v41, %v4819_v39  ;;  %v1644_v49 = vpop.f32.mrf.mxu1 }
 0x104   :  { %3066 = vst.msk [vmem:[%s5893_s3 + $0x3c] sm:$0xf] %vm3050_vm1, %v3709_v42  ;;  %v3707_v50 = vpack.c.bf16 %v2007_v43, %v2007_v43  ;;  %v2012_v51 = vmax.f32 %v1221_v44, 0.0  ;;  %v3815_v52 = vpack.c.bf16 %v2115_v45, %v2115_v45  ;;  %v1213_v53 = vadd.f32 %v4819_v39, %v1212_v47 }
 0x105   :  { %3174 = vst.msk [vmem:[%s5893_s3 + $0x1ec] sm:$0xf] %vm3050_vm1, %v3817_v46  ;;  %v2120_v54 = vmax.f32 %v1653_v48, 0.0  ;;  %v4033_v55 = vpop.f32.mrf.mxu0  ;;  %v1645_v56 = vadd.f32 %v4819_v39, %v1644_v49  ;;  %v4141_v57 = vpop.f32.mrf.mxu1 }
 0x106   :  { %3064 = vst.msk [vmem:[%s5893_s3 + $0x34] sm:$0xf] %vm3050_vm1, %v3707_v50  ;;  %v3712_v58 = vpack.c.bf16 %v2012_v51, %v2012_v51  ;;  %3172 = vst.msk [vmem:[%s5893_s3 + $0x1e4] sm:$0xf] %vm3050_vm1, %v3815_v52  ;;  %v2010_v59 = vmax.f32 %v1213_v53, 0.0  ;;  %v1224_v60 = vadd.f32 %v4033_v55, %v4819_v39  ;;  %v1656_v61 = vadd.f32 %v4141_v57, %v4819_v39 }
 0x107   :  { %v3820_v62 = vpack.c.bf16 %v2120_v54, %v2120_v54  ;;  %v2118_v63 = vmax.f32 %v1645_v56, 0.0  ;;  %v1215_v0 = vpop.f32.mrf.mxu0  ;;  %v1647_v1 = vpop.f32.mrf.mxu1 }
 0x108   :  { %3069 = vst.msk [vmem:[%s5893_s3 + $0x48] sm:$0xf] %vm3050_vm1, %v3712_v58  ;;  %v3710_v2 = vpack.c.bf16 %v2010_v59, %v2010_v59  ;;  %v2013_v3 = vmax.f32 %v1224_v60, 0.0  ;;  %v1216_v4 = vadd.f32 %v4819_v39, %v1215_v0  ;;  %v2121_v5 = vmax.f32 %v1656_v61, 0.0 }
 0x109   :  { %3177 = vst.msk [vmem:[%s5893_s3 + $0x1f8] sm:$0xf] %vm3050_vm1, %v3820_v62  ;;  %v3818_v6 = vpack.c.bf16 %v2118_v63, %v2118_v63  ;;  %v4036_v7 = vpop.f32.mrf.mxu0  ;;  %v1648_v8 = vadd.f32 %v4819_v39, %v1647_v1  ;;  %v4144_v9 = vpop.f32.mrf.mxu1 }
 0x10a   :  { %3067 = vst.msk [vmem:[%s5893_s3 + $0x40] sm:$0xf] %vm3050_vm1, %v3710_v2  ;;  %v3713_v10 = vpack.c.bf16 %v2013_v3, %v2013_v3  ;;  %v2011_v11 = vmax.f32 %v1216_v4, 0.0  ;;  %v3821_v12 = vpack.c.bf16 %v2121_v5, %v2121_v5  ;;  %v1237_v13 = vadd.f32 %v4036_v7, %v4819_v39 }
 0x10b   :  { %3175 = vst.msk [vmem:[%s5893_s3 + $0x1f0] sm:$0xf] %vm3050_vm1, %v3818_v6  ;;  %v2119_v14 = vmax.f32 %v1648_v8, 0.0  ;;  %v1228_v15 = vpop.f32.mrf.mxu0  ;;  %v1669_v16 = vadd.f32 %v4144_v9, %v4819_v39  ;;  %v1660_v17 = vpop.f32.mrf.mxu1 }
 0x10c   :  { %3070 = vst.msk [vmem:[%s5893_s3 + $0x4c] sm:$0xf] %vm3050_vm1, %v3713_v10  ;;  %v3711_v18 = vpack.c.bf16 %v2011_v11, %v2011_v11  ;;  %3178 = vst.msk [vmem:[%s5893_s3 + $0x1fc] sm:$0xf] %vm3050_vm1, %v3821_v12  ;;  %v2016_v19 = vmax.f32 %v1237_v13, 0.0  ;;  %v1229_v20 = vadd.f32 %v4819_v39, %v1228_v15  ;;  %v1661_v21 = vadd.f32 %v4819_v39, %v1660_v17 }
 0x10d   :  { %v3819_v22 = vpack.c.bf16 %v2119_v14, %v2119_v14  ;;  %v2124_v23 = vmax.f32 %v1669_v16, 0.0  ;;  %v4037_v24 = vpop.f32.mrf.mxu0  ;;  %v4145_v25 = vpop.f32.mrf.mxu1 }
 0x10e   :  { %3068 = vst.msk [vmem:[%s5893_s3 + $0x44] sm:$0xf] %vm3050_vm1, %v3711_v18  ;;  %v3716_v26 = vpack.c.bf16 %v2016_v19, %v2016_v19  ;;  %v2014_v27 = vmax.f32 %v1229_v20, 0.0  ;;  %v1240_v28 = vadd.f32 %v4037_v24, %v4819_v39  ;;  %v2122_v29 = vmax.f32 %v1661_v21, 0.0 }
 0x10f   :  { %3176 = vst.msk [vmem:[%s5893_s3 + $0x1f4] sm:$0xf] %vm3050_vm1, %v3819_v22  ;;  %v3824_v30 = vpack.c.bf16 %v2124_v23, %v2124_v23  ;;  %v1231_v31 = vpop.f32.mrf.mxu0  ;;  %v1672_v32 = vadd.f32 %v4145_v25, %v4819_v39  ;;  %v1663_v33 = vpop.f32.mrf.mxu1 }
 0x110   :  { %3073 = vst.msk [vmem:[%s5893_s3 + $0x58] sm:$0xf] %vm3050_vm1, %v3716_v26  ;;  %v3714_v34 = vpack.c.bf16 %v2014_v27, %v2014_v27  ;;  %v2017_v35 = vmax.f32 %v1240_v28, 0.0  ;;  %v3822_v36 = vpack.c.bf16 %v2122_v29, %v2122_v29  ;;  %v1232_v37 = vadd.f32 %v4819_v39, %v1231_v31 }
 0x111   :  { %3181 = vst.msk [vmem:[%s5893_s3 + $0x208] sm:$0xf] %vm3050_vm1, %v3824_v30  ;;  %v2125_v38 = vmax.f32 %v1672_v32, 0.0  ;;  %v4040_v40 = vpop.f32.mrf.mxu0  ;;  %v1664_v41 = vadd.f32 %v4819_v39, %v1663_v33  ;;  %v4148_v42 = vpop.f32.mrf.mxu1 }
 0x112   :  { %3071 = vst.msk [vmem:[%s5893_s3 + $0x50] sm:$0xf] %vm3050_vm1, %v3714_v34  ;;  %v3717_v43 = vpack.c.bf16 %v2017_v35, %v2017_v35  ;;  %3179 = vst.msk [vmem:[%s5893_s3 + $0x200] sm:$0xf] %vm3050_vm1, %v3822_v36  ;;  %v2015_v44 = vmax.f32 %v1232_v37, 0.0  ;;  %v1253_v45 = vadd.f32 %v4040_v40, %v4819_v39  ;;  %v1685_v46 = vadd.f32 %v4148_v42, %v4819_v39 }
 0x113   :  { %v3825_v47 = vpack.c.bf16 %v2125_v38, %v2125_v38  ;;  %v2123_v48 = vmax.f32 %v1664_v41, 0.0  ;;  %v1244_v49 = vpop.f32.mrf.mxu0  ;;  %v1676_v50 = vpop.f32.mrf.mxu1 }
 0x114   :  { %3074 = vst.msk [vmem:[%s5893_s3 + $0x5c] sm:$0xf] %vm3050_vm1, %v3717_v43  ;;  %v3715_v51 = vpack.c.bf16 %v2015_v44, %v2015_v44  ;;  %v2020_v52 = vmax.f32 %v1253_v45, 0.0  ;;  %v1245_v53 = vadd.f32 %v4819_v39, %v1244_v49  ;;  %v2128_v54 = vmax.f32 %v1685_v46, 0.0 }
 0x115   :  { %3182 = vst.msk [vmem:[%s5893_s3 + $0x20c] sm:$0xf] %vm3050_vm1, %v3825_v47  ;;  %v3823_v55 = vpack.c.bf16 %v2123_v48, %v2123_v48  ;;  %v4041_v56 = vpop.f32.mrf.mxu0  ;;  %v1677_v57 = vadd.f32 %v4819_v39, %v1676_v50  ;;  %v4149_v58 = vpop.f32.mrf.mxu1 }
 0x116   :  { %3072 = vst.msk [vmem:[%s5893_s3 + $0x54] sm:$0xf] %vm3050_vm1, %v3715_v51  ;;  %v3720_v59 = vpack.c.bf16 %v2020_v52, %v2020_v52  ;;  %v2018_v60 = vmax.f32 %v1245_v53, 0.0  ;;  %v3828_v61 = vpack.c.bf16 %v2128_v54, %v2128_v54  ;;  %v1256_v62 = vadd.f32 %v4041_v56, %v4819_v39 }
 0x117   :  { %3180 = vst.msk [vmem:[%s5893_s3 + $0x204] sm:$0xf] %vm3050_vm1, %v3823_v55  ;;  %v2126_v63 = vmax.f32 %v1677_v57, 0.0  ;;  %v1247_v0 = vpop.f32.mrf.mxu0  ;;  %v1688_v1 = vadd.f32 %v4149_v58, %v4819_v39  ;;  %v1679_v2 = vpop.f32.mrf.mxu1 }
 0x118   :  { %3077 = vst.msk [vmem:[%s5893_s3 + $0x68] sm:$0xf] %vm3050_vm1, %v3720_v59  ;;  %v3718_v3 = vpack.c.bf16 %v2018_v60, %v2018_v60  ;;  %3185 = vst.msk [vmem:[%s5893_s3 + $0x218] sm:$0xf] %vm3050_vm1, %v3828_v61  ;;  %v2021_v4 = vmax.f32 %v1256_v62, 0.0  ;;  %v1248_v5 = vadd.f32 %v4819_v39, %v1247_v0  ;;  %v1680_v6 = vadd.f32 %v4819_v39, %v1679_v2 }
 0x119   :  { %v3826_v7 = vpack.c.bf16 %v2126_v63, %v2126_v63  ;;  %v2129_v8 = vmax.f32 %v1688_v1, 0.0  ;;  %v4044_v9 = vpop.f32.mrf.mxu0  ;;  %v4152_v10 = vpop.f32.mrf.mxu1 }
 0x11a   :  { %3075 = vst.msk [vmem:[%s5893_s3 + $0x60] sm:$0xf] %vm3050_vm1, %v3718_v3  ;;  %v3721_v11 = vpack.c.bf16 %v2021_v4, %v2021_v4  ;;  %v2019_v12 = vmax.f32 %v1248_v5, 0.0  ;;  %v1269_v13 = vadd.f32 %v4044_v9, %v4819_v39  ;;  %v2127_v14 = vmax.f32 %v1680_v6, 0.0 }
 0x11b   :  { %3183 = vst.msk [vmem:[%s5893_s3 + $0x210] sm:$0xf] %vm3050_vm1, %v3826_v7  ;;  %v3829_v15 = vpack.c.bf16 %v2129_v8, %v2129_v8  ;;  %v1260_v16 = vpop.f32.mrf.mxu0  ;;  %v1701_v17 = vadd.f32 %v4152_v10, %v4819_v39  ;;  %v1692_v18 = vpop.f32.mrf.mxu1 }
 0x11c   :  { %3078 = vst.msk [vmem:[%s5893_s3 + $0x6c] sm:$0xf] %vm3050_vm1, %v3721_v11  ;;  %v3719_v19 = vpack.c.bf16 %v2019_v12, %v2019_v12  ;;  %v2024_v20 = vmax.f32 %v1269_v13, 0.0  ;;  %v3827_v21 = vpack.c.bf16 %v2127_v14, %v2127_v14  ;;  %v1261_v22 = vadd.f32 %v4819_v39, %v1260_v16 }
 0x11d   :  { %3186 = vst.msk [vmem:[%s5893_s3 + $0x21c] sm:$0xf] %vm3050_vm1, %v3829_v15  ;;  %v2132_v23 = vmax.f32 %v1701_v17, 0.0  ;;  %v4045_v24 = vpop.f32.mrf.mxu0  ;;  %v1693_v25 = vadd.f32 %v4819_v39, %v1692_v18  ;;  %v4153_v26 = vpop.f32.mrf.mxu1 }
 0x11e   :  { %3076 = vst.msk [vmem:[%s5893_s3 + $0x64] sm:$0xf] %vm3050_vm1, %v3719_v19  ;;  %v3724_v27 = vpack.c.bf16 %v2024_v20, %v2024_v20  ;;  %3184 = vst.msk [vmem:[%s5893_s3 + $0x214] sm:$0xf] %vm3050_vm1, %v3827_v21  ;;  %v2022_v28 = vmax.f32 %v1261_v22, 0.0  ;;  %v1272_v29 = vadd.f32 %v4045_v24, %v4819_v39  ;;  %v1704_v30 = vadd.f32 %v4153_v26, %v4819_v39 }
 0x11f   :  { %v3832_v31 = vpack.c.bf16 %v2132_v23, %v2132_v23  ;;  %v2130_v32 = vmax.f32 %v1693_v25, 0.0  ;;  %v1263_v33 = vpop.f32.mrf.mxu0  ;;  %v1695_v34 = vpop.f32.mrf.mxu1 }
 0x120   :  { %3081 = vst.msk [vmem:[%s5893_s3 + $0x78] sm:$0xf] %vm3050_vm1, %v3724_v27  ;;  %v3722_v35 = vpack.c.bf16 %v2022_v28, %v2022_v28  ;;  %v2025_v36 = vmax.f32 %v1272_v29, 0.0  ;;  %v1264_v37 = vadd.f32 %v4819_v39, %v1263_v33  ;;  %v2133_v38 = vmax.f32 %v1704_v30, 0.0 }
 0x121   :  { %3189 = vst.msk [vmem:[%s5893_s3 + $0x228] sm:$0xf] %vm3050_vm1, %v3832_v31  ;;  %v3830_v40 = vpack.c.bf16 %v2130_v32, %v2130_v32  ;;  %v4048_v41 = vpop.f32.mrf.mxu0  ;;  %v1696_v42 = vadd.f32 %v4819_v39, %v1695_v34  ;;  %v4156_v43 = vpop.f32.mrf.mxu1 }
 0x122   :  { %3079 = vst.msk [vmem:[%s5893_s3 + $0x70] sm:$0xf] %vm3050_vm1, %v3722_v35  ;;  %v3725_v44 = vpack.c.bf16 %v2025_v36, %v2025_v36  ;;  %v2023_v45 = vmax.f32 %v1264_v37, 0.0  ;;  %v3833_v46 = vpack.c.bf16 %v2133_v38, %v2133_v38  ;;  %v1285_v47 = vadd.f32 %v4048_v41, %v4819_v39 }
 0x123   :  { %3187 = vst.msk [vmem:[%s5893_s3 + $0x220] sm:$0xf] %vm3050_vm1, %v3830_v40  ;;  %v2131_v48 = vmax.f32 %v1696_v42, 0.0  ;;  %v1276_v49 = vpop.f32.mrf.mxu0  ;;  %v1717_v50 = vadd.f32 %v4156_v43, %v4819_v39  ;;  %v1708_v51 = vpop.f32.mrf.mxu1 }
 0x124   :  { %3082 = vst.msk [vmem:[%s5893_s3 + $0x7c] sm:$0xf] %vm3050_vm1, %v3725_v44  ;;  %v3723_v52 = vpack.c.bf16 %v2023_v45, %v2023_v45  ;;  %3190 = vst.msk [vmem:[%s5893_s3 + $0x22c] sm:$0xf] %vm3050_vm1, %v3833_v46  ;;  %v2028_v53 = vmax.f32 %v1285_v47, 0.0  ;;  %v1277_v54 = vadd.f32 %v4819_v39, %v1276_v49  ;;  %v1709_v55 = vadd.f32 %v4819_v39, %v1708_v51 }
 0x125   :  { %v3831_v56 = vpack.c.bf16 %v2131_v48, %v2131_v48  ;;  %v2136_v57 = vmax.f32 %v1717_v50, 0.0  ;;  %v4049_v58 = vpop.f32.mrf.mxu0  ;;  %v4157_v59 = vpop.f32.mrf.mxu1 }
 0x126   :  { %3080 = vst.msk [vmem:[%s5893_s3 + $0x74] sm:$0xf] %vm3050_vm1, %v3723_v52  ;;  %v3728_v60 = vpack.c.bf16 %v2028_v53, %v2028_v53  ;;  %v2026_v61 = vmax.f32 %v1277_v54, 0.0  ;;  %v1288_v62 = vadd.f32 %v4049_v58, %v4819_v39  ;;  %v2134_v63 = vmax.f32 %v1709_v55, 0.0 }
 0x127   :  { %3188 = vst.msk [vmem:[%s5893_s3 + $0x224] sm:$0xf] %vm3050_vm1, %v3831_v56  ;;  %v3836_v0 = vpack.c.bf16 %v2136_v57, %v2136_v57  ;;  %v1279_v1 = vpop.f32.mrf.mxu0  ;;  %v1720_v2 = vadd.f32 %v4157_v59, %v4819_v39  ;;  %v1711_v3 = vpop.f32.mrf.mxu1 }
 0x128   :  { %3085 = vst.msk [vmem:[%s5893_s3 + $0x88] sm:$0xf] %vm3050_vm1, %v3728_v60  ;;  %v3726_v4 = vpack.c.bf16 %v2026_v61, %v2026_v61  ;;  %v2029_v5 = vmax.f32 %v1288_v62, 0.0  ;;  %v3834_v6 = vpack.c.bf16 %v2134_v63, %v2134_v63  ;;  %v1280_v7 = vadd.f32 %v4819_v39, %v1279_v1 }
 0x129   :  { %3193 = vst.msk [vmem:[%s5893_s3 + $0x238] sm:$0xf] %vm3050_vm1, %v3836_v0  ;;  %v2137_v8 = vmax.f32 %v1720_v2, 0.0  ;;  %v4052_v9 = vpop.f32.mrf.mxu0  ;;  %v1712_v10 = vadd.f32 %v4819_v39, %v1711_v3  ;;  %v4160_v11 = vpop.f32.mrf.mxu1 }
 0x12a   :  { %3083 = vst.msk [vmem:[%s5893_s3 + $0x80] sm:$0xf] %vm3050_vm1, %v3726_v4  ;;  %v3729_v12 = vpack.c.bf16 %v2029_v5, %v2029_v5  ;;  %3191 = vst.msk [vmem:[%s5893_s3 + $0x230] sm:$0xf] %vm3050_vm1, %v3834_v6  ;;  %v2027_v13 = vmax.f32 %v1280_v7, 0.0  ;;  %v1301_v14 = vadd.f32 %v4052_v9, %v4819_v39  ;;  %v1733_v15 = vadd.f32 %v4160_v11, %v4819_v39 }
 0x12b   :  { %v3837_v16 = vpack.c.bf16 %v2137_v8, %v2137_v8  ;;  %v2135_v17 = vmax.f32 %v1712_v10, 0.0  ;;  %v1292_v18 = vpop.f32.mrf.mxu0  ;;  %v1724_v19 = vpop.f32.mrf.mxu1 }
 0x12c   :  { %3086 = vst.msk [vmem:[%s5893_s3 + $0x8c] sm:$0xf] %vm3050_vm1, %v3729_v12  ;;  %v3727_v20 = vpack.c.bf16 %v2027_v13, %v2027_v13  ;;  %v2032_v21 = vmax.f32 %v1301_v14, 0.0  ;;  %v1293_v22 = vadd.f32 %v4819_v39, %v1292_v18  ;;  %v2140_v23 = vmax.f32 %v1733_v15, 0.0 }
 0x12d   :  { %3194 = vst.msk [vmem:[%s5893_s3 + $0x23c] sm:$0xf] %vm3050_vm1, %v3837_v16  ;;  %v3835_v24 = vpack.c.bf16 %v2135_v17, %v2135_v17  ;;  %v4053_v25 = vpop.f32.mrf.mxu0  ;;  %v1725_v26 = vadd.f32 %v4819_v39, %v1724_v19  ;;  %v4161_v27 = vpop.f32.mrf.mxu1 }
 0x12e   :  { %3084 = vst.msk [vmem:[%s5893_s3 + $0x84] sm:$0xf] %vm3050_vm1, %v3727_v20  ;;  %v3732_v28 = vpack.c.bf16 %v2032_v21, %v2032_v21  ;;  %v2030_v29 = vmax.f32 %v1293_v22, 0.0  ;;  %v3840_v30 = vpack.c.bf16 %v2140_v23, %v2140_v23  ;;  %v1304_v31 = vadd.f32 %v4053_v25, %v4819_v39 }
 0x12f   :  { %3192 = vst.msk [vmem:[%s5893_s3 + $0x234] sm:$0xf] %vm3050_vm1, %v3835_v24  ;;  %v2138_v32 = vmax.f32 %v1725_v26, 0.0  ;;  %v1295_v33 = vpop.f32.mrf.mxu0  ;;  %v1736_v34 = vadd.f32 %v4161_v27, %v4819_v39  ;;  %v1727_v35 = vpop.f32.mrf.mxu1 }
 0x130   :  { %3089 = vst.msk [vmem:[%s5893_s3 + $0x98] sm:$0xf] %vm3050_vm1, %v3732_v28  ;;  %v3730_v36 = vpack.c.bf16 %v2030_v29, %v2030_v29  ;;  %3197 = vst.msk [vmem:[%s5893_s3 + $0x248] sm:$0xf] %vm3050_vm1, %v3840_v30  ;;  %v2033_v37 = vmax.f32 %v1304_v31, 0.0  ;;  %v1296_v38 = vadd.f32 %v4819_v39, %v1295_v33  ;;  %v1728_v40 = vadd.f32 %v4819_v39, %v1727_v35 }
 0x131   :  { %v3838_v41 = vpack.c.bf16 %v2138_v32, %v2138_v32  ;;  %v2141_v42 = vmax.f32 %v1736_v34, 0.0  ;;  %v4056_v43 = vpop.f32.mrf.mxu0  ;;  %v4164_v44 = vpop.f32.mrf.mxu1 }
 0x132   :  { %3087 = vst.msk [vmem:[%s5893_s3 + $0x90] sm:$0xf] %vm3050_vm1, %v3730_v36  ;;  %v3733_v45 = vpack.c.bf16 %v2033_v37, %v2033_v37  ;;  %v2031_v46 = vmax.f32 %v1296_v38, 0.0  ;;  %v1317_v47 = vadd.f32 %v4056_v43, %v4819_v39  ;;  %v2139_v48 = vmax.f32 %v1728_v40, 0.0 }
 0x133   :  { %3195 = vst.msk [vmem:[%s5893_s3 + $0x240] sm:$0xf] %vm3050_vm1, %v3838_v41  ;;  %v3841_v49 = vpack.c.bf16 %v2141_v42, %v2141_v42  ;;  %v1308_v50 = vpop.f32.mrf.mxu0  ;;  %v1749_v51 = vadd.f32 %v4164_v44, %v4819_v39  ;;  %v1740_v52 = vpop.f32.mrf.mxu1 }
 0x134   :  { %3090 = vst.msk [vmem:[%s5893_s3 + $0x9c] sm:$0xf] %vm3050_vm1, %v3733_v45  ;;  %v3731_v53 = vpack.c.bf16 %v2031_v46, %v2031_v46  ;;  %v2036_v54 = vmax.f32 %v1317_v47, 0.0  ;;  %v3839_v55 = vpack.c.bf16 %v2139_v48, %v2139_v48  ;;  %v1309_v56 = vadd.f32 %v4819_v39, %v1308_v50 }
 0x135   :  { %3198 = vst.msk [vmem:[%s5893_s3 + $0x24c] sm:$0xf] %vm3050_vm1, %v3841_v49  ;;  %v2144_v57 = vmax.f32 %v1749_v51, 0.0  ;;  %v4057_v58 = vpop.f32.mrf.mxu0  ;;  %v1741_v59 = vadd.f32 %v4819_v39, %v1740_v52  ;;  %v4165_v60 = vpop.f32.mrf.mxu1 }
 0x136   :  { %3088 = vst.msk [vmem:[%s5893_s3 + $0x94] sm:$0xf] %vm3050_vm1, %v3731_v53  ;;  %v3736_v61 = vpack.c.bf16 %v2036_v54, %v2036_v54  ;;  %3196 = vst.msk [vmem:[%s5893_s3 + $0x244] sm:$0xf] %vm3050_vm1, %v3839_v55  ;;  %v2034_v62 = vmax.f32 %v1309_v56, 0.0  ;;  %v1320_v63 = vadd.f32 %v4057_v58, %v4819_v39  ;;  %v1752_v0 = vadd.f32 %v4165_v60, %v4819_v39 }
 0x137   :  { %v3844_v1 = vpack.c.bf16 %v2144_v57, %v2144_v57  ;;  %v2142_v2 = vmax.f32 %v1741_v59, 0.0  ;;  %v1311_v3 = vpop.f32.mrf.mxu0  ;;  %v1743_v4 = vpop.f32.mrf.mxu1 }
 0x138   :  { %3093 = vst.msk [vmem:[%s5893_s3 + $0xa8] sm:$0xf] %vm3050_vm1, %v3736_v61  ;;  %v3734_v5 = vpack.c.bf16 %v2034_v62, %v2034_v62  ;;  %v2037_v6 = vmax.f32 %v1320_v63, 0.0  ;;  %v1312_v7 = vadd.f32 %v4819_v39, %v1311_v3  ;;  %v2145_v8 = vmax.f32 %v1752_v0, 0.0 }
 0x139   :  { %3201 = vst.msk [vmem:[%s5893_s3 + $0x258] sm:$0xf] %vm3050_vm1, %v3844_v1  ;;  %v3842_v9 = vpack.c.bf16 %v2142_v2, %v2142_v2  ;;  %v4060_v10 = vpop.f32.mrf.mxu0  ;;  %v1744_v11 = vadd.f32 %v4819_v39, %v1743_v4  ;;  %v4168_v12 = vpop.f32.mrf.mxu1  ;;  %v5326_v4 = vld [vmem:[#allocation4] ss:$0 sm:$0xff] }
 0x13a   :  { %3091 = vst.msk [vmem:[%s5893_s3 + $0xa0] sm:$0xf] %vm3050_vm1, %v3734_v5  ;;  %v3737_v13 = vpack.c.bf16 %v2037_v6, %v2037_v6  ;;  %v2035_v14 = vmax.f32 %v1312_v7, 0.0  ;;  %v3845_v15 = vpack.c.bf16 %v2145_v8, %v2145_v8  ;;  %v1333_v16 = vadd.f32 %v4060_v10, %v4819_v39 }
 0x13b   :  { %3199 = vst.msk [vmem:[%s5893_s3 + $0x250] sm:$0xf] %vm3050_vm1, %v3842_v9  ;;  %v2143_v17 = vmax.f32 %v1744_v11, 0.0  ;;  %v1324_v18 = vpop.f32.mrf.mxu0  ;;  %v1765_v19 = vadd.f32 %v4168_v12, %v4819_v39  ;;  %v1756_v20 = vpop.f32.mrf.mxu1 }
 0x13c   :  { %3094 = vst.msk [vmem:[%s5893_s3 + $0xac] sm:$0xf] %vm3050_vm1, %v3737_v13  ;;  %v3735_v21 = vpack.c.bf16 %v2035_v14, %v2035_v14  ;;  %3202 = vst.msk [vmem:[%s5893_s3 + $0x25c] sm:$0xf] %vm3050_vm1, %v3845_v15  ;;  %v2040_v22 = vmax.f32 %v1333_v16, 0.0  ;;  %v1325_v23 = vadd.f32 %v4819_v39, %v1324_v18  ;;  %v1757_v24 = vadd.f32 %v4819_v39, %v1756_v20 }
 0x13d   :  { %v3843_v25 = vpack.c.bf16 %v2143_v17, %v2143_v17  ;;  %v2148_v26 = vmax.f32 %v1765_v19, 0.0  ;;  %v4061_v27 = vpop.f32.mrf.mxu0  ;;  %v4169_v28 = vpop.f32.mrf.mxu1 }
 0x13e   :  { %3092 = vst.msk [vmem:[%s5893_s3 + $0xa4] sm:$0xf] %vm3050_vm1, %v3735_v21  ;;  %v3740_v29 = vpack.c.bf16 %v2040_v22, %v2040_v22  ;;  %v2038_v30 = vmax.f32 %v1325_v23, 0.0  ;;  %v1336_v31 = vadd.f32 %v4061_v27, %v4819_v39  ;;  %v2146_v32 = vmax.f32 %v1757_v24, 0.0 }
 0x13f   :  { %3200 = vst.msk [vmem:[%s5893_s3 + $0x254] sm:$0xf] %vm3050_vm1, %v3843_v25  ;;  %v3848_v33 = vpack.c.bf16 %v2148_v26, %v2148_v26  ;;  %v1327_v34 = vpop.f32.mrf.mxu0  ;;  %v1768_v35 = vadd.f32 %v4169_v28, %v4819_v39  ;;  %v1759_v36 = vpop.f32.mrf.mxu1 }
 0x140   :  { %3097 = vst.msk [vmem:[%s5893_s3 + $0xb8] sm:$0xf] %vm3050_vm1, %v3740_v29  ;;  %v3738_v37 = vpack.c.bf16 %v2038_v30, %v2038_v30  ;;  %v2041_v38 = vmax.f32 %v1336_v31, 0.0  ;;  %v3846_v40 = vpack.c.bf16 %v2146_v32, %v2146_v32  ;;  %v1328_v41 = vadd.f32 %v4819_v39, %v1327_v34 }
 0x141   :  { %3205 = vst.msk [vmem:[%s5893_s3 + $0x268] sm:$0xf] %vm3050_vm1, %v3848_v33  ;;  %v2149_v42 = vmax.f32 %v1768_v35, 0.0  ;;  %v4064_v43 = vpop.f32.mrf.mxu0  ;;  %v1760_v44 = vadd.f32 %v4819_v39, %v1759_v36  ;;  %v4172_v45 = vpop.f32.mrf.mxu1 }
 0x142   :  { %3095 = vst.msk [vmem:[%s5893_s3 + $0xb0] sm:$0xf] %vm3050_vm1, %v3738_v37  ;;  %v3741_v46 = vpack.c.bf16 %v2041_v38, %v2041_v38  ;;  %3203 = vst.msk [vmem:[%s5893_s3 + $0x260] sm:$0xf] %vm3050_vm1, %v3846_v40  ;;  %v2039_v47 = vmax.f32 %v1328_v41, 0.0  ;;  %v1349_v48 = vadd.f32 %v4064_v43, %v4819_v39  ;;  %v1781_v49 = vadd.f32 %v4172_v45, %v4819_v39 }
 0x143   :  { %v3849_v50 = vpack.c.bf16 %v2149_v42, %v2149_v42  ;;  %v2147_v51 = vmax.f32 %v1760_v44, 0.0  ;;  %v1340_v52 = vpop.f32.mrf.mxu0  ;;  %v1772_v53 = vpop.f32.mrf.mxu1 }
 0x144   :  { %3098 = vst.msk [vmem:[%s5893_s3 + $0xbc] sm:$0xf] %vm3050_vm1, %v3741_v46  ;;  %v3739_v54 = vpack.c.bf16 %v2039_v47, %v2039_v47  ;;  %v2044_v55 = vmax.f32 %v1349_v48, 0.0  ;;  %v1341_v56 = vadd.f32 %v4819_v39, %v1340_v52  ;;  %v2152_v57 = vmax.f32 %v1781_v49, 0.0 }
 0x145   :  { %3206 = vst.msk [vmem:[%s5893_s3 + $0x26c] sm:$0xf] %vm3050_vm1, %v3849_v50  ;;  %v3847_v58 = vpack.c.bf16 %v2147_v51, %v2147_v51  ;;  %v4065_v59 = vpop.f32.mrf.mxu0  ;;  %v1773_v60 = vadd.f32 %v4819_v39, %v1772_v53  ;;  %v4173_v61 = vpop.f32.mrf.mxu1 }
 0x146   :  { %3096 = vst.msk [vmem:[%s5893_s3 + $0xb4] sm:$0xf] %vm3050_vm1, %v3739_v54  ;;  %v3744_v62 = vpack.c.bf16 %v2044_v55, %v2044_v55  ;;  %v2042_v63 = vmax.f32 %v1341_v56, 0.0  ;;  %v3852_v0 = vpack.c.bf16 %v2152_v57, %v2152_v57  ;;  %v1352_v1 = vadd.f32 %v4065_v59, %v4819_v39 }
 0x147   :  { %3204 = vst.msk [vmem:[%s5893_s3 + $0x264] sm:$0xf] %vm3050_vm1, %v3847_v58  ;;  %v2150_v2 = vmax.f32 %v1773_v60, 0.0  ;;  %v1343_v3 = vpop.f32.mrf.mxu0  ;;  %v1784_v5 = vadd.f32 %v5326_v4, %v4173_v61  ;;  %v1775_v6 = vpop.f32.mrf.mxu1 }
 0x148   :  { %3101 = vst.msk [vmem:[%s5893_s3 + $0xc8] sm:$0xf] %vm3050_vm1, %v3744_v62  ;;  %v3742_v7 = vpack.c.bf16 %v2042_v63, %v2042_v63  ;;  %3209 = vst.msk [vmem:[%s5893_s3 + $0x278] sm:$0xf] %vm3050_vm1, %v3852_v0  ;;  %v2045_v39 = vmax.f32 %v1352_v1, 0.0  ;;  %v1344_v8 = vadd.f32 %v5326_v4, %v1343_v3  ;;  %v1776_v9 = vadd.f32 %v5326_v4, %v1775_v6 }
 0x149   :  { %v3850_v10 = vpack.c.bf16 %v2150_v2, %v2150_v2  ;;  %v2153_v11 = vmax.f32 %v1784_v5, 0.0  ;;  %v4068_v12 = vpop.f32.mrf.mxu0  ;;  %v4176_v13 = vpop.f32.mrf.mxu1 }
 0x14a   :  { %3099 = vst.msk [vmem:[%s5893_s3 + $0xc0] sm:$0xf] %vm3050_vm1, %v3742_v7  ;;  %v3745_v14 = vpack.c.bf16 %v2045_v39, %v2045_v39  ;;  %v2043_v15 = vmax.f32 %v1344_v8, 0.0  ;;  %v1365_v16 = vadd.f32 %v5326_v4, %v4068_v12  ;;  %v2151_v17 = vmax.f32 %v1776_v9, 0.0 }
 0x14b   :  { %3207 = vst.msk [vmem:[%s5893_s3 + $0x270] sm:$0xf] %vm3050_vm1, %v3850_v10  ;;  %v3853_v18 = vpack.c.bf16 %v2153_v11, %v2153_v11  ;;  %v1356_v19 = vpop.f32.mrf.mxu0  ;;  %v1797_v20 = vadd.f32 %v5326_v4, %v4176_v13  ;;  %v1788_v21 = vpop.f32.mrf.mxu1 }
 0x14c   :  { %3102 = vst.msk [vmem:[%s5893_s3 + $0xcc] sm:$0xf] %vm3050_vm1, %v3745_v14  ;;  %v3743_v22 = vpack.c.bf16 %v2043_v15, %v2043_v15  ;;  %v2048_v23 = vmax.f32 %v1365_v16, 0.0  ;;  %v3851_v24 = vpack.c.bf16 %v2151_v17, %v2151_v17  ;;  %v1357_v25 = vadd.f32 %v5326_v4, %v1356_v19 }
 0x14d   :  { %3210 = vst.msk [vmem:[%s5893_s3 + $0x27c] sm:$0xf] %vm3050_vm1, %v3853_v18  ;;  %v2156_v26 = vmax.f32 %v1797_v20, 0.0  ;;  %v4069_v27 = vpop.f32.mrf.mxu0  ;;  %v1789_v28 = vadd.f32 %v5326_v4, %v1788_v21  ;;  %v4177_v29 = vpop.f32.mrf.mxu1 }
 0x14e   :  { %3100 = vst.msk [vmem:[%s5893_s3 + $0xc4] sm:$0xf] %vm3050_vm1, %v3743_v22  ;;  %v3748_v30 = vpack.c.bf16 %v2048_v23, %v2048_v23  ;;  %3208 = vst.msk [vmem:[%s5893_s3 + $0x274] sm:$0xf] %vm3050_vm1, %v3851_v24  ;;  %v2046_v31 = vmax.f32 %v1357_v25, 0.0  ;;  %v1368_v32 = vadd.f32 %v5326_v4, %v4069_v27  ;;  %v1800_v33 = vadd.f32 %v5326_v4, %v4177_v29 }
 0x14f   :  { %v3856_v34 = vpack.c.bf16 %v2156_v26, %v2156_v26  ;;  %v2154_v35 = vmax.f32 %v1789_v28, 0.0  ;;  %v1359_v36 = vpop.f32.mrf.mxu0  ;;  %v1791_v37 = vpop.f32.mrf.mxu1 }
 0x150   :  { %3105 = vst.msk [vmem:[%s5893_s3 + $0xd8] sm:$0xf] %vm3050_vm1, %v3748_v30  ;;  %v3746_v38 = vpack.c.bf16 %v2046_v31, %v2046_v31  ;;  %v2049_v40 = vmax.f32 %v1368_v32, 0.0  ;;  %v1360_v41 = vadd.f32 %v5326_v4, %v1359_v36  ;;  %v2157_v42 = vmax.f32 %v1800_v33, 0.0 }
 0x151   :  { %3213 = vst.msk [vmem:[%s5893_s3 + $0x288] sm:$0xf] %vm3050_vm1, %v3856_v34  ;;  %v3854_v43 = vpack.c.bf16 %v2154_v35, %v2154_v35  ;;  %v4072_v44 = vpop.f32.mrf.mxu0  ;;  %v1792_v45 = vadd.f32 %v5326_v4, %v1791_v37  ;;  %v4180_v46 = vpop.f32.mrf.mxu1 }
 0x152   :  { %3103 = vst.msk [vmem:[%s5893_s3 + $0xd0] sm:$0xf] %vm3050_vm1, %v3746_v38  ;;  %v3749_v47 = vpack.c.bf16 %v2049_v40, %v2049_v40  ;;  %v2047_v48 = vmax.f32 %v1360_v41, 0.0  ;;  %v3857_v49 = vpack.c.bf16 %v2157_v42, %v2157_v42  ;;  %v1381_v50 = vadd.f32 %v5326_v4, %v4072_v44 }
 0x153   :  { %3211 = vst.msk [vmem:[%s5893_s3 + $0x280] sm:$0xf] %vm3050_vm1, %v3854_v43  ;;  %v2155_v51 = vmax.f32 %v1792_v45, 0.0  ;;  %v1372_v52 = vpop.f32.mrf.mxu0  ;;  %v1813_v53 = vadd.f32 %v5326_v4, %v4180_v46  ;;  %v1804_v54 = vpop.f32.mrf.mxu1 }
 0x154   :  { %3106 = vst.msk [vmem:[%s5893_s3 + $0xdc] sm:$0xf] %vm3050_vm1, %v3749_v47  ;;  %v3747_v55 = vpack.c.bf16 %v2047_v48, %v2047_v48  ;;  %3214 = vst.msk [vmem:[%s5893_s3 + $0x28c] sm:$0xf] %vm3050_vm1, %v3857_v49  ;;  %v2052_v56 = vmax.f32 %v1381_v50, 0.0  ;;  %v1373_v57 = vadd.f32 %v5326_v4, %v1372_v52  ;;  %v1805_v58 = vadd.f32 %v5326_v4, %v1804_v54 }
 0x155   :  { %v3855_v59 = vpack.c.bf16 %v2155_v51, %v2155_v51  ;;  %v2160_v60 = vmax.f32 %v1813_v53, 0.0  ;;  %v4073_v61 = vpop.f32.mrf.mxu0  ;;  %v4181_v62 = vpop.f32.mrf.mxu1 }
 0x156   :  { %3104 = vst.msk [vmem:[%s5893_s3 + $0xd4] sm:$0xf] %vm3050_vm1, %v3747_v55  ;;  %v3752_v63 = vpack.c.bf16 %v2052_v56, %v2052_v56  ;;  %v2050_v0 = vmax.f32 %v1373_v57, 0.0  ;;  %v1384_v1 = vadd.f32 %v5326_v4, %v4073_v61  ;;  %v2158_v2 = vmax.f32 %v1805_v58, 0.0 }
 0x157   :  { %3212 = vst.msk [vmem:[%s5893_s3 + $0x284] sm:$0xf] %vm3050_vm1, %v3855_v59  ;;  %v3860_v3 = vpack.c.bf16 %v2160_v60, %v2160_v60  ;;  %v1375_v5 = vpop.f32.mrf.mxu0  ;;  %v1816_v6 = vadd.f32 %v5326_v4, %v4181_v62  ;;  %v1807_v7 = vpop.f32.mrf.mxu1 }
 0x158   :  { %3109 = vst.msk [vmem:[%s5893_s3 + $0xe8] sm:$0xf] %vm3050_vm1, %v3752_v63  ;;  %v3750_v39 = vpack.c.bf16 %v2050_v0, %v2050_v0  ;;  %v2053_v8 = vmax.f32 %v1384_v1, 0.0  ;;  %v3858_v9 = vpack.c.bf16 %v2158_v2, %v2158_v2  ;;  %v1376_v10 = vadd.f32 %v5326_v4, %v1375_v5 }
 0x159   :  { %3217 = vst.msk [vmem:[%s5893_s3 + $0x298] sm:$0xf] %vm3050_vm1, %v3860_v3  ;;  %v2161_v11 = vmax.f32 %v1816_v6, 0.0  ;;  %v4076_v12 = vpop.f32.mrf.mxu0  ;;  %v1808_v13 = vadd.f32 %v5326_v4, %v1807_v7  ;;  %v4184_v14 = vpop.f32.mrf.mxu1 }
 0x15a   :  { %3107 = vst.msk [vmem:[%s5893_s3 + $0xe0] sm:$0xf] %vm3050_vm1, %v3750_v39  ;;  %v3753_v15 = vpack.c.bf16 %v2053_v8, %v2053_v8  ;;  %3215 = vst.msk [vmem:[%s5893_s3 + $0x290] sm:$0xf] %vm3050_vm1, %v3858_v9  ;;  %v2051_v16 = vmax.f32 %v1376_v10, 0.0  ;;  %v1397_v17 = vadd.f32 %v5326_v4, %v4076_v12  ;;  %v1829_v18 = vadd.f32 %v5326_v4, %v4184_v14 }
 0x15b   :  { %v3861_v19 = vpack.c.bf16 %v2161_v11, %v2161_v11  ;;  %v2159_v20 = vmax.f32 %v1808_v13, 0.0  ;;  %v1388_v21 = vpop.f32.mrf.mxu0  ;;  %v1820_v22 = vpop.f32.mrf.mxu1 }
 0x15c   :  { %3110 = vst.msk [vmem:[%s5893_s3 + $0xec] sm:$0xf] %vm3050_vm1, %v3753_v15  ;;  %v3751_v23 = vpack.c.bf16 %v2051_v16, %v2051_v16  ;;  %v2056_v24 = vmax.f32 %v1397_v17, 0.0  ;;  %v1389_v25 = vadd.f32 %v5326_v4, %v1388_v21  ;;  %v2164_v26 = vmax.f32 %v1829_v18, 0.0 }
 0x15d   :  { %3218 = vst.msk [vmem:[%s5893_s3 + $0x29c] sm:$0xf] %vm3050_vm1, %v3861_v19  ;;  %v3859_v27 = vpack.c.bf16 %v2159_v20, %v2159_v20  ;;  %v4077_v28 = vpop.f32.mrf.mxu0  ;;  %v1821_v29 = vadd.f32 %v5326_v4, %v1820_v22  ;;  %v4185_v30 = vpop.f32.mrf.mxu1 }
 0x15e   :  { %3108 = vst.msk [vmem:[%s5893_s3 + $0xe4] sm:$0xf] %vm3050_vm1, %v3751_v23  ;;  %v3756_v31 = vpack.c.bf16 %v2056_v24, %v2056_v24  ;;  %v2054_v32 = vmax.f32 %v1389_v25, 0.0  ;;  %v3864_v33 = vpack.c.bf16 %v2164_v26, %v2164_v26  ;;  %v1400_v34 = vadd.f32 %v5326_v4, %v4077_v28 }
 0x15f   :  { %3216 = vst.msk [vmem:[%s5893_s3 + $0x294] sm:$0xf] %vm3050_vm1, %v3859_v27  ;;  %v2162_v35 = vmax.f32 %v1821_v29, 0.0  ;;  %v1391_v36 = vpop.f32.mrf.mxu0  ;;  %v1832_v37 = vadd.f32 %v5326_v4, %v4185_v30  ;;  %v1823_v38 = vpop.f32.mrf.mxu1 }
 0x160   :  { %3113 = vst.msk [vmem:[%s5893_s3 + $0xf8] sm:$0xf] %vm3050_vm1, %v3756_v31  ;;  %v3754_v40 = vpack.c.bf16 %v2054_v32, %v2054_v32  ;;  %3221 = vst.msk [vmem:[%s5893_s3 + $0x2a8] sm:$0xf] %vm3050_vm1, %v3864_v33  ;;  %v2057_v41 = vmax.f32 %v1400_v34, 0.0  ;;  %v1392_v42 = vadd.f32 %v5326_v4, %v1391_v36  ;;  %v1824_v43 = vadd.f32 %v5326_v4, %v1823_v38 }
 0x161   :  { %v3862_v44 = vpack.c.bf16 %v2162_v35, %v2162_v35  ;;  %v2165_v45 = vmax.f32 %v1832_v37, 0.0  ;;  %v4080_v46 = vpop.f32.mrf.mxu0  ;;  %v4188_v47 = vpop.f32.mrf.mxu1 }
 0x162   :  { %3111 = vst.msk [vmem:[%s5893_s3 + $0xf0] sm:$0xf] %vm3050_vm1, %v3754_v40  ;;  %v3757_v48 = vpack.c.bf16 %v2057_v41, %v2057_v41  ;;  %v2055_v49 = vmax.f32 %v1392_v42, 0.0  ;;  %v1413_v50 = vadd.f32 %v5326_v4, %v4080_v46  ;;  %v2163_v51 = vmax.f32 %v1824_v43, 0.0 }
 0x163   :  { %3219 = vst.msk [vmem:[%s5893_s3 + $0x2a0] sm:$0xf] %vm3050_vm1, %v3862_v44  ;;  %v3865_v52 = vpack.c.bf16 %v2165_v45, %v2165_v45  ;;  %v1404_v53 = vpop.f32.mrf.mxu0  ;;  %v1845_v54 = vadd.f32 %v5326_v4, %v4188_v47  ;;  %v1836_v55 = vpop.f32.mrf.mxu1 }
 0x164   :  { %3114 = vst.msk [vmem:[%s5893_s3 + $0xfc] sm:$0xf] %vm3050_vm1, %v3757_v48  ;;  %v3755_v56 = vpack.c.bf16 %v2055_v49, %v2055_v49  ;;  %v2060_v57 = vmax.f32 %v1413_v50, 0.0  ;;  %v3863_v58 = vpack.c.bf16 %v2163_v51, %v2163_v51  ;;  %v1405_v59 = vadd.f32 %v5326_v4, %v1404_v53 }
 0x165   :  { %3222 = vst.msk [vmem:[%s5893_s3 + $0x2ac] sm:$0xf] %vm3050_vm1, %v3865_v52  ;;  %v2168_v60 = vmax.f32 %v1845_v54, 0.0  ;;  %v4081_v61 = vpop.f32.mrf.mxu0  ;;  %v1837_v62 = vadd.f32 %v5326_v4, %v1836_v55  ;;  %v4189_v63 = vpop.f32.mrf.mxu1 }
 0x166   :  { %3112 = vst.msk [vmem:[%s5893_s3 + $0xf4] sm:$0xf] %vm3050_vm1, %v3755_v56  ;;  %v3760_v0 = vpack.c.bf16 %v2060_v57, %v2060_v57  ;;  %3220 = vst.msk [vmem:[%s5893_s3 + $0x2a4] sm:$0xf] %vm3050_vm1, %v3863_v58  ;;  %v2058_v1 = vmax.f32 %v1405_v59, 0.0  ;;  %v1416_v2 = vadd.f32 %v5326_v4, %v4081_v61  ;;  %v1848_v3 = vadd.f32 %v5326_v4, %v4189_v63 }
 0x167   :  { %v3868_v5 = vpack.c.bf16 %v2168_v60, %v2168_v60  ;;  %v2166_v6 = vmax.f32 %v1837_v62, 0.0  ;;  %v1407_v7 = vpop.f32.mrf.mxu0  ;;  %v1839_v39 = vpop.f32.mrf.mxu1 }
 0x168   :  { %3117 = vst.msk [vmem:[%s5893_s3 + $0x108] sm:$0xf] %vm3050_vm1, %v3760_v0  ;;  %v3758_v8 = vpack.c.bf16 %v2058_v1, %v2058_v1  ;;  %v2061_v9 = vmax.f32 %v1416_v2, 0.0  ;;  %v1408_v10 = vadd.f32 %v5326_v4, %v1407_v7  ;;  %v2169_v11 = vmax.f32 %v1848_v3, 0.0 }
 0x169   :  { %3225 = vst.msk [vmem:[%s5893_s3 + $0x2b8] sm:$0xf] %vm3050_vm1, %v3868_v5  ;;  %v3866_v12 = vpack.c.bf16 %v2166_v6, %v2166_v6  ;;  %v4084_v13 = vpop.f32.mrf.mxu0  ;;  %v1840_v14 = vadd.f32 %v5326_v4, %v1839_v39  ;;  %v4192_v15 = vpop.f32.mrf.mxu1 }
 0x16a   :  { %3115 = vst.msk [vmem:[%s5893_s3 + $0x100] sm:$0xf] %vm3050_vm1, %v3758_v8  ;;  %v3761_v16 = vpack.c.bf16 %v2061_v9, %v2061_v9  ;;  %v2059_v17 = vmax.f32 %v1408_v10, 0.0  ;;  %v3869_v18 = vpack.c.bf16 %v2169_v11, %v2169_v11  ;;  %v1429_v19 = vadd.f32 %v5326_v4, %v4084_v13 }
 0x16b   :  { %3223 = vst.msk [vmem:[%s5893_s3 + $0x2b0] sm:$0xf] %vm3050_vm1, %v3866_v12  ;;  %v2167_v20 = vmax.f32 %v1840_v14, 0.0  ;;  %v1420_v21 = vpop.f32.mrf.mxu0  ;;  %v1861_v22 = vadd.f32 %v5326_v4, %v4192_v15  ;;  %v1852_v23 = vpop.f32.mrf.mxu1 }
 0x16c   :  { %3118 = vst.msk [vmem:[%s5893_s3 + $0x10c] sm:$0xf] %vm3050_vm1, %v3761_v16  ;;  %v3759_v24 = vpack.c.bf16 %v2059_v17, %v2059_v17  ;;  %3226 = vst.msk [vmem:[%s5893_s3 + $0x2bc] sm:$0xf] %vm3050_vm1, %v3869_v18  ;;  %v2064_v25 = vmax.f32 %v1429_v19, 0.0  ;;  %v1421_v26 = vadd.f32 %v5326_v4, %v1420_v21  ;;  %v1853_v27 = vadd.f32 %v5326_v4, %v1852_v23 }
 0x16d   :  { %v3867_v28 = vpack.c.bf16 %v2167_v20, %v2167_v20  ;;  %v2172_v29 = vmax.f32 %v1861_v22, 0.0  ;;  %v4085_v30 = vpop.f32.mrf.mxu0  ;;  %v4193_v31 = vpop.f32.mrf.mxu1 }
 0x16e   :  { %3116 = vst.msk [vmem:[%s5893_s3 + $0x104] sm:$0xf] %vm3050_vm1, %v3759_v24  ;;  %v3764_v32 = vpack.c.bf16 %v2064_v25, %v2064_v25  ;;  %v2062_v33 = vmax.f32 %v1421_v26, 0.0  ;;  %v1432_v34 = vadd.f32 %v5326_v4, %v4085_v30  ;;  %v2170_v35 = vmax.f32 %v1853_v27, 0.0 }
 0x16f   :  { %3224 = vst.msk [vmem:[%s5893_s3 + $0x2b4] sm:$0xf] %vm3050_vm1, %v3867_v28  ;;  %v3872_v36 = vpack.c.bf16 %v2172_v29, %v2172_v29  ;;  %v1423_v37 = vpop.f32.mrf.mxu0  ;;  %v1864_v38 = vadd.f32 %v5326_v4, %v4193_v31  ;;  %v1855_v40 = vpop.f32.mrf.mxu1 }
 0x170   :  { %3121 = vst.msk [vmem:[%s5893_s3 + $0x118] sm:$0xf] %vm3050_vm1, %v3764_v32  ;;  %v3762_v41 = vpack.c.bf16 %v2062_v33, %v2062_v33  ;;  %v2065_v42 = vmax.f32 %v1432_v34, 0.0  ;;  %v3870_v43 = vpack.c.bf16 %v2170_v35, %v2170_v35  ;;  %v1424_v44 = vadd.f32 %v5326_v4, %v1423_v37 }
 0x171   :  { %3229 = vst.msk [vmem:[%s5893_s3 + $0x2c8] sm:$0xf] %vm3050_vm1, %v3872_v36  ;;  %v2173_v45 = vmax.f32 %v1864_v38, 0.0  ;;  %v4088_v46 = vpop.f32.mrf.mxu0  ;;  %v1856_v47 = vadd.f32 %v5326_v4, %v1855_v40  ;;  %v4196_v48 = vpop.f32.mrf.mxu1 }
 0x172   :  { %3119 = vst.msk [vmem:[%s5893_s3 + $0x110] sm:$0xf] %vm3050_vm1, %v3762_v41  ;;  %v3765_v49 = vpack.c.bf16 %v2065_v42, %v2065_v42  ;;  %3227 = vst.msk [vmem:[%s5893_s3 + $0x2c0] sm:$0xf] %vm3050_vm1, %v3870_v43  ;;  %v2063_v50 = vmax.f32 %v1424_v44, 0.0  ;;  %v1445_v51 = vadd.f32 %v5326_v4, %v4088_v46  ;;  %v1877_v52 = vadd.f32 %v5326_v4, %v4196_v48 }
 0x173   :  { %v3873_v53 = vpack.c.bf16 %v2173_v45, %v2173_v45  ;;  %v2171_v54 = vmax.f32 %v1856_v47, 0.0  ;;  %v1436_v55 = vpop.f32.mrf.mxu0  ;;  %v1868_v56 = vpop.f32.mrf.mxu1 }
 0x174   :  { %3122 = vst.msk [vmem:[%s5893_s3 + $0x11c] sm:$0xf] %vm3050_vm1, %v3765_v49  ;;  %v3763_v57 = vpack.c.bf16 %v2063_v50, %v2063_v50  ;;  %v2068_v58 = vmax.f32 %v1445_v51, 0.0  ;;  %v1437_v59 = vadd.f32 %v5326_v4, %v1436_v55  ;;  %v2176_v60 = vmax.f32 %v1877_v52, 0.0 }
 0x175   :  { %3230 = vst.msk [vmem:[%s5893_s3 + $0x2cc] sm:$0xf] %vm3050_vm1, %v3873_v53  ;;  %v3871_v61 = vpack.c.bf16 %v2171_v54, %v2171_v54  ;;  %v4089_v62 = vpop.f32.mrf.mxu0  ;;  %v1869_v63 = vadd.f32 %v5326_v4, %v1868_v56  ;;  %v4197_v0 = vpop.f32.mrf.mxu1 }
 0x176   :  { %3120 = vst.msk [vmem:[%s5893_s3 + $0x114] sm:$0xf] %vm3050_vm1, %v3763_v57  ;;  %v3768_v1 = vpack.c.bf16 %v2068_v58, %v2068_v58  ;;  %v2066_v2 = vmax.f32 %v1437_v59, 0.0  ;;  %v3876_v3 = vpack.c.bf16 %v2176_v60, %v2176_v60  ;;  %v1448_v5 = vadd.f32 %v5326_v4, %v4089_v62 }
 0x177   :  { %3228 = vst.msk [vmem:[%s5893_s3 + $0x2c4] sm:$0xf] %vm3050_vm1, %v3871_v61  ;;  %v2174_v6 = vmax.f32 %v1869_v63, 0.0  ;;  %v1439_v7 = vpop.f32.mrf.mxu0  ;;  %v1880_v39 = vadd.f32 %v5326_v4, %v4197_v0  ;;  %v1871_v8 = vpop.f32.mrf.mxu1 }
 0x178   :  { %3125 = vst.msk [vmem:[%s5893_s3 + $0x128] sm:$0xf] %vm3050_vm1, %v3768_v1  ;;  %v3766_v9 = vpack.c.bf16 %v2066_v2, %v2066_v2  ;;  %3233 = vst.msk [vmem:[%s5893_s3 + $0x2d8] sm:$0xf] %vm3050_vm1, %v3876_v3  ;;  %v2069_v10 = vmax.f32 %v1448_v5, 0.0  ;;  %v1440_v11 = vadd.f32 %v5326_v4, %v1439_v7  ;;  %v1872_v12 = vadd.f32 %v5326_v4, %v1871_v8 }
 0x179   :  { %v3874_v13 = vpack.c.bf16 %v2174_v6, %v2174_v6  ;;  %v2177_v14 = vmax.f32 %v1880_v39, 0.0  ;;  %v4092_v15 = vpop.f32.mrf.mxu0  ;;  %v4200_v16 = vpop.f32.mrf.mxu1 }
 0x17a   :  { %3123 = vst.msk [vmem:[%s5893_s3 + $0x120] sm:$0xf] %vm3050_vm1, %v3766_v9  ;;  %v3769_v17 = vpack.c.bf16 %v2069_v10, %v2069_v10  ;;  %v2067_v18 = vmax.f32 %v1440_v11, 0.0  ;;  %v1461_v19 = vadd.f32 %v5326_v4, %v4092_v15  ;;  %v2175_v20 = vmax.f32 %v1872_v12, 0.0 }
 0x17b   :  { %3231 = vst.msk [vmem:[%s5893_s3 + $0x2d0] sm:$0xf] %vm3050_vm1, %v3874_v13  ;;  %v3877_v21 = vpack.c.bf16 %v2177_v14, %v2177_v14  ;;  %v1452_v22 = vpop.f32.mrf.mxu0  ;;  %v1893_v23 = vadd.f32 %v5326_v4, %v4200_v16  ;;  %v1884_v24 = vpop.f32.mrf.mxu1 }
 0x17c   :  { %3126 = vst.msk [vmem:[%s5893_s3 + $0x12c] sm:$0xf] %vm3050_vm1, %v3769_v17  ;;  %v3767_v25 = vpack.c.bf16 %v2067_v18, %v2067_v18  ;;  %v2072_v26 = vmax.f32 %v1461_v19, 0.0  ;;  %v3875_v27 = vpack.c.bf16 %v2175_v20, %v2175_v20  ;;  %v1453_v28 = vadd.f32 %v5326_v4, %v1452_v22 }
 0x17d   :  { %3234 = vst.msk [vmem:[%s5893_s3 + $0x2dc] sm:$0xf] %vm3050_vm1, %v3877_v21  ;;  %v2180_v29 = vmax.f32 %v1893_v23, 0.0  ;;  %v4093_v30 = vpop.f32.mrf.mxu0  ;;  %v1885_v31 = vadd.f32 %v5326_v4, %v1884_v24  ;;  %v4201_v32 = vpop.f32.mrf.mxu1 }
 0x17e   :  { %3124 = vst.msk [vmem:[%s5893_s3 + $0x124] sm:$0xf] %vm3050_vm1, %v3767_v25  ;;  %v3772_v33 = vpack.c.bf16 %v2072_v26, %v2072_v26  ;;  %3232 = vst.msk [vmem:[%s5893_s3 + $0x2d4] sm:$0xf] %vm3050_vm1, %v3875_v27  ;;  %v2070_v34 = vmax.f32 %v1453_v28, 0.0  ;;  %v1464_v35 = vadd.f32 %v5326_v4, %v4093_v30  ;;  %v1896_v36 = vadd.f32 %v5326_v4, %v4201_v32 }
 0x17f   :  { %v3880_v37 = vpack.c.bf16 %v2180_v29, %v2180_v29  ;;  %v2178_v38 = vmax.f32 %v1885_v31, 0.0  ;;  %v1455_v40 = vpop.f32.mrf.mxu0  ;;  %v1887_v41 = vpop.f32.mrf.mxu1 }
 0x180   :  { %3129 = vst.msk [vmem:[%s5893_s3 + $0x138] sm:$0xf] %vm3050_vm1, %v3772_v33  ;;  %v3770_v42 = vpack.c.bf16 %v2070_v34, %v2070_v34  ;;  %v2073_v43 = vmax.f32 %v1464_v35, 0.0  ;;  %v1456_v44 = vadd.f32 %v5326_v4, %v1455_v40  ;;  %v2181_v45 = vmax.f32 %v1896_v36, 0.0 }
 0x181   :  { %3237 = vst.msk [vmem:[%s5893_s3 + $0x2e8] sm:$0xf] %vm3050_vm1, %v3880_v37  ;;  %v3878_v46 = vpack.c.bf16 %v2178_v38, %v2178_v38  ;;  %v4096_v47 = vpop.f32.mrf.mxu0  ;;  %v1888_v48 = vadd.f32 %v5326_v4, %v1887_v41  ;;  %v4204_v49 = vpop.f32.mrf.mxu1 }
 0x182   :  { %3127 = vst.msk [vmem:[%s5893_s3 + $0x130] sm:$0xf] %vm3050_vm1, %v3770_v42  ;;  %v3773_v50 = vpack.c.bf16 %v2073_v43, %v2073_v43  ;;  %v2071_v51 = vmax.f32 %v1456_v44, 0.0  ;;  %v3881_v52 = vpack.c.bf16 %v2181_v45, %v2181_v45  ;;  %v1477_v53 = vadd.f32 %v5326_v4, %v4096_v47 }
 0x183   :  { %3235 = vst.msk [vmem:[%s5893_s3 + $0x2e0] sm:$0xf] %vm3050_vm1, %v3878_v46  ;;  %v2179_v54 = vmax.f32 %v1888_v48, 0.0  ;;  %v1468_v55 = vpop.f32.mrf.mxu0  ;;  %v1909_v56 = vadd.f32 %v5326_v4, %v4204_v49  ;;  %v1900_v57 = vpop.f32.mrf.mxu1 }
 0x184   :  { %3130 = vst.msk [vmem:[%s5893_s3 + $0x13c] sm:$0xf] %vm3050_vm1, %v3773_v50  ;;  %v3771_v58 = vpack.c.bf16 %v2071_v51, %v2071_v51  ;;  %3238 = vst.msk [vmem:[%s5893_s3 + $0x2ec] sm:$0xf] %vm3050_vm1, %v3881_v52  ;;  %v2076_v59 = vmax.f32 %v1477_v53, 0.0  ;;  %v1469_v60 = vadd.f32 %v5326_v4, %v1468_v55  ;;  %v1901_v61 = vadd.f32 %v5326_v4, %v1900_v57 }
 0x185   :  { %v3879_v62 = vpack.c.bf16 %v2179_v54, %v2179_v54  ;;  %v2184_v63 = vmax.f32 %v1909_v56, 0.0  ;;  %v4097_v0 = vpop.f32.mrf.mxu0  ;;  %v4205_v1 = vpop.f32.mrf.mxu1 }
 0x186   :  { %3128 = vst.msk [vmem:[%s5893_s3 + $0x134] sm:$0xf] %vm3050_vm1, %v3771_v58  ;;  %v3776_v2 = vpack.c.bf16 %v2076_v59, %v2076_v59  ;;  %v2074_v3 = vmax.f32 %v1469_v60, 0.0  ;;  %v1480_v5 = vadd.f32 %v5326_v4, %v4097_v0  ;;  %v2182_v6 = vmax.f32 %v1901_v61, 0.0 }
 0x187   :  { %3236 = vst.msk [vmem:[%s5893_s3 + $0x2e4] sm:$0xf] %vm3050_vm1, %v3879_v62  ;;  %v3884_v7 = vpack.c.bf16 %v2184_v63, %v2184_v63  ;;  %v1471_v39 = vpop.f32.mrf.mxu0  ;;  %v1912_v8 = vadd.f32 %v5326_v4, %v4205_v1  ;;  %v1903_v9 = vpop.f32.mrf.mxu1 }
 0x188   :  { %3133 = vst.msk [vmem:[%s5893_s3 + $0x148] sm:$0xf] %vm3050_vm1, %v3776_v2  ;;  %v3774_v10 = vpack.c.bf16 %v2074_v3, %v2074_v3  ;;  %v2077_v11 = vmax.f32 %v1480_v5, 0.0  ;;  %v3882_v12 = vpack.c.bf16 %v2182_v6, %v2182_v6  ;;  %v1472_v13 = vadd.f32 %v5326_v4, %v1471_v39 }
 0x189   :  { %3241 = vst.msk [vmem:[%s5893_s3 + $0x2f8] sm:$0xf] %vm3050_vm1, %v3884_v7  ;;  %v2185_v14 = vmax.f32 %v1912_v8, 0.0  ;;  %v4100_v15 = vpop.f32.mrf.mxu0  ;;  %v1904_v16 = vadd.f32 %v5326_v4, %v1903_v9  ;;  %v4208_v17 = vpop.f32.mrf.mxu1 }
 0x18a   :  { %3131 = vst.msk [vmem:[%s5893_s3 + $0x140] sm:$0xf] %vm3050_vm1, %v3774_v10  ;;  %v3777_v18 = vpack.c.bf16 %v2077_v11, %v2077_v11  ;;  %3239 = vst.msk [vmem:[%s5893_s3 + $0x2f0] sm:$0xf] %vm3050_vm1, %v3882_v12  ;;  %v2075_v19 = vmax.f32 %v1472_v13, 0.0  ;;  %v1493_v20 = vadd.f32 %v5326_v4, %v4100_v15  ;;  %v1925_v21 = vadd.f32 %v5326_v4, %v4208_v17 }
 0x18b   :  { %v3885_v22 = vpack.c.bf16 %v2185_v14, %v2185_v14  ;;  %v2183_v23 = vmax.f32 %v1904_v16, 0.0  ;;  %v1484_v24 = vpop.f32.mrf.mxu0  ;;  %v1916_v25 = vpop.f32.mrf.mxu1 }
 0x18c   :  { %3134 = vst.msk [vmem:[%s5893_s3 + $0x14c] sm:$0xf] %vm3050_vm1, %v3777_v18  ;;  %v3775_v26 = vpack.c.bf16 %v2075_v19, %v2075_v19  ;;  %v2080_v27 = vmax.f32 %v1493_v20, 0.0  ;;  %v1485_v28 = vadd.f32 %v5326_v4, %v1484_v24  ;;  %v2188_v29 = vmax.f32 %v1925_v21, 0.0 }
 0x18d   :  { %3242 = vst.msk [vmem:[%s5893_s3 + $0x2fc] sm:$0xf] %vm3050_vm1, %v3885_v22  ;;  %v3883_v30 = vpack.c.bf16 %v2183_v23, %v2183_v23  ;;  %v4101_v31 = vpop.f32.mrf.mxu0  ;;  %v1917_v32 = vadd.f32 %v5326_v4, %v1916_v25  ;;  %v4209_v33 = vpop.f32.mrf.mxu1 }
 0x18e   :  { %3132 = vst.msk [vmem:[%s5893_s3 + $0x144] sm:$0xf] %vm3050_vm1, %v3775_v26  ;;  %v3780_v34 = vpack.c.bf16 %v2080_v27, %v2080_v27  ;;  %v2078_v35 = vmax.f32 %v1485_v28, 0.0  ;;  %v3888_v36 = vpack.c.bf16 %v2188_v29, %v2188_v29  ;;  %v1496_v37 = vadd.f32 %v5326_v4, %v4101_v31 }
 0x18f   :  { %3240 = vst.msk [vmem:[%s5893_s3 + $0x2f4] sm:$0xf] %vm3050_vm1, %v3883_v30  ;;  %v2186_v38 = vmax.f32 %v1917_v32, 0.0  ;;  %v1487_v40 = vpop.f32.mrf.mxu0  ;;  %v1928_v41 = vadd.f32 %v5326_v4, %v4209_v33  ;;  %v1919_v42 = vpop.f32.mrf.mxu1 }
 0x190   :  { %3137 = vst.msk [vmem:[%s5893_s3 + $0x158] sm:$0xf] %vm3050_vm1, %v3780_v34  ;;  %v3778_v43 = vpack.c.bf16 %v2078_v35, %v2078_v35  ;;  %3245 = vst.msk [vmem:[%s5893_s3 + $0x308] sm:$0xf] %vm3050_vm1, %v3888_v36  ;;  %v2081_v44 = vmax.f32 %v1496_v37, 0.0  ;;  %v1488_v45 = vadd.f32 %v5326_v4, %v1487_v40  ;;  %v1920_v46 = vadd.f32 %v5326_v4, %v1919_v42 }
 0x191   :  { %v3886_v47 = vpack.c.bf16 %v2186_v38, %v2186_v38  ;;  %v2189_v48 = vmax.f32 %v1928_v41, 0.0  ;;  %v4104_v49 = vpop.f32.mrf.mxu0  ;;  %v4212_v50 = vpop.f32.mrf.mxu1 }
 0x192   :  { %3135 = vst.msk [vmem:[%s5893_s3 + $0x150] sm:$0xf] %vm3050_vm1, %v3778_v43  ;;  %v3781_v51 = vpack.c.bf16 %v2081_v44, %v2081_v44  ;;  %v2079_v52 = vmax.f32 %v1488_v45, 0.0  ;;  %v1509_v53 = vadd.f32 %v5326_v4, %v4104_v49  ;;  %v2187_v54 = vmax.f32 %v1920_v46, 0.0 }
 0x193   :  { %3243 = vst.msk [vmem:[%s5893_s3 + $0x300] sm:$0xf] %vm3050_vm1, %v3886_v47  ;;  %v3889_v55 = vpack.c.bf16 %v2189_v48, %v2189_v48  ;;  %v1500_v56 = vpop.f32.mrf.mxu0  ;;  %v1941_v57 = vadd.f32 %v5326_v4, %v4212_v50  ;;  %v1932_v58 = vpop.f32.mrf.mxu1 }
 0x194   :  { %3138 = vst.msk [vmem:[%s5893_s3 + $0x15c] sm:$0xf] %vm3050_vm1, %v3781_v51  ;;  %v3779_v59 = vpack.c.bf16 %v2079_v52, %v2079_v52  ;;  %v2084_v60 = vmax.f32 %v1509_v53, 0.0  ;;  %v3887_v61 = vpack.c.bf16 %v2187_v54, %v2187_v54  ;;  %v1501_v62 = vadd.f32 %v5326_v4, %v1500_v56 }
 0x195   :  { %3246 = vst.msk [vmem:[%s5893_s3 + $0x30c] sm:$0xf] %vm3050_vm1, %v3889_v55  ;;  %v2192_v63 = vmax.f32 %v1941_v57, 0.0  ;;  %v4105_v0 = vpop.f32.mrf.mxu0  ;;  %v1933_v1 = vadd.f32 %v5326_v4, %v1932_v58  ;;  %v4213_v2 = vpop.f32.mrf.mxu1 }
 0x196   :  { %3136 = vst.msk [vmem:[%s5893_s3 + $0x154] sm:$0xf] %vm3050_vm1, %v3779_v59  ;;  %v3784_v3 = vpack.c.bf16 %v2084_v60, %v2084_v60  ;;  %3244 = vst.msk [vmem:[%s5893_s3 + $0x304] sm:$0xf] %vm3050_vm1, %v3887_v61  ;;  %v2082_v5 = vmax.f32 %v1501_v62, 0.0  ;;  %v1512_v6 = vadd.f32 %v5326_v4, %v4105_v0  ;;  %v1944_v7 = vadd.f32 %v5326_v4, %v4213_v2 }
 0x197   :  { %v3892_v39 = vpack.c.bf16 %v2192_v63, %v2192_v63  ;;  %v2190_v8 = vmax.f32 %v1933_v1, 0.0  ;;  %v1503_v9 = vpop.f32.mrf.mxu0  ;;  %v1935_v10 = vpop.f32.mrf.mxu1 }
 0x198   :  { %3141 = vst.msk [vmem:[%s5893_s3 + $0x168] sm:$0xf] %vm3050_vm1, %v3784_v3  ;;  %v3782_v11 = vpack.c.bf16 %v2082_v5, %v2082_v5  ;;  %v2085_v12 = vmax.f32 %v1512_v6, 0.0  ;;  %v1504_v13 = vadd.f32 %v5326_v4, %v1503_v9  ;;  %v2193_v14 = vmax.f32 %v1944_v7, 0.0 }
 0x199   :  { %3249 = vst.msk [vmem:[%s5893_s3 + $0x318] sm:$0xf] %vm3050_vm1, %v3892_v39  ;;  %v3890_v15 = vpack.c.bf16 %v2190_v8, %v2190_v8  ;;  %v4108_v16 = vpop.f32.mrf.mxu0  ;;  %v1936_v17 = vadd.f32 %v5326_v4, %v1935_v10  ;;  %v4216_v18 = vpop.f32.mrf.mxu1 }
 0x19a   :  { %3139 = vst.msk [vmem:[%s5893_s3 + $0x160] sm:$0xf] %vm3050_vm1, %v3782_v11  ;;  %v3785_v19 = vpack.c.bf16 %v2085_v12, %v2085_v12  ;;  %v2083_v20 = vmax.f32 %v1504_v13, 0.0  ;;  %v3893_v21 = vpack.c.bf16 %v2193_v14, %v2193_v14  ;;  %v1525_v22 = vadd.f32 %v5326_v4, %v4108_v16 }
 0x19b   :  { %3247 = vst.msk [vmem:[%s5893_s3 + $0x310] sm:$0xf] %vm3050_vm1, %v3890_v15  ;;  %v2191_v23 = vmax.f32 %v1936_v17, 0.0  ;;  %v1516_v24 = vpop.f32.mrf.mxu0  ;;  %v1957_v25 = vadd.f32 %v5326_v4, %v4216_v18  ;;  %v1948_v26 = vpop.f32.mrf.mxu1 }
 0x19c   :  { %3142 = vst.msk [vmem:[%s5893_s3 + $0x16c] sm:$0xf] %vm3050_vm1, %v3785_v19  ;;  %v3783_v27 = vpack.c.bf16 %v2083_v20, %v2083_v20  ;;  %3250 = vst.msk [vmem:[%s5893_s3 + $0x31c] sm:$0xf] %vm3050_vm1, %v3893_v21  ;;  %v2088_v28 = vmax.f32 %v1525_v22, 0.0  ;;  %v1517_v29 = vadd.f32 %v5326_v4, %v1516_v24  ;;  %v1949_v30 = vadd.f32 %v5326_v4, %v1948_v26 }
 0x19d   :  { %v3891_v31 = vpack.c.bf16 %v2191_v23, %v2191_v23  ;;  %v2196_v32 = vmax.f32 %v1957_v25, 0.0  ;;  %v4109_v33 = vpop.f32.mrf.mxu0  ;;  %v4217_v34 = vpop.f32.mrf.mxu1 }
 0x19e   :  { %3140 = vst.msk [vmem:[%s5893_s3 + $0x164] sm:$0xf] %vm3050_vm1, %v3783_v27  ;;  %v3788_v35 = vpack.c.bf16 %v2088_v28, %v2088_v28  ;;  %v2086_v36 = vmax.f32 %v1517_v29, 0.0  ;;  %v1528_v37 = vadd.f32 %v5326_v4, %v4109_v33  ;;  %v2194_v38 = vmax.f32 %v1949_v30, 0.0 }
 0x19f   :  { %3248 = vst.msk [vmem:[%s5893_s3 + $0x314] sm:$0xf] %vm3050_vm1, %v3891_v31  ;;  %v3896_v40 = vpack.c.bf16 %v2196_v32, %v2196_v32  ;;  %v1519_v41 = vpop.f32.mrf.mxu0  ;;  %v1960_v42 = vadd.f32 %v5326_v4, %v4217_v34  ;;  %v1951_v43 = vpop.f32.mrf.mxu1 }
 0x1a0   :  { %3145 = vst.msk [vmem:[%s5893_s3 + $0x178] sm:$0xf] %vm3050_vm1, %v3788_v35  ;;  %v3786_v44 = vpack.c.bf16 %v2086_v36, %v2086_v36  ;;  %v2089_v45 = vmax.f32 %v1528_v37, 0.0  ;;  %v3894_v46 = vpack.c.bf16 %v2194_v38, %v2194_v38  ;;  %v1520_v47 = vadd.f32 %v5326_v4, %v1519_v41  ;;  %v4340_v38 = vld [vmem:[#allocation4] ss:$0 sm:$0xff] }
 0x1a1   :  { %3253 = vst.msk [vmem:[%s5893_s3 + $0x328] sm:$0xf] %vm3050_vm1, %v3896_v40  ;;  %v2197_v48 = vmax.f32 %v1960_v42, 0.0  ;;  %v4112_v49 = vpop.f32.mrf.mxu0  ;;  %v1952_v50 = vadd.f32 %v5326_v4, %v1951_v43  ;;  %v4220_v51 = vpop.f32.mrf.mxu1 }
 0x1a2   :  { %3143 = vst.msk [vmem:[%s5893_s3 + $0x170] sm:$0xf] %vm3050_vm1, %v3786_v44  ;;  %v3789_v52 = vpack.c.bf16 %v2089_v45, %v2089_v45  ;;  %3251 = vst.msk [vmem:[%s5893_s3 + $0x320] sm:$0xf] %vm3050_vm1, %v3894_v46  ;;  %v2087_v53 = vmax.f32 %v1520_v47, 0.0  ;;  %v1541_v54 = vadd.f32 %v5326_v4, %v4112_v49  ;;  %v1973_v55 = vadd.f32 %v5326_v4, %v4220_v51 }
 0x1a3   :  { %v3897_v56 = vpack.c.bf16 %v2197_v48, %v2197_v48  ;;  %v2195_v57 = vmax.f32 %v1952_v50, 0.0  ;;  %v1532_v58 = vpop.f32.mrf.mxu0  ;;  %v1964_v59 = vpop.f32.mrf.mxu1 }
 0x1a4   :  { %3146 = vst.msk [vmem:[%s5893_s3 + $0x17c] sm:$0xf] %vm3050_vm1, %v3789_v52  ;;  %v3787_v60 = vpack.c.bf16 %v2087_v53, %v2087_v53  ;;  %v2092_v61 = vmax.f32 %v1541_v54, 0.0  ;;  %v1533_v62 = vadd.f32 %v5326_v4, %v1532_v58  ;;  %v2200_v63 = vmax.f32 %v1973_v55, 0.0 }
 0x1a5   :  { %3254 = vst.msk [vmem:[%s5893_s3 + $0x32c] sm:$0xf] %vm3050_vm1, %v3897_v56  ;;  %v3895_v0 = vpack.c.bf16 %v2195_v57, %v2195_v57  ;;  %v4113_v1 = vpop.f32.mrf.mxu0  ;;  %v1965_v2 = vadd.f32 %v5326_v4, %v1964_v59  ;;  %v4221_v3 = vpop.f32.mrf.mxu1 }
 0x1a6   :  { %3144 = vst.msk [vmem:[%s5893_s3 + $0x174] sm:$0xf] %vm3050_vm1, %v3787_v60  ;;  %v3792_v5 = vpack.c.bf16 %v2092_v61, %v2092_v61  ;;  %v2090_v6 = vmax.f32 %v1533_v62, 0.0  ;;  %v3900_v7 = vpack.c.bf16 %v2200_v63, %v2200_v63  ;;  %v1544_v39 = vadd.f32 %v5326_v4, %v4113_v1 }
 0x1a7   :  { %3252 = vst.msk [vmem:[%s5893_s3 + $0x324] sm:$0xf] %vm3050_vm1, %v3895_v0  ;;  %v2198_v8 = vmax.f32 %v1965_v2, 0.0  ;;  %v1535_v9 = vpop.f32.mrf.mxu0  ;;  %v1976_v10 = vadd.f32 %v5326_v4, %v4221_v3  ;;  %v1967_v11 = vpop.f32.mrf.mxu1 }
 0x1a8   :  { %3149 = vst.msk [vmem:[%s5893_s3 + $0x188] sm:$0xf] %vm3050_vm1, %v3792_v5  ;;  %v3790_v12 = vpack.c.bf16 %v2090_v6, %v2090_v6  ;;  %3257 = vst.msk [vmem:[%s5893_s3 + $0x338] sm:$0xf] %vm3050_vm1, %v3900_v7  ;;  %v2093_v13 = vmax.f32 %v1544_v39, 0.0  ;;  %v1536_v14 = vadd.f32 %v5326_v4, %v1535_v9  ;;  %v1968_v15 = vadd.f32 %v5326_v4, %v1967_v11 }
 0x1a9   :  { %v3898_v16 = vpack.c.bf16 %v2198_v8, %v2198_v8  ;;  %v2201_v17 = vmax.f32 %v1976_v10, 0.0  ;;  %v4116_v18 = vpop.f32.mrf.mxu0  ;;  %v4224_v19 = vpop.f32.mrf.mxu1 }
 0x1aa   :  { %3147 = vst.msk [vmem:[%s5893_s3 + $0x180] sm:$0xf] %vm3050_vm1, %v3790_v12  ;;  %v3793_v20 = vpack.c.bf16 %v2093_v13, %v2093_v13  ;;  %v2091_v21 = vmax.f32 %v1536_v14, 0.0  ;;  %v1557_v22 = vadd.f32 %v5326_v4, %v4116_v18  ;;  %v2199_v23 = vmax.f32 %v1968_v15, 0.0 }
 0x1ab   :  { %3255 = vst.msk [vmem:[%s5893_s3 + $0x330] sm:$0xf] %vm3050_vm1, %v3898_v16  ;;  %v3901_v24 = vpack.c.bf16 %v2201_v17, %v2201_v17  ;;  %v1548_v25 = vpop.f32.mrf.mxu0  ;;  %v1989_v26 = vadd.f32 %v5326_v4, %v4224_v19  ;;  %v1980_v27 = vpop.f32.mrf.mxu1 }
 0x1ac   :  { %3150 = vst.msk [vmem:[%s5893_s3 + $0x18c] sm:$0xf] %vm3050_vm1, %v3793_v20  ;;  %v3791_v28 = vpack.c.bf16 %v2091_v21, %v2091_v21  ;;  %v2096_v29 = vmax.f32 %v1557_v22, 0.0  ;;  %v3899_v30 = vpack.c.bf16 %v2199_v23, %v2199_v23  ;;  %v1549_v31 = vadd.f32 %v5326_v4, %v1548_v25 }
 0x1ad   :  { %3258 = vst.msk [vmem:[%s5893_s3 + $0x33c] sm:$0xf] %vm3050_vm1, %v3901_v24  ;;  %v2204_v32 = vmax.f32 %v1989_v26, 0.0  ;;  %v4117_v33 = vpop.f32.mrf.mxu0  ;;  %v1981_v34 = vadd.f32 %v5326_v4, %v1980_v27  ;;  %v4225_v35 = vpop.f32.mrf.mxu1 }
 0x1ae   :  { %3148 = vst.msk [vmem:[%s5893_s3 + $0x184] sm:$0xf] %vm3050_vm1, %v3791_v28  ;;  %v3796_v36 = vpack.c.bf16 %v2096_v29, %v2096_v29  ;;  %3256 = vst.msk [vmem:[%s5893_s3 + $0x334] sm:$0xf] %vm3050_vm1, %v3899_v30  ;;  %v2094_v37 = vmax.f32 %v1549_v31, 0.0  ;;  %v1560_v40 = vadd.f32 %v4340_v38, %v4117_v33 }
 0x1af   :  { %v3904_v41 = vpack.c.bf16 %v2204_v32, %v2204_v32  ;;  %v2202_v42 = vmax.f32 %v1981_v34, 0.0  ;;  %v1551_v43 = vpop.f32.mrf.mxu0  ;;  %v1983_v4 = vpop.f32.mrf.mxu1 }
 0x1b0   :  { %3153 = vst.msk [vmem:[%s5893_s3 + $0x198] sm:$0xf] %vm3050_vm1, %v3796_v36  ;;  %v3794_v44 = vpack.c.bf16 %v2094_v37, %v2094_v37  ;;  %v2097_v45 = vmax.f32 %v1560_v40, 0.0  ;;  %v1552_v46 = vadd.f32 %v4340_v38, %v1551_v43  ;;  %v1984_v47 = vadd.f32 %v4340_v38, %v1983_v4 }
 0x1b1   :  { %3262 = vst.msk [vmem:[%s5893_s3 + $0x348] sm:$0x1] %vm3261_vm2, %v3904_v41  ;;  %v3902_v48 = vpack.c.bf16 %v2202_v42, %v2202_v42  ;;  %v4120_v49 = vpop.f32.mrf.mxu0 }
 0x1b2   :  { %3151 = vst.msk [vmem:[%s5893_s3 + $0x190] sm:$0xf] %vm3050_vm1, %v3794_v44  ;;  %v3797_v50 = vpack.c.bf16 %v2097_v45, %v2097_v45  ;;  %v2095_v51 = vmax.f32 %v1552_v46, 0.0  ;;  %v1573_v52 = vadd.f32 %v4340_v38, %v4120_v49  ;;  %v2203_v53 = vmax.f32 %v1984_v47, 0.0 }
 0x1b3   :  { %3259 = vst.msk [vmem:[%s5893_s3 + $0x340] sm:$0xf] %vm3050_vm1, %v3902_v48  ;;  %v1564_v54 = vpop.f32.mrf.mxu0 }
 0x1b4   :  { %3154 = vst.msk [vmem:[%s5893_s3 + $0x19c] sm:$0xf] %vm3050_vm1, %v3797_v50  ;;  %v3795_v55 = vpack.c.bf16 %v2095_v51, %v2095_v51  ;;  %v2100_v56 = vmax.f32 %v1573_v52, 0.0  ;;  %v3903_v57 = vpack.c.bf16 %v2203_v53, %v2203_v53  ;;  %v1565_v58 = vadd.f32 %v4340_v38, %v1564_v54 }
 0x1b5   :  { %v4121_v59 = vpop.f32.mrf.mxu0 }
 0x1b6   :  { %3152 = vst.msk [vmem:[%s5893_s3 + $0x194] sm:$0xf] %vm3050_vm1, %v3795_v55  ;;  %v3800_v60 = vpack.c.bf16 %v2100_v56, %v2100_v56  ;;  %3260 = vst.msk [vmem:[%s5893_s3 + $0x344] sm:$0xf] %vm3050_vm1, %v3903_v57  ;;  %v2098_v61 = vmax.f32 %v1565_v58, 0.0  ;;  %v1576_v62 = vadd.f32 %v4340_v38, %v4121_v59 }
 0x1b7   :  { %v1567_v63 = vpop.f32.mrf.mxu0 }
 0x1b8   :  { %3157 = vst.msk [vmem:[%s5893_s3 + $0x1a8] sm:$0xf] %vm3050_vm1, %v3800_v60  ;;  %v3798_v0 = vpack.c.bf16 %v2098_v61, %v2098_v61  ;;  %v2101_v1 = vmax.f32 %v1576_v62, 0.0  ;;  %v1568_v2 = vadd.f32 %v4340_v38, %v1567_v63 }
 0x1ba   :  { %3155 = vst.msk [vmem:[%s5893_s3 + $0x1a0] sm:$0xf] %vm3050_vm1, %v3798_v0  ;;  %v3801_v3 = vpack.c.bf16 %v2101_v1, %v2101_v1  ;;  %v2099_v5 = vmax.f32 %v1568_v2, 0.0 }
 0x1bc   :  { %3158 = vst.msk [vmem:[%s5893_s3 + $0x1ac] sm:$0xf] %vm3050_vm1, %v3801_v3  ;;  %v3799_v6 = vpack.c.bf16 %v2099_v5, %v2099_v5 }
 0x1be   :  { %3156 = vst.msk [vmem:[%s5893_s3 + $0x1a4] sm:$0xf] %vm3050_vm1, %v3799_v6 }
 0x1bf   :  { %3267 = vsyncpa [#allocation3], 1 }
 0x1c0   :  { %3268 = vsyncpa [#allocation5], 1 }

// kernel: vae_forward.9
= control target key start
LH: loop header
LB: loop body
LE: loop exit
PB: predicated region body
PF: predicated region fallthrough
CT: control target
= control target key end

     0   :  { %v2045_v0 = vmov 0   ;;  %vm1580_vm0 = vcmask 257024   ;;  %s2738_s1 = inlined_call_operand.vmem [shape: bf16[512,32], index: 1, kind: input, shape index: {}]   ;;  %s2739_s0 = inlined_call_operand.vmem [shape: bf16[392,512], index: 0, kind: input, shape index: {}]   ;;  %s2740_s2 = inlined_call_operand.vmem [shape: f32[1,32], index: 2, kind: input, shape index: {}]   ;;  %s2741_s3 = inlined_call_operand.vmem [shape: bf16[392,32], index: 3, kind: output, shape index: {}]  }
   0x1   :  { %870 = vmatprep.subr.bf16.mxu0 %v2045_v0  ;;  %1102 = vmatprep.subr.bf16.mxu1 %v2045_v0  ;;  %v1866_v1 = vld [vmem:[%s2738_s1 + $0x38] sm:$0xff]   ;;  %v1868_v3 = vld [vmem:[%s2738_s1 + $0x30] sm:$0xff]   ;;  %v1870_v5 = vld [vmem:[%s2738_s1 + $0x28] sm:$0xff]  }
   0x2   :  { %v1867_v2 = vld [vmem:[%s2738_s1 + $0xb8] sm:$0xff]   ;;  %871 = vmatpush1.bf16.msra.mxu0 %v1866_v1  ;;  %v1869_v4 = vld [vmem:[%s2738_s1 + $0xb0] sm:$0xff]   ;;  %v1871_v6 = vld [vmem:[%s2738_s1 + $0xa8] sm:$0xff]  }
   0x3   :  { %1103 = vmatpush1.bf16.msra.mxu1 %v1867_v2  ;;  %872 = vmatprep.subr.bf16.mxu0 %v2045_v0  ;;  %v1872_v7 = vld [vmem:[%s2738_s1 + $0x20] sm:$0xff]   ;;  %v1874_v9 = vld [vmem:[%s2738_s1 + $0x18] sm:$0xff]   ;;  %v1876_v11 = vld [vmem:[%s2738_s1 + $0x10] sm:$0xff]  }
   0x4   :  { %1104 = vmatprep.subr.bf16.mxu1 %v2045_v0  ;;  %v1873_v8 = vld [vmem:[%s2738_s1 + $0xa0] sm:$0xff]   ;;  %v1875_v10 = vld [vmem:[%s2738_s1 + $0x98] sm:$0xff]   ;;  %v1877_v12 = vld [vmem:[%s2738_s1 + $0x90] sm:$0xff]  }
   0x5   :  { %v1878_v13 = vld [vmem:[%s2738_s1 + $0x8] sm:$0xff]   ;;  %v1880_v15 = vld [vmem:[%s2738_s1] sm:$0xff]   ;;  %v1882_v17 = vld [vmem:[%s2738_s1 + $0x78] sm:$0xff]  }
   0x6   :  { %873 = vmatpush1.bf16.msra.mxu0 %v1868_v3  ;;  %v1879_v14 = vld [vmem:[%s2738_s1 + $0x88] sm:$0xff]   ;;  %v1881_v16 = vld [vmem:[%s2738_s1 + $0x80] sm:$0xff]   ;;  %v1883_v18 = vld [vmem:[%s2738_s1 + $0xf8] sm:$0xff]  }
   0x7   :  { %1105 = vmatpush1.bf16.msra.mxu1 %v1869_v4  ;;  %874 = vmatprep.subr.bf16.mxu0 %v2045_v0  ;;  %v1900_v19 = vld [vmem:[%s2739_s0 + $0x4] ss:$16 sps:$4 sm:$0xff]   ;;  %v1903_v21 = vld [vmem:[%s2739_s0 + $0xc] ss:$16 sps:$4 sm:$0xff]   ;;  %v1898_v35 = vld [vmem:[%s2739_s0] ss:$16 sps:$4 sm:$0xff]  }
   0x8   :  { %1106 = vmatprep.subr.bf16.mxu1 %v2045_v0  ;;  %v1884_v20 = vld [vmem:[%s2738_s1 + $0x70] sm:$0xff]   ;;  %902 = vmatprep.mubr.bf16.mxu0 %v1900_v19  ;;  %v1886_v23 = vld [vmem:[%s2738_s1 + $0x68] sm:$0xff]   ;;  %v1888_v25 = vld [vmem:[%s2738_s1 + $0x60] sm:$0xff]  }
   0x9   :  { %v1885_v22 = vld [vmem:[%s2738_s1 + $0xf0] sm:$0xff]   ;;  %1134 = vmatprep.mubr.bf16.mxu1 %v1903_v21  ;;  %v1887_v24 = vld [vmem:[%s2738_s1 + $0xe8] sm:$0xff]   ;;  %v1889_v26 = vld [vmem:[%s2738_s1 + $0xe0] sm:$0xff]  }
   0xa   :  { %875 = vmatpush1.bf16.msra.mxu0 %v1870_v5  ;;  %v1890_v27 = vld [vmem:[%s2738_s1 + $0x58] sm:$0xff]   ;;  %v1892_v29 = vld [vmem:[%s2738_s1 + $0x50] sm:$0xff]   ;;  %v1894_v31 = vld [vmem:[%s2738_s1 + $0x48] sm:$0xff]  }
   0xb   :  { %1107 = vmatpush1.bf16.msra.mxu1 %v1871_v6  ;;  %876 = vmatprep.subr.bf16.mxu0 %v2045_v0  ;;  %v1891_v28 = vld [vmem:[%s2738_s1 + $0xd8] sm:$0xff]   ;;  %v1893_v30 = vld [vmem:[%s2738_s1 + $0xd0] sm:$0xff]   ;;  %v1895_v32 = vld [vmem:[%s2738_s1 + $0xc8] sm:$0xff]  }
   0xc   :  { %1108 = vmatprep.subr.bf16.mxu1 %v2045_v0  ;;  %v1896_v33 = vld [vmem:[%s2738_s1 + $0x40] sm:$0xff]   ;;  %v1901_v36 = vld [vmem:[%s2739_s0 + $0x8] ss:$16 sps:$4 sm:$0xff]   ;;  %v1906_v38 = vld [vmem:[%s2739_s0 + $0x2c] ss:$16 sps:$4 sm:$0xff]  }
   0xd   :  { %v1897_v34 = vld [vmem:[%s2738_s1 + $0xc0] sm:$0xff]   ;;  %v1909_v40 = vld [vmem:[%s2739_s0 + $0x28] ss:$16 sps:$4 sm:$0xff]   ;;  %v1912_v42 = vld [vmem:[%s2739_s0 + $0x4c] ss:$16 sps:$4 sm:$0xff]  }
   0xe   :  { %877 = vmatpush1.bf16.msra.mxu0 %v1872_v7  ;;  %v1904_v37 = vld [vmem:[%s2739_s0 + $0x24] ss:$16 sps:$4 sm:$0xff]   ;;  %v1908_v39 = vld [vmem:[%s2739_s0 + $0x20] ss:$16 sps:$4 sm:$0xff]   ;;  %v1915_v44 = vld [vmem:[%s2739_s0 + $0x48] ss:$16 sps:$4 sm:$0xff]  }
   0xf   :  { %1109 = vmatpush1.bf16.msra.mxu1 %v1873_v8  ;;  %878 = vmatprep.subr.bf16.mxu0 %v2045_v0  ;;  %v1910_v41 = vld [vmem:[%s2739_s0 + $0x44] ss:$16 sps:$4 sm:$0xff]   ;;  %v1914_v43 = vld [vmem:[%s2739_s0 + $0x40] ss:$16 sps:$4 sm:$0xff]   ;;  %v1918_v46 = vld [vmem:[%s2739_s0 + $0x6c] ss:$16 sps:$4 sm:$0xff]  }
  0x10   :  { %1110 = vmatprep.subr.bf16.mxu1 %v2045_v0  ;;  %v1916_v45 = vld [vmem:[%s2739_s0 + $0x64] ss:$16 sps:$4 sm:$0xff]   ;;  %v1920_v47 = vld [vmem:[%s2739_s0 + $0x60] ss:$16 sps:$4 sm:$0xff]   ;;  %v1921_v48 = vld [vmem:[%s2739_s0 + $0x68] ss:$16 sps:$4 sm:$0xff]  }
  0x11   :  { %v1922_v49 = vld [vmem:[%s2739_s0 + $0x84] ss:$16 sps:$4 sm:$0xff]   ;;  %v1924_v50 = vld [vmem:[%s2739_s0 + $0x8c] ss:$16 sps:$4 sm:$0xff]   ;;  %v1926_v51 = vld [vmem:[%s2739_s0 + $0x80] ss:$16 sps:$4 sm:$0xff]  }
  0x12   :  { %879 = vmatpush1.bf16.msra.mxu0 %v1874_v9  ;;  %v1927_v52 = vld [vmem:[%s2739_s0 + $0x88] ss:$16 sps:$4 sm:$0xff]   ;;  %v1928_v53 = vld [vmem:[%s2739_s0 + $0xa4] ss:$16 sps:$4 sm:$0xff]   ;;  %v1930_v54 = vld [vmem:[%s2739_s0 + $0xac] ss:$16 sps:$4 sm:$0xff]  }
  0x13   :  { %1111 = vmatpush1.bf16.msra.mxu1 %v1875_v10  ;;  %880 = vmatprep.subr.bf16.mxu0 %v2045_v0  ;;  %v1932_v55 = vld [vmem:[%s2739_s0 + $0xa0] ss:$16 sps:$4 sm:$0xff]   ;;  %v1933_v56 = vld [vmem:[%s2739_s0 + $0xa8] ss:$16 sps:$4 sm:$0xff]   ;;  %v1934_v57 = vld [vmem:[%s2739_s0 + $0xc4] ss:$16 sps:$4 sm:$0xff]  }
  0x14   :  { %1112 = vmatprep.subr.bf16.mxu1 %v2045_v0  ;;  %v1936_v58 = vld [vmem:[%s2739_s0 + $0xcc] ss:$16 sps:$4 sm:$0xff]   ;;  %v1938_v59 = vld [vmem:[%s2739_s0 + $0xc0] ss:$16 sps:$4 sm:$0xff]   ;;  %v1939_v60 = vld [vmem:[%s2739_s0 + $0xc8] ss:$16 sps:$4 sm:$0xff]  }
  0x15   :  { %v1940_v61 = vld [vmem:[%s2739_s0 + $0xe4] ss:$16 sps:$4 sm:$0xff]   ;;  %v1942_v62 = vld [vmem:[%s2739_s0 + $0xec] ss:$16 sps:$4 sm:$0xff]   ;;  %v1944_v63 = vld [vmem:[%s2739_s0 + $0xe0] ss:$16 sps:$4 sm:$0xff]  }
  0x16   :  { %881 = vmatpush1.bf16.msra.mxu0 %v1876_v11  ;;  %v1946_v1 = vld [vmem:[%s2739_s0 + $0x104] ss:$16 sps:$4 sm:$0xff]   ;;  %v1948_v2 = vld [vmem:[%s2739_s0 + $0x10c] ss:$16 sps:$4 sm:$0xff]   ;;  %v1950_v3 = vld [vmem:[%s2739_s0 + $0x100] ss:$16 sps:$4 sm:$0xff]  }
  0x17   :  { %1113 = vmatpush1.bf16.msra.mxu1 %v1877_v12  ;;  %882 = vmatprep.subr.bf16.mxu0 %v2045_v0  ;;  %v1951_v4 = vld [vmem:[%s2739_s0 + $0x108] ss:$16 sps:$4 sm:$0xff]   ;;  %v1952_v5 = vld [vmem:[%s2739_s0 + $0x124] ss:$16 sps:$4 sm:$0xff]   ;;  %v1954_v6 = vld [vmem:[%s2739_s0 + $0x12c] ss:$16 sps:$4 sm:$0xff]  }
  0x18   :  { %1114 = vmatprep.subr.bf16.mxu1 %v2045_v0  ;;  %v1956_v7 = vld [vmem:[%s2739_s0 + $0x120] ss:$16 sps:$4 sm:$0xff]   ;;  %v1957_v8 = vld [vmem:[%s2739_s0 + $0x128] ss:$16 sps:$4 sm:$0xff]   ;;  %v1958_v9 = vld [vmem:[%s2739_s0 + $0x144] ss:$16 sps:$4 sm:$0xff]  }
  0x19   :  { %v1960_v10 = vld [vmem:[%s2739_s0 + $0x14c] ss:$16 sps:$4 sm:$0xff]   ;;  %v1962_v11 = vld [vmem:[%s2739_s0 + $0x140] ss:$16 sps:$4 sm:$0xff]   ;;  %v1963_v12 = vld [vmem:[%s2739_s0 + $0x148] ss:$16 sps:$4 sm:$0xff]  }
  0x1a   :  { %883 = vmatpush1.bf16.msra.mxu0 %v1878_v13  ;;  %v1964_v13 = vld [vmem:[%s2739_s0 + $0x164] ss:$16 sps:$4 sm:$0xff]   ;;  %v1974_v19 = vld [vmem:[%s2739_s0 + $0x180] ss:$16 sps:$4 sm:$0xff]  }
  0x1b   :  { %1115 = vmatpush1.bf16.msra.mxu1 %v1879_v14  ;;  %884 = vmatprep.subr.bf16.mxu0 %v2045_v0  ;;  %v1966_v14 = vld [vmem:[%s2739_s0 + $0x16c] ss:$16 sps:$4 sm:$0xff]   ;;  %v1976_v21 = vld [vmem:[%s2739_s0 + $0x1a4] ss:$16 sps:$4 sm:$0xff]  }
  0x1c   :  { %1116 = vmatprep.subr.bf16.mxu1 %v2045_v0 }
  0x1e   :  { %885 = vmatpush1.bf16.msra.mxu0 %v1880_v15  ;;  %v1968_v15 = vld [vmem:[%s2739_s0 + $0x160] ss:$16 sps:$4 sm:$0xff]  }
  0x1f   :  { %1117 = vmatpush1.bf16.msra.mxu1 %v1881_v16  ;;  %886 = vmatprep.subr.bf16.mxu0 %v2045_v0  ;;  %v1969_v16 = vld [vmem:[%s2739_s0 + $0x168] ss:$16 sps:$4 sm:$0xff]  }
  0x20   :  { %1118 = vmatprep.subr.bf16.mxu1 %v2045_v0 }
  0x22   :  { %887 = vmatpush2.bf16.msra.mxu0 %v1882_v17  ;;  %v1970_v17 = vld [vmem:[%s2739_s0 + $0x184] ss:$16 sps:$4 sm:$0xff]  }
  0x23   :  { %1119 = vmatpush2.bf16.msra.mxu1 %v1883_v18  ;;  %888 = vmatprep.subr.bf16.mxu0 %v2045_v0  ;;  %v1972_v18 = vld [vmem:[%s2739_s0 + $0x18c] ss:$16 sps:$4 sm:$0xff]  }
  0x24   :  { %1120 = vmatprep.subr.bf16.mxu1 %v2045_v0 }
  0x26   :  { %889 = vmatpush2.bf16.msra.mxu0 %v1884_v20  ;;  %v1975_v20 = vld [vmem:[%s2739_s0 + $0x188] ss:$16 sps:$4 sm:$0xff]  }
  0x27   :  { %1121 = vmatpush2.bf16.msra.mxu1 %v1885_v22  ;;  %890 = vmatprep.subr.bf16.mxu0 %v2045_v0  ;;  %v1978_v22 = vld [vmem:[%s2739_s0 + $0x1ac] ss:$16 sps:$4 sm:$0xff]  }
  0x28   :  { %1122 = vmatprep.subr.bf16.mxu1 %v2045_v0 }
  0x2a   :  { %891 = vmatpush2.bf16.msra.mxu0 %v1886_v23  ;;  %v1980_v23 = vld [vmem:[%s2739_s0 + $0x1a0] ss:$16 sps:$4 sm:$0xff]  }
  0x2b   :  { %1123 = vmatpush2.bf16.msra.mxu1 %v1887_v24  ;;  %892 = vmatprep.subr.bf16.mxu0 %v2045_v0  ;;  %v1981_v24 = vld [vmem:[%s2739_s0 + $0x1a8] ss:$16 sps:$4 sm:$0xff]  }
  0x2c   :  { %1124 = vmatprep.subr.bf16.mxu1 %v2045_v0 }
  0x2e   :  { %893 = vmatpush2.bf16.msra.mxu0 %v1888_v25  ;;  %v1982_v25 = vld [vmem:[%s2739_s0 + $0x1c4] ss:$16 sps:$4 sm:$0xff]  }
  0x2f   :  { %1125 = vmatpush2.bf16.msra.mxu1 %v1889_v26  ;;  %894 = vmatprep.subr.bf16.mxu0 %v2045_v0  ;;  %v1984_v26 = vld [vmem:[%s2739_s0 + $0x1cc] ss:$16 sps:$4 sm:$0xff]  }
  0x30   :  { %1126 = vmatprep.subr.bf16.mxu1 %v2045_v0 }
  0x32   :  { %895 = vmatpush2.bf16.msra.mxu0 %v1890_v27  ;;  %v1986_v27 = vld [vmem:[%s2739_s0 + $0x1c0] ss:$16 sps:$4 sm:$0xff]  }
  0x33   :  { %1127 = vmatpush2.bf16.msra.mxu1 %v1891_v28  ;;  %896 = vmatprep.subr.bf16.mxu0 %v2045_v0  ;;  %v1987_v28 = vld [vmem:[%s2739_s0 + $0x1c8] ss:$16 sps:$4 sm:$0xff]  }
  0x34   :  { %1128 = vmatprep.subr.bf16.mxu1 %v2045_v0 }
  0x36   :  { %897 = vmatpush2.bf16.msra.mxu0 %v1892_v29  ;;  %v1988_v29 = vld [vmem:[%s2739_s0 + $0x1e4] ss:$16 sps:$4 sm:$0xff]  }
  0x37   :  { %1129 = vmatpush2.bf16.msra.mxu1 %v1893_v30  ;;  %898 = vmatprep.subr.bf16.mxu0 %v2045_v0  ;;  %v1990_v30 = vld [vmem:[%s2739_s0 + $0x1ec] ss:$16 sps:$4 sm:$0xff]  }
  0x38   :  { %1130 = vmatprep.subr.bf16.mxu1 %v2045_v0 }
  0x3a   :  { %899 = vmatpush2.bf16.msra.mxu0 %v1894_v31  ;;  %v1992_v31 = vld [vmem:[%s2739_s0 + $0x1e0] ss:$16 sps:$4 sm:$0xff]  }
  0x3b   :  { %1131 = vmatpush2.bf16.msra.mxu1 %v1895_v32  ;;  %900 = vmatprep.subr.bf16.mxu0 %v2045_v0  ;;  %v1993_v32 = vld [vmem:[%s2739_s0 + $0x1e8] ss:$16 sps:$4 sm:$0xff]  }
  0x3c   :  { %1132 = vmatprep.subr.bf16.mxu1 %v2045_v0  ;;  %v1945_v0 = vld [vmem:[%s2739_s0 + $0xe8] ss:$16 sps:$4 sm:$0xff]  }
  0x3e   :  { %901 = vmatpush2.bf16.msra.mxu0 %v1896_v33  ;;  %v1994_v33 = vld [vmem:[%s2739_s0 + $0x204] ss:$16 sps:$4 sm:$0xff]  }
  0x3f   :  { %1133 = vmatpush2.bf16.msra.mxu1 %v1897_v34  ;;  %v1996_v34 = vld [vmem:[%s2739_s0 + $0x20c] ss:$16 sps:$4 sm:$0xff]  }
  0x41   :  { %903 = vmatmul.mubr.bf16.vlgmr.msra.gmra.mxu0 %v1898_v35  ;;  %v1998_v35 = vld [vmem:[%s2739_s0 + $0x200] ss:$16 sps:$4 sm:$0xff]  }
  0x42   :  { %1135 = vmatmul.mubr.bf16.vlgmr.msra.gmra.mxu1 %v1901_v36  ;;  %910 = vmatprep.mubr.bf16.mxu0 %v1904_v37  ;;  %v1999_v36 = vld [vmem:[%s2739_s0 + $0x208] ss:$16 sps:$4 sm:$0xff]   ;;  %v2000_v37 = vld [vmem:[%s2739_s0 + $0x224] ss:$16 sps:$4 sm:$0xff]  }
  0x43   :  { %1142 = vmatprep.mubr.bf16.mxu1 %v1906_v38  ;;  %v2002_v38 = vld [vmem:[%s2739_s0 + $0x22c] ss:$16 sps:$4 sm:$0xff]  }
  0x49   :  { %911 = vmatmul.mubr.bf16.gmra.mxu0 %v1908_v39  ;;  %v2004_v39 = vld [vmem:[%s2739_s0 + $0x220] ss:$16 sps:$4 sm:$0xff]  }
  0x4a   :  { %1143 = vmatmul.mubr.bf16.gmra.mxu1 %v1909_v40  ;;  %918 = vmatprep.mubr.bf16.mxu0 %v1910_v41  ;;  %v2005_v40 = vld [vmem:[%s2739_s0 + $0x228] ss:$16 sps:$4 sm:$0xff]   ;;  %v2006_v41 = vld [vmem:[%s2739_s0 + $0x244] ss:$16 sps:$4 sm:$0xff]  }
  0x4b   :  { %1150 = vmatprep.mubr.bf16.mxu1 %v1912_v42  ;;  %v2008_v42 = vld [vmem:[%s2739_s0 + $0x24c] ss:$16 sps:$4 sm:$0xff]  }
  0x51   :  { %919 = vmatmul.mubr.bf16.gmra.mxu0 %v1914_v43  ;;  %v2010_v43 = vld [vmem:[%s2739_s0 + $0x240] ss:$16 sps:$4 sm:$0xff]  }
  0x52   :  { %1151 = vmatmul.mubr.bf16.gmra.mxu1 %v1915_v44  ;;  %926 = vmatprep.mubr.bf16.mxu0 %v1916_v45  ;;  %v2011_v44 = vld [vmem:[%s2739_s0 + $0x248] ss:$16 sps:$4 sm:$0xff]   ;;  %v2012_v45 = vld [vmem:[%s2739_s0 + $0x264] ss:$16 sps:$4 sm:$0xff]  }
  0x53   :  { %1158 = vmatprep.mubr.bf16.mxu1 %v1918_v46  ;;  %v2014_v46 = vld [vmem:[%s2739_s0 + $0x26c] ss:$16 sps:$4 sm:$0xff]  }
  0x59   :  { %927 = vmatmul.mubr.bf16.gmra.mxu0 %v1920_v47  ;;  %v2016_v47 = vld [vmem:[%s2739_s0 + $0x260] ss:$16 sps:$4 sm:$0xff]  }
  0x5a   :  { %1159 = vmatmul.mubr.bf16.gmra.mxu1 %v1921_v48  ;;  %934 = vmatprep.mubr.bf16.mxu0 %v1922_v49  ;;  %v2017_v48 = vld [vmem:[%s2739_s0 + $0x268] ss:$16 sps:$4 sm:$0xff]   ;;  %v2018_v49 = vld [vmem:[%s2739_s0 + $0x284] ss:$16 sps:$4 sm:$0xff]  }
  0x5b   :  { %1166 = vmatprep.mubr.bf16.mxu1 %v1924_v50  ;;  %v2020_v50 = vld [vmem:[%s2739_s0 + $0x28c] ss:$16 sps:$4 sm:$0xff]  }
  0x61   :  { %935 = vmatmul.mubr.bf16.gmra.mxu0 %v1926_v51  ;;  %v2022_v51 = vld [vmem:[%s2739_s0 + $0x280] ss:$16 sps:$4 sm:$0xff]  }
  0x62   :  { %1167 = vmatmul.mubr.bf16.gmra.mxu1 %v1927_v52  ;;  %942 = vmatprep.mubr.bf16.mxu0 %v1928_v53  ;;  %v2023_v52 = vld [vmem:[%s2739_s0 + $0x288] ss:$16 sps:$4 sm:$0xff]   ;;  %v2024_v53 = vld [vmem:[%s2739_s0 + $0x2a4] ss:$16 sps:$4 sm:$0xff]  }
  0x63   :  { %1174 = vmatprep.mubr.bf16.mxu1 %v1930_v54  ;;  %v2026_v54 = vld [vmem:[%s2739_s0 + $0x2ac] ss:$16 sps:$4 sm:$0xff]  }
  0x69   :  { %943 = vmatmul.mubr.bf16.gmra.mxu0 %v1932_v55  ;;  %v2028_v55 = vld [vmem:[%s2739_s0 + $0x2a0] ss:$16 sps:$4 sm:$0xff]  }
  0x6a   :  { %1175 = vmatmul.mubr.bf16.gmra.mxu1 %v1933_v56  ;;  %950 = vmatprep.mubr.bf16.mxu0 %v1934_v57  ;;  %v2029_v56 = vld [vmem:[%s2739_s0 + $0x2a8] ss:$16 sps:$4 sm:$0xff]   ;;  %v2030_v57 = vld [vmem:[%s2739_s0 + $0x2c4] ss:$16 sps:$4 sm:$0xff]  }
  0x6b   :  { %1182 = vmatprep.mubr.bf16.mxu1 %v1936_v58  ;;  %v2032_v58 = vld [vmem:[%s2739_s0 + $0x2cc] ss:$16 sps:$4 sm:$0xff]  }
  0x71   :  { %951 = vmatmul.mubr.bf16.gmra.mxu0 %v1938_v59  ;;  %v2034_v59 = vld [vmem:[%s2739_s0 + $0x2c0] ss:$16 sps:$4 sm:$0xff]  }
  0x72   :  { %1183 = vmatmul.mubr.bf16.gmra.mxu1 %v1939_v60  ;;  %958 = vmatprep.mubr.bf16.mxu0 %v1940_v61  ;;  %v2035_v60 = vld [vmem:[%s2739_s0 + $0x2c8] ss:$16 sps:$4 sm:$0xff]   ;;  %v2036_v61 = vld [vmem:[%s2739_s0 + $0x2e4] ss:$16 sps:$4 sm:$0xff]  }
  0x73   :  { %1190 = vmatprep.mubr.bf16.mxu1 %v1942_v62  ;;  %v2038_v62 = vld [vmem:[%s2739_s0 + $0x2ec] ss:$16 sps:$4 sm:$0xff]  }
  0x79   :  { %959 = vmatmul.mubr.bf16.gmra.mxu0 %v1944_v63  ;;  %v111_v63 = vld [vmem:[%s2739_s0 + $0x300] sm:$0xff] }
  0x7a   :  { %1191 = vmatmul.mubr.bf16.gmra.mxu1 %v1945_v0  ;;  %966 = vmatprep.mubr.bf16.mxu0 %v1946_v1  ;;  %v112_v0 = vld [vmem:[%s2739_s0 + $0x308] sm:$0xff]  ;;  %v2040_v1 = vld [vmem:[%s2739_s0 + $0x2e0] ss:$16 sps:$4 sm:$0xff]  }
  0x7b   :  { %1198 = vmatprep.mubr.bf16.mxu1 %v1948_v2  ;;  %v2041_v2 = vld [vmem:[%s2739_s0 + $0x2e8] ss:$16 sps:$4 sm:$0xff]  }
  0x81   :  { %967 = vmatmul.mubr.bf16.gmra.mxu0 %v1950_v3  ;;  %v1732_v3 = vcombine.high %v111_v63, %v111_v63 }
  0x82   :  { %1199 = vmatmul.mubr.bf16.gmra.mxu1 %v1951_v4  ;;  %974 = vmatprep.mubr.bf16.mxu0 %v1952_v5  ;;  %v1734_v4 = vcombine.high %v112_v0, %v112_v0  ;;  %v1731_v5 = vcombine.low %v111_v63, %v111_v63 }
  0x83   :  { %1206 = vmatprep.mubr.bf16.mxu1 %v1954_v6  ;;  %v1733_v6 = vcombine.low %v112_v0, %v112_v0 }
  0x89   :  { %975 = vmatmul.mubr.bf16.gmra.mxu0 %v1956_v7  ;;  %v2491_v7 = vld [vmem:[%s2740_s2] ss:$0 sm:$0xff] }
  0x8a   :  { %1207 = vmatmul.mubr.bf16.gmra.mxu1 %v1957_v8  ;;  %982 = vmatprep.mubr.bf16.mxu0 %v1958_v9 }
  0x8b   :  { %1214 = vmatprep.mubr.bf16.mxu1 %v1960_v10 }
  0x91   :  { %983 = vmatmul.mubr.bf16.gmra.mxu0 %v1962_v11 }
  0x92   :  { %1215 = vmatmul.mubr.bf16.gmra.mxu1 %v1963_v12  ;;  %990 = vmatprep.mubr.bf16.mxu0 %v1964_v13 }
  0x93   :  { %1222 = vmatprep.mubr.bf16.mxu1 %v1966_v14 }
  0x99   :  { %991 = vmatmul.mubr.bf16.gmra.mxu0 %v1968_v15 }
  0x9a   :  { %1223 = vmatmul.mubr.bf16.gmra.mxu1 %v1969_v16  ;;  %998 = vmatprep.mubr.bf16.mxu0 %v1970_v17 }
  0x9b   :  { %1230 = vmatprep.mubr.bf16.mxu1 %v1972_v18 }
  0xa1   :  { %999 = vmatmul.mubr.bf16.gmra.mxu0 %v1974_v19 }
  0xa2   :  { %1231 = vmatmul.mubr.bf16.gmra.mxu1 %v1975_v20  ;;  %1006 = vmatprep.mubr.bf16.mxu0 %v1976_v21 }
  0xa3   :  { %1238 = vmatprep.mubr.bf16.mxu1 %v1978_v22 }
  0xa9   :  { %1007 = vmatmul.mubr.bf16.gmra.mxu0 %v1980_v23 }
  0xaa   :  { %1239 = vmatmul.mubr.bf16.gmra.mxu1 %v1981_v24  ;;  %1014 = vmatprep.mubr.bf16.mxu0 %v1982_v25 }
  0xab   :  { %1246 = vmatprep.mubr.bf16.mxu1 %v1984_v26 }
  0xb1   :  { %1015 = vmatmul.mubr.bf16.gmra.mxu0 %v1986_v27 }
  0xb2   :  { %1247 = vmatmul.mubr.bf16.gmra.mxu1 %v1987_v28  ;;  %1022 = vmatprep.mubr.bf16.mxu0 %v1988_v29 }
  0xb3   :  { %1254 = vmatprep.mubr.bf16.mxu1 %v1990_v30 }
  0xb9   :  { %1023 = vmatmul.mubr.bf16.gmra.mxu0 %v1992_v31 }
  0xba   :  { %1255 = vmatmul.mubr.bf16.gmra.mxu1 %v1993_v32  ;;  %1030 = vmatprep.mubr.bf16.mxu0 %v1994_v33 }
  0xbb   :  { %1262 = vmatprep.mubr.bf16.mxu1 %v1996_v34 }
  0xc1   :  { %1031 = vmatmul.mubr.bf16.gmra.mxu0 %v1998_v35 }
  0xc2   :  { %1263 = vmatmul.mubr.bf16.gmra.mxu1 %v1999_v36  ;;  %1038 = vmatprep.mubr.bf16.mxu0 %v2000_v37 }
  0xc3   :  { %1270 = vmatprep.mubr.bf16.mxu1 %v2002_v38 }
  0xc9   :  { %1039 = vmatmul.mubr.bf16.gmra.mxu0 %v2004_v39 }
  0xca   :  { %1271 = vmatmul.mubr.bf16.gmra.mxu1 %v2005_v40  ;;  %1046 = vmatprep.mubr.bf16.mxu0 %v2006_v41 }
  0xcb   :  { %1278 = vmatprep.mubr.bf16.mxu1 %v2008_v42 }
  0xd1   :  { %1047 = vmatmul.mubr.bf16.gmra.mxu0 %v2010_v43 }
  0xd2   :  { %1279 = vmatmul.mubr.bf16.gmra.mxu1 %v2011_v44  ;;  %1054 = vmatprep.mubr.bf16.mxu0 %v2012_v45 }
  0xd3   :  { %1286 = vmatprep.mubr.bf16.mxu1 %v2014_v46 }
  0xd9   :  { %1055 = vmatmul.mubr.bf16.gmra.mxu0 %v2016_v47 }
  0xda   :  { %1287 = vmatmul.mubr.bf16.gmra.mxu1 %v2017_v48  ;;  %1062 = vmatprep.mubr.bf16.mxu0 %v2018_v49 }
  0xdb   :  { %1294 = vmatprep.mubr.bf16.mxu1 %v2020_v50 }
  0xe1   :  { %1063 = vmatmul.mubr.bf16.gmra.mxu0 %v2022_v51 }
  0xe2   :  { %1295 = vmatmul.mubr.bf16.gmra.mxu1 %v2023_v52  ;;  %1070 = vmatprep.mubr.bf16.mxu0 %v2024_v53 }
  0xe3   :  { %1302 = vmatprep.mubr.bf16.mxu1 %v2026_v54 }
  0xe9   :  { %1071 = vmatmul.mubr.bf16.gmra.mxu0 %v2028_v55 }
  0xea   :  { %1303 = vmatmul.mubr.bf16.gmra.mxu1 %v2029_v56  ;;  %1078 = vmatprep.mubr.bf16.mxu0 %v2030_v57 }
  0xeb   :  { %1310 = vmatprep.mubr.bf16.mxu1 %v2032_v58 }
  0xf1   :  { %1079 = vmatmul.mubr.bf16.gmra.mxu0 %v2034_v59 }
  0xf2   :  { %1311 = vmatmul.mubr.bf16.gmra.mxu1 %v2035_v60  ;;  %1086 = vmatprep.mubr.bf16.mxu0 %v2036_v61 }
  0xf3   :  { %1318 = vmatprep.mubr.bf16.mxu1 %v2038_v62 }
  0xf9   :  { %1087 = vmatmul.mubr.bf16.gmra.mxu0 %v2040_v1 }
  0xfa   :  { %1319 = vmatmul.mubr.bf16.gmra.mxu1 %v2041_v2  ;;  %1094 = vmatprep.mubr.bf16.mxu0 %v1732_v3 }
  0xfb   :  { %1326 = vmatprep.mubr.bf16.mxu1 %v1734_v4 }
 0x101   :  { %v904_v8 = vpop.f32.mrf.mxu0  ;;  %1095 = vmatmul.mubr.bf16.gmra.mxu0 %v1731_v5 }
 0x102   :  { %v905_v9 = vadd.f32 %v2491_v7, %v904_v8  ;;  %v1136_v10 = vpop.f32.mrf.mxu1  ;;  %1327 = vmatmul.mubr.bf16.gmra.mxu1 %v1733_v6 }
 0x103   :  { %v906_v11 = vpop.f32.mrf.mxu0 }
 0x104   :  { %v1137_v12 = vadd.f32 %v1136_v10, %v905_v9  ;;  %v1138_v13 = vpop.f32.mrf.mxu1 }
 0x105   :  { %v907_v14 = vpop.f32.mrf.mxu0 }
 0x106   :  { %v1334_v15 = vmax.f32 %v1137_v12, 0.0  ;;  %v908_v16 = vadd.f32 %v2491_v7, %v907_v14  ;;  %v1139_v17 = vpop.f32.mrf.mxu1 }
 0x107   :  { %v909_v18 = vpop.f32.mrf.mxu0 }
 0x108   :  { %v1816_v19 = vpack.c.bf16 %v1334_v15, %v1334_v15  ;;  %v1140_v20 = vadd.f32 %v1139_v17, %v908_v16  ;;  %v1141_v21 = vpop.f32.mrf.mxu1 }
 0x109   :  { %v912_v22 = vpop.f32.mrf.mxu0 }
 0x10a   :  { %1581 = vst.msk [vmem:[%s2741_s3] sm:$0xf] %vm1580_vm0, %v1816_v19  ;;  %v1335_v23 = vmax.f32 %v1140_v20, 0.0  ;;  %v913_v24 = vadd.f32 %v2491_v7, %v912_v22  ;;  %v1144_v25 = vpop.f32.mrf.mxu1 }
 0x10b   :  { %v914_v26 = vpop.f32.mrf.mxu0 }
 0x10c   :  { %v1817_v27 = vpack.c.bf16 %v1335_v23, %v1335_v23  ;;  %v1145_v28 = vadd.f32 %v1144_v25, %v913_v24  ;;  %v1146_v29 = vpop.f32.mrf.mxu1 }
 0x10d   :  { %v915_v30 = vpop.f32.mrf.mxu0 }
 0x10e   :  { %1582 = vst.msk [vmem:[%s2741_s3 + $0x4] sm:$0xf] %vm1580_vm0, %v1817_v27  ;;  %v1336_v31 = vmax.f32 %v1145_v28, 0.0  ;;  %v916_v32 = vadd.f32 %v2491_v7, %v915_v30  ;;  %v1147_v33 = vpop.f32.mrf.mxu1 }
 0x10f   :  { %v917_v34 = vpop.f32.mrf.mxu0 }
 0x110   :  { %v1818_v35 = vpack.c.bf16 %v1336_v31, %v1336_v31  ;;  %v1148_v36 = vadd.f32 %v1147_v33, %v916_v32  ;;  %v1149_v37 = vpop.f32.mrf.mxu1 }
 0x111   :  { %v920_v38 = vpop.f32.mrf.mxu0 }
 0x112   :  { %1583 = vst.msk [vmem:[%s2741_s3 + $0x8] sm:$0xf] %vm1580_vm0, %v1818_v35  ;;  %v1337_v39 = vmax.f32 %v1148_v36, 0.0  ;;  %v921_v40 = vadd.f32 %v2491_v7, %v920_v38  ;;  %v1152_v41 = vpop.f32.mrf.mxu1 }
 0x113   :  { %v922_v42 = vpop.f32.mrf.mxu0 }
 0x114   :  { %v1819_v43 = vpack.c.bf16 %v1337_v39, %v1337_v39  ;;  %v1153_v44 = vadd.f32 %v1152_v41, %v921_v40  ;;  %v1154_v45 = vpop.f32.mrf.mxu1 }
 0x115   :  { %v923_v46 = vpop.f32.mrf.mxu0 }
 0x116   :  { %1584 = vst.msk [vmem:[%s2741_s3 + $0xc] sm:$0xf] %vm1580_vm0, %v1819_v43  ;;  %v1338_v47 = vmax.f32 %v1153_v44, 0.0  ;;  %v924_v48 = vadd.f32 %v2491_v7, %v923_v46  ;;  %v1155_v49 = vpop.f32.mrf.mxu1 }
 0x117   :  { %v925_v50 = vpop.f32.mrf.mxu0 }
 0x118   :  { %v1820_v51 = vpack.c.bf16 %v1338_v47, %v1338_v47  ;;  %v1156_v52 = vadd.f32 %v1155_v49, %v924_v48  ;;  %v1157_v53 = vpop.f32.mrf.mxu1 }
 0x119   :  { %v928_v54 = vpop.f32.mrf.mxu0 }
 0x11a   :  { %1585 = vst.msk [vmem:[%s2741_s3 + $0x10] sm:$0xf] %vm1580_vm0, %v1820_v51  ;;  %v1339_v55 = vmax.f32 %v1156_v52, 0.0  ;;  %v929_v56 = vadd.f32 %v2491_v7, %v928_v54  ;;  %v1160_v57 = vpop.f32.mrf.mxu1 }
 0x11b   :  { %v930_v58 = vpop.f32.mrf.mxu0 }
 0x11c   :  { %v1821_v59 = vpack.c.bf16 %v1339_v55, %v1339_v55  ;;  %v1161_v60 = vadd.f32 %v1160_v57, %v929_v56  ;;  %v1162_v61 = vpop.f32.mrf.mxu1 }
 0x11d   :  { %v931_v62 = vpop.f32.mrf.mxu0 }
 0x11e   :  { %1586 = vst.msk [vmem:[%s2741_s3 + $0x14] sm:$0xf] %vm1580_vm0, %v1821_v59  ;;  %v1340_v63 = vmax.f32 %v1161_v60, 0.0  ;;  %v932_v0 = vadd.f32 %v2491_v7, %v931_v62  ;;  %v1163_v1 = vpop.f32.mrf.mxu1 }
 0x11f   :  { %v933_v2 = vpop.f32.mrf.mxu0 }
 0x120   :  { %v1822_v3 = vpack.c.bf16 %v1340_v63, %v1340_v63  ;;  %v1164_v4 = vadd.f32 %v1163_v1, %v932_v0  ;;  %v1165_v5 = vpop.f32.mrf.mxu1 }
 0x121   :  { %v936_v6 = vpop.f32.mrf.mxu0 }
 0x122   :  { %1587 = vst.msk [vmem:[%s2741_s3 + $0x18] sm:$0xf] %vm1580_vm0, %v1822_v3  ;;  %v1341_v8 = vmax.f32 %v1164_v4, 0.0  ;;  %v937_v9 = vadd.f32 %v2491_v7, %v936_v6  ;;  %v1168_v10 = vpop.f32.mrf.mxu1 }
 0x123   :  { %v938_v11 = vpop.f32.mrf.mxu0 }
 0x124   :  { %v1823_v12 = vpack.c.bf16 %v1341_v8, %v1341_v8  ;;  %v1169_v13 = vadd.f32 %v1168_v10, %v937_v9  ;;  %v1170_v14 = vpop.f32.mrf.mxu1 }
 0x125   :  { %v939_v15 = vpop.f32.mrf.mxu0 }
 0x126   :  { %1588 = vst.msk [vmem:[%s2741_s3 + $0x1c] sm:$0xf] %vm1580_vm0, %v1823_v12  ;;  %v1342_v16 = vmax.f32 %v1169_v13, 0.0  ;;  %v940_v17 = vadd.f32 %v2491_v7, %v939_v15  ;;  %v1171_v18 = vpop.f32.mrf.mxu1 }
 0x127   :  { %v941_v19 = vpop.f32.mrf.mxu0 }
 0x128   :  { %v1824_v20 = vpack.c.bf16 %v1342_v16, %v1342_v16  ;;  %v1172_v21 = vadd.f32 %v1171_v18, %v940_v17  ;;  %v1173_v22 = vpop.f32.mrf.mxu1 }
 0x129   :  { %v944_v23 = vpop.f32.mrf.mxu0 }
 0x12a   :  { %1589 = vst.msk [vmem:[%s2741_s3 + $0x20] sm:$0xf] %vm1580_vm0, %v1824_v20  ;;  %v1343_v24 = vmax.f32 %v1172_v21, 0.0  ;;  %v945_v25 = vadd.f32 %v2491_v7, %v944_v23  ;;  %v1176_v26 = vpop.f32.mrf.mxu1 }
 0x12b   :  { %v946_v27 = vpop.f32.mrf.mxu0 }
 0x12c   :  { %v1825_v28 = vpack.c.bf16 %v1343_v24, %v1343_v24  ;;  %v1177_v29 = vadd.f32 %v1176_v26, %v945_v25  ;;  %v1178_v30 = vpop.f32.mrf.mxu1 }
 0x12d   :  { %v947_v31 = vpop.f32.mrf.mxu0 }
 0x12e   :  { %1590 = vst.msk [vmem:[%s2741_s3 + $0x24] sm:$0xf] %vm1580_vm0, %v1825_v28  ;;  %v1344_v32 = vmax.f32 %v1177_v29, 0.0  ;;  %v948_v33 = vadd.f32 %v2491_v7, %v947_v31  ;;  %v1179_v34 = vpop.f32.mrf.mxu1 }
 0x12f   :  { %v949_v35 = vpop.f32.mrf.mxu0 }
 0x130   :  { %v1826_v36 = vpack.c.bf16 %v1344_v32, %v1344_v32  ;;  %v1180_v37 = vadd.f32 %v1179_v34, %v948_v33  ;;  %v1181_v38 = vpop.f32.mrf.mxu1 }
 0x131   :  { %v952_v39 = vpop.f32.mrf.mxu0 }
 0x132   :  { %1591 = vst.msk [vmem:[%s2741_s3 + $0x28] sm:$0xf] %vm1580_vm0, %v1826_v36  ;;  %v1345_v40 = vmax.f32 %v1180_v37, 0.0  ;;  %v953_v41 = vadd.f32 %v2491_v7, %v952_v39  ;;  %v1184_v42 = vpop.f32.mrf.mxu1 }
 0x133   :  { %v954_v43 = vpop.f32.mrf.mxu0 }
 0x134   :  { %v1827_v44 = vpack.c.bf16 %v1345_v40, %v1345_v40  ;;  %v1185_v45 = vadd.f32 %v1184_v42, %v953_v41  ;;  %v1186_v46 = vpop.f32.mrf.mxu1 }
 0x135   :  { %v955_v47 = vpop.f32.mrf.mxu0 }
 0x136   :  { %1592 = vst.msk [vmem:[%s2741_s3 + $0x2c] sm:$0xf] %vm1580_vm0, %v1827_v44  ;;  %v1346_v48 = vmax.f32 %v1185_v45, 0.0  ;;  %v956_v49 = vadd.f32 %v2491_v7, %v955_v47  ;;  %v1187_v50 = vpop.f32.mrf.mxu1 }
 0x137   :  { %v957_v51 = vpop.f32.mrf.mxu0 }
 0x138   :  { %v1828_v52 = vpack.c.bf16 %v1346_v48, %v1346_v48  ;;  %v1188_v53 = vadd.f32 %v1187_v50, %v956_v49  ;;  %v1189_v54 = vpop.f32.mrf.mxu1 }
 0x139   :  { %v960_v55 = vpop.f32.mrf.mxu0 }
 0x13a   :  { %1593 = vst.msk [vmem:[%s2741_s3 + $0x30] sm:$0xf] %vm1580_vm0, %v1828_v52  ;;  %v1347_v56 = vmax.f32 %v1188_v53, 0.0  ;;  %v961_v57 = vadd.f32 %v2491_v7, %v960_v55  ;;  %v1192_v58 = vpop.f32.mrf.mxu1 }
 0x13b   :  { %v962_v59 = vpop.f32.mrf.mxu0 }
 0x13c   :  { %v1829_v60 = vpack.c.bf16 %v1347_v56, %v1347_v56  ;;  %v1193_v61 = vadd.f32 %v1192_v58, %v961_v57  ;;  %v1194_v62 = vpop.f32.mrf.mxu1 }
 0x13d   :  { %v963_v63 = vpop.f32.mrf.mxu0 }
 0x13e   :  { %1594 = vst.msk [vmem:[%s2741_s3 + $0x34] sm:$0xf] %vm1580_vm0, %v1829_v60  ;;  %v1348_v0 = vmax.f32 %v1193_v61, 0.0  ;;  %v964_v1 = vadd.f32 %v2491_v7, %v963_v63  ;;  %v1195_v2 = vpop.f32.mrf.mxu1 }
 0x13f   :  { %v965_v3 = vpop.f32.mrf.mxu0 }
 0x140   :  { %v1830_v4 = vpack.c.bf16 %v1348_v0, %v1348_v0  ;;  %v1196_v5 = vadd.f32 %v1195_v2, %v964_v1  ;;  %v1197_v6 = vpop.f32.mrf.mxu1 }
 0x141   :  { %v968_v8 = vpop.f32.mrf.mxu0 }
 0x142   :  { %1595 = vst.msk [vmem:[%s2741_s3 + $0x38] sm:$0xf] %vm1580_vm0, %v1830_v4  ;;  %v1349_v9 = vmax.f32 %v1196_v5, 0.0  ;;  %v969_v10 = vadd.f32 %v2491_v7, %v968_v8  ;;  %v1200_v11 = vpop.f32.mrf.mxu1 }
 0x143   :  { %v970_v12 = vpop.f32.mrf.mxu0 }
 0x144   :  { %v1831_v13 = vpack.c.bf16 %v1349_v9, %v1349_v9  ;;  %v1201_v14 = vadd.f32 %v1200_v11, %v969_v10  ;;  %v1202_v15 = vpop.f32.mrf.mxu1 }
 0x145   :  { %v971_v16 = vpop.f32.mrf.mxu0 }
 0x146   :  { %1596 = vst.msk [vmem:[%s2741_s3 + $0x3c] sm:$0xf] %vm1580_vm0, %v1831_v13  ;;  %v1350_v17 = vmax.f32 %v1201_v14, 0.0  ;;  %v972_v18 = vadd.f32 %v2491_v7, %v971_v16  ;;  %v1203_v19 = vpop.f32.mrf.mxu1 }
 0x147   :  { %v973_v20 = vpop.f32.mrf.mxu0 }
 0x148   :  { %v1832_v21 = vpack.c.bf16 %v1350_v17, %v1350_v17  ;;  %v1204_v22 = vadd.f32 %v1203_v19, %v972_v18  ;;  %v1205_v23 = vpop.f32.mrf.mxu1 }
 0x149   :  { %v976_v24 = vpop.f32.mrf.mxu0 }
 0x14a   :  { %1597 = vst.msk [vmem:[%s2741_s3 + $0x40] sm:$0xf] %vm1580_vm0, %v1832_v21  ;;  %v1351_v25 = vmax.f32 %v1204_v22, 0.0  ;;  %v977_v26 = vadd.f32 %v2491_v7, %v976_v24  ;;  %v1208_v27 = vpop.f32.mrf.mxu1 }
 0x14b   :  { %v978_v28 = vpop.f32.mrf.mxu0 }
 0x14c   :  { %v1833_v29 = vpack.c.bf16 %v1351_v25, %v1351_v25  ;;  %v1209_v30 = vadd.f32 %v1208_v27, %v977_v26  ;;  %v1210_v31 = vpop.f32.mrf.mxu1 }
 0x14d   :  { %v979_v32 = vpop.f32.mrf.mxu0 }
 0x14e   :  { %1598 = vst.msk [vmem:[%s2741_s3 + $0x44] sm:$0xf] %vm1580_vm0, %v1833_v29  ;;  %v1352_v33 = vmax.f32 %v1209_v30, 0.0  ;;  %v980_v34 = vadd.f32 %v2491_v7, %v979_v32  ;;  %v1211_v35 = vpop.f32.mrf.mxu1 }
 0x14f   :  { %v981_v36 = vpop.f32.mrf.mxu0 }
 0x150   :  { %v1834_v37 = vpack.c.bf16 %v1352_v33, %v1352_v33  ;;  %v1212_v38 = vadd.f32 %v1211_v35, %v980_v34  ;;  %v1213_v39 = vpop.f32.mrf.mxu1 }
 0x151   :  { %v984_v40 = vpop.f32.mrf.mxu0 }
 0x152   :  { %1599 = vst.msk [vmem:[%s2741_s3 + $0x48] sm:$0xf] %vm1580_vm0, %v1834_v37  ;;  %v1353_v41 = vmax.f32 %v1212_v38, 0.0  ;;  %v985_v42 = vadd.f32 %v2491_v7, %v984_v40  ;;  %v1216_v43 = vpop.f32.mrf.mxu1 }
 0x153   :  { %v986_v44 = vpop.f32.mrf.mxu0 }
 0x154   :  { %v1835_v45 = vpack.c.bf16 %v1353_v41, %v1353_v41  ;;  %v1217_v46 = vadd.f32 %v1216_v43, %v985_v42  ;;  %v1218_v47 = vpop.f32.mrf.mxu1 }
 0x155   :  { %v987_v48 = vpop.f32.mrf.mxu0 }
 0x156   :  { %1600 = vst.msk [vmem:[%s2741_s3 + $0x4c] sm:$0xf] %vm1580_vm0, %v1835_v45  ;;  %v1354_v49 = vmax.f32 %v1217_v46, 0.0  ;;  %v988_v50 = vadd.f32 %v2491_v7, %v987_v48  ;;  %v1219_v51 = vpop.f32.mrf.mxu1 }
 0x157   :  { %v989_v52 = vpop.f32.mrf.mxu0 }
 0x158   :  { %v1836_v53 = vpack.c.bf16 %v1354_v49, %v1354_v49  ;;  %v1220_v54 = vadd.f32 %v1219_v51, %v988_v50  ;;  %v1221_v55 = vpop.f32.mrf.mxu1 }
 0x159   :  { %v992_v56 = vpop.f32.mrf.mxu0 }
 0x15a   :  { %1601 = vst.msk [vmem:[%s2741_s3 + $0x50] sm:$0xf] %vm1580_vm0, %v1836_v53  ;;  %v1355_v57 = vmax.f32 %v1220_v54, 0.0  ;;  %v993_v58 = vadd.f32 %v2491_v7, %v992_v56  ;;  %v1224_v59 = vpop.f32.mrf.mxu1 }
 0x15b   :  { %v994_v60 = vpop.f32.mrf.mxu0 }
 0x15c   :  { %v1837_v61 = vpack.c.bf16 %v1355_v57, %v1355_v57  ;;  %v1225_v62 = vadd.f32 %v1224_v59, %v993_v58  ;;  %v1226_v63 = vpop.f32.mrf.mxu1 }
 0x15d   :  { %v995_v0 = vpop.f32.mrf.mxu0 }
 0x15e   :  { %1602 = vst.msk [vmem:[%s2741_s3 + $0x54] sm:$0xf] %vm1580_vm0, %v1837_v61  ;;  %v1356_v1 = vmax.f32 %v1225_v62, 0.0  ;;  %v996_v2 = vadd.f32 %v2491_v7, %v995_v0  ;;  %v1227_v3 = vpop.f32.mrf.mxu1 }
 0x15f   :  { %v997_v4 = vpop.f32.mrf.mxu0 }
 0x160   :  { %v1838_v5 = vpack.c.bf16 %v1356_v1, %v1356_v1  ;;  %v1228_v6 = vadd.f32 %v1227_v3, %v996_v2  ;;  %v1229_v8 = vpop.f32.mrf.mxu1 }
 0x161   :  { %v1000_v9 = vpop.f32.mrf.mxu0 }
 0x162   :  { %1603 = vst.msk [vmem:[%s2741_s3 + $0x58] sm:$0xf] %vm1580_vm0, %v1838_v5  ;;  %v1357_v10 = vmax.f32 %v1228_v6, 0.0  ;;  %v1001_v11 = vadd.f32 %v2491_v7, %v1000_v9  ;;  %v1232_v12 = vpop.f32.mrf.mxu1 }
 0x163   :  { %v1002_v13 = vpop.f32.mrf.mxu0 }
 0x164   :  { %v1839_v14 = vpack.c.bf16 %v1357_v10, %v1357_v10  ;;  %v1233_v15 = vadd.f32 %v1232_v12, %v1001_v11  ;;  %v1234_v16 = vpop.f32.mrf.mxu1 }
 0x165   :  { %v1003_v17 = vpop.f32.mrf.mxu0 }
 0x166   :  { %1604 = vst.msk [vmem:[%s2741_s3 + $0x5c] sm:$0xf] %vm1580_vm0, %v1839_v14  ;;  %v1358_v18 = vmax.f32 %v1233_v15, 0.0  ;;  %v1004_v19 = vadd.f32 %v2491_v7, %v1003_v17  ;;  %v1235_v20 = vpop.f32.mrf.mxu1 }
 0x167   :  { %v1005_v21 = vpop.f32.mrf.mxu0 }
 0x168   :  { %v1840_v22 = vpack.c.bf16 %v1358_v18, %v1358_v18  ;;  %v1236_v23 = vadd.f32 %v1235_v20, %v1004_v19  ;;  %v1237_v24 = vpop.f32.mrf.mxu1 }
 0x169   :  { %v1008_v25 = vpop.f32.mrf.mxu0 }
 0x16a   :  { %1605 = vst.msk [vmem:[%s2741_s3 + $0x60] sm:$0xf] %vm1580_vm0, %v1840_v22  ;;  %v1359_v26 = vmax.f32 %v1236_v23, 0.0  ;;  %v1009_v27 = vadd.f32 %v2491_v7, %v1008_v25  ;;  %v1240_v28 = vpop.f32.mrf.mxu1 }
 0x16b   :  { %v1010_v29 = vpop.f32.mrf.mxu0 }
 0x16c   :  { %v1841_v30 = vpack.c.bf16 %v1359_v26, %v1359_v26  ;;  %v1241_v31 = vadd.f32 %v1240_v28, %v1009_v27  ;;  %v1242_v32 = vpop.f32.mrf.mxu1 }
 0x16d   :  { %v1011_v33 = vpop.f32.mrf.mxu0 }
 0x16e   :  { %1606 = vst.msk [vmem:[%s2741_s3 + $0x64] sm:$0xf] %vm1580_vm0, %v1841_v30  ;;  %v1360_v34 = vmax.f32 %v1241_v31, 0.0  ;;  %v1012_v35 = vadd.f32 %v2491_v7, %v1011_v33  ;;  %v1243_v36 = vpop.f32.mrf.mxu1 }
 0x16f   :  { %v1013_v37 = vpop.f32.mrf.mxu0 }
 0x170   :  { %v1842_v38 = vpack.c.bf16 %v1360_v34, %v1360_v34  ;;  %v1244_v39 = vadd.f32 %v1243_v36, %v1012_v35  ;;  %v1245_v40 = vpop.f32.mrf.mxu1 }
 0x171   :  { %v1016_v41 = vpop.f32.mrf.mxu0 }
 0x172   :  { %1607 = vst.msk [vmem:[%s2741_s3 + $0x68] sm:$0xf] %vm1580_vm0, %v1842_v38  ;;  %v1361_v42 = vmax.f32 %v1244_v39, 0.0  ;;  %v1017_v43 = vadd.f32 %v2491_v7, %v1016_v41  ;;  %v1248_v44 = vpop.f32.mrf.mxu1 }
 0x173   :  { %v1018_v45 = vpop.f32.mrf.mxu0 }
 0x174   :  { %v1843_v46 = vpack.c.bf16 %v1361_v42, %v1361_v42  ;;  %v1249_v47 = vadd.f32 %v1248_v44, %v1017_v43  ;;  %v1250_v48 = vpop.f32.mrf.mxu1 }
 0x175   :  { %v1019_v49 = vpop.f32.mrf.mxu0 }
 0x176   :  { %1608 = vst.msk [vmem:[%s2741_s3 + $0x6c] sm:$0xf] %vm1580_vm0, %v1843_v46  ;;  %v1362_v50 = vmax.f32 %v1249_v47, 0.0  ;;  %v1020_v51 = vadd.f32 %v2491_v7, %v1019_v49  ;;  %v1251_v52 = vpop.f32.mrf.mxu1 }
 0x177   :  { %v1021_v53 = vpop.f32.mrf.mxu0 }
 0x178   :  { %v1844_v54 = vpack.c.bf16 %v1362_v50, %v1362_v50  ;;  %v1252_v55 = vadd.f32 %v1251_v52, %v1020_v51  ;;  %v1253_v56 = vpop.f32.mrf.mxu1 }
 0x179   :  { %v1024_v57 = vpop.f32.mrf.mxu0 }
 0x17a   :  { %1609 = vst.msk [vmem:[%s2741_s3 + $0x70] sm:$0xf] %vm1580_vm0, %v1844_v54  ;;  %v1363_v58 = vmax.f32 %v1252_v55, 0.0  ;;  %v1025_v59 = vadd.f32 %v2491_v7, %v1024_v57  ;;  %v1256_v60 = vpop.f32.mrf.mxu1 }
 0x17b   :  { %v1026_v61 = vpop.f32.mrf.mxu0 }
 0x17c   :  { %v1845_v62 = vpack.c.bf16 %v1363_v58, %v1363_v58  ;;  %v1257_v63 = vadd.f32 %v1256_v60, %v1025_v59  ;;  %v1258_v0 = vpop.f32.mrf.mxu1 }
 0x17d   :  { %v1027_v1 = vpop.f32.mrf.mxu0 }
 0x17e   :  { %1610 = vst.msk [vmem:[%s2741_s3 + $0x74] sm:$0xf] %vm1580_vm0, %v1845_v62  ;;  %v1364_v2 = vmax.f32 %v1257_v63, 0.0  ;;  %v1028_v3 = vadd.f32 %v2491_v7, %v1027_v1  ;;  %v1259_v4 = vpop.f32.mrf.mxu1 }
 0x17f   :  { %v1029_v5 = vpop.f32.mrf.mxu0 }
 0x180   :  { %v1846_v6 = vpack.c.bf16 %v1364_v2, %v1364_v2  ;;  %v1260_v8 = vadd.f32 %v1259_v4, %v1028_v3  ;;  %v1261_v9 = vpop.f32.mrf.mxu1 }
 0x181   :  { %v1032_v10 = vpop.f32.mrf.mxu0 }
 0x182   :  { %1611 = vst.msk [vmem:[%s2741_s3 + $0x78] sm:$0xf] %vm1580_vm0, %v1846_v6  ;;  %v1365_v11 = vmax.f32 %v1260_v8, 0.0  ;;  %v1033_v12 = vadd.f32 %v2491_v7, %v1032_v10  ;;  %v1264_v13 = vpop.f32.mrf.mxu1 }
 0x183   :  { %v1034_v14 = vpop.f32.mrf.mxu0 }
 0x184   :  { %v1847_v15 = vpack.c.bf16 %v1365_v11, %v1365_v11  ;;  %v1265_v16 = vadd.f32 %v1264_v13, %v1033_v12  ;;  %v1266_v17 = vpop.f32.mrf.mxu1 }
 0x185   :  { %v1035_v18 = vpop.f32.mrf.mxu0 }
 0x186   :  { %1612 = vst.msk [vmem:[%s2741_s3 + $0x7c] sm:$0xf] %vm1580_vm0, %v1847_v15  ;;  %v1366_v19 = vmax.f32 %v1265_v16, 0.0  ;;  %v1036_v20 = vadd.f32 %v2491_v7, %v1035_v18  ;;  %v1267_v21 = vpop.f32.mrf.mxu1 }
 0x187   :  { %v1037_v22 = vpop.f32.mrf.mxu0 }
 0x188   :  { %v1848_v23 = vpack.c.bf16 %v1366_v19, %v1366_v19  ;;  %v1268_v24 = vadd.f32 %v1267_v21, %v1036_v20  ;;  %v1269_v25 = vpop.f32.mrf.mxu1 }
 0x189   :  { %v1040_v26 = vpop.f32.mrf.mxu0 }
 0x18a   :  { %1613 = vst.msk [vmem:[%s2741_s3 + $0x80] sm:$0xf] %vm1580_vm0, %v1848_v23  ;;  %v1367_v27 = vmax.f32 %v1268_v24, 0.0  ;;  %v1041_v28 = vadd.f32 %v2491_v7, %v1040_v26  ;;  %v1272_v29 = vpop.f32.mrf.mxu1 }
 0x18b   :  { %v1042_v30 = vpop.f32.mrf.mxu0 }
 0x18c   :  { %v1849_v31 = vpack.c.bf16 %v1367_v27, %v1367_v27  ;;  %v1273_v32 = vadd.f32 %v1272_v29, %v1041_v28  ;;  %v1274_v33 = vpop.f32.mrf.mxu1 }
 0x18d   :  { %v1043_v34 = vpop.f32.mrf.mxu0 }
 0x18e   :  { %1614 = vst.msk [vmem:[%s2741_s3 + $0x84] sm:$0xf] %vm1580_vm0, %v1849_v31  ;;  %v1368_v35 = vmax.f32 %v1273_v32, 0.0  ;;  %v1044_v36 = vadd.f32 %v2491_v7, %v1043_v34  ;;  %v1275_v37 = vpop.f32.mrf.mxu1 }
 0x18f   :  { %v1045_v38 = vpop.f32.mrf.mxu0 }
 0x190   :  { %v1850_v39 = vpack.c.bf16 %v1368_v35, %v1368_v35  ;;  %v1276_v40 = vadd.f32 %v1275_v37, %v1044_v36  ;;  %v1277_v41 = vpop.f32.mrf.mxu1 }
 0x191   :  { %v1048_v42 = vpop.f32.mrf.mxu0 }
 0x192   :  { %1615 = vst.msk [vmem:[%s2741_s3 + $0x88] sm:$0xf] %vm1580_vm0, %v1850_v39  ;;  %v1369_v43 = vmax.f32 %v1276_v40, 0.0  ;;  %v1049_v44 = vadd.f32 %v2491_v7, %v1048_v42  ;;  %v1280_v45 = vpop.f32.mrf.mxu1 }
 0x193   :  { %v1050_v46 = vpop.f32.mrf.mxu0 }
 0x194   :  { %v1851_v47 = vpack.c.bf16 %v1369_v43, %v1369_v43  ;;  %v1281_v48 = vadd.f32 %v1280_v45, %v1049_v44  ;;  %v1282_v49 = vpop.f32.mrf.mxu1 }
 0x195   :  { %v1051_v50 = vpop.f32.mrf.mxu0 }
 0x196   :  { %1616 = vst.msk [vmem:[%s2741_s3 + $0x8c] sm:$0xf] %vm1580_vm0, %v1851_v47  ;;  %v1370_v51 = vmax.f32 %v1281_v48, 0.0  ;;  %v1052_v52 = vadd.f32 %v2491_v7, %v1051_v50  ;;  %v1283_v53 = vpop.f32.mrf.mxu1 }
 0x197   :  { %v1053_v54 = vpop.f32.mrf.mxu0 }
 0x198   :  { %v1852_v55 = vpack.c.bf16 %v1370_v51, %v1370_v51  ;;  %v1284_v56 = vadd.f32 %v1283_v53, %v1052_v52  ;;  %v1285_v57 = vpop.f32.mrf.mxu1 }
 0x199   :  { %v1056_v58 = vpop.f32.mrf.mxu0 }
 0x19a   :  { %1617 = vst.msk [vmem:[%s2741_s3 + $0x90] sm:$0xf] %vm1580_vm0, %v1852_v55  ;;  %v1371_v59 = vmax.f32 %v1284_v56, 0.0  ;;  %v1057_v60 = vadd.f32 %v2491_v7, %v1056_v58  ;;  %v1288_v61 = vpop.f32.mrf.mxu1 }
 0x19b   :  { %v1058_v62 = vpop.f32.mrf.mxu0 }
 0x19c   :  { %v1853_v63 = vpack.c.bf16 %v1371_v59, %v1371_v59  ;;  %v1289_v0 = vadd.f32 %v1288_v61, %v1057_v60  ;;  %v1290_v1 = vpop.f32.mrf.mxu1 }
 0x19d   :  { %v1059_v2 = vpop.f32.mrf.mxu0 }
 0x19e   :  { %1618 = vst.msk [vmem:[%s2741_s3 + $0x94] sm:$0xf] %vm1580_vm0, %v1853_v63  ;;  %v1372_v3 = vmax.f32 %v1289_v0, 0.0  ;;  %v1060_v4 = vadd.f32 %v2491_v7, %v1059_v2  ;;  %v1291_v5 = vpop.f32.mrf.mxu1 }
 0x19f   :  { %v1061_v6 = vpop.f32.mrf.mxu0 }
 0x1a0   :  { %v1854_v8 = vpack.c.bf16 %v1372_v3, %v1372_v3  ;;  %v1292_v9 = vadd.f32 %v1291_v5, %v1060_v4  ;;  %v1293_v10 = vpop.f32.mrf.mxu1 }
 0x1a1   :  { %v1064_v11 = vpop.f32.mrf.mxu0 }
 0x1a2   :  { %1619 = vst.msk [vmem:[%s2741_s3 + $0x98] sm:$0xf] %vm1580_vm0, %v1854_v8  ;;  %v1373_v12 = vmax.f32 %v1292_v9, 0.0  ;;  %v1065_v13 = vadd.f32 %v2491_v7, %v1064_v11  ;;  %v1296_v14 = vpop.f32.mrf.mxu1 }
 0x1a3   :  { %v1066_v15 = vpop.f32.mrf.mxu0 }
 0x1a4   :  { %v1855_v16 = vpack.c.bf16 %v1373_v12, %v1373_v12  ;;  %v1297_v17 = vadd.f32 %v1296_v14, %v1065_v13  ;;  %v1298_v18 = vpop.f32.mrf.mxu1 }
 0x1a5   :  { %v1067_v19 = vpop.f32.mrf.mxu0 }
 0x1a6   :  { %1620 = vst.msk [vmem:[%s2741_s3 + $0x9c] sm:$0xf] %vm1580_vm0, %v1855_v16  ;;  %v1374_v20 = vmax.f32 %v1297_v17, 0.0  ;;  %v1068_v21 = vadd.f32 %v2491_v7, %v1067_v19  ;;  %v1299_v22 = vpop.f32.mrf.mxu1 }
 0x1a7   :  { %v1069_v23 = vpop.f32.mrf.mxu0 }
 0x1a8   :  { %v1856_v24 = vpack.c.bf16 %v1374_v20, %v1374_v20  ;;  %v1300_v25 = vadd.f32 %v1299_v22, %v1068_v21  ;;  %v1301_v26 = vpop.f32.mrf.mxu1 }
 0x1a9   :  { %v1072_v27 = vpop.f32.mrf.mxu0 }
 0x1aa   :  { %1621 = vst.msk [vmem:[%s2741_s3 + $0xa0] sm:$0xf] %vm1580_vm0, %v1856_v24  ;;  %v1375_v28 = vmax.f32 %v1300_v25, 0.0  ;;  %v1073_v29 = vadd.f32 %v2491_v7, %v1072_v27  ;;  %v1304_v30 = vpop.f32.mrf.mxu1 }
 0x1ab   :  { %v1074_v31 = vpop.f32.mrf.mxu0 }
 0x1ac   :  { %v1857_v32 = vpack.c.bf16 %v1375_v28, %v1375_v28  ;;  %v1305_v33 = vadd.f32 %v1304_v30, %v1073_v29  ;;  %v1306_v34 = vpop.f32.mrf.mxu1 }
 0x1ad   :  { %v1075_v35 = vpop.f32.mrf.mxu0 }
 0x1ae   :  { %1622 = vst.msk [vmem:[%s2741_s3 + $0xa4] sm:$0xf] %vm1580_vm0, %v1857_v32  ;;  %v1376_v36 = vmax.f32 %v1305_v33, 0.0  ;;  %v1076_v37 = vadd.f32 %v2491_v7, %v1075_v35  ;;  %v1307_v38 = vpop.f32.mrf.mxu1 }
 0x1af   :  { %v1077_v39 = vpop.f32.mrf.mxu0 }
 0x1b0   :  { %v1858_v40 = vpack.c.bf16 %v1376_v36, %v1376_v36  ;;  %v1308_v41 = vadd.f32 %v1307_v38, %v1076_v37  ;;  %v1309_v42 = vpop.f32.mrf.mxu1 }
 0x1b1   :  { %v1080_v43 = vpop.f32.mrf.mxu0 }
 0x1b2   :  { %1623 = vst.msk [vmem:[%s2741_s3 + $0xa8] sm:$0xf] %vm1580_vm0, %v1858_v40  ;;  %v1377_v44 = vmax.f32 %v1308_v41, 0.0  ;;  %v1081_v45 = vadd.f32 %v2491_v7, %v1080_v43  ;;  %v1312_v46 = vpop.f32.mrf.mxu1 }
 0x1b3   :  { %v1082_v47 = vpop.f32.mrf.mxu0 }
 0x1b4   :  { %v1859_v48 = vpack.c.bf16 %v1377_v44, %v1377_v44  ;;  %v1313_v49 = vadd.f32 %v1312_v46, %v1081_v45  ;;  %v1314_v50 = vpop.f32.mrf.mxu1 }
 0x1b5   :  { %v1083_v51 = vpop.f32.mrf.mxu0 }
 0x1b6   :  { %1624 = vst.msk [vmem:[%s2741_s3 + $0xac] sm:$0xf] %vm1580_vm0, %v1859_v48  ;;  %v1378_v52 = vmax.f32 %v1313_v49, 0.0  ;;  %v1084_v53 = vadd.f32 %v2491_v7, %v1083_v51  ;;  %v1315_v54 = vpop.f32.mrf.mxu1 }
 0x1b7   :  { %v1085_v55 = vpop.f32.mrf.mxu0 }
 0x1b8   :  { %v1860_v56 = vpack.c.bf16 %v1378_v52, %v1378_v52  ;;  %v1316_v57 = vadd.f32 %v1315_v54, %v1084_v53  ;;  %v1317_v58 = vpop.f32.mrf.mxu1 }
 0x1b9   :  { %v1088_v59 = vpop.f32.mrf.mxu0 }
 0x1ba   :  { %1625 = vst.msk [vmem:[%s2741_s3 + $0xb0] sm:$0xf] %vm1580_vm0, %v1860_v56  ;;  %v1379_v60 = vmax.f32 %v1316_v57, 0.0  ;;  %v1089_v61 = vadd.f32 %v2491_v7, %v1088_v59  ;;  %v1320_v62 = vpop.f32.mrf.mxu1 }
 0x1bb   :  { %v1090_v63 = vpop.f32.mrf.mxu0 }
 0x1bc   :  { %v1861_v0 = vpack.c.bf16 %v1379_v60, %v1379_v60  ;;  %v1321_v1 = vadd.f32 %v1320_v62, %v1089_v61  ;;  %v1322_v2 = vpop.f32.mrf.mxu1 }
 0x1bd   :  { %v1091_v3 = vpop.f32.mrf.mxu0 }
 0x1be   :  { %1626 = vst.msk [vmem:[%s2741_s3 + $0xb4] sm:$0xf] %vm1580_vm0, %v1861_v0  ;;  %v1380_v4 = vmax.f32 %v1321_v1, 0.0  ;;  %v1092_v5 = vadd.f32 %v2491_v7, %v1091_v3  ;;  %v1323_v6 = vpop.f32.mrf.mxu1 }
 0x1bf   :  { %v1093_v8 = vpop.f32.mrf.mxu0 }
 0x1c0   :  { %v1862_v9 = vpack.c.bf16 %v1380_v4, %v1380_v4  ;;  %v1324_v10 = vadd.f32 %v1323_v6, %v1092_v5  ;;  %v1325_v11 = vpop.f32.mrf.mxu1 }
 0x1c1   :  { %v1096_v12 = vpop.f32.mrf.mxu0 }
 0x1c2   :  { %1627 = vst.msk [vmem:[%s2741_s3 + $0xb8] sm:$0xf] %vm1580_vm0, %v1862_v9  ;;  %v1381_v13 = vmax.f32 %v1324_v10, 0.0  ;;  %v1097_v14 = vadd.f32 %v2491_v7, %v1096_v12  ;;  %v1328_v15 = vpop.f32.mrf.mxu1 }
 0x1c3   :  { %v1098_v16 = vpop.f32.mrf.mxu0 }
 0x1c4   :  { %v1863_v17 = vpack.c.bf16 %v1381_v13, %v1381_v13  ;;  %v1329_v18 = vadd.f32 %v1328_v15, %v1097_v14  ;;  %v1330_v19 = vpop.f32.mrf.mxu1 }
 0x1c5   :  { %v1099_v20 = vpop.f32.mrf.mxu0 }
 0x1c6   :  { %1628 = vst.msk [vmem:[%s2741_s3 + $0xbc] sm:$0xf] %vm1580_vm0, %v1863_v17  ;;  %v1382_v21 = vmax.f32 %v1329_v18, 0.0  ;;  %v1331_v22 = vpop.f32.mrf.mxu1 }
 0x1c7   :  { %v1100_v23 = vpop.f32.mrf.mxu0 }
 0x1c8   :  { %v1864_v24 = vpack.c.bf16 %v1382_v21, %v1382_v21  ;;  %v1332_v25 = vpop.f32.mrf.mxu1 }
 0x1ca   :  { %1629 = vst.msk [vmem:[%s2741_s3 + $0xc0] sm:$0xf] %vm1580_vm0, %v1864_v24 }

// kernel: vae_forward.10
= control target key start
LH: loop header
LB: loop body
LE: loop exit
PB: predicated region body
PF: predicated region fallthrough
CT: control target
= control target key end

     0   :  { %vm667_vm0 = vcmask 519168   ;;  %vm680_vm1 = vcmask 516096   ;;  %s1224_s1 = inlined_call_operand.vmem [shape: bf16[512,64], index: 1, kind: input, shape index: {}]   ;;  %s1225_s0 = inlined_call_operand.vmem [shape: bf16[98,512], index: 0, kind: input, shape index: {}]   ;;  %s1226_s2 = inlined_call_operand.vmem [shape: f32[1,64], index: 2, kind: input, shape index: {}]   ;;  %s1227_s3 = inlined_call_operand.vmem [shape: bf16[98,64], index: 3, kind: output, shape index: {}]  }
   0x1   :  { %v889_v0 = vld [vmem:[%s1224_s1 + $0x78] sm:$0xff]   ;;  %v893_v4 = vld [vmem:[%s1224_s1 + $0x70] sm:$0xff]   ;;  %v897_v8 = vld [vmem:[%s1224_s1 + $0x68] sm:$0xff]  }
   0x2   :  { %v890_v1 = vld [vmem:[%s1224_s1 + $0xf8] sm:$0xff]   ;;  %773 = vmatprep.subr.bf16.mxu0 %v889_v0  ;;  %v894_v5 = vld [vmem:[%s1224_s1 + $0xf0] sm:$0xff]   ;;  %v898_v9 = vld [vmem:[%s1224_s1 + $0xe8] sm:$0xff]  }
   0x3   :  { %v891_v2 = vld [vmem:[%s1224_s1 + $0x38] sm:$0xff]   ;;  %831 = vmatprep.subr.bf16.mxu1 %v890_v1  ;;  %v895_v6 = vld [vmem:[%s1224_s1 + $0x30] sm:$0xff]   ;;  %v899_v10 = vld [vmem:[%s1224_s1 + $0x28] sm:$0xff]  }
   0x4   :  { %v892_v3 = vld [vmem:[%s1224_s1 + $0xb8] sm:$0xff]   ;;  %774 = vmatpush3.bf16.msra.mxu0 %v891_v2  ;;  %v896_v7 = vld [vmem:[%s1224_s1 + $0xb0] sm:$0xff]   ;;  %v900_v11 = vld [vmem:[%s1224_s1 + $0xa8] sm:$0xff]  }
   0x5   :  { %832 = vmatpush3.bf16.msra.mxu1 %v892_v3  ;;  %775 = vmatprep.subr.bf16.mxu0 %v893_v4  ;;  %v901_v12 = vld [vmem:[%s1224_s1 + $0x60] sm:$0xff]   ;;  %v905_v16 = vld [vmem:[%s1224_s1 + $0x58] sm:$0xff]   ;;  %v909_v20 = vld [vmem:[%s1224_s1 + $0x50] sm:$0xff]  }
   0x6   :  { %833 = vmatprep.subr.bf16.mxu1 %v894_v5  ;;  %v902_v13 = vld [vmem:[%s1224_s1 + $0xe0] sm:$0xff]   ;;  %v906_v17 = vld [vmem:[%s1224_s1 + $0xd8] sm:$0xff]   ;;  %v910_v21 = vld [vmem:[%s1224_s1 + $0xd0] sm:$0xff]  }
   0x7   :  { %v903_v14 = vld [vmem:[%s1224_s1 + $0x20] sm:$0xff]   ;;  %v907_v18 = vld [vmem:[%s1224_s1 + $0x18] sm:$0xff]   ;;  %v911_v22 = vld [vmem:[%s1224_s1 + $0x10] sm:$0xff]  }
   0x8   :  { %776 = vmatpush3.bf16.msra.mxu0 %v895_v6  ;;  %v904_v15 = vld [vmem:[%s1224_s1 + $0xa0] sm:$0xff]   ;;  %v908_v19 = vld [vmem:[%s1224_s1 + $0x98] sm:$0xff]   ;;  %v912_v23 = vld [vmem:[%s1224_s1 + $0x90] sm:$0xff]  }
   0x9   :  { %834 = vmatpush3.bf16.msra.mxu1 %v896_v7  ;;  %777 = vmatprep.subr.bf16.mxu0 %v897_v8  ;;  %v913_v24 = vld [vmem:[%s1224_s1 + $0x48] sm:$0xff]   ;;  %v917_v28 = vld [vmem:[%s1224_s1 + $0x40] sm:$0xff]  }
   0xa   :  { %835 = vmatprep.subr.bf16.mxu1 %v898_v9  ;;  %v914_v25 = vld [vmem:[%s1224_s1 + $0xc8] sm:$0xff]   ;;  %v918_v29 = vld [vmem:[%s1224_s1 + $0xc0] sm:$0xff]  }
   0xb   :  { %v915_v26 = vld [vmem:[%s1224_s1 + $0x8] sm:$0xff]   ;;  %v919_v30 = vld [vmem:[%s1224_s1] sm:$0xff]  }
   0xc   :  { %778 = vmatpush3.bf16.msra.mxu0 %v899_v10  ;;  %v916_v27 = vld [vmem:[%s1224_s1 + $0x88] sm:$0xff]   ;;  %v920_v31 = vld [vmem:[%s1224_s1 + $0x80] sm:$0xff]  }
   0xd   :  { %836 = vmatpush3.bf16.msra.mxu1 %v900_v11  ;;  %779 = vmatprep.subr.bf16.mxu0 %v901_v12  ;;  %v921_v32 = vld [vmem:[%s1225_s0] ss:$16 sps:$4 sm:$0xff]   ;;  %v923_v33 = vld [vmem:[%s1225_s0 + $0x4] ss:$16 sps:$4 sm:$0xff]   ;;  %v924_v34 = vld [vmem:[%s1225_s0 + $0x8] ss:$16 sps:$4 sm:$0xff]  }
   0xe   :  { %837 = vmatprep.subr.bf16.mxu1 %v902_v13  ;;  %v926_v35 = vld [vmem:[%s1225_s0 + $0xc] ss:$16 sps:$4 sm:$0xff]   ;;  %470 = vmatprep.mubr.bf16.mxu0 %v923_v33  ;;  %v927_v36 = vld [vmem:[%s1225_s0 + $0x24] ss:$16 sps:$4 sm:$0xff]   ;;  %v931_v38 = vld [vmem:[%s1225_s0 + $0x20] ss:$16 sps:$4 sm:$0xff]  }
   0xf   :  { %558 = vmatprep.mubr.bf16.mxu1 %v926_v35  ;;  %v929_v37 = vld [vmem:[%s1225_s0 + $0x2c] ss:$16 sps:$4 sm:$0xff]   ;;  %v932_v39 = vld [vmem:[%s1225_s0 + $0x28] ss:$16 sps:$4 sm:$0xff]   ;;  %v933_v40 = vld [vmem:[%s1225_s0 + $0x44] ss:$16 sps:$4 sm:$0xff]  }
  0x10   :  { %780 = vmatpush3.bf16.msra.mxu0 %v903_v14  ;;  %v935_v41 = vld [vmem:[%s1225_s0 + $0x4c] ss:$16 sps:$4 sm:$0xff]   ;;  %v937_v42 = vld [vmem:[%s1225_s0 + $0x40] ss:$16 sps:$4 sm:$0xff]   ;;  %v938_v43 = vld [vmem:[%s1225_s0 + $0x48] ss:$16 sps:$4 sm:$0xff]  }
  0x11   :  { %838 = vmatpush3.bf16.msra.mxu1 %v904_v15  ;;  %781 = vmatprep.subr.bf16.mxu0 %v905_v16  ;;  %v939_v44 = vld [vmem:[%s1225_s0 + $0x64] ss:$16 sps:$4 sm:$0xff]   ;;  %v941_v45 = vld [vmem:[%s1225_s0 + $0x6c] ss:$16 sps:$4 sm:$0xff]   ;;  %v943_v46 = vld [vmem:[%s1225_s0 + $0x60] ss:$16 sps:$4 sm:$0xff]  }
  0x12   :  { %839 = vmatprep.subr.bf16.mxu1 %v906_v17  ;;  %v944_v47 = vld [vmem:[%s1225_s0 + $0x68] ss:$16 sps:$4 sm:$0xff]   ;;  %v945_v48 = vld [vmem:[%s1225_s0 + $0x84] ss:$16 sps:$4 sm:$0xff]   ;;  %v947_v49 = vld [vmem:[%s1225_s0 + $0x8c] ss:$16 sps:$4 sm:$0xff]  }
  0x13   :  { %v949_v50 = vld [vmem:[%s1225_s0 + $0x80] ss:$16 sps:$4 sm:$0xff]   ;;  %v950_v51 = vld [vmem:[%s1225_s0 + $0x88] ss:$16 sps:$4 sm:$0xff]   ;;  %v951_v52 = vld [vmem:[%s1225_s0 + $0xa4] ss:$16 sps:$4 sm:$0xff]  }
  0x14   :  { %782 = vmatpush3.bf16.msra.mxu0 %v907_v18  ;;  %v953_v53 = vld [vmem:[%s1225_s0 + $0xac] ss:$16 sps:$4 sm:$0xff]   ;;  %v39_v54 = vld [vmem:[%s1225_s0 + $0xc0] sm:$0x11]  ;;  %v956_v57 = vld [vmem:[%s1225_s0 + $0xa8] ss:$16 sps:$4 sm:$0xff]  }
  0x15   :  { %840 = vmatpush3.bf16.msra.mxu1 %v908_v19  ;;  %783 = vmatprep.subr.bf16.mxu0 %v909_v20  ;;  %v40_v55 = vld [vmem:[%s1225_s0 + $0xc8] sm:$0x11]  ;;  %v955_v56 = vld [vmem:[%s1225_s0 + $0xa0] ss:$16 sps:$4 sm:$0xff]   ;;  %v712_v58 = vcombine.high %v39_v54, %v39_v54  ;;  %v711_v60 = vcombine.low %v39_v54, %v39_v54 }
  0x16   :  { %841 = vmatprep.subr.bf16.mxu1 %v910_v21  ;;  %v714_v59 = vcombine.high %v40_v55, %v40_v55  ;;  %v713_v61 = vcombine.low %v40_v55, %v40_v55  ;;  %v1158_v0 = vld [vmem:[%s1226_s2] ss:$0 sm:$0xff] }
  0x18   :  { %784 = vmatpush3.bf16.msra.mxu0 %v911_v22 }
  0x19   :  { %842 = vmatpush3.bf16.msra.mxu1 %v912_v23  ;;  %785 = vmatprep.subr.bf16.mxu0 %v913_v24 }
  0x1a   :  { %843 = vmatprep.subr.bf16.mxu1 %v914_v25 }
  0x1c   :  { %786 = vmatpush3.bf16.msra.mxu0 %v915_v26 }
  0x1d   :  { %844 = vmatpush3.bf16.msra.mxu1 %v916_v27  ;;  %787 = vmatprep.subr.bf16.mxu0 %v917_v28 }
  0x1e   :  { %845 = vmatprep.subr.bf16.mxu1 %v918_v29 }
  0x20   :  { %788 = vmatpush3.bf16.msra.mxu0 %v919_v30 }
  0x21   :  { %846 = vmatpush3.bf16.msra.mxu1 %v920_v31 }
  0x23   :  { %471 = vmatmul.mubr.bf16.vlgmr.msra.gmra.mxu0 %v921_v32 }
  0x24   :  { %559 = vmatmul.mubr.bf16.vlgmr.msra.gmra.mxu1 %v924_v34  ;;  %478 = vmatprep.mubr.bf16.mxu0 %v927_v36 }
  0x25   :  { %566 = vmatprep.mubr.bf16.mxu1 %v929_v37 }
  0x2b   :  { %479 = vmatmul.mubr.bf16.gmra.mxu0 %v931_v38 }
  0x2c   :  { %567 = vmatmul.mubr.bf16.gmra.mxu1 %v932_v39  ;;  %486 = vmatprep.mubr.bf16.mxu0 %v933_v40 }
  0x2d   :  { %574 = vmatprep.mubr.bf16.mxu1 %v935_v41 }
  0x33   :  { %487 = vmatmul.mubr.bf16.gmra.mxu0 %v937_v42 }
  0x34   :  { %575 = vmatmul.mubr.bf16.gmra.mxu1 %v938_v43  ;;  %494 = vmatprep.mubr.bf16.mxu0 %v939_v44 }
  0x35   :  { %582 = vmatprep.mubr.bf16.mxu1 %v941_v45 }
  0x3b   :  { %495 = vmatmul.mubr.bf16.gmra.mxu0 %v943_v46 }
  0x3c   :  { %583 = vmatmul.mubr.bf16.gmra.mxu1 %v944_v47  ;;  %502 = vmatprep.mubr.bf16.mxu0 %v945_v48 }
  0x3d   :  { %590 = vmatprep.mubr.bf16.mxu1 %v947_v49 }
  0x43   :  { %503 = vmatmul.mubr.bf16.gmra.mxu0 %v949_v50 }
  0x44   :  { %591 = vmatmul.mubr.bf16.gmra.mxu1 %v950_v51  ;;  %510 = vmatprep.mubr.bf16.mxu0 %v951_v52 }
  0x45   :  { %598 = vmatprep.mubr.bf16.mxu1 %v953_v53 }
  0x4b   :  { %511 = vmatmul.mubr.bf16.gmra.mxu0 %v955_v56 }
  0x4c   :  { %599 = vmatmul.mubr.bf16.gmra.mxu1 %v956_v57  ;;  %518 = vmatprep.mubr.bf16.mxu0 %v712_v58 }
  0x4d   :  { %606 = vmatprep.mubr.bf16.mxu1 %v714_v59 }
  0x53   :  { %519 = vmatmul.mubr.bf16.gmra.mxu0 %v711_v60 }
  0x54   :  { %607 = vmatmul.mubr.bf16.gmra.mxu1 %v713_v61 }
  0xe3   :  { %v789_v62 = vpop.f32.mrf.mxu0 }
  0xe4   :  { %v847_v63 = vpop.f32.mrf.mxu1 }
  0xe5   :  { %v790_v1 = vpop.f32.mrf.mxu0 }
  0xe6   :  { %v791_v2 = vadd.f32 %v790_v1, %v789_v62  ;;  %v848_v3 = vpop.f32.mrf.mxu1 }
  0xe7   :  { %v792_v4 = vpop.f32.mrf.mxu0  ;;  %v849_v6 = vadd.f32 %v848_v3, %v847_v63 }
  0xe8   :  { %v473_v5 = vadd.f32 %v791_v2, %v1158_v0  ;;  %v850_v7 = vpop.f32.mrf.mxu1 }
  0xe9   :  { %v793_v8 = vpop.f32.mrf.mxu0 }
  0xea   :  { %v561_v9 = vadd.f32 %v849_v6, %v473_v5  ;;  %v794_v10 = vadd.f32 %v793_v8, %v792_v4  ;;  %v851_v11 = vpop.f32.mrf.mxu1 }
  0xeb   :  { %v795_v12 = vpop.f32.mrf.mxu0  ;;  %v852_v15 = vadd.f32 %v851_v11, %v850_v7 }
  0xec   :  { %v760_v13 = vpack.c.bf16 %v561_v9, %v561_v9  ;;  %v476_v14 = vadd.f32 %v794_v10, %v1158_v0  ;;  %v853_v16 = vpop.f32.mrf.mxu1 }
  0xed   :  { %v796_v17 = vpop.f32.mrf.mxu0 }
  0xee   :  { %668 = vst.msk [vmem:[%s1227_s3] sm:$0xf] %vm667_vm0, %v760_v13  ;;  %v564_v18 = vadd.f32 %v852_v15, %v476_v14  ;;  %v797_v19 = vadd.f32 %v796_v17, %v795_v12  ;;  %v854_v20 = vpop.f32.mrf.mxu1 }
  0xef   :  { %v798_v21 = vpop.f32.mrf.mxu0  ;;  %v855_v24 = vadd.f32 %v854_v20, %v853_v16 }
  0xf0   :  { %v761_v22 = vpack.c.bf16 %v564_v18, %v564_v18  ;;  %v481_v23 = vadd.f32 %v797_v19, %v1158_v0  ;;  %v856_v25 = vpop.f32.mrf.mxu1 }
  0xf1   :  { %v799_v26 = vpop.f32.mrf.mxu0 }
  0xf2   :  { %669 = vst.msk [vmem:[%s1227_s3 + $0x4] sm:$0xf] %vm667_vm0, %v761_v22  ;;  %v569_v27 = vadd.f32 %v855_v24, %v481_v23  ;;  %v800_v28 = vadd.f32 %v799_v26, %v798_v21  ;;  %v857_v29 = vpop.f32.mrf.mxu1 }
  0xf3   :  { %v801_v30 = vpop.f32.mrf.mxu0  ;;  %v858_v33 = vadd.f32 %v857_v29, %v856_v25 }
  0xf4   :  { %v762_v31 = vpack.c.bf16 %v569_v27, %v569_v27  ;;  %v484_v32 = vadd.f32 %v800_v28, %v1158_v0  ;;  %v859_v34 = vpop.f32.mrf.mxu1 }
  0xf5   :  { %v802_v35 = vpop.f32.mrf.mxu0 }
  0xf6   :  { %670 = vst.msk [vmem:[%s1227_s3 + $0x8] sm:$0xf] %vm667_vm0, %v762_v31  ;;  %v572_v36 = vadd.f32 %v858_v33, %v484_v32  ;;  %v803_v37 = vadd.f32 %v802_v35, %v801_v30  ;;  %v860_v38 = vpop.f32.mrf.mxu1 }
  0xf7   :  { %v804_v39 = vpop.f32.mrf.mxu0  ;;  %v861_v42 = vadd.f32 %v860_v38, %v859_v34 }
  0xf8   :  { %v763_v40 = vpack.c.bf16 %v572_v36, %v572_v36  ;;  %v489_v41 = vadd.f32 %v803_v37, %v1158_v0  ;;  %v862_v43 = vpop.f32.mrf.mxu1 }
  0xf9   :  { %v805_v44 = vpop.f32.mrf.mxu0 }
  0xfa   :  { %671 = vst.msk [vmem:[%s1227_s3 + $0xc] sm:$0xf] %vm667_vm0, %v763_v40  ;;  %v577_v45 = vadd.f32 %v861_v42, %v489_v41  ;;  %v806_v46 = vadd.f32 %v805_v44, %v804_v39  ;;  %v863_v47 = vpop.f32.mrf.mxu1 }
  0xfb   :  { %v807_v48 = vpop.f32.mrf.mxu0  ;;  %v864_v51 = vadd.f32 %v863_v47, %v862_v43 }
  0xfc   :  { %v764_v49 = vpack.c.bf16 %v577_v45, %v577_v45  ;;  %v492_v50 = vadd.f32 %v806_v46, %v1158_v0  ;;  %v865_v52 = vpop.f32.mrf.mxu1 }
  0xfd   :  { %v808_v53 = vpop.f32.mrf.mxu0 }
  0xfe   :  { %672 = vst.msk [vmem:[%s1227_s3 + $0x10] sm:$0xf] %vm667_vm0, %v764_v49  ;;  %v580_v54 = vadd.f32 %v864_v51, %v492_v50  ;;  %v809_v55 = vadd.f32 %v808_v53, %v807_v48  ;;  %v866_v56 = vpop.f32.mrf.mxu1 }
  0xff   :  { %v810_v57 = vpop.f32.mrf.mxu0  ;;  %v867_v60 = vadd.f32 %v866_v56, %v865_v52 }
 0x100   :  { %v765_v58 = vpack.c.bf16 %v580_v54, %v580_v54  ;;  %v497_v59 = vadd.f32 %v809_v55, %v1158_v0  ;;  %v868_v61 = vpop.f32.mrf.mxu1 }
 0x101   :  { %v811_v62 = vpop.f32.mrf.mxu0 }
 0x102   :  { %673 = vst.msk [vmem:[%s1227_s3 + $0x14] sm:$0xf] %vm667_vm0, %v765_v58  ;;  %v585_v63 = vadd.f32 %v867_v60, %v497_v59  ;;  %v812_v1 = vadd.f32 %v811_v62, %v810_v57  ;;  %v869_v2 = vpop.f32.mrf.mxu1 }
 0x103   :  { %v813_v3 = vpop.f32.mrf.mxu0  ;;  %v870_v6 = vadd.f32 %v869_v2, %v868_v61 }
 0x104   :  { %v766_v4 = vpack.c.bf16 %v585_v63, %v585_v63  ;;  %v500_v5 = vadd.f32 %v812_v1, %v1158_v0  ;;  %v871_v7 = vpop.f32.mrf.mxu1 }
 0x105   :  { %v814_v8 = vpop.f32.mrf.mxu0 }
 0x106   :  { %674 = vst.msk [vmem:[%s1227_s3 + $0x18] sm:$0xf] %vm667_vm0, %v766_v4  ;;  %v588_v9 = vadd.f32 %v870_v6, %v500_v5  ;;  %v815_v10 = vadd.f32 %v814_v8, %v813_v3  ;;  %v872_v11 = vpop.f32.mrf.mxu1 }
 0x107   :  { %v816_v12 = vpop.f32.mrf.mxu0  ;;  %v873_v15 = vadd.f32 %v872_v11, %v871_v7 }
 0x108   :  { %v767_v13 = vpack.c.bf16 %v588_v9, %v588_v9  ;;  %v505_v14 = vadd.f32 %v815_v10, %v1158_v0  ;;  %v874_v16 = vpop.f32.mrf.mxu1 }
 0x109   :  { %v817_v17 = vpop.f32.mrf.mxu0 }
 0x10a   :  { %675 = vst.msk [vmem:[%s1227_s3 + $0x1c] sm:$0xf] %vm667_vm0, %v767_v13  ;;  %v593_v18 = vadd.f32 %v873_v15, %v505_v14  ;;  %v818_v19 = vadd.f32 %v817_v17, %v816_v12  ;;  %v875_v20 = vpop.f32.mrf.mxu1 }
 0x10b   :  { %v819_v21 = vpop.f32.mrf.mxu0  ;;  %v876_v24 = vadd.f32 %v875_v20, %v874_v16 }
 0x10c   :  { %v768_v22 = vpack.c.bf16 %v593_v18, %v593_v18  ;;  %v508_v23 = vadd.f32 %v818_v19, %v1158_v0  ;;  %v877_v25 = vpop.f32.mrf.mxu1 }
 0x10d   :  { %v820_v26 = vpop.f32.mrf.mxu0 }
 0x10e   :  { %676 = vst.msk [vmem:[%s1227_s3 + $0x20] sm:$0xf] %vm667_vm0, %v768_v22  ;;  %v596_v27 = vadd.f32 %v876_v24, %v508_v23  ;;  %v821_v28 = vadd.f32 %v820_v26, %v819_v21  ;;  %v878_v29 = vpop.f32.mrf.mxu1 }
 0x10f   :  { %v822_v30 = vpop.f32.mrf.mxu0  ;;  %v879_v33 = vadd.f32 %v878_v29, %v877_v25 }
 0x110   :  { %v769_v31 = vpack.c.bf16 %v596_v27, %v596_v27  ;;  %v513_v32 = vadd.f32 %v821_v28, %v1158_v0  ;;  %v880_v34 = vpop.f32.mrf.mxu1 }
 0x111   :  { %v823_v35 = vpop.f32.mrf.mxu0 }
 0x112   :  { %677 = vst.msk [vmem:[%s1227_s3 + $0x24] sm:$0xf] %vm667_vm0, %v769_v31  ;;  %v601_v36 = vadd.f32 %v879_v33, %v513_v32  ;;  %v824_v37 = vadd.f32 %v823_v35, %v822_v30  ;;  %v881_v38 = vpop.f32.mrf.mxu1 }
 0x113   :  { %v825_v39 = vpop.f32.mrf.mxu0  ;;  %v882_v42 = vadd.f32 %v881_v38, %v880_v34 }
 0x114   :  { %v770_v40 = vpack.c.bf16 %v601_v36, %v601_v36  ;;  %v516_v41 = vadd.f32 %v824_v37, %v1158_v0  ;;  %v883_v43 = vpop.f32.mrf.mxu1 }
 0x115   :  { %v826_v44 = vpop.f32.mrf.mxu0 }
 0x116   :  { %678 = vst.msk [vmem:[%s1227_s3 + $0x28] sm:$0xf] %vm667_vm0, %v770_v40  ;;  %v604_v45 = vadd.f32 %v882_v42, %v516_v41  ;;  %v827_v46 = vadd.f32 %v826_v44, %v825_v39  ;;  %v884_v47 = vpop.f32.mrf.mxu1 }
 0x117   :  { %v828_v48 = vpop.f32.mrf.mxu0  ;;  %v885_v51 = vadd.f32 %v884_v47, %v883_v43 }
 0x118   :  { %v771_v49 = vpack.c.bf16 %v604_v45, %v604_v45  ;;  %v521_v50 = vadd.f32 %v827_v46, %v1158_v0  ;;  %v886_v52 = vpop.f32.mrf.mxu1 }
 0x119   :  { %v829_v53 = vpop.f32.mrf.mxu0 }
 0x11a   :  { %679 = vst.msk [vmem:[%s1227_s3 + $0x2c] sm:$0xf] %vm667_vm0, %v771_v49  ;;  %v609_v54 = vadd.f32 %v885_v51, %v521_v50  ;;  %v887_v55 = vpop.f32.mrf.mxu1 }
 0x11c   :  { %v772_v56 = vpack.c.bf16 %v609_v54, %v609_v54 }
 0x11e   :  { %681 = vst.msk [vmem:[%s1227_s3 + $0x30] sm:$0x1] %vm680_vm1, %v772_v56 }

// kernel: vae_forward.12
= control target key start
LH: loop header
LB: loop body
LE: loop exit
PB: predicated region body
PF: predicated region fallthrough
CT: control target
= control target key end

     0   :  { %v1161_v1 = vmov 0   ;;  %vm301_vm0 = vcmask 130048   ;;  %v1162_v26 = vmov 0.0   ;;  %vm1163_vm1 = vmmov 0   ;;  %s1389_s1 = inlined_call_operand.vmem [shape: bf16[16,3136], index: 1, kind: input, shape index: {}]   ;;  %s1390_s0 = inlined_call_operand.vmem [shape: bf16[2,16], index: 0, kind: input, shape index: {}]   ;;  %s1391_s2 = inlined_call_operand.vmem [shape: f32[1,3136], index: 2, kind: input, shape index: {}]   ;;  %s1392_s3 = inlined_call_operand.vmem [shape: bf16[2,3136], index: 3, kind: output, shape index: {}]  }
   0x1   :  { %v1124_v0 = vld [vmem:[%s1389_s1 + $0x4] ss:$100 sps:$4 sm:$0xff]   ;;  %337 = vmatprep.mubr.bf16.mxu0 %v1161_v1  ;;  %378 = vmatprep.mubr.bf16.mxu1 %v1161_v1  ;;  %v1126_v2 = vld [vmem:[%s1389_s1 + $0xc] ss:$100 sps:$4 sm:$0xff]   ;;  %v1202_v5 = vld [vmem:[%s1390_s0] sm:$0x1]  ;;  %v50_v28 = vlaneseq }
   0x2   :  { %319 = vmatprep.subr.bf16.mxu0 %v1124_v0  ;;  %v1128_v3 = vld [vmem:[%s1389_s1] ss:$100 sps:$4 sm:$0xff]   ;;  %v1129_v4 = vld [vmem:[%s1389_s1 + $0x8] ss:$100 sps:$4 sm:$0xff]   ;;  %360 = vmatprep.subr.bf16.mxu1 %v1126_v2  ;;  %v1130_v6 = vld [vmem:[%s1389_s1 + $0x10] ss:$100 sps:$4 sm:$0xff]  }
   0x3   :  { %320 = vmatpush1.bf16.msra.mxu0 %v1128_v3  ;;  %361 = vmatpush1.bf16.msra.mxu1 %v1129_v4  ;;  %v1132_v7 = vld [vmem:[%s1389_s1 + $0x14] ss:$100 sps:$4 sm:$0xff]   ;;  %v1135_v9 = vld [vmem:[%s1389_s1 + $0x1c] ss:$100 sps:$4 sm:$0xff]   ;;  %v1138_v10 = vld [vmem:[%s1389_s1 + $0x24] ss:$100 sps:$4 sm:$0xff]  }
   0x4   :  { %v1133_v8 = vld [vmem:[%s1389_s1 + $0x18] ss:$100 sps:$4 sm:$0xff]   ;;  %401 = vmatprep.subr.bf16.mxu0 %v1132_v7  ;;  %442 = vmatprep.subr.bf16.mxu1 %v1135_v9  ;;  %v1141_v11 = vld [vmem:[%s1389_s1 + $0x2c] ss:$100 sps:$4 sm:$0xff]   ;;  %v1136_v12 = vld [vmem:[%s1389_s1 + $0x20] ss:$100 sps:$4 sm:$0xff]  }
   0x5   :  { %v1139_v13 = vld [vmem:[%s1389_s1 + $0x28] ss:$100 sps:$4 sm:$0xff]   ;;  %v1144_v14 = vld [vmem:[%s1389_s1 + $0x34] ss:$100 sps:$4 sm:$0xff]   ;;  %v1147_v15 = vld [vmem:[%s1389_s1 + $0x3c] ss:$100 sps:$4 sm:$0xff]  }
   0x6   :  { %1087 = vmatmul.mubr.msk.bf16.vlgmr.msra.gmra.mxu0 %vm301_vm0, %v1202_v5  ;;  %1088 = vmatmul.mubr.msk.bf16.vlgmr.msra.gmra.mxu1 %vm301_vm0, %v1202_v5  ;;  %v1142_v16 = vld [vmem:[%s1389_s1 + $0x30] ss:$100 sps:$4 sm:$0xff]   ;;  %v1145_v17 = vld [vmem:[%s1389_s1 + $0x38] ss:$100 sps:$4 sm:$0xff]   ;;  %v1150_v18 = vld [vmem:[%s1389_s1 + $0x44] ss:$100 sps:$4 sm:$0xff]  }
   0x7   :  { %402 = vmatpush1.bf16.msra.mxu0 %v1130_v6  ;;  %443 = vmatpush1.bf16.msra.mxu1 %v1133_v8  ;;  %v1153_v19 = vld [vmem:[%s1389_s1 + $0x4c] ss:$100 sps:$4 sm:$0xff]   ;;  %v1148_v20 = vld [vmem:[%s1389_s1 + $0x40] ss:$100 sps:$4 sm:$0xff]   ;;  %v1156_v22 = vld [vmem:[%s1389_s1 + $0x54] ss:$100 sps:$4 sm:$0xff]  }
   0x8   :  { %419 = vmatprep.mubr.bf16.mxu0 %v1161_v1  ;;  %460 = vmatprep.mubr.bf16.mxu1 %v1161_v1  ;;  %v1151_v21 = vld [vmem:[%s1389_s1 + $0x48] ss:$100 sps:$4 sm:$0xff]   ;;  %v1159_v23 = vld [vmem:[%s1389_s1 + $0x5c] ss:$100 sps:$4 sm:$0xff]   ;;  %v1154_v24 = vld [vmem:[%s1389_s1 + $0x50] ss:$100 sps:$4 sm:$0xff]  }
   0x9   :  { %483 = vmatprep.subr.bf16.mxu0 %v1138_v10  ;;  %524 = vmatprep.subr.bf16.mxu1 %v1141_v11  ;;  %v1157_v25 = vld [vmem:[%s1389_s1 + $0x58] ss:$100 sps:$4 sm:$0xff]   ;;  %v1160_v27 = vld [vmem:[%s1389_s1 + $0x60] ss:$100 sps:$4 sm:$0xff]   ;;  %v51_v29 = vshrl.u32 %v50_v28, 7  ;;  %vm1055_vm2 = vcmask 516096  }
   0xa   :  { %v42_v34 = vld [vmem:[%s1391_s2] sm:$0xff]  ;;  %v1164_v35 = vmov 1966171168  }
   0xb   :  { %v1303_v30 = vsub.s32 2, %v51_v29  ;;  %v1305_v31 = vsub.s32 1, %v51_v29  ;;  %v1307_v32 = vsub.s32 3, %v51_v29  ;;  %v1309_v33 = vsub.s32 0, %v51_v29 }
   0xc   :  { %v892_v36 = vunpack.c.l.s4 %v1164_v35  ;;  %v1318_v43 = vsub.s32 6, %v51_v29  ;;  %v1320_v47 = vsub.s32 4, %v51_v29  ;;  %v1322_v48 = vsub.s32 5, %v51_v29 }
   0xd   :  { %v61_v37 = vrot.slane %v42_v34, %v1303_v30  ;;  %v57_v38 = vrot.slane %v42_v34, %v1305_v31  ;;  %v65_v39 = vrot.slane %v42_v34, %v1307_v32  ;;  %v53_v40 = vrot.slane %v42_v34, %v1309_v33 }
   0xe   :  { %1089 = vmatmul.mubr.msk.bf16.vlgmr.msra.gmra.mxu0 %vm301_vm0, %v1202_v5  ;;  %1090 = vmatmul.mubr.msk.bf16.vlgmr.msra.gmra.mxu1 %vm301_vm0, %v1202_v5  ;;  %v893_v45 = vunpack.c.0.s8 %v892_v36  ;;  %v1324_v52 = vsub.s32 7, %v51_v29  ;;  %v77_v56 = vrot.slane %v42_v34, %v1318_v43  ;;  %v69_v62 = vrot.slane %v42_v34, %v1320_v47 }
   0xf   :  { %484 = vmatpush1.bf16.msra.mxu0 %v1136_v12  ;;  %525 = vmatpush1.bf16.msra.mxu1 %v1139_v13  ;;  %v73_v63 = vrot.slane %v42_v34, %v1322_v48 }
  0x10   :  { %501 = vmatprep.mubr.bf16.mxu0 %v1161_v1  ;;  %542 = vmatprep.mubr.bf16.mxu1 %v1161_v1  ;;  %v1327_v58 = vsub.s32 %v893_v45, %v51_v29  ;;  %v81_v0 = vrot.slane %v42_v34, %v1324_v52 }
  0x11   :  { %565 = vmatprep.subr.bf16.mxu0 %v1144_v14  ;;  %606 = vmatprep.subr.bf16.mxu1 %v1147_v15  ;;  %v43_v15 = vld [vmem:[%s1391_s2 + $0x8] sm:$0xff] }
  0x16   :  { %1091 = vmatmul.mubr.msk.bf16.vlgmr.msra.gmra.mxu0 %vm301_vm0, %v1202_v5  ;;  %1092 = vmatmul.mubr.msk.bf16.vlgmr.msra.gmra.mxu1 %vm301_vm0, %v1202_v5 }
  0x17   :  { %566 = vmatpush1.bf16.msra.mxu0 %v1142_v16  ;;  %607 = vmatpush1.bf16.msra.mxu1 %v1145_v17 }
  0x18   :  { %583 = vmatprep.mubr.bf16.mxu0 %v1161_v1  ;;  %624 = vmatprep.mubr.bf16.mxu1 %v1161_v1 }
  0x19   :  { %647 = vmatprep.subr.bf16.mxu0 %v1150_v18  ;;  %688 = vmatprep.subr.bf16.mxu1 %v1153_v19  ;;  %v93_v18 = vrot.slane %v43_v15, %v1303_v30  ;;  %v89_v19 = vrot.slane %v43_v15, %v1305_v31 }
  0x1e   :  { %1093 = vmatmul.mubr.msk.bf16.vlgmr.msra.gmra.mxu0 %vm301_vm0, %v1202_v5  ;;  %1094 = vmatmul.mubr.msk.bf16.vlgmr.msra.gmra.mxu1 %vm301_vm0, %v1202_v5 }
  0x1f   :  { %648 = vmatpush1.bf16.msra.mxu0 %v1148_v20  ;;  %689 = vmatpush1.bf16.msra.mxu1 %v1151_v21 }
  0x20   :  { %665 = vmatprep.mubr.bf16.mxu0 %v1161_v1  ;;  %706 = vmatprep.mubr.bf16.mxu1 %v1161_v1 }
  0x21   :  { %729 = vmatprep.subr.bf16.mxu0 %v1156_v22  ;;  %770 = vmatprep.subr.bf16.mxu1 %v1159_v23  ;;  %v97_v23 = vrot.slane %v43_v15, %v1307_v32 }
  0x26   :  { %1095 = vmatmul.mubr.msk.bf16.vlgmr.msra.gmra.mxu0 %vm301_vm0, %v1202_v5  ;;  %1096 = vmatmul.mubr.msk.bf16.vlgmr.msra.gmra.mxu1 %vm301_vm0, %v1202_v5 }
  0x27   :  { %730 = vmatpush1.bf16.msra.mxu0 %v1154_v24  ;;  %771 = vmatpush1.bf16.msra.mxu1 %v1157_v25  ;;  %v85_v24 = vrot.slane %v43_v15, %v1309_v33 }
  0x28   :  { %747 = vmatprep.mubr.bf16.mxu0 %v1161_v1  ;;  %788 = vmatprep.mubr.bf16.mxu1 %v1161_v1 }
  0x29   :  { %1114 = vmatprep.subr.bf16.mxu0 %v1162_v26 }
  0x2e   :  { %1097 = vmatmul.mubr.msk.bf16.vlgmr.msra.gmra.mxu0 %vm301_vm0, %v1202_v5  ;;  %1098 = vmatmul.mubr.msk.bf16.vlgmr.msra.gmra.mxu1 %vm301_vm0, %v1202_v5 }
  0x2f   :  { %1115 = vmatpush3.bf16.msra.mxu0 %v1160_v27  ;;  %1116 = vmatprep.mubr.msk.bf16.mxu0 %vm1163_vm1, %v1162_v26 }
  0x36   :  { %1117 = vmatmul.mubr.msk.bf16.vlgmr.msra.gmra.mxu0 %vm301_vm0, %v1202_v5 }
  0xc6   :  { %v339_v41 = vpop.f32.mrf.mxu0  ;;  %v380_v42 = vpop.f32.mrf.mxu1 }
  0xc7   :  { %v381_v49 = vadd.f32 %v380_v42, %v61_v37  ;;  %v340_v53 = vadd.f32 %v339_v41, %v53_v40 }
  0xc8   :  { %v341_v44 = vpop.f32.mrf.mxu0  ;;  %v382_v46 = vpop.f32.mrf.mxu1 }
  0xc9   :  { %v342_v50 = vadd.f32 %v341_v44, %v57_v38  ;;  %v383_v51 = vadd.f32 %v382_v46, %v65_v39  ;;  %v109_v44 = vrot.slane %v43_v15, %v1318_v43 }
  0xca   :  { %v343_v54 = vpop.f32.mrf.mxu0  ;;  %v384_v55 = vpop.f32.mrf.mxu1 }
  0xcb   :  { %v1100_v57 = vpack.c.bf16 %v342_v50, %v340_v53  ;;  %v1101_v61 = vpack.c.bf16 %v383_v51, %v381_v49  ;;  %v101_v51 = vrot.slane %v43_v15, %v1320_v47  ;;  %v105_v53 = vrot.slane %v43_v15, %v1322_v48 }
  0xcc   :  { %v344_v59 = vpop.f32.mrf.mxu0  ;;  %v385_v60 = vpop.f32.mrf.mxu1  ;;  %v113_v54 = vrot.slane %v43_v15, %v1324_v52 }
  0xcd   :  { %v897_v4 = vrot.slane %v1100_v57, %v1327_v58  ;;  %v904_v7 = vrot.slane %v1101_v61, %v1327_v58 }
  0xce   :  { %v421_v1 = vpop.f32.mrf.mxu0  ;;  %v462_v2 = vpop.f32.mrf.mxu1 }
  0xcf   :  { %v463_v3 = vadd.f32 %v462_v2, %v77_v56  ;;  %v422_v8 = vadd.f32 %v421_v1, %v69_v62  ;;  %v919_v20 = vcombine.low %v897_v4, %v904_v7 }
  0xd0   :  { %v423_v5 = vpop.f32.mrf.mxu0  ;;  %v464_v6 = vpop.f32.mrf.mxu1 }
  0xd1   :  { %v424_v9 = vadd.f32 %v423_v5, %v73_v63  ;;  %v465_v10 = vadd.f32 %v464_v6, %v81_v0  ;;  %v927_v35 = vrot.slane %v919_v20, %v1327_v58  ;;  %v44_v6 = vld [vmem:[%s1391_s2 + $0x10] sm:$0xff] }
  0xd2   :  { %v425_v11 = vpop.f32.mrf.mxu0  ;;  %v466_v12 = vpop.f32.mrf.mxu1  ;;  %v117_v15 = vrot.slane %v44_v6, %v1309_v33 }
  0xd3   :  { %v1102_v13 = vpack.c.bf16 %v424_v9, %v422_v8  ;;  %v1103_v14 = vpack.c.bf16 %v465_v10, %v463_v3  ;;  %v125_v10 = vrot.slane %v44_v6, %v1303_v30 }
  0xd4   :  { %v426_v16 = vpop.f32.mrf.mxu0  ;;  %v467_v17 = vpop.f32.mrf.mxu1 }
  0xd5   :  { %v911_v21 = vrot.slane %v1102_v13, %v1327_v58  ;;  %v918_v22 = vrot.slane %v1103_v14, %v1327_v58  ;;  %v121_v13 = vrot.slane %v44_v6, %v1305_v31  ;;  %v129_v14 = vrot.slane %v44_v6, %v1307_v32 }
  0xd6   :  { %v503_v25 = vpop.f32.mrf.mxu0  ;;  %v544_v26 = vpop.f32.mrf.mxu1  ;;  %v141_v32 = vrot.slane %v44_v6, %v1318_v43 }
  0xd7   :  { %v920_v27 = vcombine.low %v911_v21, %v918_v22  ;;  %v545_v28 = vadd.f32 %v544_v26, %v93_v18  ;;  %v504_v39 = vadd.f32 %v503_v25, %v85_v24 }
  0xd8   :  { %v505_v29 = vpop.f32.mrf.mxu0  ;;  %v546_v34 = vpop.f32.mrf.mxu1 }
  0xd9   :  { %v934_v36 = vrot.slane %v920_v27, %v1327_v58  ;;  %v506_v37 = vadd.f32 %v505_v29, %v89_v19  ;;  %v547_v38 = vadd.f32 %v546_v34, %v97_v23 }
  0xda   :  { %v507_v40 = vpop.f32.mrf.mxu0  ;;  %v548_v41 = vpop.f32.mrf.mxu1 }
  0xdb   :  { %v935_v42 = vcombine.low %v927_v35, %v934_v36  ;;  %v1104_v45 = vpack.c.bf16 %v506_v37, %v504_v39  ;;  %v1105_v46 = vpack.c.bf16 %v547_v38, %v545_v28  ;;  %v133_v35 = vrot.slane %v44_v6, %v1320_v47 }
  0xdc   :  { %v508_v49 = vpop.f32.mrf.mxu0  ;;  %v549_v50 = vpop.f32.mrf.mxu1  ;;  %v137_v36 = vrot.slane %v44_v6, %v1322_v48  ;;  %v145_v37 = vrot.slane %v44_v6, %v1324_v52  ;;  %v1061_v52 = vld [vmem:[%s1391_s2 + $0x18] ss:$0 sm:$0xff] }
  0xdd   :  { %1052 = vst [vmem:[%s1392_s3] sm:$0xff] %v935_v42  ;;  %v946_v59 = vrot.slane %v1104_v45, %v1327_v58  ;;  %v953_v60 = vrot.slane %v1105_v46, %v1327_v58 }
  0xde   :  { %v585_v55 = vpop.f32.mrf.mxu0  ;;  %v626_v56 = vpop.f32.mrf.mxu1 }
  0xdf   :  { %v627_v57 = vadd.f32 %v626_v56, %v109_v44  ;;  %v586_v63 = vadd.f32 %v585_v55, %v101_v51  ;;  %v968_v7 = vcombine.low %v946_v59, %v953_v60 }
  0xe0   :  { %v587_v61 = vpop.f32.mrf.mxu0  ;;  %v628_v62 = vpop.f32.mrf.mxu1 }
  0xe1   :  { %v588_v0 = vadd.f32 %v587_v61, %v105_v53  ;;  %v629_v1 = vadd.f32 %v628_v62, %v113_v54  ;;  %v976_v19 = vrot.slane %v968_v7, %v1327_v58 }
  0xe2   :  { %v589_v2 = vpop.f32.mrf.mxu0  ;;  %v630_v3 = vpop.f32.mrf.mxu1 }
  0xe3   :  { %v1106_v4 = vpack.c.bf16 %v588_v0, %v586_v63  ;;  %v1107_v5 = vpack.c.bf16 %v629_v1, %v627_v57 }
  0xe4   :  { %v590_v8 = vpop.f32.mrf.mxu0  ;;  %v631_v9 = vpop.f32.mrf.mxu1 }
  0xe5   :  { %v960_v11 = vrot.slane %v1106_v4, %v1327_v58  ;;  %v967_v12 = vrot.slane %v1107_v5, %v1327_v58 }
  0xe6   :  { %v667_v16 = vpop.f32.mrf.mxu0  ;;  %v708_v17 = vpop.f32.mrf.mxu1 }
  0xe7   :  { %v969_v18 = vcombine.low %v960_v11, %v967_v12  ;;  %v709_v30 = vadd.f32 %v708_v17, %v125_v10  ;;  %v668_v25 = vadd.f32 %v667_v16, %v117_v15 }
  0xe8   :  { %v669_v20 = vpop.f32.mrf.mxu0  ;;  %v710_v21 = vpop.f32.mrf.mxu1 }
  0xe9   :  { %v983_v22 = vrot.slane %v969_v18, %v1327_v58  ;;  %v670_v23 = vadd.f32 %v669_v20, %v121_v13  ;;  %v711_v24 = vadd.f32 %v710_v21, %v129_v14 }
  0xea   :  { %v671_v26 = vpop.f32.mrf.mxu0  ;;  %v712_v27 = vpop.f32.mrf.mxu1 }
  0xeb   :  { %v984_v31 = vcombine.low %v976_v19, %v983_v22  ;;  %v1108_v28 = vpack.c.bf16 %v670_v23, %v668_v25  ;;  %v1109_v34 = vpack.c.bf16 %v711_v24, %v709_v30 }
  0xec   :  { %v672_v33 = vpop.f32.mrf.mxu0  ;;  %v713_v29 = vpop.f32.mrf.mxu1 }
  0xed   :  { %1053 = vst [vmem:[%s1392_s3 + $0x8] sm:$0xff] %v984_v31  ;;  %v995_v41 = vrot.slane %v1108_v28, %v1327_v58  ;;  %v1002_v44 = vrot.slane %v1109_v34, %v1327_v58 }
  0xee   :  { %v749_v38 = vpop.f32.mrf.mxu0  ;;  %v790_v39 = vpop.f32.mrf.mxu1 }
  0xef   :  { %v791_v40 = vadd.f32 %v790_v39, %v141_v32  ;;  %v750_v45 = vadd.f32 %v749_v38, %v133_v35  ;;  %v1017_v55 = vcombine.low %v995_v41, %v1002_v44 }
  0xf0   :  { %v751_v43 = vpop.f32.mrf.mxu0  ;;  %v792_v42 = vpop.f32.mrf.mxu1 }
  0xf1   :  { %v752_v46 = vadd.f32 %v751_v43, %v137_v36  ;;  %v793_v49 = vadd.f32 %v792_v42, %v145_v37  ;;  %v1025_v63 = vrot.slane %v1017_v55, %v1327_v58 }
  0xf2   :  { %v753_v50 = vpop.f32.mrf.mxu0  ;;  %v794_v51 = vpop.f32.mrf.mxu1 }
  0xf3   :  { %v1110_v53 = vpack.c.bf16 %v752_v46, %v750_v45  ;;  %v1111_v47 = vpack.c.bf16 %v793_v49, %v791_v40 }
  0xf4   :  { %v754_v54 = vpop.f32.mrf.mxu0  ;;  %v795_v48 = vpop.f32.mrf.mxu1 }
  0xf5   :  { %v1009_v56 = vrot.slane %v1110_v53, %v1327_v58  ;;  %v1016_v57 = vrot.slane %v1111_v47, %v1327_v58 }
  0xf6   :  { %v831_v59 = vpop.f32.mrf.mxu0 }
  0xf7   :  { %v1018_v60 = vcombine.low %v1009_v56, %v1016_v57  ;;  %v832_v61 = vadd.f32 %v1061_v52, %v831_v59 }
  0xf8   :  { %v1118_v62 = vpop.f32.mrf.mxu0 }
  0xf9   :  { %v1032_v0 = vrot.slane %v1018_v60, %v1327_v58  ;;  %v861_v1 = vpack.c.bf16 %v832_v61, %v832_v61 }
  0xfa   :  { %v834_v2 = vpop.f32.mrf.mxu0 }
  0xfb   :  { %v1033_v3 = vcombine.low %v1025_v63, %v1032_v0  ;;  %v1040_v4 = vrot.slane %v861_v1, %v1327_v58 }
  0xfc   :  { %v1119_v5 = vpop.f32.mrf.mxu0 }
  0xfd   :  { %1054 = vst [vmem:[%s1392_s3 + $0x10] sm:$0xff] %v1033_v3  ;;  %v1047_v6 = vrot.slane %v1040_v4, %v1327_v58 }
  0xff   :  { %1056 = vst.msk [vmem:[%s1392_s3 + $0x18] sm:$0x1] %vm1055_vm2, %v1047_v6 }

// kernel: vae_forward.11
= control target key start
LH: loop header
LB: loop body
LE: loop exit
PB: predicated region body
PF: predicated region fallthrough
CT: control target
= control target key end

     0   :  { %v2995_v21 = vmov 1966171168   ;;  %v426_v23 = vlaneseq  ;;  %vm2997_vm0 = vmmov 0   ;;  %vm1783_vm1 = vcmask 523264   ;;  %s3660_s1 = inlined_call_operand.vmem [shape: bf16[3136,32], index: 1, kind: input, shape index: {}]   ;;  %s3661_s0 = inlined_call_operand.vmem [shape: bf16[2,3136], index: 0, kind: input, shape index: {}]   ;;  %s3662_s2 = inlined_call_operand.vmem [shape: f32[1,32], index: 2, kind: input, shape index: {}]   ;;  %s3663_s3 = inlined_call_operand.vmem [shape: f32[2,32], index: 3, kind: output, shape index: {}]  }
   0x1   :  { %v2796_v0 = vld [vmem:[%s3660_s1 + $0x78] sm:$0xff]   ;;  %v2800_v4 = vld [vmem:[%s3660_s1 + $0x70] sm:$0xff]   ;;  %v2804_v8 = vld [vmem:[%s3660_s1 + $0x68] sm:$0xff]   ;;  %v424_v22 = vunpack.c.l.s4 %v2995_v21  ;;  %vm2307_vm2 = vcmask 254976  }
   0x2   :  { %v2797_v1 = vld [vmem:[%s3660_s1 + $0x38] sm:$0xff]   ;;  %2512 = vmatprep.subr.bf16.mxu0 %v2796_v0  ;;  %v2801_v5 = vld [vmem:[%s3660_s1 + $0x30] sm:$0xff]   ;;  %v2805_v9 = vld [vmem:[%s3660_s1 + $0x28] sm:$0xff]   ;;  %v427_v29 = vshrl.u32 %v426_v23, 7 }
   0x3   :  { %v2798_v2 = vld [vmem:[%s3660_s1 + $0xf8] sm:$0xff]   ;;  %2513 = vmatpush3.bf16.msra.mxu0 %v2797_v1  ;;  %v2802_v6 = vld [vmem:[%s3660_s1 + $0xf0] sm:$0xff]   ;;  %v2806_v10 = vld [vmem:[%s3660_s1 + $0xe8] sm:$0xff]   ;;  %v425_v28 = vunpack.c.0.s8 %v424_v22 }
   0x4   :  { %v2799_v3 = vld [vmem:[%s3660_s1 + $0xb8] sm:$0xff]   ;;  %2534 = vmatprep.subr.bf16.mxu1 %v2798_v2  ;;  %2514 = vmatprep.subr.bf16.mxu0 %v2800_v4  ;;  %v2803_v7 = vld [vmem:[%s3660_s1 + $0xb0] sm:$0xff]   ;;  %v2807_v11 = vld [vmem:[%s3660_s1 + $0xa8] sm:$0xff]  }
   0x5   :  { %2535 = vmatpush3.bf16.msra.mxu1 %v2799_v3  ;;  %v2808_v12 = vld [vmem:[%s3660_s1 + $0x60] sm:$0xff]   ;;  %v2812_v16 = vld [vmem:[%s3660_s1 + $0x58] sm:$0xff]   ;;  %v2816_v20 = vld [vmem:[%s3660_s1 + $0x50] sm:$0xff]   ;;  %v3105_v34 = vsub.s32 %v425_v28, %v427_v29 }
   0x6   :  { %2536 = vmatprep.subr.bf16.mxu1 %v2802_v6  ;;  %v2809_v13 = vld [vmem:[%s3660_s1 + $0x20] sm:$0xff]   ;;  %v2813_v17 = vld [vmem:[%s3660_s1 + $0x18] sm:$0xff]   ;;  %v2817_v24 = vld [vmem:[%s3660_s1 + $0x10] sm:$0xff]  }
   0x7   :  { %2515 = vmatpush3.bf16.msra.mxu0 %v2801_v5  ;;  %v2810_v14 = vld [vmem:[%s3660_s1 + $0xe0] sm:$0xff]   ;;  %v2814_v18 = vld [vmem:[%s3660_s1 + $0xd8] sm:$0xff]   ;;  %v2818_v25 = vld [vmem:[%s3660_s1 + $0xd0] sm:$0xff]  }
   0x8   :  { %2516 = vmatprep.subr.bf16.mxu0 %v2804_v8  ;;  %v2811_v15 = vld [vmem:[%s3660_s1 + $0xa0] sm:$0xff]   ;;  %v2815_v19 = vld [vmem:[%s3660_s1 + $0x98] sm:$0xff]   ;;  %v2819_v26 = vld [vmem:[%s3660_s1 + $0x90] sm:$0xff]  }
   0x9   :  { %2537 = vmatpush3.bf16.msra.mxu1 %v2803_v7  ;;  %v2820_v27 = vld [vmem:[%s3660_s1 + $0x48] sm:$0xff]   ;;  %v2824_v33 = vld [vmem:[%s3660_s1 + $0x40] sm:$0xff]   ;;  %v2829_v41 = vld [vmem:[%s3660_s1 + $0x178] sm:$0xff]  }
   0xa   :  { %2538 = vmatprep.subr.bf16.mxu1 %v2806_v10  ;;  %v2821_v30 = vld [vmem:[%s3660_s1 + $0x8] sm:$0xff]   ;;  %v2825_v35 = vld [vmem:[%s3660_s1] sm:$0xff]   ;;  %v2831_v45 = vld [vmem:[%s3660_s1 + $0x1f8] sm:$0xff]  }
   0xb   :  { %2517 = vmatpush3.bf16.msra.mxu0 %v2805_v9  ;;  %v2822_v31 = vld [vmem:[%s3660_s1 + $0xc8] sm:$0xff]   ;;  %v2826_v36 = vld [vmem:[%s3660_s1 + $0xc0] sm:$0xff]   ;;  %v2830_v47 = vld [vmem:[%s3660_s1 + $0x138] sm:$0xff]  }
   0xc   :  { %2518 = vmatprep.subr.bf16.mxu0 %v2808_v12  ;;  %v2823_v32 = vld [vmem:[%s3660_s1 + $0x88] sm:$0xff]   ;;  %v15_v37 = vld [vmem:[%s3661_s0] sm:$0xff]  ;;  %v2833_v50 = vld [vmem:[%s3660_s1 + $0x170] sm:$0xff]  }
   0xd   :  { %2539 = vmatpush3.bf16.msra.mxu1 %v2807_v11  ;;  %v422_v38 = vcombine.high %v15_v37, %v15_v37  ;;  %v429_v39 = vrot.slane %v15_v37, %v3105_v34  ;;  %v2828_v40 = vld [vmem:[%s3660_s1 + $0x80] sm:$0xff]   ;;  %v2832_v52 = vld [vmem:[%s3660_s1 + $0x1b8] sm:$0xff]   ;;  %v2835_v54 = vld [vmem:[%s3660_s1 + $0x1f0] sm:$0xff]  }
   0xe   :  { %2540 = vmatprep.subr.bf16.mxu1 %v2810_v14  ;;  %v2834_v55 = vld [vmem:[%s3660_s1 + $0x130] sm:$0xff]   ;;  %v2837_v57 = vld [vmem:[%s3660_s1 + $0x168] sm:$0xff]   ;;  %v2841_v61 = vld [vmem:[%s3660_s1 + $0x160] sm:$0xff]  }
   0xf   :  { %2519 = vmatpush3.bf16.msra.mxu0 %v2809_v13  ;;  %v437_v42 = vcombine.high %v429_v39, %v429_v39  ;;  %v445_v43 = vrot.slane %v429_v39, %v3105_v34  ;;  %v3125_v44 = vrot.slane %v422_v38, %v3105_v34  ;;  %v2836_v58 = vld [vmem:[%s3660_s1 + $0x1b0] sm:$0xff]   ;;  %v2839_v59 = vld [vmem:[%s3660_s1 + $0x1e8] sm:$0xff]   ;;  %v2843_v63 = vld [vmem:[%s3660_s1 + $0x1e0] sm:$0xff]  }
  0x10   :  { %2520 = vmatprep.subr.bf16.mxu0 %v2812_v16  ;;  %v2838_v60 = vld [vmem:[%s3660_s1 + $0x128] sm:$0xff]   ;;  %v2842_v0 = vld [vmem:[%s3660_s1 + $0x120] sm:$0xff]   ;;  %v2845_v1 = vld [vmem:[%s3660_s1 + $0x158] sm:$0xff]  }
  0x11   :  { %2541 = vmatpush3.bf16.msra.mxu1 %v2811_v15  ;;  %v459_v46 = vrot.slane %v437_v42, %v3105_v34  ;;  %v438_v48 = vcombine.high %v3125_v44, %v3125_v44  ;;  %v467_v49 = vcombine.high %v445_v43, %v445_v43  ;;  %v2840_v62 = vld [vmem:[%s3660_s1 + $0x1a8] sm:$0xff]   ;;  %v2844_v2 = vld [vmem:[%s3660_s1 + $0x1a0] sm:$0xff]   ;;  %v2847_v3 = vld [vmem:[%s3660_s1 + $0x1d8] sm:$0xff]  }
  0x12   :  { %2542 = vmatprep.subr.bf16.mxu1 %v2814_v18  ;;  %v2846_v4 = vld [vmem:[%s3660_s1 + $0x118] sm:$0xff]   ;;  %v2849_v5 = vld [vmem:[%s3660_s1 + $0x150] sm:$0xff]   ;;  %v2853_v9 = vld [vmem:[%s3660_s1 + $0x148] sm:$0xff]  }
  0x13   :  { %2521 = vmatpush3.bf16.msra.mxu0 %v2813_v17  ;;  %1819 = vmatprep.mubr.bf16.mxu0 %v459_v46  ;;  %v469_v51 = vcombine.high %v459_v46, %v459_v46  ;;  %v466_v53 = vrot.slane %v438_v48, %v3105_v34  ;;  %v2848_v6 = vld [vmem:[%s3660_s1 + $0x198] sm:$0xff]   ;;  %v2851_v7 = vld [vmem:[%s3660_s1 + $0x1d0] sm:$0xff]   ;;  %v2855_v11 = vld [vmem:[%s3660_s1 + $0x1c8] sm:$0xff]   ;;  %v452_v17 = vrot.slane %v3125_v44, %v3105_v34 }
  0x14   :  { %2522 = vmatprep.subr.bf16.mxu0 %v2816_v20  ;;  %v2850_v8 = vld [vmem:[%s3660_s1 + $0x110] sm:$0xff]   ;;  %v2854_v12 = vld [vmem:[%s3660_s1 + $0x108] sm:$0xff]   ;;  %v2857_v13 = vld [vmem:[%s3660_s1 + $0x140] sm:$0xff]  }
  0x15   :  { %2543 = vmatpush3.bf16.msra.mxu1 %v2815_v19  ;;  %1859 = vmatprep.mubr.bf16.mxu1 %v469_v51  ;;  %v470_v56 = vcombine.high %v466_v53, %v466_v53  ;;  %v2852_v10 = vld [vmem:[%s3660_s1 + $0x190] sm:$0xff]   ;;  %v2856_v14 = vld [vmem:[%s3660_s1 + $0x188] sm:$0xff]   ;;  %v2859_v15 = vld [vmem:[%s3660_s1 + $0x1c0] sm:$0xff]   ;;  %v468_v22 = vcombine.high %v452_v17, %v452_v17 }
  0x16   :  { %2544 = vmatprep.subr.bf16.mxu1 %v2818_v25  ;;  %v2858_v16 = vld [vmem:[%s3660_s1 + $0x100] sm:$0xff]   ;;  %v2861_v18 = vld [vmem:[%s3660_s1 + $0x278] sm:$0xff]   ;;  %v2865_v23 = vld [vmem:[%s3660_s1 + $0x270] sm:$0xff]  }
  0x17   :  { %2523 = vmatpush3.bf16.msra.mxu0 %v2817_v24  ;;  %v2860_v19 = vld [vmem:[%s3660_s1 + $0x180] sm:$0xff]   ;;  %v2863_v20 = vld [vmem:[%s3660_s1 + $0x2f8] sm:$0xff]   ;;  %v2867_v25 = vld [vmem:[%s3660_s1 + $0x2f0] sm:$0xff]  }
  0x18   :  { %2524 = vmatprep.subr.bf16.mxu0 %v2820_v27  ;;  %v2862_v21 = vld [vmem:[%s3660_s1 + $0x238] sm:$0xff]   ;;  %v2869_v27 = vld [vmem:[%s3660_s1 + $0x268] sm:$0xff]   ;;  %v2868_v28 = vld [vmem:[%s3660_s1 + $0x2b0] sm:$0xff]  }
  0x19   :  { %2545 = vmatpush3.bf16.msra.mxu1 %v2819_v26  ;;  %v2864_v24 = vld [vmem:[%s3660_s1 + $0x2b8] sm:$0xff]   ;;  %v2866_v26 = vld [vmem:[%s3660_s1 + $0x230] sm:$0xff]   ;;  %v2871_v29 = vld [vmem:[%s3660_s1 + $0x2e8] sm:$0xff]  }
  0x1a   :  { %2546 = vmatprep.subr.bf16.mxu1 %v2822_v31  ;;  %v2873_v31 = vld [vmem:[%s3660_s1 + $0x260] sm:$0xff]   ;;  %v2879_v38 = vld [vmem:[%s3660_s1 + $0x2d8] sm:$0xff]   ;;  %v2883_v42 = vld [vmem:[%s3660_s1 + $0x2d0] sm:$0xff]  }
  0x1b   :  { %2525 = vmatpush3.bf16.msra.mxu0 %v2821_v30  ;;  %v2870_v30 = vld [vmem:[%s3660_s1 + $0x228] sm:$0xff]   ;;  %v2876_v37 = vld [vmem:[%s3660_s1 + $0x2a0] sm:$0xff]   ;;  %v2878_v39 = vld [vmem:[%s3660_s1 + $0x218] sm:$0xff]  }
  0x1c   :  { %2526 = vmatprep.subr.bf16.mxu0 %v2824_v33  ;;  %v2875_v33 = vld [vmem:[%s3660_s1 + $0x2e0] sm:$0xff]   ;;  %v2885_v44 = vld [vmem:[%s3660_s1 + $0x248] sm:$0xff]  }
  0x1d   :  { %2547 = vmatpush3.bf16.msra.mxu1 %v2823_v32  ;;  %v2872_v32 = vld [vmem:[%s3660_s1 + $0x2a8] sm:$0xff]   ;;  %v2889_v48 = vld [vmem:[%s3660_s1 + $0x240] sm:$0xff]  }
  0x1e   :  { %2548 = vmatprep.subr.bf16.mxu1 %v2826_v36  ;;  %v2877_v36 = vld [vmem:[%s3660_s1 + $0x258] sm:$0xff]   ;;  %v2887_v46 = vld [vmem:[%s3660_s1 + $0x2c8] sm:$0xff]  }
  0x1f   :  { %2527 = vmatpush3.bf16.msra.mxu0 %v2825_v35  ;;  %v2874_v35 = vld [vmem:[%s3660_s1 + $0x220] sm:$0xff]   ;;  %v16_v51 = vld [vmem:[%s3661_s0 + $0x8] sm:$0xff] }
  0x20   :  { %2556 = vmatprep.subr.bf16.mxu0 %v2829_v41  ;;  %v2880_v41 = vld [vmem:[%s3660_s1 + $0x298] sm:$0xff]  }
  0x21   :  { %2549 = vmatpush3.bf16.msra.mxu1 %v2828_v40  ;;  %v2881_v40 = vld [vmem:[%s3660_s1 + $0x250] sm:$0xff]  }
  0x22   :  { %2578 = vmatprep.subr.bf16.mxu1 %v2831_v45  ;;  %1820 = vmatmul.mubr.bf16.vlgmr.msra.gmra.mxu0 %v445_v43  ;;  %v2882_v43 = vld [vmem:[%s3660_s1 + $0x210] sm:$0xff]  }
  0x23   :  { %2557 = vmatpush3.bf16.msra.mxu0 %v2830_v47  ;;  %1899 = vmatprep.mubr.bf16.mxu0 %v466_v53  ;;  %v2884_v45 = vld [vmem:[%s3660_s1 + $0x290] sm:$0xff]   ;;  %v2886_v47 = vld [vmem:[%s3660_s1 + $0x208] sm:$0xff]   ;;  %v478_v53 = vrot.slane %v16_v51, %v3105_v34 }
  0x24   :  { %1860 = vmatmul.mubr.bf16.vlgmr.msra.gmra.mxu1 %v467_v49  ;;  %2558 = vmatprep.subr.bf16.mxu0 %v2833_v50  ;;  %v2888_v49 = vld [vmem:[%s3660_s1 + $0x288] sm:$0xff]   ;;  %v2891_v50 = vld [vmem:[%s3660_s1 + $0x2c0] sm:$0xff]  }
  0x25   :  { %2579 = vmatpush3.bf16.msra.mxu1 %v2832_v52  ;;  %1939 = vmatprep.mubr.bf16.mxu1 %v470_v56  ;;  %v2890_v52 = vld [vmem:[%s3660_s1 + $0x200] sm:$0xff]   ;;  %v486_v56 = vcombine.high %v478_v53, %v478_v53 }
  0x26   :  { %2580 = vmatprep.subr.bf16.mxu1 %v2835_v54  ;;  %v471_v54 = vcombine.high %v16_v51, %v16_v51  ;;  %v2942_v51 = vld [vmem:[%s3660_s1 + $0x458] sm:$0xff]  }
  0x27   :  { %2559 = vmatpush3.bf16.msra.mxu0 %v2834_v55  ;;  %v2893_v55 = vld [vmem:[%s3660_s1 + $0x378] sm:$0xff]  }
  0x28   :  { %2560 = vmatprep.subr.bf16.mxu0 %v2837_v57  ;;  %v2892_v57 = vld [vmem:[%s3660_s1 + $0x280] sm:$0xff]  }
  0x29   :  { %2581 = vmatpush3.bf16.msra.mxu1 %v2836_v58  ;;  %v494_v58 = vrot.slane %v478_v53, %v3105_v34  ;;  %v2944_v53 = vld [vmem:[%s3660_s1 + $0x4d8] sm:$0xff]  }
  0x2a   :  { %2582 = vmatprep.subr.bf16.mxu1 %v2839_v59  ;;  %v3331_v59 = vrot.slane %v471_v54, %v3105_v34  ;;  %v2943_v54 = vld [vmem:[%s3660_s1 + $0x418] sm:$0xff]  }
  0x2b   :  { %2561 = vmatpush3.bf16.msra.mxu0 %v2838_v60  ;;  %v2895_v60 = vld [vmem:[%s3660_s1 + $0x3f8] sm:$0xff]  }
  0x2c   :  { %2562 = vmatprep.subr.bf16.mxu0 %v2841_v61  ;;  %v508_v61 = vrot.slane %v486_v56, %v3105_v34  ;;  %v2945_v56 = vld [vmem:[%s3660_s1 + $0x498] sm:$0xff]  }
  0x2d   :  { %2583 = vmatpush3.bf16.msra.mxu1 %v2840_v62  ;;  %v2894_v62 = vld [vmem:[%s3660_s1 + $0x338] sm:$0xff]  }
  0x2e   :  { %2584 = vmatprep.subr.bf16.mxu1 %v2843_v63  ;;  %v487_v63 = vcombine.high %v3331_v59, %v3331_v59 }
  0x2f   :  { %2563 = vmatpush3.bf16.msra.mxu0 %v2842_v0  ;;  %v516_v0 = vcombine.high %v494_v58, %v494_v58 }
  0x30   :  { %2564 = vmatprep.subr.bf16.mxu0 %v2845_v1  ;;  %v2897_v1 = vld [vmem:[%s3660_s1 + $0x370] sm:$0xff]  }
  0x31   :  { %2585 = vmatpush3.bf16.msra.mxu1 %v2844_v2  ;;  %v518_v2 = vcombine.high %v508_v61, %v508_v61 }
  0x32   :  { %2586 = vmatprep.subr.bf16.mxu1 %v2847_v3  ;;  %v2896_v3 = vld [vmem:[%s3660_s1 + $0x3b8] sm:$0xff]  }
  0x33   :  { %2565 = vmatpush3.bf16.msra.mxu0 %v2846_v4  ;;  %v515_v4 = vrot.slane %v487_v63, %v3105_v34  ;;  %v2954_v63 = vld [vmem:[%s3660_s1 + $0x440] sm:$0xff]  }
  0x34   :  { %2566 = vmatprep.subr.bf16.mxu0 %v2849_v5  ;;  %v2899_v5 = vld [vmem:[%s3660_s1 + $0x3f0] sm:$0xff]  }
  0x35   :  { %2587 = vmatpush3.bf16.msra.mxu1 %v2848_v6  ;;  %v2898_v6 = vld [vmem:[%s3660_s1 + $0x330] sm:$0xff]  }
  0x36   :  { %2588 = vmatprep.subr.bf16.mxu1 %v2851_v7  ;;  %v519_v7 = vcombine.high %v515_v4, %v515_v4 }
  0x37   :  { %2567 = vmatpush3.bf16.msra.mxu0 %v2850_v8  ;;  %v2901_v8 = vld [vmem:[%s3660_s1 + $0x368] sm:$0xff]  }
  0x38   :  { %2568 = vmatprep.subr.bf16.mxu0 %v2853_v9  ;;  %v2900_v9 = vld [vmem:[%s3660_s1 + $0x3b0] sm:$0xff]  }
  0x39   :  { %2589 = vmatpush3.bf16.msra.mxu1 %v2852_v10  ;;  %v2903_v10 = vld [vmem:[%s3660_s1 + $0x3e8] sm:$0xff]  }
  0x3a   :  { %2590 = vmatprep.subr.bf16.mxu1 %v2855_v11  ;;  %v2902_v11 = vld [vmem:[%s3660_s1 + $0x328] sm:$0xff]  }
  0x3b   :  { %2569 = vmatpush3.bf16.msra.mxu0 %v2854_v12  ;;  %v2905_v12 = vld [vmem:[%s3660_s1 + $0x360] sm:$0xff]  }
  0x3c   :  { %2570 = vmatprep.subr.bf16.mxu0 %v2857_v13  ;;  %v2904_v13 = vld [vmem:[%s3660_s1 + $0x3a8] sm:$0xff]  }
  0x3d   :  { %2591 = vmatpush3.bf16.msra.mxu1 %v2856_v14  ;;  %v2907_v14 = vld [vmem:[%s3660_s1 + $0x3e0] sm:$0xff]  }
  0x3e   :  { %2592 = vmatprep.subr.bf16.mxu1 %v2859_v15  ;;  %v2906_v15 = vld [vmem:[%s3660_s1 + $0x320] sm:$0xff]  }
  0x3f   :  { %2571 = vmatpush3.bf16.msra.mxu0 %v2858_v16  ;;  %v2909_v16 = vld [vmem:[%s3660_s1 + $0x358] sm:$0xff]  }
  0x40   :  { %2600 = vmatprep.subr.bf16.mxu0 %v2861_v18  ;;  %v2911_v18 = vld [vmem:[%s3660_s1 + $0x3d8] sm:$0xff]  }
  0x41   :  { %2593 = vmatpush3.bf16.msra.mxu1 %v2860_v19  ;;  %v2910_v19 = vld [vmem:[%s3660_s1 + $0x318] sm:$0xff]  }
  0x42   :  { %1900 = vmatmul.mubr.bf16.vlgmr.msra.gmra.mxu0 %v452_v17  ;;  %2622 = vmatprep.subr.bf16.mxu1 %v2863_v20  ;;  %v2908_v17 = vld [vmem:[%s3660_s1 + $0x3a0] sm:$0xff]   ;;  %v2913_v20 = vld [vmem:[%s3660_s1 + $0x350] sm:$0xff]  }
  0x43   :  { %2601 = vmatpush3.bf16.msra.mxu0 %v2862_v21  ;;  %1979 = vmatprep.mubr.bf16.mxu0 %v508_v61  ;;  %v2912_v21 = vld [vmem:[%s3660_s1 + $0x398] sm:$0xff]   ;;  %v2952_v61 = vld [vmem:[%s3660_s1 + $0x4c8] sm:$0xff]  }
  0x44   :  { %1940 = vmatmul.mubr.bf16.vlgmr.msra.gmra.mxu1 %v468_v22  ;;  %2602 = vmatprep.subr.bf16.mxu0 %v2865_v23  ;;  %v2915_v22 = vld [vmem:[%s3660_s1 + $0x3d0] sm:$0xff]  }
  0x45   :  { %2623 = vmatpush3.bf16.msra.mxu1 %v2864_v24  ;;  %2019 = vmatprep.mubr.bf16.mxu1 %v518_v2  ;;  %v2914_v23 = vld [vmem:[%s3660_s1 + $0x310] sm:$0xff]   ;;  %v2917_v24 = vld [vmem:[%s3660_s1 + $0x348] sm:$0xff]  }
  0x46   :  { %2624 = vmatprep.subr.bf16.mxu1 %v2867_v25  ;;  %v2916_v25 = vld [vmem:[%s3660_s1 + $0x390] sm:$0xff]  }
  0x47   :  { %2603 = vmatpush3.bf16.msra.mxu0 %v2866_v26  ;;  %v2919_v26 = vld [vmem:[%s3660_s1 + $0x3c8] sm:$0xff]   ;;  %v17_v2 = vld [vmem:[%s3661_s0 + $0x10] sm:$0xff] }
  0x48   :  { %2604 = vmatprep.subr.bf16.mxu0 %v2869_v27  ;;  %v2918_v27 = vld [vmem:[%s3660_s1 + $0x308] sm:$0xff]  }
  0x49   :  { %2625 = vmatpush3.bf16.msra.mxu1 %v2868_v28  ;;  %v2921_v28 = vld [vmem:[%s3660_s1 + $0x340] sm:$0xff]  }
  0x4a   :  { %2626 = vmatprep.subr.bf16.mxu1 %v2871_v29  ;;  %v2920_v29 = vld [vmem:[%s3660_s1 + $0x388] sm:$0xff]  }
  0x4b   :  { %2605 = vmatpush3.bf16.msra.mxu0 %v2870_v30  ;;  %v2923_v30 = vld [vmem:[%s3660_s1 + $0x3c0] sm:$0xff]  }
  0x4c   :  { %2606 = vmatprep.subr.bf16.mxu0 %v2873_v31  ;;  %v2922_v31 = vld [vmem:[%s3660_s1 + $0x300] sm:$0xff]  }
  0x4d   :  { %2627 = vmatpush3.bf16.msra.mxu1 %v2872_v32  ;;  %v501_v32 = vrot.slane %v3331_v59, %v3105_v34  ;;  %v2950_v59 = vld [vmem:[%s3660_s1 + $0x448] sm:$0xff]  }
  0x4e   :  { %2628 = vmatprep.subr.bf16.mxu1 %v2875_v33  ;;  %v2926_v33 = vld [vmem:[%s3660_s1 + $0x478] sm:$0xff]  }
  0x4f   :  { %2607 = vmatpush3.bf16.msra.mxu0 %v2874_v35  ;;  %v2925_v35 = vld [vmem:[%s3660_s1 + $0x380] sm:$0xff]  }
  0x50   :  { %2608 = vmatprep.subr.bf16.mxu0 %v2877_v36  ;;  %v2928_v36 = vld [vmem:[%s3660_s1 + $0x4f8] sm:$0xff]  }
  0x51   :  { %2629 = vmatpush3.bf16.msra.mxu1 %v2876_v37  ;;  %v2927_v37 = vld [vmem:[%s3660_s1 + $0x438] sm:$0xff]  }
  0x52   :  { %2630 = vmatprep.subr.bf16.mxu1 %v2879_v38  ;;  %v517_v38 = vcombine.high %v501_v32, %v501_v32 }
  0x53   :  { %2609 = vmatpush3.bf16.msra.mxu0 %v2878_v39  ;;  %v2930_v39 = vld [vmem:[%s3660_s1 + $0x470] sm:$0xff]  }
  0x54   :  { %2610 = vmatprep.subr.bf16.mxu0 %v2881_v40  ;;  %v2929_v40 = vld [vmem:[%s3660_s1 + $0x4b8] sm:$0xff]  }
  0x55   :  { %2631 = vmatpush3.bf16.msra.mxu1 %v2880_v41  ;;  %v2932_v41 = vld [vmem:[%s3660_s1 + $0x4f0] sm:$0xff]  }
  0x56   :  { %2632 = vmatprep.subr.bf16.mxu1 %v2883_v42  ;;  %v2931_v42 = vld [vmem:[%s3660_s1 + $0x430] sm:$0xff]  }
  0x57   :  { %2611 = vmatpush3.bf16.msra.mxu0 %v2882_v43  ;;  %v2934_v43 = vld [vmem:[%s3660_s1 + $0x468] sm:$0xff]  }
  0x58   :  { %2612 = vmatprep.subr.bf16.mxu0 %v2885_v44  ;;  %v2933_v44 = vld [vmem:[%s3660_s1 + $0x4b0] sm:$0xff]  }
  0x59   :  { %2633 = vmatpush3.bf16.msra.mxu1 %v2884_v45  ;;  %v2936_v45 = vld [vmem:[%s3660_s1 + $0x4e8] sm:$0xff]  }
  0x5a   :  { %2634 = vmatprep.subr.bf16.mxu1 %v2887_v46  ;;  %v2935_v46 = vld [vmem:[%s3660_s1 + $0x428] sm:$0xff]  }
  0x5b   :  { %2613 = vmatpush3.bf16.msra.mxu0 %v2886_v47  ;;  %v2938_v47 = vld [vmem:[%s3660_s1 + $0x460] sm:$0xff]  }
  0x5c   :  { %2614 = vmatprep.subr.bf16.mxu0 %v2889_v48  ;;  %v2937_v48 = vld [vmem:[%s3660_s1 + $0x4a8] sm:$0xff]  }
  0x5d   :  { %2635 = vmatpush3.bf16.msra.mxu1 %v2888_v49  ;;  %v2940_v49 = vld [vmem:[%s3660_s1 + $0x4e0] sm:$0xff]  }
  0x5e   :  { %2636 = vmatprep.subr.bf16.mxu1 %v2891_v50  ;;  %v2939_v50 = vld [vmem:[%s3660_s1 + $0x420] sm:$0xff]  }
  0x5f   :  { %2615 = vmatpush3.bf16.msra.mxu0 %v2890_v52  ;;  %v2941_v52 = vld [vmem:[%s3660_s1 + $0x4a0] sm:$0xff]  }
  0x60   :  { %2644 = vmatprep.subr.bf16.mxu0 %v2893_v55  ;;  %v2946_v55 = vld [vmem:[%s3660_s1 + $0x450] sm:$0xff]  }
  0x61   :  { %2637 = vmatpush3.bf16.msra.mxu1 %v2892_v57  ;;  %v2948_v57 = vld [vmem:[%s3660_s1 + $0x4d0] sm:$0xff]  }
  0x62   :  { %1980 = vmatmul.mubr.bf16.vlgmr.msra.gmra.mxu0 %v494_v58  ;;  %2666 = vmatprep.subr.bf16.mxu1 %v2895_v60  ;;  %v2947_v58 = vld [vmem:[%s3660_s1 + $0x410] sm:$0xff]  }
  0x63   :  { %2645 = vmatpush3.bf16.msra.mxu0 %v2894_v62  ;;  %2059 = vmatprep.mubr.bf16.mxu0 %v515_v4  ;;  %v2949_v60 = vld [vmem:[%s3660_s1 + $0x490] sm:$0xff]   ;;  %v2951_v62 = vld [vmem:[%s3660_s1 + $0x408] sm:$0xff]   ;;  %v527_v4 = vrot.slane %v17_v2, %v3105_v34 }
  0x64   :  { %2020 = vmatmul.mubr.bf16.vlgmr.msra.gmra.mxu1 %v516_v0  ;;  %2646 = vmatprep.subr.bf16.mxu0 %v2897_v1  ;;  %v2953_v0 = vld [vmem:[%s3660_s1 + $0x488] sm:$0xff]   ;;  %v2956_v1 = vld [vmem:[%s3660_s1 + $0x4c0] sm:$0xff]  }
  0x65   :  { %2667 = vmatpush3.bf16.msra.mxu1 %v2896_v3  ;;  %2099 = vmatprep.mubr.bf16.mxu1 %v519_v7  ;;  %v2955_v3 = vld [vmem:[%s3660_s1 + $0x400] sm:$0xff]   ;;  %v535_v7 = vcombine.high %v527_v4, %v527_v4 }
  0x66   :  { %2668 = vmatprep.subr.bf16.mxu1 %v2899_v5  ;;  %v520_v5 = vcombine.high %v17_v2, %v17_v2 }
  0x67   :  { %2647 = vmatpush3.bf16.msra.mxu0 %v2898_v6  ;;  %v2958_v6 = vld [vmem:[%s3660_s1 + $0x578] sm:$0xff]  }
  0x68   :  { %2648 = vmatprep.subr.bf16.mxu0 %v2901_v8  ;;  %v2957_v8 = vld [vmem:[%s3660_s1 + $0x480] sm:$0xff]  }
  0x69   :  { %2669 = vmatpush3.bf16.msra.mxu1 %v2900_v9  ;;  %v543_v9 = vrot.slane %v527_v4, %v3105_v34 }
  0x6a   :  { %2670 = vmatprep.subr.bf16.mxu1 %v2903_v10  ;;  %v3537_v10 = vrot.slane %v520_v5, %v3105_v34 }
  0x6b   :  { %2649 = vmatpush3.bf16.msra.mxu0 %v2902_v11  ;;  %v2960_v11 = vld [vmem:[%s3660_s1 + $0x5f8] sm:$0xff]  }
  0x6c   :  { %2650 = vmatprep.subr.bf16.mxu0 %v2905_v12  ;;  %v557_v12 = vrot.slane %v535_v7, %v3105_v34 }
  0x6d   :  { %2671 = vmatpush3.bf16.msra.mxu1 %v2904_v13  ;;  %v2959_v13 = vld [vmem:[%s3660_s1 + $0x538] sm:$0xff]  }
  0x6e   :  { %2672 = vmatprep.subr.bf16.mxu1 %v2907_v14  ;;  %v536_v14 = vcombine.high %v3537_v10, %v3537_v10 }
  0x6f   :  { %2651 = vmatpush3.bf16.msra.mxu0 %v2906_v15  ;;  %v565_v15 = vcombine.high %v543_v9, %v543_v9 }
  0x70   :  { %2652 = vmatprep.subr.bf16.mxu0 %v2909_v16  ;;  %v2962_v16 = vld [vmem:[%s3660_s1 + $0x570] sm:$0xff]  }
  0x71   :  { %2673 = vmatpush3.bf16.msra.mxu1 %v2908_v17  ;;  %v567_v17 = vcombine.high %v557_v12, %v557_v12 }
  0x72   :  { %2674 = vmatprep.subr.bf16.mxu1 %v2911_v18  ;;  %v2961_v18 = vld [vmem:[%s3660_s1 + $0x5b8] sm:$0xff]  }
  0x73   :  { %2653 = vmatpush3.bf16.msra.mxu0 %v2910_v19  ;;  %v564_v19 = vrot.slane %v536_v14, %v3105_v34 }
  0x74   :  { %2654 = vmatprep.subr.bf16.mxu0 %v2913_v20  ;;  %v2964_v20 = vld [vmem:[%s3660_s1 + $0x5f0] sm:$0xff]  }
  0x75   :  { %2675 = vmatpush3.bf16.msra.mxu1 %v2912_v21  ;;  %v2963_v21 = vld [vmem:[%s3660_s1 + $0x530] sm:$0xff]  }
  0x76   :  { %2676 = vmatprep.subr.bf16.mxu1 %v2915_v22  ;;  %v568_v22 = vcombine.high %v564_v19, %v564_v19 }
  0x77   :  { %2655 = vmatpush3.bf16.msra.mxu0 %v2914_v23  ;;  %v2966_v23 = vld [vmem:[%s3660_s1 + $0x568] sm:$0xff]  }
  0x78   :  { %2656 = vmatprep.subr.bf16.mxu0 %v2917_v24  ;;  %v2965_v24 = vld [vmem:[%s3660_s1 + $0x5b0] sm:$0xff]  }
  0x79   :  { %2677 = vmatpush3.bf16.msra.mxu1 %v2916_v25  ;;  %v2968_v25 = vld [vmem:[%s3660_s1 + $0x5e8] sm:$0xff]  }
  0x7a   :  { %2678 = vmatprep.subr.bf16.mxu1 %v2919_v26  ;;  %v2967_v26 = vld [vmem:[%s3660_s1 + $0x528] sm:$0xff]  }
  0x7b   :  { %2657 = vmatpush3.bf16.msra.mxu0 %v2918_v27  ;;  %v2970_v27 = vld [vmem:[%s3660_s1 + $0x560] sm:$0xff]  }
  0x7c   :  { %2658 = vmatprep.subr.bf16.mxu0 %v2921_v28  ;;  %v2969_v28 = vld [vmem:[%s3660_s1 + $0x5a8] sm:$0xff]  }
  0x7d   :  { %2679 = vmatpush3.bf16.msra.mxu1 %v2920_v29  ;;  %v2972_v29 = vld [vmem:[%s3660_s1 + $0x5e0] sm:$0xff]  }
  0x7e   :  { %2680 = vmatprep.subr.bf16.mxu1 %v2923_v30  ;;  %v2971_v30 = vld [vmem:[%s3660_s1 + $0x520] sm:$0xff]  }
  0x7f   :  { %2659 = vmatpush3.bf16.msra.mxu0 %v2922_v31  ;;  %v2974_v31 = vld [vmem:[%s3660_s1 + $0x558] sm:$0xff]  }
  0x80   :  { %2688 = vmatprep.subr.bf16.mxu0 %v2926_v33  ;;  %v2976_v33 = vld [vmem:[%s3660_s1 + $0x5d8] sm:$0xff]  }
  0x81   :  { %2681 = vmatpush3.bf16.msra.mxu1 %v2925_v35  ;;  %v2975_v35 = vld [vmem:[%s3660_s1 + $0x518] sm:$0xff]  }
  0x82   :  { %2060 = vmatmul.mubr.bf16.vlgmr.msra.gmra.mxu0 %v501_v32  ;;  %2710 = vmatprep.subr.bf16.mxu1 %v2928_v36  ;;  %v2973_v32 = vld [vmem:[%s3660_s1 + $0x5a0] sm:$0xff]   ;;  %v2978_v36 = vld [vmem:[%s3660_s1 + $0x550] sm:$0xff]  }
  0x83   :  { %2689 = vmatpush3.bf16.msra.mxu0 %v2927_v37  ;;  %2139 = vmatprep.mubr.bf16.mxu0 %v557_v12  ;;  %v2977_v37 = vld [vmem:[%s3660_s1 + $0x598] sm:$0xff]  }
  0x84   :  { %2100 = vmatmul.mubr.bf16.vlgmr.msra.gmra.mxu1 %v517_v38  ;;  %2690 = vmatprep.subr.bf16.mxu0 %v2930_v39  ;;  %v2980_v38 = vld [vmem:[%s3660_s1 + $0x5d0] sm:$0xff]  }
  0x85   :  { %2711 = vmatpush3.bf16.msra.mxu1 %v2929_v40  ;;  %2179 = vmatprep.mubr.bf16.mxu1 %v567_v17  ;;  %v2979_v39 = vld [vmem:[%s3660_s1 + $0x510] sm:$0xff]   ;;  %v2982_v40 = vld [vmem:[%s3660_s1 + $0x548] sm:$0xff]  }
  0x86   :  { %2712 = vmatprep.subr.bf16.mxu1 %v2932_v41  ;;  %v2981_v41 = vld [vmem:[%s3660_s1 + $0x590] sm:$0xff]  }
  0x87   :  { %2691 = vmatpush3.bf16.msra.mxu0 %v2931_v42  ;;  %v2984_v42 = vld [vmem:[%s3660_s1 + $0x5c8] sm:$0xff]  }
  0x88   :  { %2692 = vmatprep.subr.bf16.mxu0 %v2934_v43  ;;  %v2983_v43 = vld [vmem:[%s3660_s1 + $0x508] sm:$0xff]  }
  0x89   :  { %2713 = vmatpush3.bf16.msra.mxu1 %v2933_v44  ;;  %v2986_v44 = vld [vmem:[%s3660_s1 + $0x540] sm:$0xff]  }
  0x8a   :  { %2714 = vmatprep.subr.bf16.mxu1 %v2936_v45  ;;  %v2985_v45 = vld [vmem:[%s3660_s1 + $0x588] sm:$0xff]  }
  0x8b   :  { %2693 = vmatpush3.bf16.msra.mxu0 %v2935_v46  ;;  %v2988_v46 = vld [vmem:[%s3660_s1 + $0x5c0] sm:$0xff]  }
  0x8c   :  { %2694 = vmatprep.subr.bf16.mxu0 %v2938_v47  ;;  %v2987_v47 = vld [vmem:[%s3660_s1 + $0x500] sm:$0xff]  }
  0x8d   :  { %2715 = vmatpush3.bf16.msra.mxu1 %v2937_v48  ;;  %v550_v48 = vrot.slane %v3537_v10, %v3105_v34 }
  0x8e   :  { %2716 = vmatprep.subr.bf16.mxu1 %v2940_v49  ;;  %v2990_v49 = vld [vmem:[%s3660_s1 + $0x580] sm:$0xff]  }
  0x8f   :  { %2695 = vmatpush3.bf16.msra.mxu0 %v2939_v50  ;;  %v2991_v50 = vld [vmem:[%s3660_s1 + $0x618] sm:$0xff]  }
  0x90   :  { %2696 = vmatprep.subr.bf16.mxu0 %v2942_v51  ;;  %v2996_v51 = vmov 0.0  }
  0x91   :  { %2717 = vmatpush3.bf16.msra.mxu1 %v2941_v52  ;;  %v566_v52 = vcombine.high %v550_v48, %v550_v48 }
  0x92   :  { %2718 = vmatprep.subr.bf16.mxu1 %v2944_v53  ;;  %v2992_v53 = vld [vmem:[%s3660_s1 + $0x610] sm:$0xff]  }
  0x93   :  { %2697 = vmatpush3.bf16.msra.mxu0 %v2943_v54  ;;  %v2993_v54 = vld [vmem:[%s3660_s1 + $0x608] sm:$0xff]  }
  0x94   :  { %2698 = vmatprep.subr.bf16.mxu0 %v2946_v55  ;;  %v2994_v55 = vld [vmem:[%s3660_s1 + $0x600] sm:$0xff]  }
  0x95   :  { %2719 = vmatpush3.bf16.msra.mxu1 %v2945_v56  ;;  %v2314_v56 = vld.sshfl [vmem:[%s3661_s0 + $0x18] sm:$0x1 pattern:$0x75316420] }
  0x96   :  { %2720 = vmatprep.subr.bf16.mxu1 %v2948_v57  ;;  %v582_v57 = vrot.slane %v2314_v56, %v3105_v34 }
  0x97   :  { %2699 = vmatpush3.bf16.msra.mxu0 %v2947_v58 }
  0x98   :  { %2700 = vmatprep.subr.bf16.mxu0 %v2950_v59  ;;  %v2313_v59 = vld [vmem:[%s3662_s2] ss:$0 sm:$0xff] }
  0x99   :  { %2721 = vmatpush3.bf16.msra.mxu1 %v2949_v60 }
  0x9a   :  { %2722 = vmatprep.subr.bf16.mxu1 %v2952_v61 }
  0x9b   :  { %2701 = vmatpush3.bf16.msra.mxu0 %v2951_v62 }
  0x9c   :  { %2702 = vmatprep.subr.bf16.mxu0 %v2954_v63 }
  0x9d   :  { %2723 = vmatpush3.bf16.msra.mxu1 %v2953_v0 }
  0x9e   :  { %2724 = vmatprep.subr.bf16.mxu1 %v2956_v1 }
  0x9f   :  { %2703 = vmatpush3.bf16.msra.mxu0 %v2955_v3 }
  0xa0   :  { %2732 = vmatprep.subr.bf16.mxu0 %v2958_v6 }
  0xa1   :  { %2725 = vmatpush3.bf16.msra.mxu1 %v2957_v8 }
  0xa2   :  { %2140 = vmatmul.mubr.bf16.vlgmr.msra.gmra.mxu0 %v543_v9  ;;  %2754 = vmatprep.subr.bf16.mxu1 %v2960_v11 }
  0xa3   :  { %2733 = vmatpush3.bf16.msra.mxu0 %v2959_v13  ;;  %2219 = vmatprep.mubr.bf16.mxu0 %v564_v19 }
  0xa4   :  { %2180 = vmatmul.mubr.bf16.vlgmr.msra.gmra.mxu1 %v565_v15  ;;  %2734 = vmatprep.subr.bf16.mxu0 %v2962_v16 }
  0xa5   :  { %2755 = vmatpush3.bf16.msra.mxu1 %v2961_v18  ;;  %2259 = vmatprep.mubr.bf16.mxu1 %v568_v22 }
  0xa6   :  { %2756 = vmatprep.subr.bf16.mxu1 %v2964_v20 }
  0xa7   :  { %2735 = vmatpush3.bf16.msra.mxu0 %v2963_v21 }
  0xa8   :  { %2736 = vmatprep.subr.bf16.mxu0 %v2966_v23 }
  0xa9   :  { %2757 = vmatpush3.bf16.msra.mxu1 %v2965_v24 }
  0xaa   :  { %2758 = vmatprep.subr.bf16.mxu1 %v2968_v25 }
  0xab   :  { %2737 = vmatpush3.bf16.msra.mxu0 %v2967_v26 }
  0xac   :  { %2738 = vmatprep.subr.bf16.mxu0 %v2970_v27 }
  0xad   :  { %2759 = vmatpush3.bf16.msra.mxu1 %v2969_v28 }
  0xae   :  { %2760 = vmatprep.subr.bf16.mxu1 %v2972_v29 }
  0xaf   :  { %2739 = vmatpush3.bf16.msra.mxu0 %v2971_v30 }
  0xb0   :  { %2740 = vmatprep.subr.bf16.mxu0 %v2974_v31 }
  0xb1   :  { %2761 = vmatpush3.bf16.msra.mxu1 %v2973_v32 }
  0xb2   :  { %2762 = vmatprep.subr.bf16.mxu1 %v2976_v33 }
  0xb3   :  { %2741 = vmatpush3.bf16.msra.mxu0 %v2975_v35 }
  0xb4   :  { %2742 = vmatprep.subr.bf16.mxu0 %v2978_v36 }
  0xb5   :  { %2763 = vmatpush3.bf16.msra.mxu1 %v2977_v37 }
  0xb6   :  { %2764 = vmatprep.subr.bf16.mxu1 %v2980_v38 }
  0xb7   :  { %2743 = vmatpush3.bf16.msra.mxu0 %v2979_v39 }
  0xb8   :  { %2744 = vmatprep.subr.bf16.mxu0 %v2982_v40 }
  0xb9   :  { %2765 = vmatpush3.bf16.msra.mxu1 %v2981_v41 }
  0xba   :  { %2766 = vmatprep.subr.bf16.mxu1 %v2984_v42 }
  0xbb   :  { %2745 = vmatpush3.bf16.msra.mxu0 %v2983_v43 }
  0xbc   :  { %2746 = vmatprep.subr.bf16.mxu0 %v2986_v44 }
  0xbd   :  { %2767 = vmatpush3.bf16.msra.mxu1 %v2985_v45 }
  0xbe   :  { %2768 = vmatprep.subr.bf16.mxu1 %v2988_v46 }
  0xbf   :  { %2747 = vmatpush3.bf16.msra.mxu0 %v2987_v47 }
  0xc0   :  { %2781 = vmatprep.subr.bf16.mxu0 %v2996_v51 }
  0xc1   :  { %2769 = vmatpush3.bf16.msra.mxu1 %v2990_v49 }
  0xc2   :  { %2220 = vmatmul.mubr.bf16.vlgmr.msra.gmra.mxu0 %v550_v48 }
  0xc3   :  { %2782 = vmatpush3.bf16.msra.mxu0 %v2991_v50  ;;  %2789 = vmatprep.mubr.msk.bf16.mxu0 %vm2997_vm0, %v2996_v51 }
  0xc4   :  { %2260 = vmatmul.mubr.bf16.vlgmr.msra.gmra.mxu1 %v566_v52  ;;  %2783 = vmatprep.subr.bf16.mxu0 %v2996_v51 }
  0xc7   :  { %2784 = vmatpush3.bf16.msra.mxu0 %v2992_v53 }
  0xc8   :  { %2785 = vmatprep.subr.bf16.mxu0 %v2996_v51 }
  0xcb   :  { %2786 = vmatpush3.bf16.msra.mxu0 %v2993_v54 }
  0xcc   :  { %2787 = vmatprep.subr.bf16.mxu0 %v2996_v51 }
  0xcf   :  { %2788 = vmatpush3.bf16.msra.mxu0 %v2994_v55 }
  0xd2   :  { %2790 = vmatmul.mubr.msk.bf16.vlgmr.msra.gmra.mxu0 %vm1783_vm1, %v582_v57 }
  0xe2   :  { %v2528_v58 = vpop.f32.mrf.mxu0 }
  0xe4   :  { %v2529_v60 = vpop.f32.mrf.mxu0  ;;  %v2550_v61 = vpop.f32.mrf.mxu1 }
  0xe5   :  { %v2530_v62 = vadd.f32 %v2529_v60, %v2528_v58 }
  0xe6   :  { %v2531_v63 = vpop.f32.mrf.mxu0  ;;  %v2551_v0 = vpop.f32.mrf.mxu1 }
  0xe7   :  { %v1822_v1 = vadd.f32 %v2530_v62, %v2313_v59  ;;  %v2552_v2 = vadd.f32 %v2551_v0, %v2550_v61 }
  0xe8   :  { %v2532_v3 = vpop.f32.mrf.mxu0  ;;  %v2553_v4 = vpop.f32.mrf.mxu1 }
  0xe9   :  { %v1862_v5 = vadd.f32 %v2552_v2, %v1822_v1 }
  0xea   :  { %v2554_v6 = vpop.f32.mrf.mxu1 }
 0x102   :  { %v2572_v34 = vpop.f32.mrf.mxu0 }
 0x104   :  { %v2573_v7 = vpop.f32.mrf.mxu0  ;;  %v2594_v8 = vpop.f32.mrf.mxu1 }
 0x105   :  { %v2574_v9 = vadd.f32 %v2573_v7, %v2572_v34 }
 0x106   :  { %v2575_v10 = vpop.f32.mrf.mxu0  ;;  %v2595_v11 = vpop.f32.mrf.mxu1 }
 0x107   :  { %v1902_v12 = vadd.f32 %v2574_v9, %v1862_v5  ;;  %v2596_v13 = vadd.f32 %v2595_v11, %v2594_v8 }
 0x108   :  { %v2576_v14 = vpop.f32.mrf.mxu0  ;;  %v2597_v15 = vpop.f32.mrf.mxu1 }
 0x109   :  { %v1942_v16 = vadd.f32 %v2596_v13, %v1902_v12 }
 0x10a   :  { %v2598_v17 = vpop.f32.mrf.mxu1 }
 0x122   :  { %v2616_v18 = vpop.f32.mrf.mxu0 }
 0x124   :  { %v2617_v19 = vpop.f32.mrf.mxu0  ;;  %v2638_v20 = vpop.f32.mrf.mxu1 }
 0x125   :  { %v2618_v21 = vadd.f32 %v2617_v19, %v2616_v18 }
 0x126   :  { %v2619_v22 = vpop.f32.mrf.mxu0  ;;  %v2639_v23 = vpop.f32.mrf.mxu1 }
 0x127   :  { %v1982_v24 = vadd.f32 %v2618_v21, %v1942_v16  ;;  %v2640_v25 = vadd.f32 %v2639_v23, %v2638_v20 }
 0x128   :  { %v2620_v26 = vpop.f32.mrf.mxu0  ;;  %v2641_v27 = vpop.f32.mrf.mxu1 }
 0x129   :  { %v2022_v28 = vadd.f32 %v2640_v25, %v1982_v24 }
 0x12a   :  { %v2642_v29 = vpop.f32.mrf.mxu1 }
 0x142   :  { %v2660_v30 = vpop.f32.mrf.mxu0 }
 0x144   :  { %v2661_v31 = vpop.f32.mrf.mxu0  ;;  %v2682_v32 = vpop.f32.mrf.mxu1 }
 0x145   :  { %v2662_v33 = vadd.f32 %v2661_v31, %v2660_v30 }
 0x146   :  { %v2663_v35 = vpop.f32.mrf.mxu0  ;;  %v2683_v36 = vpop.f32.mrf.mxu1 }
 0x147   :  { %v2062_v37 = vadd.f32 %v2662_v33, %v2022_v28  ;;  %v2684_v38 = vadd.f32 %v2683_v36, %v2682_v32 }
 0x148   :  { %v2664_v39 = vpop.f32.mrf.mxu0  ;;  %v2685_v40 = vpop.f32.mrf.mxu1 }
 0x149   :  { %v2102_v41 = vadd.f32 %v2684_v38, %v2062_v37 }
 0x14a   :  { %v2686_v42 = vpop.f32.mrf.mxu1 }
 0x162   :  { %v2704_v43 = vpop.f32.mrf.mxu0 }
 0x164   :  { %v2705_v44 = vpop.f32.mrf.mxu0  ;;  %v2726_v45 = vpop.f32.mrf.mxu1 }
 0x165   :  { %v2706_v52 = vadd.f32 %v2705_v44, %v2704_v43 }
 0x166   :  { %v2707_v46 = vpop.f32.mrf.mxu0  ;;  %v2727_v47 = vpop.f32.mrf.mxu1 }
 0x167   :  { %v2142_v57 = vadd.f32 %v2706_v52, %v2102_v41  ;;  %v2728_v58 = vadd.f32 %v2727_v47, %v2726_v45 }
 0x168   :  { %v2708_v48 = vpop.f32.mrf.mxu0  ;;  %v2729_v49 = vpop.f32.mrf.mxu1 }
 0x169   :  { %v2182_v63 = vadd.f32 %v2728_v58, %v2142_v57 }
 0x16a   :  { %v2730_v50 = vpop.f32.mrf.mxu1 }
 0x182   :  { %v2748_v51 = vpop.f32.mrf.mxu0 }
 0x184   :  { %v2749_v53 = vpop.f32.mrf.mxu0  ;;  %v2770_v54 = vpop.f32.mrf.mxu1 }
 0x185   :  { %v2750_v61 = vadd.f32 %v2749_v53, %v2748_v51 }
 0x186   :  { %v2751_v55 = vpop.f32.mrf.mxu0  ;;  %v2771_v56 = vpop.f32.mrf.mxu1 }
 0x187   :  { %v2222_v0 = vadd.f32 %v2750_v61, %v2182_v63  ;;  %v2772_v1 = vadd.f32 %v2771_v56, %v2770_v54 }
 0x188   :  { %v2752_v59 = vpop.f32.mrf.mxu0  ;;  %v2773_v60 = vpop.f32.mrf.mxu1 }
 0x189   :  { %v2262_v2 = vadd.f32 %v2772_v1, %v2222_v0 }
 0x18a   :  { %v2774_v62 = vpop.f32.mrf.mxu1 }
 0x192   :  { %v2301_v3 = vpop.f32.mrf.mxu0 }
 0x193   :  { %v2302_v4 = vadd.f32 %v2301_v3, %v2262_v2 }
 0x194   :  { %v2791_v5 = vpop.f32.mrf.mxu0 }
 0x195   :  { %2308 = vst.msk [vmem:[%s3663_s3] sm:$0x3] %vm2307_vm2, %v2302_v4 }
 0x196   :  { %v2304_v6 = vpop.f32.mrf.mxu0 }
 0x198   :  { %v2792_v34 = vpop.f32.mrf.mxu0 }

// kernel: vae_forward.13
= control target key start
LH: loop header
LB: loop body
LE: loop exit
PB: predicated region body
PF: predicated region fallthrough
CT: control target
= control target key end

     0   :  { %v1281_v34 = vmov 0.0   ;;  %vm1282_vm0 = vmmov 0   ;;  %vm516_vm1 = vcmask 523264   ;;  %s1650_s1 = inlined_call_operand.vmem [shape: bf16[576,128], index: 1, kind: input, shape index: {}]   ;;  %s1651_s0 = inlined_call_operand.vmem [shape: bf16[98,576], index: 0, kind: input, shape index: {}]   ;;  %s1652_s2 = inlined_call_operand.vmem [shape: f32[1,128], index: 2, kind: input, shape index: {}]   ;;  %s1653_s3 = inlined_call_operand.vmem [shape: bf16[98,128], index: 3, kind: output, shape index: {}]  }
   0x1   :  { %v1198_v0 = vld [vmem:[%s1650_s1 + $0x78] sm:$0xff]   ;;  %v1202_v4 = vld [vmem:[%s1650_s1 + $0x70] sm:$0xff]   ;;  %v1206_v8 = vld [vmem:[%s1650_s1 + $0x68] sm:$0xff]  }
   0x2   :  { %v1199_v1 = vld [vmem:[%s1650_s1 + $0xf8] sm:$0xff]   ;;  %1025 = vmatprep.subr.bf16.mxu0 %v1198_v0  ;;  %v1203_v5 = vld [vmem:[%s1650_s1 + $0xf0] sm:$0xff]   ;;  %v1207_v9 = vld [vmem:[%s1650_s1 + $0xe8] sm:$0xff]  }
   0x3   :  { %v1200_v2 = vld [vmem:[%s1650_s1 + $0x38] sm:$0xff]   ;;  %1083 = vmatprep.subr.bf16.mxu1 %v1199_v1  ;;  %v1204_v6 = vld [vmem:[%s1650_s1 + $0x30] sm:$0xff]   ;;  %v1208_v10 = vld [vmem:[%s1650_s1 + $0x28] sm:$0xff]  }
   0x4   :  { %v1201_v3 = vld [vmem:[%s1650_s1 + $0xb8] sm:$0xff]   ;;  %1026 = vmatpush3.bf16.msra.mxu0 %v1200_v2  ;;  %v1205_v7 = vld [vmem:[%s1650_s1 + $0xb0] sm:$0xff]   ;;  %v1209_v11 = vld [vmem:[%s1650_s1 + $0xa8] sm:$0xff]  }
   0x5   :  { %1084 = vmatpush3.bf16.msra.mxu1 %v1201_v3  ;;  %1027 = vmatprep.subr.bf16.mxu0 %v1202_v4  ;;  %v1210_v12 = vld [vmem:[%s1650_s1 + $0x60] sm:$0xff]   ;;  %v1214_v16 = vld [vmem:[%s1650_s1 + $0x58] sm:$0xff]   ;;  %v1218_v20 = vld [vmem:[%s1650_s1 + $0x50] sm:$0xff]  }
   0x6   :  { %1085 = vmatprep.subr.bf16.mxu1 %v1203_v5  ;;  %v1211_v13 = vld [vmem:[%s1650_s1 + $0xe0] sm:$0xff]   ;;  %v1215_v17 = vld [vmem:[%s1650_s1 + $0xd8] sm:$0xff]   ;;  %v1219_v21 = vld [vmem:[%s1650_s1 + $0xd0] sm:$0xff]  }
   0x7   :  { %v1212_v14 = vld [vmem:[%s1650_s1 + $0x20] sm:$0xff]   ;;  %v1216_v18 = vld [vmem:[%s1650_s1 + $0x18] sm:$0xff]   ;;  %v1220_v22 = vld [vmem:[%s1650_s1 + $0x10] sm:$0xff]  }
   0x8   :  { %1028 = vmatpush3.bf16.msra.mxu0 %v1204_v6  ;;  %v1213_v15 = vld [vmem:[%s1650_s1 + $0xa0] sm:$0xff]   ;;  %v1217_v19 = vld [vmem:[%s1650_s1 + $0x98] sm:$0xff]   ;;  %v1221_v23 = vld [vmem:[%s1650_s1 + $0x90] sm:$0xff]  }
   0x9   :  { %1086 = vmatpush3.bf16.msra.mxu1 %v1205_v7  ;;  %1029 = vmatprep.subr.bf16.mxu0 %v1206_v8  ;;  %v1222_v24 = vld [vmem:[%s1650_s1 + $0x48] sm:$0xff]   ;;  %v1226_v28 = vld [vmem:[%s1650_s1 + $0x40] sm:$0xff]   ;;  %v1236_v37 = vld [vmem:[%s1650_s1 + $0x118] sm:$0xff]  }
   0xa   :  { %1087 = vmatprep.subr.bf16.mxu1 %v1207_v9  ;;  %v1223_v25 = vld [vmem:[%s1650_s1 + $0xc8] sm:$0xff]   ;;  %v1227_v29 = vld [vmem:[%s1650_s1 + $0xc0] sm:$0xff]   ;;  %v1247_v43 = vld [vmem:[%s1650_s1 + $0x110] sm:$0xff]  }
   0xb   :  { %v1224_v26 = vld [vmem:[%s1650_s1 + $0x8] sm:$0xff]   ;;  %v1228_v30 = vld [vmem:[%s1650_s1] sm:$0xff]   ;;  %v1245_v44 = vld [vmem:[%s1651_s0 + $0x5c] ss:$20 sps:$4 sm:$0xff]  }
   0xc   :  { %1030 = vmatpush3.bf16.msra.mxu0 %v1208_v10  ;;  %v1225_v27 = vld [vmem:[%s1650_s1 + $0x88] sm:$0xff]   ;;  %v1229_v31 = vld [vmem:[%s1650_s1 + $0x80] sm:$0xff]   ;;  %v1250_v48 = vld [vmem:[%s1651_s0 + $0x7c] ss:$20 sps:$4 sm:$0xff]  }
   0xd   :  { %1088 = vmatpush3.bf16.msra.mxu1 %v1209_v11  ;;  %1031 = vmatprep.subr.bf16.mxu0 %v1210_v12  ;;  %v1230_v32 = vld [vmem:[%s1651_s0] ss:$20 sps:$4 sm:$0xff]   ;;  %v1232_v33 = vld [vmem:[%s1651_s0 + $0x4] ss:$20 sps:$4 sm:$0xff]   ;;  %v1233_v35 = vld [vmem:[%s1651_s0 + $0x8] ss:$20 sps:$4 sm:$0xff]  }
   0xe   :  { %1089 = vmatprep.subr.bf16.mxu1 %v1211_v13  ;;  %v1235_v36 = vld [vmem:[%s1651_s0 + $0xc] ss:$20 sps:$4 sm:$0xff]   ;;  %570 = vmatprep.mubr.bf16.mxu0 %v1232_v33  ;;  %v1239_v39 = vld [vmem:[%s1651_s0 + $0x34] ss:$20 sps:$4 sm:$0xff]   ;;  %v1242_v41 = vld [vmem:[%s1651_s0 + $0x30] ss:$20 sps:$4 sm:$0xff]  }
   0xf   :  { %658 = vmatprep.mubr.bf16.mxu1 %v1235_v36  ;;  %v1237_v38 = vld [vmem:[%s1651_s0 + $0x2c] ss:$20 sps:$4 sm:$0xff]   ;;  %v1241_v40 = vld [vmem:[%s1651_s0 + $0x28] ss:$20 sps:$4 sm:$0xff]   ;;  %v1248_v46 = vld [vmem:[%s1651_s0 + $0x50] ss:$20 sps:$4 sm:$0xff]  }
  0x10   :  { %1032 = vmatpush3.bf16.msra.mxu0 %v1212_v14  ;;  %v1243_v42 = vld [vmem:[%s1651_s0 + $0x54] ss:$20 sps:$4 sm:$0xff]   ;;  %v1249_v47 = vld [vmem:[%s1651_s0 + $0x58] ss:$20 sps:$4 sm:$0xff]   ;;  %v1269_v50 = vld [vmem:[%s1650_s1 + $0x100] sm:$0xff]  }
  0x11   :  { %1090 = vmatpush3.bf16.msra.mxu1 %v1213_v15  ;;  %1033 = vmatprep.subr.bf16.mxu0 %v1214_v16  ;;  %v1256_v45 = vld [vmem:[%s1650_s1 + $0x108] sm:$0xff]   ;;  %v1252_v49 = vld [vmem:[%s1651_s0 + $0x84] ss:$20 sps:$4 sm:$0xff]   ;;  %v1255_v52 = vld [vmem:[%s1651_s0 + $0x80] ss:$20 sps:$4 sm:$0xff]  }
  0x12   :  { %1091 = vmatprep.subr.bf16.mxu1 %v1215_v17  ;;  %v1254_v51 = vld [vmem:[%s1651_s0 + $0x78] ss:$20 sps:$4 sm:$0xff]   ;;  %v1261_v55 = vld [vmem:[%s1651_s0 + $0xa0] ss:$20 sps:$4 sm:$0xff]   ;;  %v1262_v56 = vld [vmem:[%s1651_s0 + $0xa8] ss:$20 sps:$4 sm:$0xff]  }
  0x13   :  { %v1257_v53 = vld [vmem:[%s1651_s0 + $0xa4] ss:$20 sps:$4 sm:$0xff]   ;;  %v1259_v54 = vld [vmem:[%s1651_s0 + $0xac] ss:$20 sps:$4 sm:$0xff]   ;;  %v1265_v58 = vld [vmem:[%s1651_s0 + $0xd4] ss:$20 sps:$4 sm:$0xff]  }
  0x14   :  { %1034 = vmatpush3.bf16.msra.mxu0 %v1216_v18  ;;  %v1263_v57 = vld [vmem:[%s1651_s0 + $0xcc] ss:$20 sps:$4 sm:$0xff]   ;;  %v51_v59 = vld [vmem:[%s1651_s0 + $0xf0] sm:$0x11]  ;;  %v52_v60 = vld [vmem:[%s1651_s0 + $0xf8] sm:$0x11] }
  0x15   :  { %1092 = vmatpush3.bf16.msra.mxu1 %v1217_v19  ;;  %1035 = vmatprep.subr.bf16.mxu0 %v1218_v20  ;;  %v1267_v61 = vld [vmem:[%s1651_s0 + $0xc8] ss:$20 sps:$4 sm:$0xff]   ;;  %v1268_v62 = vld [vmem:[%s1651_s0 + $0xd0] ss:$20 sps:$4 sm:$0xff]   ;;  %v917_v63 = vcombine.high %v51_v59, %v51_v59  ;;  %v919_v0 = vcombine.high %v52_v60, %v52_v60  ;;  %v916_v1 = vcombine.low %v51_v59, %v51_v59  ;;  %v1276_v5 = vld [vmem:[%s1651_s0 + $0x38] ss:$20 sps:$4 sm:$0xff]  }
  0x16   :  { %1093 = vmatprep.subr.bf16.mxu1 %v1219_v21  ;;  %v918_v2 = vcombine.low %v52_v60, %v52_v60  ;;  %v1274_v3 = vld [vmem:[%s1651_s0 + $0x10] ss:$20 sps:$4 sm:$0xff]   ;;  %v1277_v6 = vld [vmem:[%s1651_s0 + $0xd8] ss:$20 sps:$4 sm:$0xff]   ;;  %v1278_v7 = vld [vmem:[%s1651_s0 + $0x60] ss:$20 sps:$4 sm:$0xff]  }
  0x17   :  { %v1275_v4 = vld [vmem:[%s1651_s0 + $0xb0] ss:$20 sps:$4 sm:$0xff]   ;;  %v1279_v8 = vld [vmem:[%s1651_s0 + $0x100] ss:$0 sps:$4 sm:$0x11]  }
  0x18   :  { %1036 = vmatpush3.bf16.msra.mxu0 %v1220_v22  ;;  %v1280_v9 = vld [vmem:[%s1651_s0 + $0x88] ss:$20 sps:$4 sm:$0xff]  }
  0x19   :  { %1094 = vmatpush3.bf16.msra.mxu1 %v1221_v23  ;;  %1037 = vmatprep.subr.bf16.mxu0 %v1222_v24 }
  0x1a   :  { %1095 = vmatprep.subr.bf16.mxu1 %v1223_v25 }
  0x1c   :  { %1038 = vmatpush3.bf16.msra.mxu0 %v1224_v26 }
  0x1d   :  { %1096 = vmatpush3.bf16.msra.mxu1 %v1225_v27  ;;  %1039 = vmatprep.subr.bf16.mxu0 %v1226_v28 }
  0x1e   :  { %1097 = vmatprep.subr.bf16.mxu1 %v1227_v29 }
  0x20   :  { %1040 = vmatpush3.bf16.msra.mxu0 %v1228_v30 }
  0x21   :  { %1098 = vmatpush3.bf16.msra.mxu1 %v1229_v31  ;;  %1152 = vmatprep.subr.bf16.mxu0 %v1281_v34 }
  0x22   :  { %1188 = vmatprep.subr.bf16.mxu1 %v1281_v34 }
  0x23   :  { %571 = vmatmul.mubr.bf16.vlgmr.msra.gmra.mxu0 %v1230_v32 }
  0x24   :  { %659 = vmatmul.mubr.bf16.vlgmr.msra.gmra.mxu1 %v1233_v35  ;;  %1153 = vmatpush3.bf16.msra.mxu0 %v1236_v37 }
  0x25   :  { %578 = vmatprep.mubr.bf16.mxu0 %v1237_v38  ;;  %1192 = vmatpush3.bf16.msra.mxu1 %v1236_v37 }
  0x26   :  { %666 = vmatprep.mubr.bf16.mxu1 %v1239_v39  ;;  %1154 = vmatprep.subr.bf16.mxu0 %v1281_v34 }
  0x27   :  { %1189 = vmatprep.subr.bf16.mxu1 %v1281_v34 }
  0x28   :  { %1155 = vmatpush3.bf16.msra.mxu0 %v1247_v43 }
  0x29   :  { %1193 = vmatpush3.bf16.msra.mxu1 %v1247_v43  ;;  %1156 = vmatprep.subr.bf16.mxu0 %v1281_v34 }
  0x2a   :  { %1190 = vmatprep.subr.bf16.mxu1 %v1281_v34 }
  0x2b   :  { %579 = vmatmul.mubr.bf16.gmra.mxu0 %v1241_v40 }
  0x2c   :  { %667 = vmatmul.mubr.bf16.gmra.mxu1 %v1242_v41  ;;  %586 = vmatprep.mubr.bf16.mxu0 %v1243_v42 }
  0x2d   :  { %674 = vmatprep.mubr.bf16.mxu1 %v1245_v44  ;;  %1157 = vmatpush3.bf16.msra.mxu0 %v1256_v45 }
  0x2e   :  { %1194 = vmatpush3.bf16.msra.mxu1 %v1256_v45  ;;  %1158 = vmatprep.subr.bf16.mxu0 %v1281_v34 }
  0x2f   :  { %1191 = vmatprep.subr.bf16.mxu1 %v1281_v34 }
  0x31   :  { %1159 = vmatpush3.bf16.msra.mxu0 %v1269_v50 }
  0x32   :  { %1195 = vmatpush3.bf16.msra.mxu1 %v1269_v50 }
  0x33   :  { %587 = vmatmul.mubr.bf16.gmra.mxu0 %v1248_v46 }
  0x34   :  { %675 = vmatmul.mubr.bf16.gmra.mxu1 %v1249_v47  ;;  %594 = vmatprep.mubr.bf16.mxu0 %v1250_v48 }
  0x35   :  { %682 = vmatprep.mubr.bf16.mxu1 %v1252_v49 }
  0x3b   :  { %595 = vmatmul.mubr.bf16.gmra.mxu0 %v1254_v51 }
  0x3c   :  { %683 = vmatmul.mubr.bf16.gmra.mxu1 %v1255_v52  ;;  %602 = vmatprep.mubr.bf16.mxu0 %v1257_v53 }
  0x3d   :  { %690 = vmatprep.mubr.bf16.mxu1 %v1259_v54 }
  0x43   :  { %603 = vmatmul.mubr.bf16.gmra.mxu0 %v1261_v55 }
  0x44   :  { %691 = vmatmul.mubr.bf16.gmra.mxu1 %v1262_v56  ;;  %610 = vmatprep.mubr.bf16.mxu0 %v1263_v57 }
  0x45   :  { %698 = vmatprep.mubr.bf16.mxu1 %v1265_v58 }
  0x4b   :  { %611 = vmatmul.mubr.bf16.gmra.mxu0 %v1267_v61  ;;  %v1590_v61 = vld [vmem:[%s1652_s2] ss:$0 sm:$0xff] }
  0x4c   :  { %699 = vmatmul.mubr.bf16.gmra.mxu1 %v1268_v62  ;;  %618 = vmatprep.mubr.bf16.mxu0 %v917_v63 }
  0x4d   :  { %706 = vmatprep.mubr.bf16.mxu1 %v919_v0 }
  0x53   :  { %619 = vmatmul.mubr.bf16.gmra.mxu0 %v916_v1 }
  0x54   :  { %707 = vmatmul.mubr.bf16.gmra.mxu1 %v918_v2  ;;  %1160 = vmatprep.mubr.msk.bf16.mxu0 %vm1282_vm0, %v1281_v34 }
  0x55   :  { %1176 = vmatprep.mubr.msk.bf16.mxu1 %vm1282_vm0, %v1281_v34 }
  0x5b   :  { %1161 = vmatmul.mubr.msk.bf16.vlgmr.msra.gmra.mxu0 %vm516_vm1, %v1274_v3 }
  0x5c   :  { %1177 = vmatmul.mubr.msk.bf16.vlgmr.msra.gmra.mxu1 %vm516_vm1, %v1275_v4  ;;  %1164 = vmatprep.mubr.msk.bf16.mxu0 %vm1282_vm0, %v1281_v34 }
  0x5d   :  { %1180 = vmatprep.mubr.msk.bf16.mxu1 %vm1282_vm0, %v1281_v34 }
  0x63   :  { %1165 = vmatmul.mubr.msk.bf16.gmra.mxu0 %vm516_vm1, %v1276_v5 }
  0x64   :  { %1181 = vmatmul.mubr.msk.bf16.gmra.mxu1 %vm516_vm1, %v1277_v6  ;;  %1168 = vmatprep.mubr.msk.bf16.mxu0 %vm1282_vm0, %v1281_v34 }
  0x65   :  { %1184 = vmatprep.mubr.msk.bf16.mxu1 %vm1282_vm0, %v1281_v34 }
  0x6b   :  { %1169 = vmatmul.mubr.msk.bf16.gmra.mxu0 %vm516_vm1, %v1278_v7 }
  0x6c   :  { %1185 = vmatmul.mubr.msk.bf16.gmra.mxu1 %vm516_vm1, %v1279_v8  ;;  %1172 = vmatprep.mubr.msk.bf16.mxu0 %vm1282_vm0, %v1281_v34 }
  0x73   :  { %1173 = vmatmul.mubr.msk.bf16.gmra.mxu0 %vm516_vm1, %v1280_v9 }
  0xe3   :  { %v1041_v10 = vpop.f32.mrf.mxu0 }
  0xe4   :  { %v1099_v11 = vpop.f32.mrf.mxu1 }
  0xe5   :  { %v1042_v12 = vpop.f32.mrf.mxu0 }
  0xe6   :  { %v1100_v13 = vpop.f32.mrf.mxu1  ;;  %v1043_v59 = vadd.f32 %v1042_v12, %v1041_v10 }
  0xe7   :  { %v1044_v14 = vpop.f32.mrf.mxu0  ;;  %v1101_v5 = vadd.f32 %v1100_v13, %v1099_v11 }
  0xe8   :  { %v1102_v15 = vpop.f32.mrf.mxu1  ;;  %v573_v4 = vadd.f32 %v1043_v59, %v1590_v61 }
  0xe9   :  { %v1045_v16 = vpop.f32.mrf.mxu0 }
  0xea   :  { %v1103_v17 = vpop.f32.mrf.mxu1  ;;  %v1046_v0 = vadd.f32 %v1045_v16, %v1044_v14  ;;  %v661_v16 = vadd.f32 %v1101_v5, %v573_v4 }
  0xeb   :  { %v1539_v18 = vpop.f32.mrf.mxu0  ;;  %v1104_v12 = vadd.f32 %v1103_v17, %v1102_v15 }
  0xec   :  { %v1541_v19 = vpop.f32.mrf.mxu1  ;;  %v576_v10 = vadd.f32 %v1046_v0, %v1590_v61 }
  0xed   :  { %v1048_v20 = vpop.f32.mrf.mxu0 }
  0xee   :  { %v1543_v21 = vpop.f32.mrf.mxu1  ;;  %v1049_v14 = vadd.f32 %v1048_v20, %v1539_v18 }
  0xef   :  { %v1545_v22 = vpop.f32.mrf.mxu0  ;;  %v1107_v18 = vadd.f32 %v1543_v21, %v1541_v19 }
  0xf0   :  { %v1547_v23 = vpop.f32.mrf.mxu1 }
  0xf1   :  { %v1549_v24 = vpop.f32.mrf.mxu0 }
  0xf2   :  { %v1551_v25 = vpop.f32.mrf.mxu1  ;;  %v1052_v13 = vadd.f32 %v1549_v24, %v1545_v22 }
  0xf3   :  { %v1553_v26 = vpop.f32.mrf.mxu0 }
  0xf4   :  { %v1555_v27 = vpop.f32.mrf.mxu1 }
  0xf5   :  { %v1557_v28 = vpop.f32.mrf.mxu0 }
  0xf6   :  { %v1559_v29 = vpop.f32.mrf.mxu1 }
  0xf7   :  { %v1561_v30 = vpop.f32.mrf.mxu0 }
  0xf8   :  { %v1563_v31 = vpop.f32.mrf.mxu1 }
  0xf9   :  { %v1565_v32 = vpop.f32.mrf.mxu0 }
  0xfa   :  { %v1567_v33 = vpop.f32.mrf.mxu1 }
  0xfb   :  { %v1569_v34 = vpop.f32.mrf.mxu0 }
  0xfc   :  { %v1571_v35 = vpop.f32.mrf.mxu1 }
  0xfd   :  { %v1573_v36 = vpop.f32.mrf.mxu0 }
  0xfe   :  { %v1575_v37 = vpop.f32.mrf.mxu1 }
  0xff   :  { %v1577_v38 = vpop.f32.mrf.mxu0 }
 0x100   :  { %v1579_v39 = vpop.f32.mrf.mxu1 }
 0x101   :  { %1654 = vst [vmem:[#allocation2_spill] sm:$0xff] %v1579_v39  ;;  %v1581_v40 = vpop.f32.mrf.mxu0 }
 0x102   :  { %v1583_v41 = vpop.f32.mrf.mxu1 }
 0x103   :  { %1655 = vst [vmem:[#allocation3_spill] sm:$0xff] %v1583_v41  ;;  %v1065_v42 = vpop.f32.mrf.mxu0 }
 0x104   :  { %v1123_v43 = vpop.f32.mrf.mxu1 }
 0x105   :  { %v1066_v44 = vpop.f32.mrf.mxu0 }
 0x106   :  { %v1124_v45 = vpop.f32.mrf.mxu1  ;;  %v1067_v62 = vadd.f32 %v1066_v44, %v1065_v42 }
 0x107   :  { %v1068_v46 = vpop.f32.mrf.mxu0  ;;  %v1125_v8 = vadd.f32 %v1124_v45, %v1123_v43 }
 0x108   :  { %v1126_v47 = vpop.f32.mrf.mxu1  ;;  %v605_v7 = vadd.f32 %v1067_v62, %v1590_v61  ;;  %v664_v62 = vadd.f32 %v1104_v12, %v576_v10 }
 0x109   :  { %v1069_v48 = vpop.f32.mrf.mxu0 }
 0x10a   :  { %v1127_v49 = vpop.f32.mrf.mxu1  ;;  %v1070_v2 = vadd.f32 %v1069_v48, %v1068_v46  ;;  %v693_v59 = vadd.f32 %v1125_v8, %v605_v7 }
 0x10b   :  { %v1071_v50 = vpop.f32.mrf.mxu0  ;;  %v1128_v42 = vadd.f32 %v1127_v49, %v1126_v47  ;;  %v581_v47 = vadd.f32 %v1049_v14, %v1590_v61 }
 0x10c   :  { %v1129_v51 = vpop.f32.mrf.mxu1  ;;  %v608_v39 = vadd.f32 %v1070_v2, %v1590_v61 }
 0x10d   :  { %v1072_v52 = vpop.f32.mrf.mxu0  ;;  %v669_v8 = vadd.f32 %v1107_v18, %v581_v47 }
 0x10e   :  { %v1130_v53 = vpop.f32.mrf.mxu1  ;;  %v1073_v48 = vadd.f32 %v1072_v52, %v1071_v50  ;;  %v1110_v50 = vadd.f32 %v1551_v25, %v1547_v23  ;;  %v1055_v23 = vadd.f32 %v1557_v28, %v1553_v26 }
 0x10f   :  { %v1074_v54 = vpop.f32.mrf.mxu0  ;;  %v1131_v22 = vadd.f32 %v1130_v53, %v1129_v51 }
 0x110   :  { %v1132_v55 = vpop.f32.mrf.mxu1  ;;  %v613_v52 = vadd.f32 %v1073_v48, %v1590_v61 }
 0x111   :  { %v1075_v56 = vpop.f32.mrf.mxu0 }
 0x112   :  { %v1133_v57 = vpop.f32.mrf.mxu1  ;;  %v1076_v0 = vadd.f32 %v1075_v56, %v1074_v54  ;;  %v584_v54 = vadd.f32 %v1052_v13, %v1590_v61 }
 0x113   :  { %v1077_v58 = vpop.f32.mrf.mxu0  ;;  %v1134_v56 = vadd.f32 %v1133_v57, %v1132_v55  ;;  %v1058_v55 = vadd.f32 %v1565_v32, %v1561_v30  ;;  %v589_v30 = vadd.f32 %v1055_v23, %v1590_v61  ;;  %v1113_v32 = vadd.f32 %v1559_v29, %v1555_v27 }
 0x114   :  { %v1585_v60 = vpop.f32.mrf.mxu1  ;;  %v616_v5 = vadd.f32 %v1076_v0, %v1590_v61 }
 0x115   :  { %v1078_v63 = vpop.f32.mrf.mxu0  ;;  %v677_v29 = vadd.f32 %v1113_v32, %v589_v30 }
 0x116   :  { %v1136_v1 = vpop.f32.mrf.mxu1 }
 0x117   :  { %v1080_v3 = vpop.f32.mrf.mxu0  ;;  %v1137_v26 = vadd.f32 %v1136_v1, %v1585_v60  ;;  %v1116_v60 = vadd.f32 %v1567_v33, %v1563_v31 }
 0x118   :  { %v1138_v6 = vpop.f32.mrf.mxu1 }
 0x119   :  { %v1081_v9 = vpop.f32.mrf.mxu0  ;;  %v1079_v6 = vadd.f32 %v1078_v63, %v1077_v58  ;;  %v672_v63 = vadd.f32 %v1110_v50, %v584_v54  ;;  %v1656_v54 = vld [vmem:[#allocation2_spill] sm:$0xff] }
 0x11a   :  { %v1139_v41 = vpop.f32.mrf.mxu1  ;;  %v701_v9 = vadd.f32 %v1131_v22, %v613_v52  ;;  %v1119_v52 = vadd.f32 %v1575_v37, %v1571_v35 }
 0x11b   :  { %v748_v44 = vpop.f32.mrf.mxu0  ;;  %v696_v41 = vadd.f32 %v1128_v42, %v608_v39  ;;  %v621_v12 = vadd.f32 %v1079_v6, %v1590_v61 }
 0x11c   :  { %v780_v46 = vpop.f32.mrf.mxu1  ;;  %v749_v43 = vadd.f32 %v748_v44, %v661_v16  ;;  %v704_v44 = vadd.f32 %v1134_v56, %v616_v5  ;;  %v1657_v56 = vld [vmem:[#allocation3_spill] sm:$0xff] }
 0x11d   :  { %v1162_v11 = vpop.f32.mrf.mxu0  ;;  %v781_v15 = vadd.f32 %v780_v46, %v693_v59  ;;  %v592_v59 = vadd.f32 %v1058_v55, %v1590_v61  ;;  %v709_v0 = vadd.f32 %v1137_v26, %v621_v12 }
 0x11e   :  { %v1178_v45 = vpop.f32.mrf.mxu1  ;;  %v802_v3 = vmax.f32 %v749_v43, 0.0 }
 0x11f   :  { %v751_v17 = vpop.f32.mrf.mxu0  ;;  %v810_v19 = vmax.f32 %v781_v15, 0.0  ;;  %v1061_v15 = vadd.f32 %v1573_v36, %v1569_v34  ;;  %v680_v33 = vadd.f32 %v1116_v60, %v592_v59 }
 0x120   :  { %v752_v20 = vadd.f32 %v751_v17, %v664_v62  ;;  %v783_v49 = vpop.f32.mrf.mxu1 }
 0x121   :  { %v784_v24 = vadd.f32 %v783_v49, %v696_v41  ;;  %v1163_v2 = vpop.f32.mrf.mxu0  ;;  %v597_v50 = vadd.f32 %v1061_v15, %v1590_v61 }
 0x122   :  { %v803_v39 = vmax.f32 %v752_v20, 0.0  ;;  %v1179_v4 = vpop.f32.mrf.mxu1  ;;  %v1064_v20 = vadd.f32 %v1581_v40, %v1577_v38 }
 0x123   :  { %v811_v21 = vmax.f32 %v784_v24, 0.0  ;;  %v756_v7 = vpop.f32.mrf.mxu0 }
 0x124   :  { %v993_v25 = vpack.c.bf16 %v803_v39, %v802_v3  ;;  %v788_v51 = vpop.f32.mrf.mxu1  ;;  %v757_v57 = vadd.f32 %v756_v7, %v669_v8  ;;  %v600_v2 = vadd.f32 %v1064_v20, %v1590_v61  ;;  %v1122_v3 = vadd.f32 %v1657_v56, %v1656_v54 }
 0x125   :  { %v1013_v53 = vpack.c.bf16 %v811_v21, %v810_v19  ;;  %v1166_v10 = vpop.f32.mrf.mxu0  ;;  %v789_v28 = vadd.f32 %v788_v51, %v701_v9  ;;  %v685_v21 = vadd.f32 %v1119_v52, %v597_v50 }
 0x126   :  { %994 = vst [vmem:[%s1653_s3] sm:$0xff] %v993_v25   ;;  %v1182_v58 = vpop.f32.mrf.mxu1  ;;  %v804_v1 = vmax.f32 %v757_v57, 0.0  ;;  %v688_v61 = vadd.f32 %v1122_v3, %v600_v2 }
 0x127   :  { %1023 = vst [vmem:[%s1653_s3 + $0x20] sm:$0xff] %v1013_v53   ;;  %v759_v42 = vpop.f32.mrf.mxu0  ;;  %v812_v43 = vmax.f32 %v789_v28, 0.0 }
 0x128   :  { %v760_v14 = vadd.f32 %v759_v42, %v672_v63  ;;  %v791_v16 = vpop.f32.mrf.mxu1 }
 0x129   :  { %v792_v46 = vadd.f32 %v791_v16, %v704_v44  ;;  %v1167_v48 = vpop.f32.mrf.mxu0 }
 0x12a   :  { %v805_v11 = vmax.f32 %v760_v14, 0.0  ;;  %v1183_v13 = vpop.f32.mrf.mxu1 }
 0x12b   :  { %v813_v45 = vmax.f32 %v792_v46, 0.0  ;;  %v764_v62 = vpop.f32.mrf.mxu0 }
 0x12c   :  { %v998_v27 = vpack.c.bf16 %v805_v11, %v804_v1  ;;  %v796_v17 = vpop.f32.mrf.mxu1  ;;  %v765_v31 = vadd.f32 %v764_v62, %v677_v29 }
 0x12d   :  { %v1018_v41 = vpack.c.bf16 %v813_v45, %v812_v43  ;;  %v797_v47 = vadd.f32 %v796_v17, %v709_v0  ;;  %v1170_v18 = vpop.f32.mrf.mxu0 }
 0x12e   :  { %1020 = vst [vmem:[%s1653_s3 + $0x8] sm:$0xff] %v998_v27   ;;  %v1186_v49 = vpop.f32.mrf.mxu1  ;;  %v806_v39 = vmax.f32 %v765_v31, 0.0 }
 0x12f   :  { %1024 = vst [vmem:[%s1653_s3 + $0x28] sm:$0xff] %v1018_v41   ;;  %v814_v34 = vmax.f32 %v797_v47, 0.0  ;;  %v767_v36 = vpop.f32.mrf.mxu0 }
 0x130   :  { %v768_v22 = vadd.f32 %v767_v36, %v680_v33  ;;  %v799_v38 = vpop.f32.mrf.mxu1 }
 0x131   :  { %v989_v40 = vpack.c.bf16 %v814_v34, %v814_v34  ;;  %v1171_v24 = vpop.f32.mrf.mxu0 }
 0x132   :  { %v807_v4 = vmax.f32 %v768_v22, 0.0  ;;  %v1187_v5 = vpop.f32.mrf.mxu1 }
 0x133   :  { %880 = vst [vmem:[%s1653_s3 + $0x30] sm:$0x1] %v989_v40  ;;  %v772_v6 = vpop.f32.mrf.mxu0 }
 0x134   :  { %v1003_v19 = vpack.c.bf16 %v807_v4, %v806_v39  ;;  %v773_v37 = vadd.f32 %v772_v6, %v685_v21 }
 0x135   :  { %v1174_v35 = vpop.f32.mrf.mxu0 }
 0x136   :  { %1021 = vst [vmem:[%s1653_s3 + $0x10] sm:$0xff] %v1003_v19   ;;  %v808_v8 = vmax.f32 %v773_v37, 0.0 }
 0x137   :  { %v775_v7 = vpop.f32.mrf.mxu0 }
 0x138   :  { %v776_v23 = vadd.f32 %v775_v7, %v688_v61 }
 0x139   :  { %v1175_v25 = vpop.f32.mrf.mxu0 }
 0x13a   :  { %v809_v51 = vmax.f32 %v776_v23, 0.0 }
 0x13c   :  { %v1008_v53 = vpack.c.bf16 %v809_v51, %v808_v8 }
 0x13e   :  { %1022 = vst [vmem:[%s1653_s3 + $0x18] sm:$0xff] %v1008_v53  }

// kernel: vae_forward.14
= control target key start
LH: loop header
LB: loop body
LE: loop exit
PB: predicated region body
PF: predicated region fallthrough
CT: control target
= control target key end

     0   :  { %v2376_v0 = vmov 0   ;;  %v2377_v2 = vmov 0.0   ;;  %vm2378_vm0 = vmmov 0   ;;  %vm710_vm1 = vcmask 261120   ;;  %s3136_s1 = inlined_call_operand.vmem [shape: bf16[288,128], index: 1, kind: input, shape index: {}]   ;;  %s3137_s0 = inlined_call_operand.vmem [shape: bf16[450,288], index: 0, kind: input, shape index: {}]   ;;  %s3138_s2 = inlined_call_operand.vmem [shape: f32[1,128], index: 2, kind: input, shape index: {}]   ;;  %s3139_s3 = inlined_call_operand.vmem [shape: bf16[450,128], index: 3, kind: output, shape index: {}]  }
   0x1   :  { %798 = vmatprep.subr.bf16.mxu0 %v2376_v0  ;;  %v2243_v1 = vld [vmem:[%s3136_s1 + $0x38] sm:$0xff]   ;;  %2120 = vmatprep.subr.bf16.mxu1 %v2377_v2  ;;  %v2244_v3 = vld [vmem:[%s3136_s1 + $0x30] sm:$0xff]   ;;  %v2245_v4 = vld [vmem:[%s3136_s1 + $0x28] sm:$0xff]  }
   0x2   :  { %2124 = vmatprep.mubr.msk.bf16.mxu1 %vm2378_vm0, %v2377_v2  ;;  %799 = vmatpush1.bf16.msra.mxu0 %v2243_v1  ;;  %v2246_v5 = vld [vmem:[%s3136_s1 + $0x20] sm:$0xff]   ;;  %v2247_v6 = vld [vmem:[%s3136_s1 + $0x18] sm:$0xff]   ;;  %v2257_v7 = vld [vmem:[%s3136_s1 + $0x88] sm:$0xff]  }
   0x3   :  { %800 = vmatprep.subr.bf16.mxu0 %v2376_v0  ;;  %2121 = vmatpush3.bf16.msra.mxu1 %v2257_v7  ;;  %v2259_v8 = vld [vmem:[%s3136_s1 + $0x80] sm:$0xff]   ;;  %v2248_v9 = vld [vmem:[%s3136_s1 + $0x10] sm:$0xff]   ;;  %v2249_v12 = vld [vmem:[%s3136_s1 + $0x8] sm:$0xff]  }
   0x4   :  { %2122 = vmatprep.subr.bf16.mxu1 %v2377_v2  ;;  %v2260_v10 = vld [vmem:[%s3137_s0 + $0x8] ss:$12 sps:$4 sm:$0xff]   ;;  %v2264_v11 = vld [vmem:[%s3137_s0 + $0x4] ss:$12 sps:$4 sm:$0xff]   ;;  %v2265_v14 = vld [vmem:[%s3137_s0 + $0x20] ss:$12 sps:$4 sm:$0xff]  }
   0x5   :  { %830 = vmatprep.mubr.bf16.mxu0 %v2264_v11  ;;  %v2250_v13 = vld [vmem:[%s3136_s1] sm:$0xff]   ;;  %v2251_v15 = vld [vmem:[%s3136_s1 + $0x78] sm:$0xff]   ;;  %v2252_v16 = vld [vmem:[%s3136_s1 + $0x70] sm:$0xff]  }
   0x6   :  { %801 = vmatpush1.bf16.msra.mxu0 %v2244_v3  ;;  %v2269_v17 = vld [vmem:[%s3137_s0 + $0x38] ss:$12 sps:$4 sm:$0xff]   ;;  %v2253_v18 = vld [vmem:[%s3136_s1 + $0x68] sm:$0xff]   ;;  %v2273_v20 = vld [vmem:[%s3137_s0 + $0x50] ss:$12 sps:$4 sm:$0xff]  }
   0x7   :  { %802 = vmatprep.subr.bf16.mxu0 %v2376_v0  ;;  %2123 = vmatpush3.bf16.msra.mxu1 %v2259_v8  ;;  %v2254_v19 = vld [vmem:[%s3136_s1 + $0x60] sm:$0xff]   ;;  %v2255_v21 = vld [vmem:[%s3136_s1 + $0x58] sm:$0xff]   ;;  %v2256_v22 = vld [vmem:[%s3136_s1 + $0x50] sm:$0xff]  }
   0x8   :  { %v2277_v23 = vld [vmem:[%s3137_s0 + $0x68] ss:$12 sps:$4 sm:$0xff]   ;;  %v2261_v25 = vld [vmem:[%s3136_s1 + $0x40] sm:$0xff]   ;;  %v2289_v32 = vld [vmem:[%s3137_s0 + $0xb0] ss:$12 sps:$4 sm:$0xff]  }
   0x9   :  { %v2258_v24 = vld [vmem:[%s3136_s1 + $0x48] sm:$0xff]   ;;  %v2285_v29 = vld [vmem:[%s3137_s0 + $0x98] ss:$12 sps:$4 sm:$0xff]   ;;  %v2270_v31 = vld [vmem:[%s3137_s0 + $0x34] ss:$12 sps:$4 sm:$0xff]  }
   0xa   :  { %803 = vmatpush1.bf16.msra.mxu0 %v2245_v4  ;;  %2125 = vmatmul.mubr.msk.bf16.vlgmr.msra.gmra.mxu1 %vm710_vm1, %v2260_v10  ;;  %v2281_v26 = vld [vmem:[%s3137_s0 + $0x80] ss:$12 sps:$4 sm:$0xff]   ;;  %v2266_v28 = vld [vmem:[%s3137_s0 + $0x1c] ss:$12 sps:$4 sm:$0xff]   ;;  %v2268_v30 = vld [vmem:[%s3137_s0 + $0x18] ss:$12 sps:$4 sm:$0xff]  }
   0xb   :  { %804 = vmatprep.subr.bf16.mxu0 %v2376_v0  ;;  %2128 = vmatprep.mubr.msk.bf16.mxu1 %vm2378_vm0, %v2377_v2  ;;  %v2262_v27 = vld [vmem:[%s3137_s0] ss:$12 sps:$4 sm:$0xff]   ;;  %v2272_v33 = vld [vmem:[%s3137_s0 + $0x30] ss:$12 sps:$4 sm:$0xff]   ;;  %v2293_v35 = vld [vmem:[%s3137_s0 + $0xc8] ss:$12 sps:$4 sm:$0xff]  }
   0xc   :  { %v2274_v34 = vld [vmem:[%s3137_s0 + $0x4c] ss:$12 sps:$4 sm:$0xff]   ;;  %v2276_v36 = vld [vmem:[%s3137_s0 + $0x48] ss:$12 sps:$4 sm:$0xff]   ;;  %v2278_v37 = vld [vmem:[%s3137_s0 + $0x64] ss:$12 sps:$4 sm:$0xff]  }
   0xd   :  { %v2297_v38 = vld [vmem:[%s3137_s0 + $0xe0] ss:$12 sps:$4 sm:$0xff]   ;;  %v2282_v40 = vld [vmem:[%s3137_s0 + $0x7c] ss:$12 sps:$4 sm:$0xff]   ;;  %v2301_v41 = vld [vmem:[%s3137_s0 + $0xf8] ss:$12 sps:$4 sm:$0xff]  }
   0xe   :  { %805 = vmatpush1.bf16.msra.mxu0 %v2246_v5  ;;  %v2280_v39 = vld [vmem:[%s3137_s0 + $0x60] ss:$12 sps:$4 sm:$0xff]   ;;  %v2284_v42 = vld [vmem:[%s3137_s0 + $0x78] ss:$12 sps:$4 sm:$0xff]   ;;  %v2305_v44 = vld [vmem:[%s3137_s0 + $0x110] ss:$12 sps:$4 sm:$0xff]  }
   0xf   :  { %806 = vmatprep.subr.bf16.mxu0 %v2376_v0  ;;  %v2286_v43 = vld [vmem:[%s3137_s0 + $0x94] ss:$12 sps:$4 sm:$0xff]   ;;  %v2288_v45 = vld [vmem:[%s3137_s0 + $0x90] ss:$12 sps:$4 sm:$0xff]   ;;  %v2290_v46 = vld [vmem:[%s3137_s0 + $0xac] ss:$12 sps:$4 sm:$0xff]  }
  0x10   :  { %v2309_v47 = vld [vmem:[%s3137_s0 + $0x128] ss:$12 sps:$4 sm:$0xff]   ;;  %v2294_v49 = vld [vmem:[%s3137_s0 + $0xc4] ss:$12 sps:$4 sm:$0xff]   ;;  %v2313_v50 = vld [vmem:[%s3137_s0 + $0x140] ss:$12 sps:$4 sm:$0xff]  }
  0x11   :  { %v2292_v48 = vld [vmem:[%s3137_s0 + $0xa8] ss:$12 sps:$4 sm:$0xff]   ;;  %v2296_v51 = vld [vmem:[%s3137_s0 + $0xc0] ss:$12 sps:$4 sm:$0xff]   ;;  %v2317_v53 = vld [vmem:[%s3137_s0 + $0x158] ss:$12 sps:$4 sm:$0xff]  }
  0x12   :  { %807 = vmatpush1.bf16.msra.mxu0 %v2247_v6  ;;  %2129 = vmatmul.mubr.msk.bf16.gmra.mxu1 %vm710_vm1, %v2265_v14  ;;  %v2298_v52 = vld [vmem:[%s3137_s0 + $0xdc] ss:$12 sps:$4 sm:$0xff]   ;;  %v2300_v54 = vld [vmem:[%s3137_s0 + $0xd8] ss:$12 sps:$4 sm:$0xff]   ;;  %v2302_v55 = vld [vmem:[%s3137_s0 + $0xf4] ss:$12 sps:$4 sm:$0xff]  }
  0x13   :  { %808 = vmatprep.subr.bf16.mxu0 %v2376_v0  ;;  %2132 = vmatprep.mubr.msk.bf16.mxu1 %vm2378_vm0, %v2377_v2  ;;  %v2321_v56 = vld [vmem:[%s3137_s0 + $0x170] ss:$12 sps:$4 sm:$0xff]   ;;  %v2306_v58 = vld [vmem:[%s3137_s0 + $0x10c] ss:$12 sps:$4 sm:$0xff]   ;;  %v2325_v59 = vld [vmem:[%s3137_s0 + $0x188] ss:$12 sps:$4 sm:$0xff]  }
  0x14   :  { %v2304_v57 = vld [vmem:[%s3137_s0 + $0xf0] ss:$12 sps:$4 sm:$0xff]   ;;  %v2308_v60 = vld [vmem:[%s3137_s0 + $0x108] ss:$12 sps:$4 sm:$0xff]   ;;  %v2329_v62 = vld [vmem:[%s3137_s0 + $0x1a0] ss:$12 sps:$4 sm:$0xff]  }
  0x15   :  { %v2310_v61 = vld [vmem:[%s3137_s0 + $0x124] ss:$12 sps:$4 sm:$0xff]   ;;  %v2312_v63 = vld [vmem:[%s3137_s0 + $0x120] ss:$12 sps:$4 sm:$0xff]   ;;  %v2341_v8 = vld [vmem:[%s3137_s0 + $0x1e8] ss:$12 sps:$4 sm:$0xff]  }
  0x16   :  { %809 = vmatpush1.bf16.msra.mxu0 %v2248_v9  ;;  %v2333_v1 = vld [vmem:[%s3137_s0 + $0x1b8] ss:$12 sps:$4 sm:$0xff]   ;;  %v2318_v4 = vld [vmem:[%s3137_s0 + $0x154] ss:$12 sps:$4 sm:$0xff]   ;;  %v2337_v5 = vld [vmem:[%s3137_s0 + $0x1d0] ss:$12 sps:$4 sm:$0xff]  }
  0x17   :  { %810 = vmatprep.subr.bf16.mxu0 %v2376_v0  ;;  %v2316_v3 = vld [vmem:[%s3137_s0 + $0x138] ss:$12 sps:$4 sm:$0xff]   ;;  %v2320_v6 = vld [vmem:[%s3137_s0 + $0x150] ss:$12 sps:$4 sm:$0xff]   ;;  %v2324_v9 = vld [vmem:[%s3137_s0 + $0x168] ss:$12 sps:$4 sm:$0xff]  }
  0x18   :  { %v2322_v7 = vld [vmem:[%s3137_s0 + $0x16c] ss:$12 sps:$4 sm:$0xff]   ;;  %v2326_v10 = vld [vmem:[%s3137_s0 + $0x184] ss:$12 sps:$4 sm:$0xff]  }
  0x19   :  { %v2345_v11 = vld [vmem:[%s3137_s0 + $0x200] ss:$12 sps:$4 sm:$0xff]   ;;  %v2349_v14 = vld [vmem:[%s3137_s0 + $0x218] ss:$12 sps:$4 sm:$0xff]  }
  0x1a   :  { %811 = vmatpush1.bf16.msra.mxu0 %v2249_v12  ;;  %2133 = vmatmul.mubr.msk.bf16.gmra.mxu1 %vm710_vm1, %v2269_v17  ;;  %v2328_v12 = vld [vmem:[%s3137_s0 + $0x180] ss:$12 sps:$4 sm:$0xff]   ;;  %v2353_v17 = vld [vmem:[%s3137_s0 + $0x230] ss:$12 sps:$4 sm:$0xff]  }
  0x1b   :  { %812 = vmatprep.subr.bf16.mxu0 %v2376_v0  ;;  %2136 = vmatprep.mubr.msk.bf16.mxu1 %vm2378_vm0, %v2377_v2 }
  0x1e   :  { %813 = vmatpush1.bf16.msra.mxu0 %v2250_v13  ;;  %v2330_v13 = vld [vmem:[%s3137_s0 + $0x19c] ss:$12 sps:$4 sm:$0xff]  }
  0x1f   :  { %814 = vmatprep.subr.bf16.mxu0 %v2376_v0 }
  0x22   :  { %815 = vmatpush2.bf16.msra.mxu0 %v2251_v15  ;;  %2137 = vmatmul.mubr.msk.bf16.gmra.mxu1 %vm710_vm1, %v2273_v20  ;;  %v2332_v15 = vld [vmem:[%s3137_s0 + $0x198] ss:$12 sps:$4 sm:$0xff]   ;;  %v2357_v20 = vld [vmem:[%s3137_s0 + $0x248] ss:$12 sps:$4 sm:$0xff]  }
  0x23   :  { %816 = vmatprep.subr.bf16.mxu0 %v2376_v0  ;;  %2140 = vmatprep.mubr.msk.bf16.mxu1 %vm2378_vm0, %v2377_v2 }
  0x26   :  { %817 = vmatpush2.bf16.msra.mxu0 %v2252_v16  ;;  %v2334_v16 = vld [vmem:[%s3137_s0 + $0x1b4] ss:$12 sps:$4 sm:$0xff]  }
  0x27   :  { %818 = vmatprep.subr.bf16.mxu0 %v2376_v0 }
  0x2a   :  { %819 = vmatpush2.bf16.msra.mxu0 %v2253_v18  ;;  %2141 = vmatmul.mubr.msk.bf16.gmra.mxu1 %vm710_vm1, %v2277_v23  ;;  %v2336_v18 = vld [vmem:[%s3137_s0 + $0x1b0] ss:$12 sps:$4 sm:$0xff]  }
  0x2b   :  { %820 = vmatprep.subr.bf16.mxu0 %v2376_v0  ;;  %2144 = vmatprep.mubr.msk.bf16.mxu1 %vm2378_vm0, %v2377_v2 }
  0x2e   :  { %821 = vmatpush2.bf16.msra.mxu0 %v2254_v19  ;;  %v2338_v19 = vld [vmem:[%s3137_s0 + $0x1cc] ss:$12 sps:$4 sm:$0xff]  }
  0x2f   :  { %822 = vmatprep.subr.bf16.mxu0 %v2376_v0 }
  0x32   :  { %823 = vmatpush2.bf16.msra.mxu0 %v2255_v21  ;;  %2145 = vmatmul.mubr.msk.bf16.gmra.mxu1 %vm710_vm1, %v2281_v26  ;;  %v2340_v21 = vld [vmem:[%s3137_s0 + $0x1c8] ss:$12 sps:$4 sm:$0xff]   ;;  %v2361_v26 = vld [vmem:[%s3137_s0 + $0x260] ss:$12 sps:$4 sm:$0xff]  }
  0x33   :  { %824 = vmatprep.subr.bf16.mxu0 %v2376_v0  ;;  %2148 = vmatprep.mubr.msk.bf16.mxu1 %vm2378_vm0, %v2377_v2 }
  0x36   :  { %825 = vmatpush2.bf16.msra.mxu0 %v2256_v22  ;;  %v2342_v22 = vld [vmem:[%s3137_s0 + $0x1e4] ss:$12 sps:$4 sm:$0xff]  }
  0x37   :  { %826 = vmatprep.subr.bf16.mxu0 %v2376_v0 }
  0x3a   :  { %827 = vmatpush2.bf16.msra.mxu0 %v2258_v24  ;;  %2149 = vmatmul.mubr.msk.bf16.gmra.mxu1 %vm710_vm1, %v2285_v29  ;;  %v2346_v29 = vld [vmem:[%s3137_s0 + $0x1fc] ss:$12 sps:$4 sm:$0xff]  }
  0x3b   :  { %828 = vmatprep.subr.bf16.mxu0 %v2376_v0  ;;  %2152 = vmatprep.mubr.msk.bf16.mxu1 %vm2378_vm0, %v2377_v2  ;;  %v2314_v0 = vld [vmem:[%s3137_s0 + $0x13c] ss:$12 sps:$4 sm:$0xff]  }
  0x3e   :  { %829 = vmatpush2.bf16.msra.mxu0 %v2261_v25 }
  0x41   :  { %831 = vmatmul.mubr.bf16.vlgmr.msra.gmra.mxu0 %v2262_v27  ;;  %v2344_v27 = vld [vmem:[%s3137_s0 + $0x1e0] ss:$12 sps:$4 sm:$0xff]  }
  0x42   :  { %838 = vmatprep.mubr.bf16.mxu0 %v2266_v28  ;;  %2153 = vmatmul.mubr.msk.bf16.gmra.mxu1 %vm710_vm1, %v2289_v32 }
  0x43   :  { %2156 = vmatprep.mubr.msk.bf16.mxu1 %vm2378_vm0, %v2377_v2 }
  0x49   :  { %839 = vmatmul.mubr.bf16.gmra.mxu0 %v2268_v30 }
  0x4a   :  { %846 = vmatprep.mubr.bf16.mxu0 %v2270_v31  ;;  %2157 = vmatmul.mubr.msk.bf16.gmra.mxu1 %vm710_vm1, %v2293_v35 }
  0x4b   :  { %2160 = vmatprep.mubr.msk.bf16.mxu1 %vm2378_vm0, %v2377_v2 }
  0x51   :  { %847 = vmatmul.mubr.bf16.gmra.mxu0 %v2272_v33  ;;  %v2365_v33 = vld [vmem:[%s3137_s0 + $0x278] ss:$12 sps:$4 sm:$0xff]  }
  0x52   :  { %854 = vmatprep.mubr.bf16.mxu0 %v2274_v34  ;;  %2161 = vmatmul.mubr.msk.bf16.gmra.mxu1 %vm710_vm1, %v2297_v38  ;;  %v2348_v34 = vld [vmem:[%s3137_s0 + $0x1f8] ss:$12 sps:$4 sm:$0xff]  }
  0x53   :  { %2164 = vmatprep.mubr.msk.bf16.mxu1 %vm2378_vm0, %v2377_v2 }
  0x59   :  { %855 = vmatmul.mubr.bf16.gmra.mxu0 %v2276_v36  ;;  %v2350_v36 = vld [vmem:[%s3137_s0 + $0x214] ss:$12 sps:$4 sm:$0xff]  }
  0x5a   :  { %862 = vmatprep.mubr.bf16.mxu0 %v2278_v37  ;;  %2165 = vmatmul.mubr.msk.bf16.gmra.mxu1 %vm710_vm1, %v2301_v41  ;;  %v2352_v41 = vld [vmem:[%s3137_s0 + $0x210] ss:$12 sps:$4 sm:$0xff]  }
  0x5b   :  { %2168 = vmatprep.mubr.msk.bf16.mxu1 %vm2378_vm0, %v2377_v2 }
  0x61   :  { %863 = vmatmul.mubr.bf16.gmra.mxu0 %v2280_v39 }
  0x62   :  { %870 = vmatprep.mubr.bf16.mxu0 %v2282_v40  ;;  %2169 = vmatmul.mubr.msk.bf16.gmra.mxu1 %vm710_vm1, %v2305_v44  ;;  %v2369_v40 = vld [vmem:[%s3137_s0 + $0x290] ss:$12 sps:$4 sm:$0xff]  }
  0x63   :  { %2172 = vmatprep.mubr.msk.bf16.mxu1 %vm2378_vm0, %v2377_v2 }
  0x69   :  { %871 = vmatmul.mubr.bf16.gmra.mxu0 %v2284_v42 }
  0x6a   :  { %878 = vmatprep.mubr.bf16.mxu0 %v2286_v43  ;;  %2173 = vmatmul.mubr.msk.bf16.gmra.mxu1 %vm710_vm1, %v2309_v47  ;;  %v2354_v43 = vld [vmem:[%s3137_s0 + $0x22c] ss:$12 sps:$4 sm:$0xff]   ;;  %v2373_v47 = vld [vmem:[%s3137_s0 + $0x2a8] ss:$0 sps:$4 sm:$0x11]  }
  0x6b   :  { %2176 = vmatprep.mubr.msk.bf16.mxu1 %vm2378_vm0, %v2377_v2 }
  0x71   :  { %879 = vmatmul.mubr.bf16.gmra.mxu0 %v2288_v45 }
  0x72   :  { %886 = vmatprep.mubr.bf16.mxu0 %v2290_v46  ;;  %2177 = vmatmul.mubr.msk.bf16.gmra.mxu1 %vm710_vm1, %v2313_v50  ;;  %v2358_v50 = vld [vmem:[%s3137_s0 + $0x244] ss:$12 sps:$4 sm:$0xff]  }
  0x73   :  { %2180 = vmatprep.mubr.msk.bf16.mxu1 %vm2378_vm0, %v2377_v2 }
  0x79   :  { %887 = vmatmul.mubr.bf16.gmra.mxu0 %v2292_v48  ;;  %v2356_v48 = vld [vmem:[%s3137_s0 + $0x228] ss:$12 sps:$4 sm:$0xff]  }
  0x7a   :  { %894 = vmatprep.mubr.bf16.mxu0 %v2294_v49  ;;  %2181 = vmatmul.mubr.msk.bf16.gmra.mxu1 %vm710_vm1, %v2317_v53  ;;  %v2360_v53 = vld [vmem:[%s3137_s0 + $0x240] ss:$12 sps:$4 sm:$0xff]  }
  0x7b   :  { %2184 = vmatprep.mubr.msk.bf16.mxu1 %vm2378_vm0, %v2377_v2 }
  0x81   :  { %895 = vmatmul.mubr.bf16.gmra.mxu0 %v2296_v51 }
  0x82   :  { %902 = vmatprep.mubr.bf16.mxu0 %v2298_v52  ;;  %2185 = vmatmul.mubr.msk.bf16.gmra.mxu1 %vm710_vm1, %v2321_v56  ;;  %v2821_v56 = vld [vmem:[%s3138_s2] ss:$0 sm:$0xff] }
  0x83   :  { %2188 = vmatprep.mubr.msk.bf16.mxu1 %vm2378_vm0, %v2377_v2 }
  0x89   :  { %903 = vmatmul.mubr.bf16.gmra.mxu0 %v2300_v54 }
  0x8a   :  { %910 = vmatprep.mubr.bf16.mxu0 %v2302_v55  ;;  %2189 = vmatmul.mubr.msk.bf16.gmra.mxu1 %vm710_vm1, %v2325_v59  ;;  %v2362_v55 = vld [vmem:[%s3137_s0 + $0x25c] ss:$12 sps:$4 sm:$0xff]  }
  0x8b   :  { %2192 = vmatprep.mubr.msk.bf16.mxu1 %vm2378_vm0, %v2377_v2 }
  0x91   :  { %911 = vmatmul.mubr.bf16.gmra.mxu0 %v2304_v57 }
  0x92   :  { %918 = vmatprep.mubr.bf16.mxu0 %v2306_v58  ;;  %2193 = vmatmul.mubr.msk.bf16.gmra.mxu1 %vm710_vm1, %v2329_v62 }
  0x93   :  { %2196 = vmatprep.mubr.msk.bf16.mxu1 %vm2378_vm0, %v2377_v2 }
  0x99   :  { %919 = vmatmul.mubr.bf16.gmra.mxu0 %v2308_v60 }
  0x9a   :  { %926 = vmatprep.mubr.bf16.mxu0 %v2310_v61  ;;  %2197 = vmatmul.mubr.msk.bf16.gmra.mxu1 %vm710_vm1, %v2333_v1 }
  0x9b   :  { %2200 = vmatprep.mubr.msk.bf16.mxu1 %vm2378_vm0, %v2377_v2 }
  0xa1   :  { %927 = vmatmul.mubr.bf16.gmra.mxu0 %v2312_v63 }
  0xa2   :  { %934 = vmatprep.mubr.bf16.mxu0 %v2314_v0  ;;  %2201 = vmatmul.mubr.msk.bf16.gmra.mxu1 %vm710_vm1, %v2337_v5  ;;  %v2364_v0 = vld [vmem:[%s3137_s0 + $0x258] ss:$12 sps:$4 sm:$0xff]   ;;  %v2366_v5 = vld [vmem:[%s3137_s0 + $0x274] ss:$12 sps:$4 sm:$0xff]  }
  0xa3   :  { %2204 = vmatprep.mubr.msk.bf16.mxu1 %vm2378_vm0, %v2377_v2 }
  0xa9   :  { %935 = vmatmul.mubr.bf16.gmra.mxu0 %v2316_v3 }
  0xaa   :  { %942 = vmatprep.mubr.bf16.mxu0 %v2318_v4  ;;  %2205 = vmatmul.mubr.msk.bf16.gmra.mxu1 %vm710_vm1, %v2341_v8 }
  0xab   :  { %2208 = vmatprep.mubr.msk.bf16.mxu1 %vm2378_vm0, %v2377_v2 }
  0xb1   :  { %943 = vmatmul.mubr.bf16.gmra.mxu0 %v2320_v6 }
  0xb2   :  { %950 = vmatprep.mubr.bf16.mxu0 %v2322_v7  ;;  %2209 = vmatmul.mubr.msk.bf16.gmra.mxu1 %vm710_vm1, %v2345_v11 }
  0xb3   :  { %2212 = vmatprep.mubr.msk.bf16.mxu1 %vm2378_vm0, %v2377_v2 }
  0xb9   :  { %951 = vmatmul.mubr.bf16.gmra.mxu0 %v2324_v9 }
  0xba   :  { %958 = vmatprep.mubr.bf16.mxu0 %v2326_v10  ;;  %2213 = vmatmul.mubr.msk.bf16.gmra.mxu1 %vm710_vm1, %v2349_v14 }
  0xbb   :  { %2216 = vmatprep.mubr.msk.bf16.mxu1 %vm2378_vm0, %v2377_v2 }
  0xc1   :  { %959 = vmatmul.mubr.bf16.gmra.mxu0 %v2328_v12 }
  0xc2   :  { %966 = vmatprep.mubr.bf16.mxu0 %v2330_v13  ;;  %2217 = vmatmul.mubr.msk.bf16.gmra.mxu1 %vm710_vm1, %v2353_v17 }
  0xc3   :  { %2220 = vmatprep.mubr.msk.bf16.mxu1 %vm2378_vm0, %v2377_v2 }
  0xc9   :  { %967 = vmatmul.mubr.bf16.gmra.mxu0 %v2332_v15 }
  0xca   :  { %974 = vmatprep.mubr.bf16.mxu0 %v2334_v16  ;;  %v2743_v23 = vpop.f32.mrf.mxu1  ;;  %2221 = vmatmul.mubr.msk.bf16.gmra.mxu1 %vm710_vm1, %v2357_v20 }
  0xcb   :  { %2224 = vmatprep.mubr.msk.bf16.mxu1 %vm2378_vm0, %v2377_v2 }
  0xcc   :  { %v2126_v24 = vpop.f32.mrf.mxu1 }
  0xce   :  { %v2748_v25 = vpop.f32.mrf.mxu1 }
  0xd0   :  { %v2127_v28 = vpop.f32.mrf.mxu1 }
  0xd1   :  { %975 = vmatmul.mubr.bf16.gmra.mxu0 %v2336_v18  ;;  %v2368_v18 = vld [vmem:[%s3137_s0 + $0x270] ss:$12 sps:$4 sm:$0xff]  }
  0xd2   :  { %982 = vmatprep.mubr.bf16.mxu0 %v2338_v19  ;;  %v2759_v30 = vpop.f32.mrf.mxu1  ;;  %2225 = vmatmul.mubr.msk.bf16.gmra.mxu1 %vm710_vm1, %v2361_v26 }
  0xd3   :  { %2228 = vmatprep.mubr.msk.bf16.mxu1 %vm2378_vm0, %v2377_v2 }
  0xd4   :  { %v2130_v31 = vpop.f32.mrf.mxu1 }
  0xd6   :  { %v2764_v32 = vpop.f32.mrf.mxu1 }
  0xd8   :  { %v2131_v35 = vpop.f32.mrf.mxu1 }
  0xd9   :  { %983 = vmatmul.mubr.bf16.gmra.mxu0 %v2340_v21 }
  0xda   :  { %990 = vmatprep.mubr.bf16.mxu0 %v2342_v22  ;;  %v2775_v37 = vpop.f32.mrf.mxu1  ;;  %2229 = vmatmul.mubr.msk.bf16.gmra.mxu1 %vm710_vm1, %v2365_v33  ;;  %v2370_v22 = vld [vmem:[%s3137_s0 + $0x28c] ss:$12 sps:$4 sm:$0xff]   ;;  %v127_v33 = vld [vmem:[%s3137_s0 + $0x2a0] sm:$0x11] }
  0xdb   :  { %2232 = vmatprep.mubr.msk.bf16.mxu1 %vm2378_vm0, %v2377_v2 }
  0xdc   :  { %v2134_v38 = vpop.f32.mrf.mxu1 }
  0xde   :  { %v2780_v39 = vpop.f32.mrf.mxu1 }
  0xe0   :  { %v2135_v42 = vpop.f32.mrf.mxu1 }
  0xe1   :  { %991 = vmatmul.mubr.bf16.gmra.mxu0 %v2344_v27  ;;  %v1759_v42 = vcombine.high %v127_v33, %v127_v33 }
  0xe2   :  { %998 = vmatprep.mubr.bf16.mxu0 %v2346_v29  ;;  %v2791_v44 = vpop.f32.mrf.mxu1  ;;  %2233 = vmatmul.mubr.msk.bf16.gmra.mxu1 %vm710_vm1, %v2369_v40 }
  0xe3   :  { %2236 = vmatprep.mubr.msk.bf16.mxu1 %vm2378_vm0, %v2377_v2 }
  0xe4   :  { %v2138_v45 = vpop.f32.mrf.mxu1 }
  0xe6   :  { %v2796_v46 = vpop.f32.mrf.mxu1 }
  0xe8   :  { %v2139_v49 = vpop.f32.mrf.mxu1 }
  0xe9   :  { %999 = vmatmul.mubr.bf16.gmra.mxu0 %v2348_v34 }
  0xea   :  { %1006 = vmatprep.mubr.bf16.mxu0 %v2350_v36  ;;  %v2807_v51 = vpop.f32.mrf.mxu1  ;;  %2237 = vmatmul.mubr.msk.bf16.gmra.mxu1 %vm710_vm1, %v2373_v47 }
  0xec   :  { %v2142_v2 = vpop.f32.mrf.mxu1 }
  0xee   :  { %v2810_v52 = vpop.f32.mrf.mxu1 }
  0xf0   :  { %v2143_v54 = vpop.f32.mrf.mxu1 }
  0xf1   :  { %1007 = vmatmul.mubr.bf16.gmra.mxu0 %v2352_v41 }
  0xf2   :  { %1014 = vmatprep.mubr.bf16.mxu0 %v2354_v43  ;;  %v2823_v57 = vpop.f32.mrf.mxu1 }
  0xf4   :  { %v2146_v59 = vpop.f32.mrf.mxu1 }
  0xf5   :  { %v1758_v59 = vcombine.low %v127_v33, %v127_v33 }
  0xf6   :  { %v2826_v62 = vpop.f32.mrf.mxu1 }
  0xf8   :  { %v2147_v1 = vpop.f32.mrf.mxu1 }
  0xf9   :  { %1015 = vmatmul.mubr.bf16.gmra.mxu0 %v2356_v48 }
  0xfa   :  { %1022 = vmatprep.mubr.bf16.mxu0 %v2358_v50  ;;  %v2836_v7 = vpop.f32.mrf.mxu1 }
  0xfc   :  { %v2150_v10 = vpop.f32.mrf.mxu1 }
  0xfe   :  { %v2840_v15 = vpop.f32.mrf.mxu1 }
 0x100   :  { %v2151_v19 = vpop.f32.mrf.mxu1 }
 0x101   :  { %v832_v58 = vpop.f32.mrf.mxu0  ;;  %1023 = vmatmul.mubr.bf16.gmra.mxu0 %v2360_v53 }
 0x102   :  { %v833_v60 = vadd.f32 %v2821_v56, %v832_v58  ;;  %1030 = vmatprep.mubr.bf16.mxu0 %v2362_v55  ;;  %v2853_v24 = vpop.f32.mrf.mxu1 }
 0x103   :  { %v834_v61 = vpop.f32.mrf.mxu0 }
 0x104   :  { %v1097_v3 = vadd.f32 %v2743_v23, %v833_v60  ;;  %v2154_v27 = vpop.f32.mrf.mxu1 }
 0x105   :  { %v835_v63 = vpop.f32.mrf.mxu0 }
 0x106   :  { %v836_v4 = vadd.f32 %v2821_v56, %v835_v63  ;;  %v1326_v11 = vmax.f32 %v1097_v3, 0.0  ;;  %v2860_v34 = vpop.f32.mrf.mxu1 }
 0x107   :  { %v837_v6 = vpop.f32.mrf.mxu0 }
 0x108   :  { %v1100_v8 = vadd.f32 %v2748_v25, %v836_v4  ;;  %v2155_v38 = vpop.f32.mrf.mxu1 }
 0x109   :  { %v840_v9 = vpop.f32.mrf.mxu0  ;;  %1031 = vmatmul.mubr.bf16.gmra.mxu0 %v2364_v0 }
 0x10a   :  { %v1327_v12 = vmax.f32 %v1100_v8, 0.0  ;;  %v841_v13 = vadd.f32 %v2821_v56, %v840_v9  ;;  %1038 = vmatprep.mubr.bf16.mxu0 %v2366_v5  ;;  %v2870_v45 = vpop.f32.mrf.mxu1 }
 0x10b   :  { %v842_v14 = vpop.f32.mrf.mxu0 }
 0x10c   :  { %v1925_v16 = vpack.c.bf16 %v1327_v12, %v1326_v11  ;;  %v1105_v20 = vadd.f32 %v2759_v30, %v841_v13  ;;  %v2158_v49 = vpop.f32.mrf.mxu1 }
 0x10d   :  { %v843_v17 = vpop.f32.mrf.mxu0 }
 0x10e   :  { %1926 = vst [vmem:[%s3139_s3] sm:$0xff] %v1925_v16   ;;  %v844_v21 = vadd.f32 %v2821_v56, %v843_v17  ;;  %v1328_v28 = vmax.f32 %v1105_v20, 0.0  ;;  %v2874_v55 = vpop.f32.mrf.mxu1 }
 0x10f   :  { %v845_v23 = vpop.f32.mrf.mxu0 }
 0x110   :  { %v1108_v25 = vadd.f32 %v2764_v32, %v844_v21  ;;  %v2372_v32 = vld [vmem:[%s3137_s0 + $0x288] ss:$12 sps:$4 sm:$0xff]   ;;  %v2159_v60 = vpop.f32.mrf.mxu1 }
 0x111   :  { %v848_v26 = vpop.f32.mrf.mxu0  ;;  %1039 = vmatmul.mubr.bf16.gmra.mxu0 %v2368_v18 }
 0x112   :  { %v1329_v29 = vmax.f32 %v1108_v25, 0.0  ;;  %v849_v31 = vadd.f32 %v2821_v56, %v848_v26  ;;  %1046 = vmatprep.mubr.bf16.mxu0 %v2370_v22  ;;  %v2881_v0 = vpop.f32.mrf.mxu1 }
 0x113   :  { %v850_v30 = vpop.f32.mrf.mxu0 }
 0x114   :  { %v1930_v35 = vpack.c.bf16 %v1329_v29, %v1328_v28  ;;  %v1113_v40 = vadd.f32 %v2775_v37, %v849_v31  ;;  %v2162_v4 = vpop.f32.mrf.mxu1 }
 0x115   :  { %v851_v36 = vpop.f32.mrf.mxu0 }
 0x116   :  { %2062 = vst [vmem:[%s3139_s3 + $0x8] sm:$0xff] %v1930_v35   ;;  %v852_v41 = vadd.f32 %v2821_v56, %v851_v36  ;;  %v1330_v50 = vmax.f32 %v1113_v40, 0.0  ;;  %v2885_v10 = vpop.f32.mrf.mxu1 }
 0x117   :  { %v853_v43 = vpop.f32.mrf.mxu0 }
 0x118   :  { %v1116_v47 = vadd.f32 %v2780_v39, %v852_v41 }
 0x119   :  { %v856_v48 = vpop.f32.mrf.mxu0  ;;  %1047 = vmatmul.mubr.bf16.gmra.mxu0 %v2372_v32 }
 0x11a   :  { %v1331_v2 = vmax.f32 %v1116_v47, 0.0  ;;  %v857_v53 = vadd.f32 %v2821_v56, %v856_v48  ;;  %1054 = vmatprep.mubr.bf16.mxu0 %v1759_v42 }
 0x11b   :  { %v858_v54 = vpop.f32.mrf.mxu0 }
 0x11c   :  { %v1935_v37 = vpack.c.bf16 %v1331_v2, %v1330_v50  ;;  %v1121_v39 = vadd.f32 %v2791_v44, %v857_v53  ;;  %v2163_v44 = vpop.f32.mrf.mxu1 }
 0x11d   :  { %v859_v58 = vpop.f32.mrf.mxu0 }
 0x11e   :  { %2063 = vst [vmem:[%s3139_s3 + $0x10] sm:$0xff] %v1935_v37   ;;  %v860_v61 = vadd.f32 %v2821_v56, %v859_v58  ;;  %v1332_v5 = vmax.f32 %v1121_v39, 0.0  ;;  %v2892_v16 = vpop.f32.mrf.mxu1 }
 0x11f   :  { %v861_v63 = vpop.f32.mrf.mxu0 }
 0x120   :  { %v1124_v1 = vadd.f32 %v2796_v46, %v860_v61  ;;  %v2166_v19 = vpop.f32.mrf.mxu1 }
 0x121   :  { %v864_v3 = vpop.f32.mrf.mxu0  ;;  %1055 = vmatmul.mubr.bf16.gmra.mxu0 %v1758_v59 }
 0x122   :  { %v1333_v6 = vmax.f32 %v1124_v1, 0.0  ;;  %v865_v8 = vadd.f32 %v2821_v56, %v864_v3  ;;  %v2896_v25 = vpop.f32.mrf.mxu1 }
 0x123   :  { %v866_v9 = vpop.f32.mrf.mxu0 }
 0x124   :  { %v1940_v11 = vpack.c.bf16 %v1333_v6, %v1332_v5  ;;  %v1129_v13 = vadd.f32 %v2807_v51, %v865_v8  ;;  %v2167_v28 = vpop.f32.mrf.mxu1 }
 0x125   :  { %v867_v12 = vpop.f32.mrf.mxu0 }
 0x126   :  { %2064 = vst [vmem:[%s3139_s3 + $0x18] sm:$0xff] %v1940_v11   ;;  %v868_v46 = vadd.f32 %v2821_v56, %v867_v12  ;;  %v1334_v20 = vmax.f32 %v1129_v13, 0.0  ;;  %v2903_v31 = vpop.f32.mrf.mxu1 }
 0x127   :  { %v869_v14 = vpop.f32.mrf.mxu0 }
 0x128   :  { %v1132_v17 = vadd.f32 %v2810_v52, %v868_v46  ;;  %v2170_v35 = vpop.f32.mrf.mxu1 }
 0x129   :  { %v872_v18 = vpop.f32.mrf.mxu0 }
 0x12a   :  { %v1335_v21 = vmax.f32 %v1132_v17, 0.0  ;;  %v873_v22 = vadd.f32 %v2821_v56, %v872_v18  ;;  %v2907_v41 = vpop.f32.mrf.mxu1 }
 0x12b   :  { %v874_v23 = vpop.f32.mrf.mxu0 }
 0x12c   :  { %v1945_v26 = vpack.c.bf16 %v1335_v21, %v1334_v20  ;;  %v1137_v51 = vadd.f32 %v2823_v57, %v873_v22  ;;  %v2171_v47 = vpop.f32.mrf.mxu1 }
 0x12d   :  { %v875_v27 = vpop.f32.mrf.mxu0 }
 0x12e   :  { %2065 = vst [vmem:[%s3139_s3 + $0x20] sm:$0xff] %v1945_v26   ;;  %v876_v52 = vadd.f32 %v2821_v56, %v875_v27  ;;  %v1336_v36 = vmax.f32 %v1137_v51, 0.0  ;;  %v2914_v49 = vpop.f32.mrf.mxu1 }
 0x12f   :  { %v877_v29 = vpop.f32.mrf.mxu0 }
 0x130   :  { %v1140_v30 = vadd.f32 %v2826_v62, %v876_v52  ;;  %v2174_v53 = vpop.f32.mrf.mxu1 }
 0x131   :  { %v880_v33 = vpop.f32.mrf.mxu0 }
 0x132   :  { %v1337_v32 = vmax.f32 %v1140_v30, 0.0  ;;  %v881_v38 = vadd.f32 %v2821_v56, %v880_v33  ;;  %v2918_v60 = vpop.f32.mrf.mxu1 }
 0x133   :  { %v882_v40 = vpop.f32.mrf.mxu0 }
 0x134   :  { %v1950_v42 = vpack.c.bf16 %v1337_v32, %v1336_v36  ;;  %v1145_v57 = vadd.f32 %v2836_v7, %v881_v38  ;;  %v2175_v63 = vpop.f32.mrf.mxu1 }
 0x135   :  { %v883_v43 = vpop.f32.mrf.mxu0 }
 0x136   :  { %2066 = vst [vmem:[%s3139_s3 + $0x28] sm:$0xff] %v1950_v42   ;;  %v884_v62 = vadd.f32 %v2821_v56, %v883_v43  ;;  %v1338_v54 = vmax.f32 %v1145_v57, 0.0  ;;  %v2925_v3 = vpop.f32.mrf.mxu1 }
 0x137   :  { %v885_v48 = vpop.f32.mrf.mxu0 }
 0x138   :  { %v1148_v50 = vadd.f32 %v2840_v15, %v884_v62  ;;  %v2178_v6 = vpop.f32.mrf.mxu1 }
 0x139   :  { %v888_v2 = vpop.f32.mrf.mxu0 }
 0x13a   :  { %v1339_v37 = vmax.f32 %v1148_v50, 0.0  ;;  %v889_v58 = vadd.f32 %v2821_v56, %v888_v2  ;;  %v2929_v44 = vpop.f32.mrf.mxu1 }
 0x13b   :  { %v890_v59 = vpop.f32.mrf.mxu0 }
 0x13c   :  { %v1955_v39 = vpack.c.bf16 %v1339_v37, %v1338_v54  ;;  %v1153_v7 = vadd.f32 %v2853_v24, %v889_v58  ;;  %v2179_v14 = vpop.f32.mrf.mxu1 }
 0x13d   :  { %v891_v61 = vpop.f32.mrf.mxu0 }
 0x13e   :  { %2067 = vst [vmem:[%s3139_s3 + $0x30] sm:$0xff] %v1955_v39   ;;  %v892_v15 = vadd.f32 %v2821_v56, %v891_v61  ;;  %v1340_v8 = vmax.f32 %v1153_v7, 0.0  ;;  %v2936_v18 = vpop.f32.mrf.mxu1 }
 0x13f   :  { %v893_v1 = vpop.f32.mrf.mxu0 }
 0x140   :  { %v1156_v4 = vadd.f32 %v2860_v34, %v892_v15  ;;  %v2182_v21 = vpop.f32.mrf.mxu1 }
 0x141   :  { %v896_v5 = vpop.f32.mrf.mxu0 }
 0x142   :  { %v1341_v9 = vmax.f32 %v1156_v4, 0.0  ;;  %v897_v11 = vadd.f32 %v2821_v56, %v896_v5  ;;  %v2940_v28 = vpop.f32.mrf.mxu1 }
 0x143   :  { %v898_v12 = vpop.f32.mrf.mxu0 }
 0x144   :  { %v1960_v13 = vpack.c.bf16 %v1341_v9, %v1340_v8  ;;  %v1161_v24 = vadd.f32 %v2870_v45, %v897_v11  ;;  %v2183_v29 = vpop.f32.mrf.mxu1 }
 0x145   :  { %v899_v46 = vpop.f32.mrf.mxu0 }
 0x146   :  { %2068 = vst [vmem:[%s3139_s3 + $0x38] sm:$0xff] %v1960_v13   ;;  %v900_v34 = vadd.f32 %v2821_v56, %v899_v46  ;;  %v1342_v22 = vmax.f32 %v1161_v24, 0.0  ;;  %v2947_v33 = vpop.f32.mrf.mxu1 }
 0x147   :  { %v901_v17 = vpop.f32.mrf.mxu0 }
 0x148   :  { %v1164_v19 = vadd.f32 %v2874_v55, %v900_v34  ;;  %v2186_v32 = vpop.f32.mrf.mxu1 }
 0x149   :  { %v904_v20 = vpop.f32.mrf.mxu0 }
 0x14a   :  { %v1343_v23 = vmax.f32 %v1164_v19, 0.0  ;;  %v905_v26 = vadd.f32 %v2821_v56, %v904_v20  ;;  %v2951_v47 = vpop.f32.mrf.mxu1 }
 0x14b   :  { %v906_v27 = vpop.f32.mrf.mxu0 }
 0x14c   :  { %v1965_v51 = vpack.c.bf16 %v1343_v23, %v1342_v22  ;;  %v1169_v45 = vadd.f32 %v2881_v0, %v905_v26  ;;  %v2187_v48 = vpop.f32.mrf.mxu1 }
 0x14d   :  { %v907_v52 = vpop.f32.mrf.mxu0 }
 0x14e   :  { %2069 = vst [vmem:[%s3139_s3 + $0x40] sm:$0xff] %v1965_v51   ;;  %v908_v55 = vadd.f32 %v2821_v56, %v907_v52  ;;  %v1344_v38 = vmax.f32 %v1169_v45, 0.0  ;;  %v2958_v2 = vpop.f32.mrf.mxu1 }
 0x14f   :  { %v909_v30 = vpop.f32.mrf.mxu0 }
 0x150   :  { %v1172_v35 = vadd.f32 %v2885_v10, %v908_v55  ;;  %v2190_v37 = vpop.f32.mrf.mxu1 }
 0x151   :  { %v912_v36 = vpop.f32.mrf.mxu0 }
 0x152   :  { %v1345_v40 = vmax.f32 %v1172_v35, 0.0  ;;  %v913_v42 = vadd.f32 %v2821_v56, %v912_v36  ;;  %v2962_v63 = vpop.f32.mrf.mxu1 }
 0x153   :  { %v914_v43 = vpop.f32.mrf.mxu0 }
 0x154   :  { %v1970_v57 = vpack.c.bf16 %v1345_v40, %v1344_v38  ;;  %v1177_v0 = vadd.f32 %v2892_v16, %v913_v42  ;;  %v2191_v1 = vpop.f32.mrf.mxu1 }
 0x155   :  { %v915_v62 = vpop.f32.mrf.mxu0 }
 0x156   :  { %2070 = vst [vmem:[%s3139_s3 + $0x48] sm:$0xff] %v1970_v57   ;;  %v916_v10 = vadd.f32 %v2821_v56, %v915_v62  ;;  %v1346_v58 = vmax.f32 %v1177_v0, 0.0  ;;  %v2969_v5 = vpop.f32.mrf.mxu1 }
 0x157   :  { %v917_v50 = vpop.f32.mrf.mxu0 }
 0x158   :  { %v1180_v53 = vadd.f32 %v2896_v25, %v916_v10  ;;  %v2194_v9 = vpop.f32.mrf.mxu1 }
 0x159   :  { %v920_v54 = vpop.f32.mrf.mxu0 }
 0x15a   :  { %v1347_v59 = vmax.f32 %v1180_v53, 0.0  ;;  %v921_v39 = vadd.f32 %v2821_v56, %v920_v54  ;;  %v2973_v14 = vpop.f32.mrf.mxu1 }
 0x15b   :  { %v922_v61 = vpop.f32.mrf.mxu0 }
 0x15c   :  { %v1975_v7 = vpack.c.bf16 %v1347_v59, %v1346_v58  ;;  %v1185_v16 = vadd.f32 %v2903_v31, %v921_v39  ;;  %v2195_v17 = vpop.f32.mrf.mxu1 }
 0x15d   :  { %v923_v15 = vpop.f32.mrf.mxu0 }
 0x15e   :  { %2071 = vst [vmem:[%s3139_s3 + $0x50] sm:$0xff] %v1975_v7   ;;  %v924_v25 = vadd.f32 %v2821_v56, %v923_v15  ;;  %v1348_v11 = vmax.f32 %v1185_v16, 0.0  ;;  %v2980_v20 = vpop.f32.mrf.mxu1 }
 0x15f   :  { %v925_v4 = vpop.f32.mrf.mxu0 }
 0x160   :  { %v1188_v6 = vadd.f32 %v2907_v41, %v924_v25  ;;  %v2198_v23 = vpop.f32.mrf.mxu1 }
 0x161   :  { %v928_v8 = vpop.f32.mrf.mxu0 }
 0x162   :  { %v1349_v12 = vmax.f32 %v1188_v6, 0.0  ;;  %v929_v13 = vadd.f32 %v2821_v56, %v928_v8  ;;  %v2984_v29 = vpop.f32.mrf.mxu1 }
 0x163   :  { %v930_v46 = vpop.f32.mrf.mxu0 }
 0x164   :  { %v1980_v24 = vpack.c.bf16 %v1349_v12, %v1348_v11  ;;  %v1193_v31 = vadd.f32 %v2914_v49, %v929_v13  ;;  %v2199_v30 = vpop.f32.mrf.mxu1 }
 0x165   :  { %v931_v34 = vpop.f32.mrf.mxu0 }
 0x166   :  { %2072 = vst [vmem:[%s3139_s3 + $0x58] sm:$0xff] %v1980_v24   ;;  %v932_v41 = vadd.f32 %v2821_v56, %v931_v34  ;;  %v1350_v26 = vmax.f32 %v1193_v31, 0.0  ;;  %v2991_v36 = vpop.f32.mrf.mxu1 }
 0x167   :  { %v933_v19 = vpop.f32.mrf.mxu0 }
 0x168   :  { %v1196_v21 = vadd.f32 %v2918_v60, %v932_v41  ;;  %v2202_v40 = vpop.f32.mrf.mxu1 }
 0x169   :  { %v936_v22 = vpop.f32.mrf.mxu0 }
 0x16a   :  { %v1351_v27 = vmax.f32 %v1196_v21, 0.0  ;;  %v937_v51 = vadd.f32 %v2821_v56, %v936_v22  ;;  %v2995_v48 = vpop.f32.mrf.mxu1 }
 0x16b   :  { %v938_v52 = vpop.f32.mrf.mxu0 }
 0x16c   :  { %v1985_v45 = vpack.c.bf16 %v1351_v27, %v1350_v26  ;;  %v1201_v49 = vadd.f32 %v2925_v3, %v937_v51  ;;  %v2203_v50 = vpop.f32.mrf.mxu1 }
 0x16d   :  { %v939_v55 = vpop.f32.mrf.mxu0 }
 0x16e   :  { %2073 = vst [vmem:[%s3139_s3 + $0x60] sm:$0xff] %v1985_v45   ;;  %v940_v60 = vadd.f32 %v2821_v56, %v939_v55  ;;  %v1352_v42 = vmax.f32 %v1201_v49, 0.0  ;;  %v3002_v54 = vpop.f32.mrf.mxu1 }
 0x16f   :  { %v941_v35 = vpop.f32.mrf.mxu0 }
 0x170   :  { %v1204_v32 = vadd.f32 %v2929_v44, %v940_v60  ;;  %v2206_v59 = vpop.f32.mrf.mxu1 }
 0x171   :  { %v944_v38 = vpop.f32.mrf.mxu0 }
 0x172   :  { %v1353_v43 = vmax.f32 %v1204_v32, 0.0  ;;  %v945_v57 = vadd.f32 %v2821_v56, %v944_v38  ;;  %v3006_v1 = vpop.f32.mrf.mxu1 }
 0x173   :  { %v946_v62 = vpop.f32.mrf.mxu0 }
 0x174   :  { %v1990_v0 = vpack.c.bf16 %v1353_v43, %v1352_v42  ;;  %v1209_v3 = vadd.f32 %v2936_v18, %v945_v57  ;;  %v2207_v4 = vpop.f32.mrf.mxu1 }
 0x175   :  { %v947_v10 = vpop.f32.mrf.mxu0 }
 0x176   :  { %2074 = vst [vmem:[%s3139_s3 + $0x68] sm:$0xff] %v1990_v0   ;;  %v948_v44 = vadd.f32 %v2821_v56, %v947_v10  ;;  %v1354_v39 = vmax.f32 %v1209_v3, 0.0  ;;  %v3013_v8 = vpop.f32.mrf.mxu1 }
 0x177   :  { %v949_v53 = vpop.f32.mrf.mxu0 }
 0x178   :  { %v1212_v37 = vadd.f32 %v2940_v28, %v948_v44  ;;  %v2210_v12 = vpop.f32.mrf.mxu1 }
 0x179   :  { %v952_v58 = vpop.f32.mrf.mxu0 }
 0x17a   :  { %v1355_v61 = vmax.f32 %v1212_v37, 0.0  ;;  %v953_v7 = vadd.f32 %v2821_v56, %v952_v58  ;;  %v3017_v17 = vpop.f32.mrf.mxu1 }
 0x17b   :  { %v954_v15 = vpop.f32.mrf.mxu0 }
 0x17c   :  { %v1995_v16 = vpack.c.bf16 %v1355_v61, %v1354_v39  ;;  %v1217_v18 = vadd.f32 %v2947_v33, %v953_v7  ;;  %v2211_v19 = vpop.f32.mrf.mxu1 }
 0x17d   :  { %v955_v25 = vpop.f32.mrf.mxu0 }
 0x17e   :  { %2075 = vst [vmem:[%s3139_s3 + $0x70] sm:$0xff] %v1995_v16   ;;  %v956_v28 = vadd.f32 %v2821_v56, %v955_v25  ;;  %v1356_v13 = vmax.f32 %v1217_v18, 0.0  ;;  %v3024_v22 = vpop.f32.mrf.mxu1 }
 0x17f   :  { %v957_v6 = vpop.f32.mrf.mxu0 }
 0x180   :  { %v1220_v9 = vadd.f32 %v2951_v47, %v956_v28  ;;  %v2214_v27 = vpop.f32.mrf.mxu1 }
 0x181   :  { %v960_v11 = vpop.f32.mrf.mxu0 }
 0x182   :  { %v1357_v46 = vmax.f32 %v1220_v9, 0.0  ;;  %v961_v24 = vadd.f32 %v2821_v56, %v960_v11  ;;  %v3028_v30 = vpop.f32.mrf.mxu1 }
 0x183   :  { %v962_v34 = vpop.f32.mrf.mxu0 }
 0x184   :  { %v2000_v31 = vpack.c.bf16 %v1357_v46, %v1356_v13  ;;  %v1225_v33 = vadd.f32 %v2958_v2, %v961_v24  ;;  %v2215_v35 = vpop.f32.mrf.mxu1 }
 0x185   :  { %v963_v41 = vpop.f32.mrf.mxu0 }
 0x186   :  { %2076 = vst [vmem:[%s3139_s3 + $0x78] sm:$0xff] %v2000_v31   ;;  %v964_v47 = vadd.f32 %v2821_v56, %v963_v41  ;;  %v1358_v51 = vmax.f32 %v1225_v33, 0.0  ;;  %v3035_v38 = vpop.f32.mrf.mxu1 }
 0x187   :  { %v965_v21 = vpop.f32.mrf.mxu0 }
 0x188   :  { %v1228_v23 = vadd.f32 %v2962_v63, %v964_v47  ;;  %v2218_v43 = vpop.f32.mrf.mxu1 }
 0x189   :  { %v968_v26 = vpop.f32.mrf.mxu0 }
 0x18a   :  { %v1359_v52 = vmax.f32 %v1228_v23, 0.0  ;;  %v969_v45 = vadd.f32 %v2821_v56, %v968_v26  ;;  %v3039_v50 = vpop.f32.mrf.mxu1 }
 0x18b   :  { %v970_v55 = vpop.f32.mrf.mxu0 }
 0x18c   :  { %v2005_v49 = vpack.c.bf16 %v1359_v52, %v1358_v51  ;;  %v1233_v2 = vadd.f32 %v2969_v5, %v969_v45  ;;  %v2219_v53 = vpop.f32.mrf.mxu1 }
 0x18d   :  { %v971_v60 = vpop.f32.mrf.mxu0 }
 0x18e   :  { %2077 = vst [vmem:[%s3139_s3 + $0x80] sm:$0xff] %v2005_v49   ;;  %v972_v63 = vadd.f32 %v2821_v56, %v971_v60  ;;  %v1360_v57 = vmax.f32 %v1233_v2, 0.0  ;;  %v3046_v58 = vpop.f32.mrf.mxu1 }
 0x18f   :  { %v973_v32 = vpop.f32.mrf.mxu0 }
 0x190   :  { %v1236_v40 = vadd.f32 %v2973_v14, %v972_v63  ;;  %v2222_v61 = vpop.f32.mrf.mxu1 }
 0x191   :  { %v976_v42 = vpop.f32.mrf.mxu0 }
 0x192   :  { %v1361_v62 = vmax.f32 %v1236_v40, 0.0  ;;  %v977_v0 = vadd.f32 %v2821_v56, %v976_v42  ;;  %v3050_v4 = vpop.f32.mrf.mxu1 }
 0x193   :  { %v978_v10 = vpop.f32.mrf.mxu0 }
 0x194   :  { %v2010_v3 = vpack.c.bf16 %v1361_v62, %v1360_v57  ;;  %v1241_v5 = vadd.f32 %v2980_v20, %v977_v0  ;;  %v2223_v6 = vpop.f32.mrf.mxu1 }
 0x195   :  { %v979_v44 = vpop.f32.mrf.mxu0 }
 0x196   :  { %2078 = vst [vmem:[%s3139_s3 + $0x88] sm:$0xff] %v2010_v3   ;;  %v980_v14 = vadd.f32 %v2821_v56, %v979_v44  ;;  %v1362_v7 = vmax.f32 %v1241_v5, 0.0  ;;  %v3057_v11 = vpop.f32.mrf.mxu1 }
 0x197   :  { %v981_v37 = vpop.f32.mrf.mxu0 }
 0x198   :  { %v1244_v59 = vadd.f32 %v2984_v29, %v980_v14  ;;  %v2226_v46 = vpop.f32.mrf.mxu1 }
 0x199   :  { %v984_v39 = vpop.f32.mrf.mxu0 }
 0x19a   :  { %v1363_v15 = vmax.f32 %v1244_v59, 0.0  ;;  %v985_v16 = vadd.f32 %v2821_v56, %v984_v39  ;;  %v3061_v19 = vpop.f32.mrf.mxu1 }
 0x19b   :  { %v986_v25 = vpop.f32.mrf.mxu0 }
 0x19c   :  { %v2015_v18 = vpack.c.bf16 %v1363_v15, %v1362_v7  ;;  %v1249_v20 = vadd.f32 %v2991_v36, %v985_v16  ;;  %v2227_v21 = vpop.f32.mrf.mxu1 }
 0x19d   :  { %v987_v28 = vpop.f32.mrf.mxu0 }
 0x19e   :  { %2079 = vst [vmem:[%s3139_s3 + $0x90] sm:$0xff] %v2015_v18   ;;  %v988_v29 = vadd.f32 %v2821_v56, %v987_v28  ;;  %v1364_v24 = vmax.f32 %v1249_v20, 0.0  ;;  %v3068_v26 = vpop.f32.mrf.mxu1 }
 0x19f   :  { %v989_v9 = vpop.f32.mrf.mxu0 }
 0x1a0   :  { %v1252_v12 = vadd.f32 %v2995_v48, %v988_v29  ;;  %v2230_v52 = vpop.f32.mrf.mxu1 }
 0x1a1   :  { %v992_v13 = vpop.f32.mrf.mxu0 }
 0x1a2   :  { %v1365_v34 = vmax.f32 %v1252_v12, 0.0  ;;  %v993_v31 = vadd.f32 %v2821_v56, %v992_v13  ;;  %v3072_v35 = vpop.f32.mrf.mxu1 }
 0x1a3   :  { %v994_v41 = vpop.f32.mrf.mxu0 }
 0x1a4   :  { %v2020_v33 = vpack.c.bf16 %v1365_v34, %v1364_v24  ;;  %v1257_v36 = vadd.f32 %v3002_v54, %v993_v31  ;;  %v2231_v32 = vpop.f32.mrf.mxu1 }
 0x1a5   :  { %v995_v47 = vpop.f32.mrf.mxu0 }
 0x1a6   :  { %2080 = vst [vmem:[%s3139_s3 + $0x98] sm:$0xff] %v2020_v33   ;;  %v996_v48 = vadd.f32 %v2821_v56, %v995_v47  ;;  %v1366_v45 = vmax.f32 %v1257_v36, 0.0  ;;  %v3079_v42 = vpop.f32.mrf.mxu1 }
 0x1a7   :  { %v997_v23 = vpop.f32.mrf.mxu0 }
 0x1a8   :  { %v1260_v27 = vadd.f32 %v3006_v1, %v996_v48  ;;  %v2234_v62 = vpop.f32.mrf.mxu1 }
 0x1a9   :  { %v1000_v51 = vpop.f32.mrf.mxu0 }
 0x1aa   :  { %v1367_v55 = vmax.f32 %v1260_v27, 0.0  ;;  %v1001_v49 = vadd.f32 %v2821_v56, %v1000_v51  ;;  %v3083_v53 = vpop.f32.mrf.mxu1 }
 0x1ab   :  { %v1002_v60 = vpop.f32.mrf.mxu0 }
 0x1ac   :  { %v2025_v2 = vpack.c.bf16 %v1367_v55, %v1366_v45  ;;  %v1265_v54 = vadd.f32 %v3013_v8, %v1001_v49  ;;  %v2235_v37 = vpop.f32.mrf.mxu1 }
 0x1ad   :  { %v1003_v63 = vpop.f32.mrf.mxu0 }
 0x1ae   :  { %2081 = vst [vmem:[%s3139_s3 + $0xa0] sm:$0xff] %v2025_v2   ;;  %v1004_v1 = vadd.f32 %v2821_v56, %v1003_v63  ;;  %v1368_v0 = vmax.f32 %v1265_v54, 0.0  ;;  %v3090_v39 = vpop.f32.mrf.mxu1 }
 0x1af   :  { %v1005_v40 = vpop.f32.mrf.mxu0 }
 0x1b0   :  { %v1268_v43 = vadd.f32 %v3017_v17, %v1004_v1  ;;  %v2238_v15 = vpop.f32.mrf.mxu1 }
 0x1b1   :  { %v1008_v57 = vpop.f32.mrf.mxu0 }
 0x1b2   :  { %v1369_v10 = vmax.f32 %v1268_v43, 0.0  ;;  %v1009_v3 = vadd.f32 %v2821_v56, %v1008_v57  ;;  %v1323_v6 = vpop.f32.mrf.mxu1 }
 0x1b3   :  { %v1010_v44 = vpop.f32.mrf.mxu0 }
 0x1b4   :  { %v2030_v5 = vpack.c.bf16 %v1369_v10, %v1368_v0  ;;  %v1273_v8 = vadd.f32 %v3024_v22, %v1009_v3  ;;  %v2239_v9 = vpop.f32.mrf.mxu1 }
 0x1b5   :  { %v1011_v14 = vpop.f32.mrf.mxu0 }
 0x1b6   :  { %2082 = vst [vmem:[%s3139_s3 + $0xa8] sm:$0xff] %v2030_v5   ;;  %v1012_v17 = vadd.f32 %v2821_v56, %v1011_v14  ;;  %v1370_v16 = vmax.f32 %v1273_v8, 0.0 }
 0x1b7   :  { %v1013_v59 = vpop.f32.mrf.mxu0 }
 0x1b8   :  { %v1276_v61 = vadd.f32 %v3028_v30, %v1012_v17 }
 0x1b9   :  { %v1016_v7 = vpop.f32.mrf.mxu0 }
 0x1ba   :  { %v1371_v25 = vmax.f32 %v1276_v61, 0.0  ;;  %v1017_v18 = vadd.f32 %v2821_v56, %v1016_v7 }
 0x1bb   :  { %v1018_v28 = vpop.f32.mrf.mxu0 }
 0x1bc   :  { %v2035_v20 = vpack.c.bf16 %v1371_v25, %v1370_v16  ;;  %v1281_v22 = vadd.f32 %v3035_v38, %v1017_v18 }
 0x1bd   :  { %v1019_v29 = vpop.f32.mrf.mxu0 }
 0x1be   :  { %2083 = vst [vmem:[%s3139_s3 + $0xb0] sm:$0xff] %v2035_v20   ;;  %v1020_v12 = vadd.f32 %v2821_v56, %v1019_v29  ;;  %v1372_v24 = vmax.f32 %v1281_v22, 0.0 }
 0x1bf   :  { %v1021_v30 = vpop.f32.mrf.mxu0 }
 0x1c0   :  { %v1284_v13 = vadd.f32 %v3039_v50, %v1020_v12 }
 0x1c1   :  { %v1024_v46 = vpop.f32.mrf.mxu0 }
 0x1c2   :  { %v1373_v34 = vmax.f32 %v1284_v13, 0.0  ;;  %v1025_v31 = vadd.f32 %v2821_v56, %v1024_v46 }
 0x1c3   :  { %v1026_v41 = vpop.f32.mrf.mxu0 }
 0x1c4   :  { %v2040_v33 = vpack.c.bf16 %v1373_v34, %v1372_v24  ;;  %v1289_v21 = vadd.f32 %v3046_v58, %v1025_v31 }
 0x1c5   :  { %v1027_v47 = vpop.f32.mrf.mxu0 }
 0x1c6   :  { %2084 = vst [vmem:[%s3139_s3 + $0xb8] sm:$0xff] %v2040_v33   ;;  %v1028_v38 = vadd.f32 %v2821_v56, %v1027_v47  ;;  %v1374_v23 = vmax.f32 %v1289_v21, 0.0 }
 0x1c7   :  { %v1029_v36 = vpop.f32.mrf.mxu0 }
 0x1c8   :  { %v1292_v48 = vadd.f32 %v3050_v4, %v1028_v38 }
 0x1c9   :  { %v1032_v50 = vpop.f32.mrf.mxu0 }
 0x1ca   :  { %v1375_v27 = vmax.f32 %v1292_v48, 0.0  ;;  %v1033_v51 = vadd.f32 %v2821_v56, %v1032_v50 }
 0x1cb   :  { %v1034_v52 = vpop.f32.mrf.mxu0 }
 0x1cc   :  { %v2045_v45 = vpack.c.bf16 %v1375_v27, %v1374_v23  ;;  %v1297_v49 = vadd.f32 %v3057_v11, %v1033_v51 }
 0x1cd   :  { %v1035_v55 = vpop.f32.mrf.mxu0 }
 0x1ce   :  { %2085 = vst [vmem:[%s3139_s3 + $0xc0] sm:$0xff] %v2045_v45   ;;  %v1036_v58 = vadd.f32 %v2821_v56, %v1035_v55  ;;  %v1376_v63 = vmax.f32 %v1297_v49, 0.0 }
 0x1cf   :  { %v1037_v60 = vpop.f32.mrf.mxu0 }
 0x1d0   :  { %v1300_v2 = vadd.f32 %v3061_v19, %v1036_v58 }
 0x1d1   :  { %v1040_v4 = vpop.f32.mrf.mxu0 }
 0x1d2   :  { %v1377_v32 = vmax.f32 %v1300_v2, 0.0  ;;  %v1041_v54 = vadd.f32 %v2821_v56, %v1040_v4 }
 0x1d3   :  { %v1042_v1 = vpop.f32.mrf.mxu0 }
 0x1d4   :  { %v2050_v40 = vpack.c.bf16 %v1377_v32, %v1376_v63  ;;  %v1305_v57 = vadd.f32 %v3068_v26, %v1041_v54 }
 0x1d5   :  { %v1043_v43 = vpop.f32.mrf.mxu0 }
 0x1d6   :  { %2086 = vst [vmem:[%s3139_s3 + $0xc8] sm:$0xff] %v2050_v40   ;;  %v1044_v11 = vadd.f32 %v2821_v56, %v1043_v43  ;;  %v1378_v10 = vmax.f32 %v1305_v57, 0.0 }
 0x1d7   :  { %v1045_v62 = vpop.f32.mrf.mxu0 }
 0x1d8   :  { %v1308_v0 = vadd.f32 %v3072_v35, %v1044_v11 }
 0x1d9   :  { %v1048_v19 = vpop.f32.mrf.mxu0 }
 0x1da   :  { %v1379_v3 = vmax.f32 %v1308_v0, 0.0  ;;  %v1049_v44 = vadd.f32 %v2821_v56, %v1048_v19 }
 0x1db   :  { %v1050_v5 = vpop.f32.mrf.mxu0 }
 0x1dc   :  { %v2055_v14 = vpack.c.bf16 %v1379_v3, %v1378_v10  ;;  %v1313_v8 = vadd.f32 %v3079_v42, %v1049_v44 }
 0x1dd   :  { %v1051_v37 = vpop.f32.mrf.mxu0 }
 0x1de   :  { %2087 = vst [vmem:[%s3139_s3 + $0xd0] sm:$0xff] %v2055_v14   ;;  %v1052_v26 = vadd.f32 %v2821_v56, %v1051_v37  ;;  %v1380_v61 = vmax.f32 %v1313_v8, 0.0 }
 0x1df   :  { %v1053_v17 = vpop.f32.mrf.mxu0 }
 0x1e0   :  { %v1316_v59 = vadd.f32 %v3083_v53, %v1052_v26 }
 0x1e1   :  { %v1056_v35 = vpop.f32.mrf.mxu0 }
 0x1e2   :  { %v1381_v7 = vmax.f32 %v1316_v59, 0.0  ;;  %v1057_v15 = vadd.f32 %v2821_v56, %v1056_v35 }
 0x1e3   :  { %v1058_v16 = vpop.f32.mrf.mxu0 }
 0x1e4   :  { %v2060_v25 = vpack.c.bf16 %v1381_v7, %v1380_v61  ;;  %v1321_v18 = vadd.f32 %v3090_v39, %v1057_v15 }
 0x1e5   :  { %v1059_v28 = vpop.f32.mrf.mxu0 }
 0x1e6   :  { %2088 = vst [vmem:[%s3139_s3 + $0xd8] sm:$0xff] %v2060_v25   ;;  %v1382_v42 = vmax.f32 %v1321_v18, 0.0 }
 0x1e7   :  { %v1060_v6 = vpop.f32.mrf.mxu0 }
 0x1e8   :  { %v1921_v20 = vpack.c.bf16 %v1382_v42, %v1382_v42 }
 0x1ea   :  { %1668 = vst [vmem:[%s3139_s3 + $0xe0] sm:$0x1] %v1921_v20 }

// kernel: vae_forward.15
= control target key start
LH: loop header
LB: loop body
LE: loop exit
PB: predicated region body
PF: predicated region fallthrough
CT: control target
= control target key end

     0   :  { %s8574_s0 = inlined_call_operand.vmem [shape: bf16[1568,512], index: 0, kind: input, shape index: {}]   ;;  %s8575_s1 = inlined_call_operand.vmem [shape: bf16[512,128], index: 1, kind: input, shape index: {}]   ;;  %s8576_s2 = inlined_call_operand.<no memory space> [shape: f32[1,1], index: 2, kind: input, shape index: {}]   ;;  %s8577_s3 = inlined_call_operand.vmem [shape: f32[1568,1], index: 3, kind: input, shape index: {}]   ;;  %s8578_s4 = inlined_call_operand.vmem [shape: f32[2,16], index: 4, kind: input, shape index: {}]   ;;  %s8579_s5 = inlined_call_operand.vmem [shape: f32[2,16], index: 5, kind: input, shape index: {}]   ;;  %s8580_s6 = inlined_call_operand.hbm [shape: f32[1,1], index: 6, kind: output, shape index: {}]  }
   0x1   :  { %v11_v0 = vstv %s8576_s2 }
   0x2   :  { %12 = vst [vmem:[#allocation3] sm:$0x1] %v11_v0 }
   0x3   :  { %13 = vsyncpa [#allocation5], 0  ;;  %s5787_s23 = smov 0  }
   0x4 LB: > { %s5793_s24 = sadd.s32 4294967295, %s5744_s23   ;;  %p4724_p0 = scmp.ge.s32.totalorder %s5744_s23, 1  ;;  %s5744_s23 = sphi %s5787_s23, %s19_s23  }
   0x5   : > { %p223_p1 = scmp.lt.s32.totalorder %s5744_s23, 3 }
   0x7   : > { %p224_p2 = pnand %p4724_p0, %p223_p1 }
   0x9   : > { %227 = sbr.rel (%p224_p2) target bundleno = 1268 (0x4f4), region = 44 }
   0xe   : > { %s254_s2 = smul.u32 98, %s5793_s24  ;;  %p4728_p4 = scmp.ne.s32.totalorder %s5793_s24, 0 }
  0x10   : > { %p255_p3 = scmp.lt.s32.totalorder %s254_s2, 195  ;;  %271 = sbr.rel (%p4728_p4) target bundleno = 23 (0x17), region = 48 }
  0x12   : > { %s8720_s2 = smov (!%p255_p3, %s254_s2), 195 }
  0x13   : > { %s4963_s25 = sshll.u32 %s8720_s2, 4  ;;  %s4727_s26 = sshll.u32 %s8720_s2, 3 }
  0x14   : > { %s5801_s29 = scalar_lea.vmem %s8574_s0, %s4963_s25  ;;  %s5806_s8 = scalar_lea.vmem %s8577_s3, %s4727_s26 }
  0x15   : > { %vm272_vm0 = vcmask 0   ;;  %v5746_v1 = vmov 0.0  }
  0x16   : > { %273 = vst.msk [vmem:[#allocation2] sm:$0x1] %vm272_vm0, %v5746_v1 }
  0x17 PF: > { %v4985_v2 = vld [vmem:[%s8575_s1 + $0x38] sm:$0xff]   ;;  %v5747_v3 = vmov 0   ;;  %v4987_v5 = vld [vmem:[%s8575_s1 + $0x30] sm:$0xff]   ;;  %v4989_v7 = vld [vmem:[%s8575_s1 + $0x28] sm:$0xff]   ;;  %vm4426_vm2 = vcmask 7168   ;;  %p4958_p5 = scmp.ne.s32.totalorder %s5793_s24, 1 }
  0x18   : > { %1706 = vmatprep.subr.bf16.mxu0 %v5747_v3  ;;  %2131 = vmatprep.subr.bf16.mxu1 %v5747_v3  ;;  %v4986_v4 = vld [vmem:[%s8575_s1 + $0xb8] sm:$0xff]   ;;  %v4988_v6 = vld [vmem:[%s8575_s1 + $0xb0] sm:$0xff]   ;;  %v4990_v8 = vld [vmem:[%s8575_s1 + $0xa8] sm:$0xff]  }
  0x19   : > { %1707 = vmatpush1.bf16.msra.mxu0 %v4985_v2  ;;  %2132 = vmatpush1.bf16.msra.mxu1 %v4986_v4  ;;  %v4991_v9 = vld [vmem:[%s8575_s1 + $0x20] sm:$0xff]   ;;  %v4993_v11 = vld [vmem:[%s8575_s1 + $0x18] sm:$0xff]   ;;  %v4995_v13 = vld [vmem:[%s8575_s1 + $0x10] sm:$0xff]  }
  0x1a   : > { %1708 = vmatprep.subr.bf16.mxu0 %v5747_v3  ;;  %2133 = vmatprep.subr.bf16.mxu1 %v5747_v3  ;;  %v4992_v10 = vld [vmem:[%s8575_s1 + $0xa0] sm:$0xff]   ;;  %v4994_v12 = vld [vmem:[%s8575_s1 + $0x98] sm:$0xff]   ;;  %v4996_v14 = vld [vmem:[%s8575_s1 + $0x90] sm:$0xff]  }
  0x1b   : > { %v4997_v15 = vld [vmem:[%s8575_s1 + $0x8] sm:$0xff]   ;;  %v4999_v17 = vld [vmem:[%s8575_s1] sm:$0xff]   ;;  %v5001_v19 = vld [vmem:[%s8575_s1 + $0x78] sm:$0xff]  }
  0x1c   : > { %v4998_v16 = vld [vmem:[%s8575_s1 + $0x88] sm:$0xff]   ;;  %v5000_v18 = vld [vmem:[%s8575_s1 + $0x80] sm:$0xff]   ;;  %v5002_v20 = vld [vmem:[%s8575_s1 + $0xf8] sm:$0xff]  }
  0x1d   : > { %1709 = vmatpush1.bf16.msra.mxu0 %v4987_v5  ;;  %2134 = vmatpush1.bf16.msra.mxu1 %v4988_v6  ;;  %v5019_v21 = vld [vmem:[%s5801_s29 + $0x4] ss:$16 sps:$4 sm:$0xff]   ;;  %v5022_v23 = vld [vmem:[%s5801_s29 + $0xc] ss:$16 sps:$4 sm:$0xff]   ;;  %v5017_v37 = vld [vmem:[%s5801_s29] ss:$16 sps:$4 sm:$0xff]  }
  0x1e   : > { %1710 = vmatprep.subr.bf16.mxu0 %v5747_v3  ;;  %2135 = vmatprep.subr.bf16.mxu1 %v5747_v3  ;;  %v5003_v22 = vld [vmem:[%s8575_s1 + $0x70] sm:$0xff]   ;;  %v5005_v25 = vld [vmem:[%s8575_s1 + $0x68] sm:$0xff]   ;;  %v5007_v27 = vld [vmem:[%s8575_s1 + $0x60] sm:$0xff]  }
  0x1f   : > { %v5004_v24 = vld [vmem:[%s8575_s1 + $0xf0] sm:$0xff]   ;;  %1738 = vmatprep.mubr.bf16.mxu0 %v5019_v21  ;;  %2163 = vmatprep.mubr.bf16.mxu1 %v5022_v23  ;;  %v5006_v26 = vld [vmem:[%s8575_s1 + $0xe8] sm:$0xff]   ;;  %v5008_v28 = vld [vmem:[%s8575_s1 + $0xe0] sm:$0xff]  }
  0x20   : > { %v5009_v29 = vld [vmem:[%s8575_s1 + $0x58] sm:$0xff]   ;;  %v5011_v31 = vld [vmem:[%s8575_s1 + $0x50] sm:$0xff]   ;;  %v5013_v33 = vld [vmem:[%s8575_s1 + $0x48] sm:$0xff]  }
  0x21   : > { %1711 = vmatpush1.bf16.msra.mxu0 %v4989_v7  ;;  %2136 = vmatpush1.bf16.msra.mxu1 %v4990_v8  ;;  %v5010_v30 = vld [vmem:[%s8575_s1 + $0xd8] sm:$0xff]   ;;  %v5012_v32 = vld [vmem:[%s8575_s1 + $0xd0] sm:$0xff]   ;;  %v5014_v34 = vld [vmem:[%s8575_s1 + $0xc8] sm:$0xff]  }
  0x22   : > { %1712 = vmatprep.subr.bf16.mxu0 %v5747_v3  ;;  %2137 = vmatprep.subr.bf16.mxu1 %v5747_v3  ;;  %v5015_v35 = vld [vmem:[%s8575_s1 + $0x40] sm:$0xff]   ;;  %v5020_v38 = vld [vmem:[%s5801_s29 + $0x8] ss:$16 sps:$4 sm:$0xff]   ;;  %v5025_v40 = vld [vmem:[%s5801_s29 + $0x2c] ss:$16 sps:$4 sm:$0xff]  }
  0x23   : > { %v5016_v36 = vld [vmem:[%s8575_s1 + $0xc0] sm:$0xff]   ;;  %v5028_v42 = vld [vmem:[%s5801_s29 + $0x28] ss:$16 sps:$4 sm:$0xff]   ;;  %v5031_v44 = vld [vmem:[%s5801_s29 + $0x4c] ss:$16 sps:$4 sm:$0xff]  }
  0x24   : > { %v5023_v39 = vld [vmem:[%s5801_s29 + $0x24] ss:$16 sps:$4 sm:$0xff]   ;;  %v5027_v41 = vld [vmem:[%s5801_s29 + $0x20] ss:$16 sps:$4 sm:$0xff]   ;;  %v5034_v46 = vld [vmem:[%s5801_s29 + $0x48] ss:$16 sps:$4 sm:$0xff]  }
  0x25   : > { %1713 = vmatpush1.bf16.msra.mxu0 %v4991_v9  ;;  %2138 = vmatpush1.bf16.msra.mxu1 %v4992_v10  ;;  %v5029_v43 = vld [vmem:[%s5801_s29 + $0x44] ss:$16 sps:$4 sm:$0xff]   ;;  %v5033_v45 = vld [vmem:[%s5801_s29 + $0x40] ss:$16 sps:$4 sm:$0xff]   ;;  %v5037_v48 = vld [vmem:[%s5801_s29 + $0x6c] ss:$16 sps:$4 sm:$0xff]  }
  0x26   : > { %1714 = vmatprep.subr.bf16.mxu0 %v5747_v3  ;;  %2139 = vmatprep.subr.bf16.mxu1 %v5747_v3  ;;  %v5035_v47 = vld [vmem:[%s5801_s29 + $0x64] ss:$16 sps:$4 sm:$0xff]   ;;  %v5039_v49 = vld [vmem:[%s5801_s29 + $0x60] ss:$16 sps:$4 sm:$0xff]   ;;  %v5040_v50 = vld [vmem:[%s5801_s29 + $0x68] ss:$16 sps:$4 sm:$0xff]  }
  0x27   : > { %v5041_v51 = vld [vmem:[%s5801_s29 + $0x84] ss:$16 sps:$4 sm:$0xff]   ;;  %v5043_v52 = vld [vmem:[%s5801_s29 + $0x8c] ss:$16 sps:$4 sm:$0xff]   ;;  %v5045_v53 = vld [vmem:[%s5801_s29 + $0x80] ss:$16 sps:$4 sm:$0xff]  }
  0x28   : > { %v5046_v54 = vld [vmem:[%s5801_s29 + $0x88] ss:$16 sps:$4 sm:$0xff]   ;;  %v5047_v55 = vld [vmem:[%s5801_s29 + $0xa4] ss:$16 sps:$4 sm:$0xff]   ;;  %v5049_v56 = vld [vmem:[%s5801_s29 + $0xac] ss:$16 sps:$4 sm:$0xff]  }
  0x29   : > { %1715 = vmatpush1.bf16.msra.mxu0 %v4993_v11  ;;  %2140 = vmatpush1.bf16.msra.mxu1 %v4994_v12  ;;  %v5051_v57 = vld [vmem:[%s5801_s29 + $0xa0] ss:$16 sps:$4 sm:$0xff]   ;;  %v5052_v58 = vld [vmem:[%s5801_s29 + $0xa8] ss:$16 sps:$4 sm:$0xff]   ;;  %v5053_v59 = vld [vmem:[%s5801_s29 + $0xc4] ss:$16 sps:$4 sm:$0xff]  }
  0x2a   : > { %1716 = vmatprep.subr.bf16.mxu0 %v5747_v3  ;;  %2141 = vmatprep.subr.bf16.mxu1 %v5747_v3  ;;  %v5055_v60 = vld [vmem:[%s5801_s29 + $0xcc] ss:$16 sps:$4 sm:$0xff]   ;;  %v5057_v61 = vld [vmem:[%s5801_s29 + $0xc0] ss:$16 sps:$4 sm:$0xff]   ;;  %v5058_v62 = vld [vmem:[%s5801_s29 + $0xc8] ss:$16 sps:$4 sm:$0xff]  }
  0x2b   : > { %v5059_v63 = vld [vmem:[%s5801_s29 + $0xe4] ss:$16 sps:$4 sm:$0xff]   ;;  %v5061_v0 = vld [vmem:[%s5801_s29 + $0xec] ss:$16 sps:$4 sm:$0xff]   ;;  %v5063_v1 = vld [vmem:[%s5801_s29 + $0xe0] ss:$16 sps:$4 sm:$0xff]  }
  0x2c   : > { %v5064_v2 = vld [vmem:[%s5801_s29 + $0xe8] ss:$16 sps:$4 sm:$0xff]   ;;  %v5067_v4 = vld [vmem:[%s5801_s29 + $0x10c] ss:$16 sps:$4 sm:$0xff]   ;;  %v5069_v5 = vld [vmem:[%s5801_s29 + $0x100] ss:$16 sps:$4 sm:$0xff]  }
  0x2d   : > { %1717 = vmatpush1.bf16.msra.mxu0 %v4995_v13  ;;  %2142 = vmatpush1.bf16.msra.mxu1 %v4996_v14  ;;  %v5070_v6 = vld [vmem:[%s5801_s29 + $0x108] ss:$16 sps:$4 sm:$0xff]   ;;  %v5071_v7 = vld [vmem:[%s5801_s29 + $0x124] ss:$16 sps:$4 sm:$0xff]   ;;  %v5073_v8 = vld [vmem:[%s5801_s29 + $0x12c] ss:$16 sps:$4 sm:$0xff]  }
  0x2e   : > { %1718 = vmatprep.subr.bf16.mxu0 %v5747_v3  ;;  %2143 = vmatprep.subr.bf16.mxu1 %v5747_v3  ;;  %v5075_v9 = vld [vmem:[%s5801_s29 + $0x120] ss:$16 sps:$4 sm:$0xff]   ;;  %v5076_v10 = vld [vmem:[%s5801_s29 + $0x128] ss:$16 sps:$4 sm:$0xff]   ;;  %v5077_v11 = vld [vmem:[%s5801_s29 + $0x144] ss:$16 sps:$4 sm:$0xff]  }
  0x2f   : > { %v5079_v12 = vld [vmem:[%s5801_s29 + $0x14c] ss:$16 sps:$4 sm:$0xff]   ;;  %v5081_v13 = vld [vmem:[%s5801_s29 + $0x140] ss:$16 sps:$4 sm:$0xff]   ;;  %v5082_v14 = vld [vmem:[%s5801_s29 + $0x148] ss:$16 sps:$4 sm:$0xff]  }
  0x30   : > { %v5093_v21 = vld [vmem:[%s5801_s29 + $0x180] ss:$16 sps:$4 sm:$0xff]   ;;  %v5095_v23 = vld [vmem:[%s5801_s29 + $0x1a4] ss:$16 sps:$4 sm:$0xff]  }
  0x31   : > { %1719 = vmatpush1.bf16.msra.mxu0 %v4997_v15  ;;  %2144 = vmatpush1.bf16.msra.mxu1 %v4998_v16  ;;  %v5083_v15 = vld [vmem:[%s5801_s29 + $0x164] ss:$16 sps:$4 sm:$0xff]   ;;  %v5085_v16 = vld [vmem:[%s5801_s29 + $0x16c] ss:$16 sps:$4 sm:$0xff]  }
  0x32   : > { %1720 = vmatprep.subr.bf16.mxu0 %v5747_v3  ;;  %2145 = vmatprep.subr.bf16.mxu1 %v5747_v3 }
  0x35   : > { %1721 = vmatpush1.bf16.msra.mxu0 %v4999_v17  ;;  %2146 = vmatpush1.bf16.msra.mxu1 %v5000_v18  ;;  %v5087_v17 = vld [vmem:[%s5801_s29 + $0x160] ss:$16 sps:$4 sm:$0xff]   ;;  %v5088_v18 = vld [vmem:[%s5801_s29 + $0x168] ss:$16 sps:$4 sm:$0xff]  }
  0x36   : > { %1722 = vmatprep.subr.bf16.mxu0 %v5747_v3  ;;  %2147 = vmatprep.subr.bf16.mxu1 %v5747_v3 }
  0x39   : > { %1723 = vmatpush2.bf16.msra.mxu0 %v5001_v19  ;;  %2148 = vmatpush2.bf16.msra.mxu1 %v5002_v20  ;;  %v5089_v19 = vld [vmem:[%s5801_s29 + $0x184] ss:$16 sps:$4 sm:$0xff]   ;;  %v5091_v20 = vld [vmem:[%s5801_s29 + $0x18c] ss:$16 sps:$4 sm:$0xff]  }
  0x3a   : > { %1724 = vmatprep.subr.bf16.mxu0 %v5747_v3  ;;  %2149 = vmatprep.subr.bf16.mxu1 %v5747_v3 }
  0x3d   : > { %1725 = vmatpush2.bf16.msra.mxu0 %v5003_v22  ;;  %2150 = vmatpush2.bf16.msra.mxu1 %v5004_v24  ;;  %v5094_v22 = vld [vmem:[%s5801_s29 + $0x188] ss:$16 sps:$4 sm:$0xff]   ;;  %v5097_v24 = vld [vmem:[%s5801_s29 + $0x1ac] ss:$16 sps:$4 sm:$0xff]  }
  0x3e   : > { %1726 = vmatprep.subr.bf16.mxu0 %v5747_v3  ;;  %2151 = vmatprep.subr.bf16.mxu1 %v5747_v3 }
  0x41   : > { %1727 = vmatpush2.bf16.msra.mxu0 %v5005_v25  ;;  %2152 = vmatpush2.bf16.msra.mxu1 %v5006_v26  ;;  %v5099_v25 = vld [vmem:[%s5801_s29 + $0x1a0] ss:$16 sps:$4 sm:$0xff]   ;;  %v5100_v26 = vld [vmem:[%s5801_s29 + $0x1a8] ss:$16 sps:$4 sm:$0xff]  }
  0x42   : > { %1728 = vmatprep.subr.bf16.mxu0 %v5747_v3  ;;  %2153 = vmatprep.subr.bf16.mxu1 %v5747_v3 }
  0x45   : > { %1729 = vmatpush2.bf16.msra.mxu0 %v5007_v27  ;;  %2154 = vmatpush2.bf16.msra.mxu1 %v5008_v28  ;;  %v5101_v27 = vld [vmem:[%s5801_s29 + $0x1c4] ss:$16 sps:$4 sm:$0xff]   ;;  %v5103_v28 = vld [vmem:[%s5801_s29 + $0x1cc] ss:$16 sps:$4 sm:$0xff]  }
  0x46   : > { %1730 = vmatprep.subr.bf16.mxu0 %v5747_v3  ;;  %2155 = vmatprep.subr.bf16.mxu1 %v5747_v3 }
  0x49   : > { %1731 = vmatpush2.bf16.msra.mxu0 %v5009_v29  ;;  %2156 = vmatpush2.bf16.msra.mxu1 %v5010_v30  ;;  %v5105_v29 = vld [vmem:[%s5801_s29 + $0x1c0] ss:$16 sps:$4 sm:$0xff]   ;;  %v5106_v30 = vld [vmem:[%s5801_s29 + $0x1c8] ss:$16 sps:$4 sm:$0xff]  }
  0x4a   : > { %1732 = vmatprep.subr.bf16.mxu0 %v5747_v3  ;;  %2157 = vmatprep.subr.bf16.mxu1 %v5747_v3 }
  0x4d   : > { %1733 = vmatpush2.bf16.msra.mxu0 %v5011_v31  ;;  %2158 = vmatpush2.bf16.msra.mxu1 %v5012_v32  ;;  %v5107_v31 = vld [vmem:[%s5801_s29 + $0x1e4] ss:$16 sps:$4 sm:$0xff]   ;;  %v5109_v32 = vld [vmem:[%s5801_s29 + $0x1ec] ss:$16 sps:$4 sm:$0xff]  }
  0x4e   : > { %1734 = vmatprep.subr.bf16.mxu0 %v5747_v3  ;;  %2159 = vmatprep.subr.bf16.mxu1 %v5747_v3 }
  0x51   : > { %1735 = vmatpush2.bf16.msra.mxu0 %v5013_v33  ;;  %2160 = vmatpush2.bf16.msra.mxu1 %v5014_v34  ;;  %v5111_v33 = vld [vmem:[%s5801_s29 + $0x1e0] ss:$16 sps:$4 sm:$0xff]   ;;  %v5112_v34 = vld [vmem:[%s5801_s29 + $0x1e8] ss:$16 sps:$4 sm:$0xff]  }
  0x52   : > { %1736 = vmatprep.subr.bf16.mxu0 %v5747_v3  ;;  %2161 = vmatprep.subr.bf16.mxu1 %v5747_v3  ;;  %v5065_v3 = vld [vmem:[%s5801_s29 + $0x104] ss:$16 sps:$4 sm:$0xff]  }
  0x55   : > { %1737 = vmatpush2.bf16.msra.mxu0 %v5015_v35  ;;  %2162 = vmatpush2.bf16.msra.mxu1 %v5016_v36  ;;  %v5113_v35 = vld [vmem:[%s5801_s29 + $0x204] ss:$16 sps:$4 sm:$0xff]   ;;  %v5115_v36 = vld [vmem:[%s5801_s29 + $0x20c] ss:$16 sps:$4 sm:$0xff]  }
  0x58   : > { %1739 = vmatmul.mubr.bf16.vlgmr.msra.gmra.mxu0 %v5017_v37  ;;  %2164 = vmatmul.mubr.bf16.vlgmr.msra.gmra.mxu1 %v5020_v38  ;;  %v5117_v37 = vld [vmem:[%s5801_s29 + $0x200] ss:$16 sps:$4 sm:$0xff]   ;;  %v5118_v38 = vld [vmem:[%s5801_s29 + $0x208] ss:$16 sps:$4 sm:$0xff]  }
  0x59   : > { %1746 = vmatprep.mubr.bf16.mxu0 %v5023_v39  ;;  %2171 = vmatprep.mubr.bf16.mxu1 %v5025_v40  ;;  %v5119_v39 = vld [vmem:[%s5801_s29 + $0x224] ss:$16 sps:$4 sm:$0xff]   ;;  %v5121_v40 = vld [vmem:[%s5801_s29 + $0x22c] ss:$16 sps:$4 sm:$0xff]  }
  0x60   : > { %1747 = vmatmul.mubr.bf16.gmra.mxu0 %v5027_v41  ;;  %2172 = vmatmul.mubr.bf16.gmra.mxu1 %v5028_v42  ;;  %v5123_v41 = vld [vmem:[%s5801_s29 + $0x220] ss:$16 sps:$4 sm:$0xff]   ;;  %v5124_v42 = vld [vmem:[%s5801_s29 + $0x228] ss:$16 sps:$4 sm:$0xff]  }
  0x61   : > { %1754 = vmatprep.mubr.bf16.mxu0 %v5029_v43  ;;  %2179 = vmatprep.mubr.bf16.mxu1 %v5031_v44  ;;  %v5125_v43 = vld [vmem:[%s5801_s29 + $0x244] ss:$16 sps:$4 sm:$0xff]   ;;  %v5127_v44 = vld [vmem:[%s5801_s29 + $0x24c] ss:$16 sps:$4 sm:$0xff]  }
  0x68   : > { %1755 = vmatmul.mubr.bf16.gmra.mxu0 %v5033_v45  ;;  %2180 = vmatmul.mubr.bf16.gmra.mxu1 %v5034_v46  ;;  %v5129_v45 = vld [vmem:[%s5801_s29 + $0x240] ss:$16 sps:$4 sm:$0xff]   ;;  %v5130_v46 = vld [vmem:[%s5801_s29 + $0x248] ss:$16 sps:$4 sm:$0xff]  }
  0x69   : > { %1762 = vmatprep.mubr.bf16.mxu0 %v5035_v47  ;;  %2187 = vmatprep.mubr.bf16.mxu1 %v5037_v48  ;;  %v5131_v47 = vld [vmem:[%s5801_s29 + $0x264] ss:$16 sps:$4 sm:$0xff]   ;;  %v5133_v48 = vld [vmem:[%s5801_s29 + $0x26c] ss:$16 sps:$4 sm:$0xff]  }
  0x70   : > { %1763 = vmatmul.mubr.bf16.gmra.mxu0 %v5039_v49  ;;  %2188 = vmatmul.mubr.bf16.gmra.mxu1 %v5040_v50  ;;  %v5135_v49 = vld [vmem:[%s5801_s29 + $0x260] ss:$16 sps:$4 sm:$0xff]   ;;  %v5136_v50 = vld [vmem:[%s5801_s29 + $0x268] ss:$16 sps:$4 sm:$0xff]  }
  0x71   : > { %1770 = vmatprep.mubr.bf16.mxu0 %v5041_v51  ;;  %2195 = vmatprep.mubr.bf16.mxu1 %v5043_v52  ;;  %v5137_v51 = vld [vmem:[%s5801_s29 + $0x284] ss:$16 sps:$4 sm:$0xff]   ;;  %v5139_v52 = vld [vmem:[%s5801_s29 + $0x28c] ss:$16 sps:$4 sm:$0xff]  }
  0x78   : > { %1771 = vmatmul.mubr.bf16.gmra.mxu0 %v5045_v53  ;;  %2196 = vmatmul.mubr.bf16.gmra.mxu1 %v5046_v54  ;;  %v5141_v53 = vld [vmem:[%s5801_s29 + $0x280] ss:$16 sps:$4 sm:$0xff]   ;;  %v5142_v54 = vld [vmem:[%s5801_s29 + $0x288] ss:$16 sps:$4 sm:$0xff]  }
  0x79   : > { %1778 = vmatprep.mubr.bf16.mxu0 %v5047_v55  ;;  %2203 = vmatprep.mubr.bf16.mxu1 %v5049_v56  ;;  %v5143_v55 = vld [vmem:[%s5801_s29 + $0x2a4] ss:$16 sps:$4 sm:$0xff]   ;;  %v5145_v56 = vld [vmem:[%s5801_s29 + $0x2ac] ss:$16 sps:$4 sm:$0xff]  }
  0x80   : > { %1779 = vmatmul.mubr.bf16.gmra.mxu0 %v5051_v57  ;;  %2204 = vmatmul.mubr.bf16.gmra.mxu1 %v5052_v58  ;;  %v5147_v57 = vld [vmem:[%s5801_s29 + $0x2a0] ss:$16 sps:$4 sm:$0xff]   ;;  %v5148_v58 = vld [vmem:[%s5801_s29 + $0x2a8] ss:$16 sps:$4 sm:$0xff]  }
  0x81   : > { %1786 = vmatprep.mubr.bf16.mxu0 %v5053_v59  ;;  %2211 = vmatprep.mubr.bf16.mxu1 %v5055_v60  ;;  %v5149_v59 = vld [vmem:[%s5801_s29 + $0x2c4] ss:$16 sps:$4 sm:$0xff]   ;;  %v5151_v60 = vld [vmem:[%s5801_s29 + $0x2cc] ss:$16 sps:$4 sm:$0xff]  }
  0x88   : > { %1787 = vmatmul.mubr.bf16.gmra.mxu0 %v5057_v61  ;;  %2212 = vmatmul.mubr.bf16.gmra.mxu1 %v5058_v62  ;;  %v5153_v61 = vld [vmem:[%s5801_s29 + $0x2c0] ss:$16 sps:$4 sm:$0xff]   ;;  %v5154_v62 = vld [vmem:[%s5801_s29 + $0x2c8] ss:$16 sps:$4 sm:$0xff]  }
  0x89   : > { %1794 = vmatprep.mubr.bf16.mxu0 %v5059_v63  ;;  %2219 = vmatprep.mubr.bf16.mxu1 %v5061_v0  ;;  %v5155_v63 = vld [vmem:[%s5801_s29 + $0x2e4] ss:$16 sps:$4 sm:$0xff]   ;;  %v5157_v0 = vld [vmem:[%s5801_s29 + $0x2ec] ss:$16 sps:$4 sm:$0xff]  }
  0x90   : > { %1795 = vmatmul.mubr.bf16.gmra.mxu0 %v5063_v1  ;;  %2220 = vmatmul.mubr.bf16.gmra.mxu1 %v5064_v2  ;;  %v5159_v1 = vld [vmem:[%s5801_s29 + $0x2e0] ss:$16 sps:$4 sm:$0xff]   ;;  %v5160_v2 = vld [vmem:[%s5801_s29 + $0x2e8] ss:$16 sps:$4 sm:$0xff]  }
  0x91   : > { %1802 = vmatprep.mubr.bf16.mxu0 %v5065_v3  ;;  %2227 = vmatprep.mubr.bf16.mxu1 %v5067_v4  ;;  %v5161_v3 = vld [vmem:[%s5801_s29 + $0x304] ss:$16 sps:$4 sm:$0xff]   ;;  %v5163_v4 = vld [vmem:[%s5801_s29 + $0x30c] ss:$16 sps:$4 sm:$0xff]  }
  0x98   : > { %1803 = vmatmul.mubr.bf16.gmra.mxu0 %v5069_v5  ;;  %2228 = vmatmul.mubr.bf16.gmra.mxu1 %v5070_v6  ;;  %v5165_v5 = vld [vmem:[%s5801_s29 + $0x300] ss:$16 sps:$4 sm:$0xff]   ;;  %v5166_v6 = vld [vmem:[%s5801_s29 + $0x308] ss:$16 sps:$4 sm:$0xff]  }
  0x99   : > { %1810 = vmatprep.mubr.bf16.mxu0 %v5071_v7  ;;  %2235 = vmatprep.mubr.bf16.mxu1 %v5073_v8  ;;  %v5167_v7 = vld [vmem:[%s5801_s29 + $0x324] ss:$16 sps:$4 sm:$0xff]   ;;  %v5169_v8 = vld [vmem:[%s5801_s29 + $0x32c] ss:$16 sps:$4 sm:$0xff]  }
  0xa0   : > { %1811 = vmatmul.mubr.bf16.gmra.mxu0 %v5075_v9  ;;  %2236 = vmatmul.mubr.bf16.gmra.mxu1 %v5076_v10 }
  0xa1   : > { %1818 = vmatprep.mubr.bf16.mxu0 %v5077_v11  ;;  %2243 = vmatprep.mubr.bf16.mxu1 %v5079_v12  ;;  %v6039_v11 = vld [vmem:[#allocation3] ss:$0 sm:$0xff] }
  0xa8   : > { %1819 = vmatmul.mubr.bf16.gmra.mxu0 %v5081_v13  ;;  %2244 = vmatmul.mubr.bf16.gmra.mxu1 %v5082_v14 }
  0xa9   : > { %1826 = vmatprep.mubr.bf16.mxu0 %v5083_v15  ;;  %2251 = vmatprep.mubr.bf16.mxu1 %v5085_v16 }
  0xb0   : > { %1827 = vmatmul.mubr.bf16.gmra.mxu0 %v5087_v17  ;;  %2252 = vmatmul.mubr.bf16.gmra.mxu1 %v5088_v18  ;;  %v5171_v17 = vld [vmem:[%s5801_s29 + $0x320] ss:$16 sps:$4 sm:$0xff]  }
  0xb1   : > { %1834 = vmatprep.mubr.bf16.mxu0 %v5089_v19  ;;  %2259 = vmatprep.mubr.bf16.mxu1 %v5091_v20  ;;  %v5172_v19 = vld [vmem:[%s5801_s29 + $0x328] ss:$16 sps:$4 sm:$0xff]   ;;  %v5173_v20 = vld [vmem:[%s5801_s29 + $0x344] ss:$16 sps:$4 sm:$0xff]  }
  0xb8   : > { %1835 = vmatmul.mubr.bf16.gmra.mxu0 %v5093_v21  ;;  %2260 = vmatmul.mubr.bf16.gmra.mxu1 %v5094_v22 }
  0xb9   : > { %1842 = vmatprep.mubr.bf16.mxu0 %v5095_v23  ;;  %2267 = vmatprep.mubr.bf16.mxu1 %v5097_v24  ;;  %v5175_v24 = vld [vmem:[%s5801_s29 + $0x34c] ss:$16 sps:$4 sm:$0xff]  }
  0xc0   : > { %1843 = vmatmul.mubr.bf16.gmra.mxu0 %v5099_v25  ;;  %2268 = vmatmul.mubr.bf16.gmra.mxu1 %v5100_v26 }
  0xc1   : > { %1850 = vmatprep.mubr.bf16.mxu0 %v5101_v27  ;;  %2275 = vmatprep.mubr.bf16.mxu1 %v5103_v28 }
  0xc8   : > { %1851 = vmatmul.mubr.bf16.gmra.mxu0 %v5105_v29  ;;  %2276 = vmatmul.mubr.bf16.gmra.mxu1 %v5106_v30 }
  0xc9   : > { %1858 = vmatprep.mubr.bf16.mxu0 %v5107_v31  ;;  %2283 = vmatprep.mubr.bf16.mxu1 %v5109_v32 }
  0xd0   : > { %1859 = vmatmul.mubr.bf16.gmra.mxu0 %v5111_v33  ;;  %2284 = vmatmul.mubr.bf16.gmra.mxu1 %v5112_v34 }
  0xd1   : > { %1866 = vmatprep.mubr.bf16.mxu0 %v5113_v35  ;;  %2291 = vmatprep.mubr.bf16.mxu1 %v5115_v36 }
  0xd8   : > { %1867 = vmatmul.mubr.bf16.gmra.mxu0 %v5117_v37  ;;  %2292 = vmatmul.mubr.bf16.gmra.mxu1 %v5118_v38  ;;  %v5177_v37 = vld [vmem:[%s5801_s29 + $0x340] ss:$16 sps:$4 sm:$0xff]  }
  0xd9   : > { %1874 = vmatprep.mubr.bf16.mxu0 %v5119_v39  ;;  %2299 = vmatprep.mubr.bf16.mxu1 %v5121_v40  ;;  %v5178_v40 = vld [vmem:[%s5801_s29 + $0x348] ss:$16 sps:$4 sm:$0xff]  }
  0xe0   : > { %1875 = vmatmul.mubr.bf16.gmra.mxu0 %v5123_v41  ;;  %2300 = vmatmul.mubr.bf16.gmra.mxu1 %v5124_v42  ;;  %v5179_v41 = vld [vmem:[%s5801_s29 + $0x364] ss:$16 sps:$4 sm:$0xff]  }
  0xe1   : > { %1882 = vmatprep.mubr.bf16.mxu0 %v5125_v43  ;;  %2307 = vmatprep.mubr.bf16.mxu1 %v5127_v44 }
  0xe8   : > { %1883 = vmatmul.mubr.bf16.gmra.mxu0 %v5129_v45  ;;  %2308 = vmatmul.mubr.bf16.gmra.mxu1 %v5130_v46  ;;  %v5181_v45 = vld [vmem:[%s5801_s29 + $0x36c] ss:$16 sps:$4 sm:$0xff]  }
  0xe9   : > { %1890 = vmatprep.mubr.bf16.mxu0 %v5131_v47  ;;  %2315 = vmatprep.mubr.bf16.mxu1 %v5133_v48 }
  0xf0   : > { %1891 = vmatmul.mubr.bf16.gmra.mxu0 %v5135_v49  ;;  %2316 = vmatmul.mubr.bf16.gmra.mxu1 %v5136_v50 }
  0xf1   : > { %1898 = vmatprep.mubr.bf16.mxu0 %v5137_v51  ;;  %2323 = vmatprep.mubr.bf16.mxu1 %v5139_v52 }
  0xf8   : > { %1899 = vmatmul.mubr.bf16.gmra.mxu0 %v5141_v53  ;;  %2324 = vmatmul.mubr.bf16.gmra.mxu1 %v5142_v54 }
  0xf9   : > { %1906 = vmatprep.mubr.bf16.mxu0 %v5143_v55  ;;  %2331 = vmatprep.mubr.bf16.mxu1 %v5145_v56 }
 0x100   : > { %1907 = vmatmul.mubr.bf16.gmra.mxu0 %v5147_v57  ;;  %2332 = vmatmul.mubr.bf16.gmra.mxu1 %v5148_v58 }
 0x101   : > { %1914 = vmatprep.mubr.bf16.mxu0 %v5149_v59  ;;  %2339 = vmatprep.mubr.bf16.mxu1 %v5151_v60  ;;  %v5183_v60 = vld [vmem:[%s5801_s29 + $0x360] ss:$16 sps:$4 sm:$0xff]  }
 0x108   : > { %1915 = vmatmul.mubr.bf16.gmra.mxu0 %v5153_v61  ;;  %2340 = vmatmul.mubr.bf16.gmra.mxu1 %v5154_v62  ;;  %v5184_v62 = vld [vmem:[%s5801_s29 + $0x368] ss:$16 sps:$4 sm:$0xff]  }
 0x109   : > { %1922 = vmatprep.mubr.bf16.mxu0 %v5155_v63  ;;  %2347 = vmatprep.mubr.bf16.mxu1 %v5157_v0  ;;  %v5187_v63 = vld [vmem:[%s5801_s29 + $0x384] ss:$16 sps:$4 sm:$0xff]  }
 0x110   : > { %1923 = vmatmul.mubr.bf16.gmra.mxu0 %v5159_v1  ;;  %2348 = vmatmul.mubr.bf16.gmra.mxu1 %v5160_v2 }
 0x111   : > { %1930 = vmatprep.mubr.bf16.mxu0 %v5161_v3  ;;  %2355 = vmatprep.mubr.bf16.mxu1 %v5163_v4  ;;  %v5190_v3 = vld [vmem:[%s5801_s29 + $0x38c] ss:$16 sps:$4 sm:$0xff]  }
 0x118   : > { %v1740_v9 = vpop.f32.mrf.mxu0  ;;  %1931 = vmatmul.mubr.bf16.gmra.mxu0 %v5165_v5  ;;  %v2165_v10 = vpop.f32.mrf.mxu1  ;;  %2356 = vmatmul.mubr.bf16.gmra.mxu1 %v5166_v6 }
 0x119   : > { %1938 = vmatprep.mubr.bf16.mxu0 %v5167_v7  ;;  %v2166_v12 = vadd.f32 %v2165_v10, %v1740_v9  ;;  %2363 = vmatprep.mubr.bf16.mxu1 %v5169_v8 }
 0x11a   : > { %v1742_v13 = vpop.f32.mrf.mxu0  ;;  %v2167_v14 = vpop.f32.mrf.mxu1 }
 0x11b   : > { %v6042_v15 = vadd.f32 %v6039_v11, %v2166_v12 }
 0x11c   : > { %v1743_v16 = vpop.f32.mrf.mxu0  ;;  %v2168_v18 = vpop.f32.mrf.mxu1 }
 0x11d   : > { %v3053_v21 = vand.u32 2147483647, %v6042_v15  ;;  %v2169_v22 = vadd.f32 %v2168_v18, %v1743_v16 }
 0x11e   : > { %v1745_v23 = vpop.f32.mrf.mxu0  ;;  %v2170_v25 = vpop.f32.mrf.mxu1 }
 0x11f   : > { %v3151_v26 = vsub.f32 0.0, %v3053_v21  ;;  %v6050_v27 = vadd.f32 %v6039_v11, %v2169_v22  ;;  %v2661_v22 = vld [vmem:[%s5806_s8] sm:$0xff] }
 0x120   : > { %v1748_v28 = vpop.f32.mrf.mxu0  ;;  %1939 = vmatmul.mubr.bf16.gmra.mxu0 %v5171_v17  ;;  %v2173_v29 = vpop.f32.mrf.mxu1  ;;  %2364 = vmatmul.mubr.bf16.gmra.mxu1 %v5172_v19 }
 0x121   : > { %1946 = vmatprep.mubr.bf16.mxu0 %v5173_v20  ;;  %v3249_v30 = vmul.f32 1.442695, %v3151_v26  ;;  %v3054_v31 = vand.u32 2147483647, %v6050_v27  ;;  %2371 = vmatprep.mubr.bf16.mxu1 %v5175_v24  ;;  %v2174_v33 = vadd.f32 %v2173_v29, %v1748_v28  ;;  %v5185_v20 = vld [vmem:[%s5801_s29 + $0x380] ss:$16 sps:$4 sm:$0xff]  }
 0x122   : > { %v1750_v32 = vpop.f32.mrf.mxu0  ;;  %v2175_v34 = vpop.f32.mrf.mxu1  ;;  %v5188_v26 = vld [vmem:[%s5801_s29 + $0x388] ss:$16 sps:$4 sm:$0xff]   ;;  %v5193_v28 = vld [vmem:[%s5801_s29 + $0x3a4] ss:$16 sps:$4 sm:$0xff]  }
 0x123   : > { %5311 = vpow2.f32 %v3249_v30  ;;  %v3152_v35 = vsub.f32 0.0, %v3054_v31  ;;  %v6055_v38 = vadd.f32 %v6039_v11, %v2174_v33  ;;  %v2662_v29 = vld [vmem:[%s5806_s8 + $0x8] sm:$0xff]  ;;  %v2759_v33 = vmax.f32 %v6042_v15, 0.0  ;;  %v2663_v34 = vld [vmem:[%s5806_s8 + $0x10] sm:$0xff] }
 0x124   : > { %v1751_v36 = vpop.f32.mrf.mxu0  ;;  %v2176_v39 = vpop.f32.mrf.mxu1  ;;  %v5196_v32 = vld [vmem:[%s5801_s29 + $0x3ac] ss:$16 sps:$4 sm:$0xff]  }
 0x125   : > { %v3251_v42 = vmul.f32 1.442695, %v3152_v35  ;;  %v2177_v43 = vadd.f32 %v2176_v39, %v1751_v36  ;;  %v3055_v46 = vand.u32 2147483647, %v6055_v38  ;;  %v2857_v39 = vmul.f32 %v2661_v22, %v6042_v15 }
 0x126   : > { %v1753_v44 = vpop.f32.mrf.mxu0  ;;  %v2178_v47 = vpop.f32.mrf.mxu1 }
 0x127   : > { %5313 = vpow2.f32 %v3251_v42  ;;  %v6062_v48 = vadd.f32 %v6039_v11, %v2177_v43  ;;  %v3153_v50 = vsub.f32 0.0, %v3055_v46  ;;  %v2858_v44 = vmul.f32 %v2662_v29, %v6050_v27  ;;  %v2665_v46 = vld [vmem:[%s5806_s8 + $0x20] sm:$0xff] }
 0x128   : > { %v1756_v49 = vpop.f32.mrf.mxu0  ;;  %1947 = vmatmul.mubr.bf16.gmra.mxu0 %v5177_v37  ;;  %v2181_v51 = vpop.f32.mrf.mxu1  ;;  %2372 = vmatmul.mubr.bf16.gmra.mxu1 %v5178_v40  ;;  %v2760_v40 = vmax.f32 %v6050_v27, 0.0 }
 0x129   : > { %1954 = vmatprep.mubr.bf16.mxu0 %v5179_v41  ;;  %v3056_v52 = vand.u32 2147483647, %v6062_v48  ;;  %v2182_v53 = vadd.f32 %v2181_v51, %v1756_v49  ;;  %2379 = vmatprep.mubr.bf16.mxu1 %v5181_v45  ;;  %v3253_v55 = vmul.f32 1.442695, %v3153_v50  ;;  %v2664_v41 = vld [vmem:[%s5806_s8 + $0x18] sm:$0xff]  ;;  %v2761_v45 = vmax.f32 %v6055_v38, 0.0 }
 0x12a   : > { %v1758_v54 = vpop.f32.mrf.mxu0  ;;  %v2183_v56 = vpop.f32.mrf.mxu1  ;;  %v2859_v51 = vmul.f32 %v2663_v34, %v6055_v38 }
 0x12b   : > { %v3154_v57 = vsub.f32 0.0, %v3056_v52  ;;  %v6066_v58 = vadd.f32 %v6039_v11, %v2182_v53  ;;  %5315 = vpow2.f32 %v3253_v55  ;;  %v2762_v55 = vmax.f32 %v6062_v48, 0.0 }
 0x12c   : > { %v1759_v59 = vpop.f32.mrf.mxu0  ;;  %v2184_v61 = vpop.f32.mrf.mxu1  ;;  %v2860_v56 = vmul.f32 %v2664_v41, %v6062_v48 }
 0x12d   : > { %v3255_v0 = vmul.f32 1.442695, %v3154_v57  ;;  %v3057_v1 = vand.u32 2147483647, %v6066_v58  ;;  %v2185_v4 = vadd.f32 %v2184_v61, %v1759_v59  ;;  %v2763_v38 = vmax.f32 %v6066_v58, 0.0 }
 0x12e   : > { %v1761_v2 = vpop.f32.mrf.mxu0  ;;  %v2186_v5 = vpop.f32.mrf.mxu1 }
 0x12f   : > { %5317 = vpow2.f32 %v3255_v0  ;;  %v3155_v6 = vsub.f32 0.0, %v3057_v1  ;;  %v6076_v9 = vadd.f32 %v6039_v11, %v2185_v4 }
 0x130   : > { %v1764_v7 = vpop.f32.mrf.mxu0  ;;  %1955 = vmatmul.mubr.bf16.gmra.mxu0 %v5183_v60  ;;  %v6073_v8 = vpop.eup %5311  ;;  %2380 = vmatmul.mubr.bf16.gmra.mxu1 %v5184_v62  ;;  %v5191_v60 = vld [vmem:[%s5801_s29 + $0x3a0] ss:$16 sps:$4 sm:$0xff]   ;;  %v2861_v62 = vmul.f32 %v2665_v46, %v6066_v58  ;;  %v6127_v58 = vsub.f32 %v2760_v40, %v2858_v44 }
 0x131   : > { %v2189_v10 = vpop.f32.mrf.mxu1  ;;  %1962 = vmatprep.mubr.bf16.mxu0 %v5187_v63  ;;  %v3445_v12 = vadd.f32 1.0, %v6073_v8  ;;  %v3257_v13 = vmul.f32 1.442695, %v3155_v6  ;;  %2387 = vmatprep.mubr.bf16.mxu1 %v5190_v3  ;;  %v3058_v16 = vand.u32 2147483647, %v6076_v9  ;;  %v3448_v15 = vmul.f32 -0.5, %v6073_v8 }
 0x132   : > { %v1766_v14 = vpop.f32.mrf.mxu0  ;;  %v2190_v17 = vadd.f32 %v2189_v10, %v1764_v7  ;;  %v3451_v61 = vand.u32 2147483647, %v6073_v8  ;;  %v2666_v63 = vld [vmem:[%s5806_s8 + $0x28] sm:$0xff]  ;;  %v6119_v3 = vsub.f32 %v2759_v33, %v2857_v39  ;;  %v5199_v7 = vld [vmem:[%s5801_s29 + $0x3c4] ss:$16 sps:$4 sm:$0xff]  }
 0x133   : > { %v2191_v18 = vpop.f32.mrf.mxu1  ;;  %5319 = vlog2.f32 %v3445_v12  ;;  %v3156_v23 = vsub.f32 0.0, %v3058_v16  ;;  %v5194_v6 = vld [vmem:[%s5801_s29 + $0x3a8] ss:$16 sps:$4 sm:$0xff]   ;;  %v3449_v10 = vadd.f32 1.0, %v3448_v15  ;;  %v5202_v14 = vld [vmem:[%s5801_s29 + $0x3cc] ss:$16 sps:$4 sm:$0xff]   ;;  %v6131_v16 = vsub.f32 %v2761_v45, %v2859_v51 }
 0x134   : > { %v1767_v19 = vpop.f32.mrf.mxu0  ;;  %v6081_v21 = vpop.eup %5313  ;;  %5321 = vpow2.f32 %v3257_v13  ;;  %v6085_v24 = vadd.f32 %v6039_v11, %v2190_v17  ;;  %v2764_v17 = vmax.f32 %v6076_v9, 0.0  ;;  %v2862_v18 = vmul.f32 %v2666_v63, %v6076_v9  ;;  %v5197_v15 = vld [vmem:[%s5801_s29 + $0x3c0] ss:$16 sps:$4 sm:$0xff]   ;;  %v5200_v51 = vld [vmem:[%s5801_s29 + $0x3c8] ss:$16 sps:$4 sm:$0xff]  }
 0x135   : > { %v2192_v25 = vpop.f32.mrf.mxu1  ;;  %v3454_v30 = vadd.f32 1.0, %v6081_v21  ;;  %v3259_v35 = vmul.f32 1.442695, %v3156_v23  ;;  %v3457_v48 = vmul.f32 -0.5, %v6081_v21  ;;  %vm6135_vm1 = vcmp.lt.f32.partialorder %v3451_v61, 0.0004427343 }
 0x136   : > { %v1769_v31 = vpop.f32.mrf.mxu0  ;;  %v3059_v36 = vand.u32 2147483647, %v6085_v24  ;;  %v2193_v42 = vadd.f32 %v2192_v25, %v1767_v19  ;;  %v6139_v23 = vsub.f32 %v2762_v55, %v2860_v56  ;;  %v6141_v25 = vsub.f32 %v2763_v38, %v2861_v62 }
 0x137   : > { %v2194_v37 = vpop.f32.mrf.mxu1  ;;  %5323 = vlog2.f32 %v3454_v30  ;;  %v3458_v29 = vadd.f32 1.0, %v3457_v48  ;;  %v2667_v30 = vld [vmem:[%s5806_s8 + $0x30] sm:$0xff]  ;;  %v3460_v41 = vand.u32 2147483647, %v6081_v21 }
 0x138   : > { %v1772_v43 = vpop.f32.mrf.mxu0  ;;  %1963 = vmatmul.mubr.bf16.gmra.mxu0 %v5185_v20  ;;  %5325 = vpow2.f32 %v3259_v35  ;;  %v3157_v47 = vsub.f32 0.0, %v3059_v36  ;;  %2388 = vmatmul.mubr.bf16.gmra.mxu1 %v5188_v26  ;;  %v6101_v50 = vpop.eup %5315  ;;  %v6106_v52 = vadd.f32 %v6039_v11, %v2193_v42  ;;  %v3450_v36 = vmul.f32 %v6073_v8, %v3449_v10 }
 0x139   : > { %v2197_v49 = vpop.f32.mrf.mxu1  ;;  %1970 = vmatprep.mubr.bf16.mxu0 %v5193_v28  ;;  %2395 = vmatprep.mubr.bf16.mxu1 %v5196_v32  ;;  %v3463_v54 = vadd.f32 1.0, %v6101_v50  ;;  %v3466_v37 = vmul.f32 -0.5, %v6101_v50  ;;  %v2765_v8 = vmax.f32 %v6085_v24, 0.0  ;;  %v6157_v46 = vmul.f32 %v2667_v30, %v6085_v24 }
 0x13a   : > { %v2198_v27 = vadd.f32 %v2197_v49, %v1772_v43  ;;  %v1774_v53 = vpop.f32.mrf.mxu0  ;;  %v3261_v57 = vmul.f32 1.442695, %v3157_v47  ;;  %v3060_v0 = vand.u32 2147483647, %v6106_v52  ;;  %v6151_v43 = vsub.f32 %v2764_v17, %v2862_v18 }
 0x13b   : > { %v2199_v59 = vpop.f32.mrf.mxu1  ;;  %5327 = vlog2.f32 %v3463_v54  ;;  %v3459_v53 = vmul.f32 %v6081_v21, %v3458_v29  ;;  %v3467_v38 = vadd.f32 1.0, %v3466_v37  ;;  %vm3461_vm3 = vcmp.lt.f32.partialorder %v3460_v41, 0.0004427343 }
 0x13c   : > { %v1775_v1 = vpop.f32.mrf.mxu0  ;;  %v6117_v2 = vpop.eup %5317  ;;  %v6123_v4 = vadd.f32 %v6039_v11, %v2198_v27  ;;  %5329 = vpow2.f32 %v3261_v57  ;;  %v3158_v19 = vsub.f32 0.0, %v3060_v0  ;;  %v5205_v57 = vld [vmem:[%s5801_s29 + $0x3e4] ss:$16 sps:$4 sm:$0xff]   ;;  %v5208_v59 = vld [vmem:[%s5801_s29 + $0x3ec] ss:$16 sps:$4 sm:$0xff]  }
 0x13d   : > { %v2200_v5 = vpop.f32.mrf.mxu1  ;;  %v3472_v12 = vadd.f32 1.0, %v6117_v2  ;;  %v3475_v54 = vmul.f32 -0.5, %v6117_v2  ;;  %v3478_v10 = vand.u32 2147483647, %v6117_v2 }
 0x13e   : > { %v1777_v13 = vpop.f32.mrf.mxu0  ;;  %v3263_v31 = vmul.f32 1.442695, %v3158_v19  ;;  %v3061_v9 = vand.u32 2147483647, %v6123_v4  ;;  %v2201_v32 = vadd.f32 %v2200_v5, %v1775_v1  ;;  %v3469_v1 = vand.u32 2147483647, %v6101_v50 }
 0x13f   : > { %v2202_v20 = vpop.f32.mrf.mxu1  ;;  %5331 = vlog2.f32 %v3472_v12  ;;  %v2668_v5 = vld [vmem:[%s5806_s8 + $0x38] sm:$0xff]  ;;  %v2766_v12 = vmax.f32 %v6106_v52, 0.0  ;;  %v3476_v17 = vadd.f32 1.0, %v3475_v54  ;;  %vm6197_vm5 = vcmp.lt.f32.partialorder %v3478_v10, 0.0004427343 }
 0x140   : > { %v1780_v26 = vpop.f32.mrf.mxu0  ;;  %1971 = vmatmul.mubr.bf16.gmra.mxu0 %v5191_v60  ;;  %v5320_v28 = vpop.eup %5319  ;;  %2396 = vmatmul.mubr.bf16.gmra.mxu1 %v5194_v6  ;;  %5333 = vpow2.f32 %v3263_v31  ;;  %v3159_v47 = vsub.f32 0.0, %v3061_v9  ;;  %v6166_v55 = vadd.f32 %v6039_v11, %v2201_v32  ;;  %v3468_v20 = vmul.f32 %v6101_v50, %v3467_v38 }
 0x141   : > { %v2205_v33 = vpop.f32.mrf.mxu1  ;;  %1978 = vmatprep.mubr.bf16.mxu0 %v5199_v7  ;;  %v6145_v34 = vpop.eup %5321  ;;  %v3447_v35 = vmul.f32 0.6931472, %v5320_v28  ;;  %2403 = vmatprep.mubr.bf16.mxu1 %v5202_v14  ;;  %vm3470_vm4 = vcmp.lt.f32.partialorder %v3469_v1, 0.0004427343 }
 0x142   : > { %v2206_v39 = vadd.f32 %v2205_v33, %v1780_v26  ;;  %v1782_v40 = vpop.f32.mrf.mxu0  ;;  %v3481_v42 = vadd.f32 1.0, %v6145_v34  ;;  %v3265_v62 = vmul.f32 1.442695, %v3159_v47  ;;  %v3484_v22 = vmul.f32 -0.5, %v6145_v34 }
 0x143   : > { %v2207_v44 = vpop.f32.mrf.mxu1  ;;  %v3453_v45 = vsel %vm6135_vm1, %v3450_v36, %v3447_v35  ;;  %v6188_v26 = vmul.f32 %v2668_v5, %v6106_v52  ;;  %v5206_v35 = vld [vmem:[%s5801_s29 + $0x3e8] ss:$16 sps:$4 sm:$0xff]   ;;  %v3487_v1 = vand.u32 2147483647, %v6145_v34 }
 0x144   : > { %v6159_v49 = vpop.f32.mrf.mxu0  ;;  %v5324_v27 = vpop.eup %5323  ;;  %5335 = vlog2.f32 %v3481_v42  ;;  %v6175_v63 = vadd.f32 %v6039_v11, %v2206_v39  ;;  %v4327_v0 = vadd.f32 %v3453_v45, %v6119_v3  ;;  %v3062_v3 = vand.u32 2147483647, %v6166_v55 }
 0x145   : > { %v6168_v56 = vpop.f32.mrf.mxu1  ;;  %v6172_v60 = vpop.eup %5325  ;;  %v3456_v61 = vmul.f32 0.6931472, %v5324_v27  ;;  %5337 = vpow2.f32 %v3265_v62  ;;  %v3477_v44 = vmul.f32 %v6117_v2, %v3476_v17  ;;  %v3485_v54 = vadd.f32 1.0, %v3484_v22 }
 0x146   : > { %v1785_v21 = vpop.f32.mrf.mxu0  ;;  %v3490_v48 = vadd.f32 1.0, %v6172_v60  ;;  %v3063_v28 = vand.u32 2147483647, %v6175_v63  ;;  %v4427_v31 = vsel %vm4426_vm2, %v4327_v0, 0.0  ;;  %v3160_v33 = vsub.f32 0.0, %v3062_v3  ;;  %v2669_v3 = vld [vmem:[%s5806_s8 + $0x40] sm:$0xff] }
 0x147   : > { %v2210_v6 = vpop.f32.mrf.mxu1  ;;  %v3462_v7 = vsel %vm3461_vm3, %v3459_v53, %v3456_v61  ;;  %v3493_v61 = vmul.f32 -0.5, %v6172_v60  ;;  %v2209_v62 = vadd.f32 %v6168_v56, %v6159_v49  ;;  %v6225_v49 = vsub.f32 %v2765_v8, %v6157_v46 }
 0x148   : > { %v1788_v13 = vpop.f32.mrf.mxu0  ;;  %1979 = vmatmul.mubr.bf16.gmra.mxu0 %v5197_v15  ;;  %v4328_v14 = vadd.f32 %v3462_v7, %v6127_v58  ;;  %5339 = vlog2.f32 %v3490_v48  ;;  %2404 = vmatmul.mubr.bf16.gmra.mxu1 %v5200_v51  ;;  %v5328_v19 = vpop.eup %5327  ;;  %v5203_v58 = vld [vmem:[%s5801_s29 + $0x3e0] ss:$16 sps:$4 sm:$0xff]   ;;  %v3267_v45 = vmul.f32 1.442695, %v3160_v33  ;;  %v3161_v47 = vsub.f32 0.0, %v3063_v28 }
 0x149   : > { %v2213_v18 = vpop.f32.mrf.mxu1  ;;  %1986 = vmatprep.mubr.bf16.mxu0 %v5205_v57  ;;  %2411 = vmatprep.mubr.bf16.mxu1 %v5208_v59  ;;  %v6192_v30 = vpop.eup %5329  ;;  %v3465_v32 = vmul.f32 0.6931472, %v5328_v19  ;;  %v5211_v51 = vld [vmem:[%s5801_s29 + $0x404] ss:$16 sps:$4 sm:$0xff]   ;;  %v5214_v59 = vld [vmem:[%s5801_s29 + $0x40c] ss:$16 sps:$4 sm:$0xff]   ;;  %v6242_v28 = vsub.f32 %v2766_v12, %v6188_v26  ;;  %v6249_v33 = vmul.f32 %v2669_v3, %v6123_v4 }
 0x14a   : > { %v1790_v29 = vpop.f32.mrf.mxu0  ;;  %v4428_v9 = vsel %vm4426_vm2, %v4328_v14, 0.0  ;;  %v3499_v39 = vadd.f32 1.0, %v6192_v30  ;;  %v3269_v38 = vmul.f32 1.442695, %v3161_v47  ;;  %v2214_v48 = vadd.f32 %v2213_v18, %v1788_v13  ;;  %v5215_v3 = vld [vmem:[%s5801_s29 + $0x420] ss:$16 sps:$4 sm:$0xff]  }
 0x14b   : > { %v2215_v50 = vpop.f32.mrf.mxu1  ;;  %v4429_v36 = vadd.f32 %v4428_v9, %v4427_v31  ;;  %v3471_v42 = vsel %vm3470_vm4, %v3468_v20, %v3465_v32  ;;  %v3486_v13 = vmul.f32 %v6145_v34, %v3485_v54  ;;  %v3496_v17 = vand.u32 2147483647, %v6172_v60  ;;  %v5209_v20 = vld [vmem:[%s5801_s29 + $0x400] ss:$16 sps:$4 sm:$0xff]  }
 0x14c   : > { %v6202_v40 = vpop.f32.mrf.mxu0  ;;  %v5332_v41 = vpop.eup %5331  ;;  %v4329_v27 = vadd.f32 %v3471_v42, %v6131_v16  ;;  %5341 = vlog2.f32 %v3499_v39  ;;  %v3494_v18 = vadd.f32 1.0, %v3493_v61  ;;  %vm3488_vm6 = vcmp.lt.f32.partialorder %v3487_v1, 0.0004427343  ;;  %v5220_v42 = vld [vmem:[%s5801_s29 + $0x42c] ss:$16 sps:$4 sm:$0xff]  }
 0x14d   : > { %v6205_v15 = vpop.f32.mrf.mxu1  ;;  %v3474_v53 = vmul.f32 0.6931472, %v5332_v41  ;;  %5343 = vpow2.f32 %v3267_v45  ;;  %v6213_v21 = vpop.eup %5333  ;;  %v3502_v34 = vmul.f32 -0.5, %v6192_v30  ;;  %v2767_v32 = vmax.f32 %v6123_v4, 0.0 }
 0x14e   : > { %v1793_v57 = vpop.f32.mrf.mxu0  ;;  %v4430_v0 = vsel %vm4426_vm2, %v4329_v27, 0.0  ;;  %v3508_v56 = vadd.f32 1.0, %v6213_v21  ;;  %5345 = vpow2.f32 %v3269_v38  ;;  %v2768_v26 = vmax.f32 %v6166_v55, 0.0 }
 0x14f   : > { %v2218_v2 = vpop.f32.mrf.mxu1  ;;  %v3480_v16 = vsel %vm6197_vm5, %v3477_v44, %v3474_v53  ;;  %v4431_v6 = vadd.f32 %v4430_v0, %v4429_v36  ;;  %v5217_v36 = vld [vmem:[%s5801_s29 + $0x424] ss:$16 sps:$4 sm:$0xff]   ;;  %v6257_v39 = vadd.f32 %v6039_v11, %v2214_v48  ;;  %v3495_v45 = vmul.f32 %v6172_v60, %v3494_v18 }
 0x150   : > { %v6219_v5 = vpop.f32.mrf.mxu0  ;;  %1987 = vmatmul.mubr.bf16.gmra.mxu0 %v5203_v58  ;;  %v4330_v7 = vadd.f32 %v3480_v16, %v6139_v23  ;;  %2412 = vmatmul.mubr.bf16.gmra.mxu1 %v5206_v35  ;;  %v6234_v23 = vadd.f32 %v6039_v11, %v2209_v62  ;;  %5347 = vlog2.f32 %v3508_v56  ;;  %v5212_v58 = vld [vmem:[%s5801_s29 + $0x408] ss:$16 sps:$4 sm:$0xff]   ;;  %vm6261_vm7 = vcmp.lt.f32.partialorder %v3496_v17, 0.0004427343  ;;  %v2671_v56 = vld [vmem:[%s5806_s8 + $0x50] sm:$0xff] }
 0x151   : > { %v6228_v10 = vpop.f32.mrf.mxu1  ;;  %1994 = vmatprep.mubr.bf16.mxu0 %v5211_v51  ;;  %v5336_v14 = vpop.eup %5335  ;;  %2419 = vmatprep.mubr.bf16.mxu1 %v5214_v59  ;;  %v2670_v51 = vld [vmem:[%s5806_s8 + $0x48] sm:$0xff]  ;;  %v3503_v54 = vadd.f32 1.0, %v3502_v34  ;;  %v3505_v57 = vand.u32 2147483647, %v6192_v30  ;;  %v3511_v38 = vmul.f32 -0.5, %v6213_v21  ;;  %v2217_v48 = vadd.f32 %v6205_v15, %v6202_v40 }
 0x152   : > { %v1798_v24 = vpop.f32.mrf.mxu0  ;;  %v4432_v8 = vsel %vm4426_vm2, %v4330_v7, 0.0  ;;  %v3483_v46 = vmul.f32 0.6931472, %v5336_v14  ;;  %v6245_v31 = vpop.eup %5337  ;;  %v3064_v50 = vand.u32 2147483647, %v6234_v23  ;;  %v2866_v16 = vmul.f32 %v2670_v51, %v6166_v55 }
 0x153   : > { %v2223_v19 = vpop.f32.mrf.mxu1  ;;  %v4433_v22 = vadd.f32 %v4432_v8, %v4431_v6  ;;  %v3517_v12 = vadd.f32 1.0, %v6245_v31  ;;  %v3065_v1 = vand.u32 2147483647, %v6257_v39  ;;  %v2222_v14 = vadd.f32 %v6228_v10, %v6219_v5  ;;  %v5218_v24 = vld [vmem:[%s5801_s29 + $0x428] ss:$16 sps:$4 sm:$0xff]  }
 0x154   : > { %v1799_v29 = vpop.f32.mrf.mxu0  ;;  %v3489_v9 = vsel %vm3488_vm6, %v3486_v13, %v3483_v46  ;;  %v3162_v27 = vsub.f32 0.0, %v3064_v50  ;;  %v3504_v46 = vmul.f32 %v6192_v30, %v3503_v54  ;;  %vm3506_vm8 = vcmp.lt.f32.partialorder %v3505_v57, 0.0004427343  ;;  %v2672_v57 = vld [vmem:[%s5806_s8 + $0x58] sm:$0xff] }
 0x155   : > { %v2224_v35 = vpop.f32.mrf.mxu1  ;;  %v5340_v37 = vpop.eup %5339  ;;  %v4331_v52 = vadd.f32 %v3489_v9, %v6141_v25  ;;  %5349 = vlog2.f32 %v3517_v12  ;;  %v3163_v18 = vsub.f32 0.0, %v3065_v1  ;;  %v3512_v5 = vadd.f32 1.0, %v3511_v38  ;;  %v5229_v1 = vld [vmem:[%s5801_s29 + $0x464] ss:$16 sps:$4 sm:$0xff]  }
 0x156   : > { %v1801_v41 = vpop.f32.mrf.mxu0  ;;  %v3492_v44 = vmul.f32 0.6931472, %v5340_v37  ;;  %v3271_v62 = vmul.f32 1.442695, %v3162_v27  ;;  %v2225_v13 = vadd.f32 %v2224_v35, %v1799_v29  ;;  %v5226_v29 = vld [vmem:[%s5801_s29 + $0x44c] ss:$16 sps:$4 sm:$0xff]   ;;  %v6301_v12 = vadd.f32 %v6039_v11, %v2217_v48 }
 0x157   : > { %v2226_v53 = vpop.f32.mrf.mxu1  ;;  %v4434_v25 = vsel %vm4426_vm2, %v4331_v52, 0.0  ;;  %v3514_v9 = vand.u32 2147483647, %v6213_v21  ;;  %v3520_v50 = vmul.f32 -0.5, %v6245_v31  ;;  %v3273_v35 = vmul.f32 1.442695, %v3163_v18 }
 0x158   : > { %v1804_v59 = vpop.f32.mrf.mxu0  ;;  %1995 = vmatmul.mubr.bf16.gmra.mxu0 %v5209_v20  ;;  %v4435_v61 = vadd.f32 %v4434_v25, %v4433_v22  ;;  %v3498_v60 = vsel %vm6261_vm7, %v3495_v45, %v3492_v44  ;;  %2420 = vmatmul.mubr.bf16.gmra.mxu1 %v5212_v58  ;;  %5351 = vpow2.f32 %v3271_v62  ;;  %v5223_v20 = vld [vmem:[%s5801_s29 + $0x444] ss:$16 sps:$4 sm:$0xff]   ;;  %v6298_v52 = vsub.f32 %v2767_v32, %v6249_v33 }
 0x159   : > { %v2229_v2 = vpop.f32.mrf.mxu1  ;;  %2002 = vmatprep.mubr.bf16.mxu0 %v5217_v36  ;;  %v4332_v0 = vadd.f32 %v3498_v60, %v6151_v43  ;;  %2427 = vmatprep.mubr.bf16.mxu1 %v5220_v42  ;;  %v5342_v7 = vpop.eup %5341  ;;  %v2769_v44 = vmax.f32 %v6175_v63, 0.0  ;;  %v2867_v45 = vmul.f32 %v2671_v56, %v6175_v63  ;;  %v3513_v32 = vmul.f32 %v6213_v21, %v3512_v5 }
 0x15a   : > { %v1806_v6 = vpop.f32.mrf.mxu0  ;;  %v6279_v17 = vadd.f32 %v2229_v2, %v1804_v59  ;;  %v6283_v8 = vpop.eup %5343  ;;  %v3501_v15 = vmul.f32 0.6931472, %v5342_v7  ;;  %v6312_v33 = vsub.f32 %v2768_v26, %v2866_v16  ;;  %vm3515_vm9 = vcmp.lt.f32.partialorder %v3514_v9, 0.0004427343  ;;  %v5224_v16 = vld [vmem:[%s5801_s29 + $0x448] ss:$16 sps:$4 sm:$0xff]  }
 0x15b   : > { %v2231_v43 = vpop.f32.mrf.mxu1  ;;  %v4436_v40 = vsel %vm4426_vm2, %v4332_v0, 0.0  ;;  %v3526_v10 = vadd.f32 1.0, %v6283_v8  ;;  %v6292_v37 = vpop.eup %5345  ;;  %v3521_v53 = vadd.f32 1.0, %v3520_v50  ;;  %v3523_v21 = vand.u32 2147483647, %v6245_v31 }
 0x15c   : > { %v1807_v19 = vpop.f32.mrf.mxu0  ;;  %v4437_v22 = vadd.f32 %v4436_v40, %v4435_v61  ;;  %v3507_v58 = vsel %vm3506_vm8, %v3504_v46, %v3501_v15  ;;  %v3535_v47 = vadd.f32 1.0, %v6292_v37  ;;  %v3066_v55 = vand.u32 2147483647, %v6301_v12  ;;  %v5221_v0 = vld [vmem:[%s5801_s29 + $0x440] ss:$16 sps:$4 sm:$0xff]  }
 0x15d   : > { %v2232_v34 = vpop.f32.mrf.mxu1  ;;  %v4333_v30 = vadd.f32 %v3507_v58, %v6225_v49  ;;  %5353 = vlog2.f32 %v3526_v10  ;;  %v5348_v42 = vpop.eup %5347  ;;  %v6320_v26 = vadd.f32 %v6039_v11, %v2222_v14  ;;  %v6323_v60 = vsub.f32 %v2769_v44, %v2867_v45  ;;  %v5232_v15 = vld [vmem:[%s5801_s29 + $0x46c] ss:$16 sps:$4 sm:$0xff]  }
 0x15e   : > { %v1809_v36 = vpop.f32.mrf.mxu0  ;;  %5355 = vpow2.f32 %v3273_v35  ;;  %v3510_v49 = vmul.f32 0.6931472, %v5348_v42  ;;  %v6326_v38 = vadd.f32 %v6039_v11, %v2225_v13  ;;  %v2233_v62 = vadd.f32 %v2232_v34, %v1807_v19  ;;  %v2673_v34 = vld [vmem:[%s5806_s8 + $0x60] sm:$0xff] }
 0x15f   : > { %v2234_v41 = vpop.f32.mrf.mxu1  ;;  %v4438_v4 = vsel %vm4426_vm2, %v4333_v30, 0.0  ;;  %5357 = vlog2.f32 %v3535_v47  ;;  %v3529_v6 = vmul.f32 -0.5, %v6283_v8  ;;  %v2770_v7 = vmax.f32 %v6234_v23, 0.0 }
 0x160   : > { %v6306_v51 = vpop.f32.mrf.mxu0  ;;  %2003 = vmatmul.mubr.bf16.gmra.mxu0 %v5215_v3  ;;  %2428 = vmatmul.mubr.bf16.gmra.mxu1 %v5218_v24  ;;  %v4439_v63 = vadd.f32 %v4438_v4, %v4437_v22  ;;  %v3516_v54 = vsel %vm3515_vm9, %v3513_v32, %v3510_v49  ;;  %v3164_v56 = vsub.f32 0.0, %v3066_v55  ;;  %v3522_v3 = vmul.f32 %v6245_v31, %v3521_v53  ;;  %v5227_v49 = vld [vmem:[%s5801_s29 + $0x460] ss:$16 sps:$4 sm:$0xff]  }
 0x161   : > { %v6314_v27 = vpop.f32.mrf.mxu1  ;;  %2010 = vmatprep.mubr.bf16.mxu0 %v5223_v20  ;;  %2435 = vmatprep.mubr.bf16.mxu1 %v5226_v29  ;;  %v4334_v61 = vadd.f32 %v3516_v54, %v6242_v28  ;;  %v3067_v28 = vand.u32 2147483647, %v6320_v26  ;;  %v2868_v24 = vmul.f32 %v2672_v57, %v6234_v23  ;;  %vm3524_vm10 = vcmp.lt.f32.partialorder %v3523_v21, 0.0004427343  ;;  %v5230_v21 = vld [vmem:[%s5801_s29 + $0x468] ss:$16 sps:$4 sm:$0xff]  }
 0x162   : > { %v1814_v25 = vpop.f32.mrf.mxu0  ;;  %v5350_v48 = vpop.eup %5349  ;;  %v3275_v18 = vmul.f32 1.442695, %v3164_v56  ;;  %v3538_v10 = vmul.f32 -0.5, %v6292_v37  ;;  %v2771_v29 = vmax.f32 %v6257_v39, 0.0  ;;  %v3068_v58 = vand.u32 2147483647, %v6326_v38 }
 0x163   : > { %v2239_v59 = vpop.f32.mrf.mxu1  ;;  %v4440_v13 = vsel %vm4426_vm2, %v4334_v61, 0.0  ;;  %v3519_v43 = vmul.f32 0.6931472, %v5350_v48  ;;  %v3165_v19 = vsub.f32 0.0, %v3067_v28  ;;  %v3530_v50 = vadd.f32 1.0, %v3529_v6 }
 0x164   : > { %v6328_v2 = vpop.f32.mrf.mxu0  ;;  %v4441_v46 = vadd.f32 %v4440_v13, %v4439_v63  ;;  %v6354_v36 = vadd.f32 %v6039_v11, %v6279_v17  ;;  %v3532_v41 = vand.u32 2147483647, %v6283_v8  ;;  %5359 = vpow2.f32 %v3275_v18  ;;  %v5238_v56 = vld [vmem:[%s5801_s29 + $0x48c] ss:$16 sps:$4 sm:$0xff]  }
 0x165   : > { %v6336_v14 = vpop.f32.mrf.mxu1  ;;  %v6342_v22 = vpop.eup %5351  ;;  %v3525_v5 = vsel %vm3524_vm10, %v3522_v3, %v3519_v43  ;;  %v3277_v42 = vmul.f32 1.442695, %v3165_v19  ;;  %v3166_v44 = vsub.f32 0.0, %v3068_v58  ;;  %v3541_v47 = vand.u32 2147483647, %v6292_v37  ;;  %v2674_v58 = vld [vmem:[%s5806_s8 + $0x68] sm:$0xff] }
 0x166   : > { %v1817_v40 = vpop.f32.mrf.mxu0  ;;  %v4335_v9 = vadd.f32 %v3525_v5, %v6298_v52  ;;  %v3544_v35 = vadd.f32 1.0, %v6342_v22  ;;  %v2869_v17 = vmul.f32 %v2673_v34, %v6257_v39  ;;  %v3539_v53 = vadd.f32 1.0, %v3538_v10 }
 0x167   : > { %v2242_v20 = vpop.f32.mrf.mxu1  ;;  %v3279_v25 = vmul.f32 1.442695, %v3166_v44  ;;  %v3531_v59 = vmul.f32 %v6283_v8, %v3530_v50  ;;  %v3069_v61 = vand.u32 2147483647, %v6354_v36  ;;  %v6369_v39 = vadd.f32 %v6039_v11, %v2233_v62  ;;  %v2676_v50 = vld [vmem:[%s5806_s8 + $0x78] sm:$0xff] }
 0x168   : > { %v6348_v31 = vpop.f32.mrf.mxu0  ;;  %2011 = vmatmul.mubr.bf16.gmra.mxu0 %v5221_v0  ;;  %2436 = vmatmul.mubr.bf16.gmra.mxu1 %v5224_v16  ;;  %v4442_v52 = vsel %vm4426_vm2, %v4335_v9, 0.0  ;;  %5361 = vlog2.f32 %v3544_v35  ;;  %v5235_v16 = vld [vmem:[%s5801_s29 + $0x484] ss:$16 sps:$4 sm:$0xff]   ;;  %vm3533_vm11 = vcmp.lt.f32.partialorder %v3532_v41, 0.0004427343  ;;  %v6377_v8 = vsub.f32 %v2770_v7, %v2868_v24 }
 0x169   : > { %v6356_v30 = vpop.f32.mrf.mxu1  ;;  %2018 = vmatprep.mubr.bf16.mxu0 %v5229_v1  ;;  %2443 = vmatprep.mubr.bf16.mxu1 %v5232_v15  ;;  %v4443_v63 = vadd.f32 %v4442_v52, %v4441_v46  ;;  %5363 = vpow2.f32 %v3277_v42  ;;  %v3547_v1 = vmul.f32 -0.5, %v6342_v22  ;;  %v2772_v43 = vmax.f32 %v6301_v12, 0.0  ;;  %v2675_v9 = vld [vmem:[%s5806_s8 + $0x70] sm:$0xff]  ;;  %v2677_v42 = vld [vmem:[%s5806_s8 + $0x80] sm:$0xff] }
 0x16a   : > { %v1822_v45 = vpop.f32.mrf.mxu0  ;;  %v5354_v32 = vpop.eup %5353  ;;  %5365 = vpow2.f32 %v3279_v25  ;;  %v3167_v62 = vsub.f32 0.0, %v3069_v61  ;;  %v3540_v46 = vmul.f32 %v6292_v37, %v3539_v53  ;;  %vm3542_vm12 = vcmp.lt.f32.partialorder %v3541_v47, 0.0004427343  ;;  %v5233_v52 = vld [vmem:[%s5801_s29 + $0x480] ss:$16 sps:$4 sm:$0xff]  }
 0x16b   : > { %v2247_v4 = vpop.f32.mrf.mxu1  ;;  %v6364_v57 = vpop.eup %5355  ;;  %v3528_v55 = vmul.f32 0.6931472, %v5354_v32  ;;  %v6382_v19 = vsub.f32 %v2771_v29, %v2869_v17  ;;  %v3070_v7 = vand.u32 2147483647, %v6369_v39  ;;  %v3548_v37 = vadd.f32 1.0, %v3547_v1 }
 0x16c   : > { %v1823_v54 = vpop.f32.mrf.mxu0  ;;  %v3553_v48 = vadd.f32 1.0, %v6364_v57  ;;  %v5358_v28 = vpop.eup %5357  ;;  %v3281_v23 = vmul.f32 1.442695, %v3167_v62  ;;  %v2238_v5 = vadd.f32 %v6314_v27, %v6306_v51  ;;  %v2241_v51 = vadd.f32 %v6336_v14, %v6328_v2  ;;  %v5236_v47 = vld [vmem:[%s5801_s29 + $0x488] ss:$16 sps:$4 sm:$0xff]  }
 0x16d   : > { %v2248_v0 = vpop.f32.mrf.mxu1  ;;  %v3534_v13 = vsel %vm3533_vm11, %v3531_v59, %v3528_v55  ;;  %v3537_v15 = vmul.f32 0.6931472, %v5358_v28  ;;  %v3168_v35 = vsub.f32 0.0, %v3070_v7  ;;  %v2246_v27 = vadd.f32 %v6356_v30, %v6348_v31  ;;  %v5241_v2 = vld [vmem:[%s5801_s29 + $0x4a4] ss:$16 sps:$4 sm:$0xff]  }
 0x16e   : > { %v1825_v6 = vpop.f32.mrf.mxu0  ;;  %v4336_v40 = vadd.f32 %v3534_v13, %v6312_v33  ;;  %5367 = vlog2.f32 %v3553_v48  ;;  %v6394_v44 = vadd.f32 %v6039_v11, %v2238_v5  ;;  %v6400_v45 = vadd.f32 %v2248_v0, %v1823_v54  ;;  %v5244_v25 = vld [vmem:[%s5801_s29 + $0x4ac] ss:$16 sps:$4 sm:$0xff]   ;;  %v6443_v7 = vld [vmem:[#allocation3] ss:$0 sm:$0xff] }
 0x16f   : > { %v2250_v3 = vpop.f32.mrf.mxu1  ;;  %v3543_v20 = vsel %vm3542_vm12, %v3540_v46, %v3537_v15  ;;  %5369 = vpow2.f32 %v3281_v23  ;;  %v3556_v4 = vmul.f32 -0.5, %v6364_v57  ;;  %v3550_v31 = vand.u32 2147483647, %v6342_v22 }
 0x170   : > { %v1828_v18 = vpop.f32.mrf.mxu0  ;;  %2019 = vmatmul.mubr.bf16.gmra.mxu0 %v5227_v49  ;;  %2444 = vmatmul.mubr.bf16.gmra.mxu1 %v5230_v21  ;;  %v4444_v33 = vsel %vm4426_vm2, %v4336_v40, 0.0  ;;  %v4337_v29 = vadd.f32 %v3543_v20, %v6323_v60  ;;  %v3283_v49 = vmul.f32 1.442695, %v3168_v35  ;;  %v2870_v30 = vmul.f32 %v2674_v58, %v6301_v12  ;;  %v2678_v20 = vld [vmem:[%s5806_s8 + $0x88] sm:$0xff] }
 0x171   : > { %v2253_v24 = vpop.f32.mrf.mxu1  ;;  %2026 = vmatprep.mubr.bf16.mxu0 %v5235_v16  ;;  %2451 = vmatprep.mubr.bf16.mxu1 %v5238_v56  ;;  %v4445_v34 = vadd.f32 %v4444_v33, %v4443_v63  ;;  %v3071_v63 = vand.u32 2147483647, %v6394_v44  ;;  %v6417_v54 = vpop.eup %5359  ;;  %v2773_v21 = vmax.f32 %v6320_v26, 0.0  ;;  %v2871_v55 = vmul.f32 %v2675_v9, %v6320_v26  ;;  %v5242_v35 = vld [vmem:[%s5801_s29 + $0x4a8] ss:$16 sps:$4 sm:$0xff]  }
 0x172   : > { %v1830_v10 = vpop.f32.mrf.mxu0  ;;  %v4446_v17 = vsel %vm4426_vm2, %v4337_v29, 0.0  ;;  %v6408_v11 = vadd.f32 %v2253_v24, %v1828_v18  ;;  %v2774_v59 = vmax.f32 %v6326_v38, 0.0  ;;  %5371 = vpow2.f32 %v3283_v49 }
 0x173   : > { %v2255_v41 = vpop.f32.mrf.mxu1  ;;  %v4447_v14 = vadd.f32 %v4446_v17, %v4445_v34  ;;  %v3562_v16 = vadd.f32 1.0, %v6417_v54  ;;  %v2872_v1 = vmul.f32 %v2676_v50, %v6326_v38  ;;  %v2775_v48 = vmax.f32 %v6354_v36, 0.0  ;;  %v5239_v10 = vld [vmem:[%s5801_s29 + $0x4a0] ss:$16 sps:$4 sm:$0xff]   ;;  %v5250_v17 = vld [vmem:[%s5801_s29 + $0x4cc] ss:$16 sps:$4 sm:$0xff]  }
 0x174   : > { %v6402_v60 = vpop.f32.mrf.mxu0  ;;  %v2873_v6 = vmul.f32 %v2677_v42, %v6354_v36  ;;  %v3549_v26 = vmul.f32 %v6342_v22, %v3548_v37  ;;  %v3557_v62 = vadd.f32 1.0, %v3556_v4  ;;  %v3169_v3 = vsub.f32 0.0, %v3071_v63  ;;  %v5247_v41 = vld [vmem:[%s5801_s29 + $0x4c4] ss:$16 sps:$4 sm:$0xff]  }
 0x175   : > { %v6410_v32 = vpop.f32.mrf.mxu1  ;;  %v5362_v0 = vpop.eup %5361  ;;  %vm3551_vm13 = vcmp.lt.f32.partialorder %v3550_v31, 0.0004427343  ;;  %v6435_v38 = vsub.f32 %v2772_v43, %v2870_v30  ;;  %5373 = vlog2.f32 %v3562_v16  ;;  %v3559_v18 = vand.u32 2147483647, %v6364_v57 }
 0x176   : > { %v1833_v53 = vpop.f32.mrf.mxu0  ;;  %v6428_v28 = vpop.eup %5363  ;;  %v3546_v13 = vmul.f32 0.6931472, %v5362_v0  ;;  %v6441_v23 = vsub.f32 %v2773_v21, %v2871_v55  ;;  %v6446_v12 = vadd.f32 %v6443_v7, %v2241_v51  ;;  %v3285_v37 = vmul.f32 1.442695, %v3169_v3 }
 0x177   : > { %v2258_v61 = vpop.f32.mrf.mxu1  ;;  %v3571_v36 = vadd.f32 1.0, %v6428_v28  ;;  %v6438_v46 = vpop.eup %5365  ;;  %v3558_v29 = vmul.f32 %v6364_v57, %v3557_v62  ;;  %v6455_v58 = vsub.f32 %v2774_v59, %v2872_v1  ;;  %v6457_v9 = vsub.f32 %v2775_v48, %v2873_v6  ;;  %v5245_v1 = vld [vmem:[%s5801_s29 + $0x4c0] ss:$16 sps:$4 sm:$0xff]   ;;  %v5248_v62 = vld [vmem:[%s5801_s29 + $0x4c8] ss:$16 sps:$4 sm:$0xff]  }
 0x178   : > { %v6426_v56 = vpop.f32.mrf.mxu0  ;;  %2027 = vmatmul.mubr.bf16.gmra.mxu0 %v5233_v52  ;;  %2452 = vmatmul.mubr.bf16.gmra.mxu1 %v5236_v47  ;;  %v3552_v22 = vsel %vm3551_vm13, %v3549_v26, %v3546_v13  ;;  %v3580_v33 = vadd.f32 1.0, %v6438_v46  ;;  %v6460_v50 = vadd.f32 %v6443_v7, %v2246_v27  ;;  %v3565_v52 = vmul.f32 -0.5, %v6417_v54 }
 0x179   : > { %v6431_v40 = vpop.f32.mrf.mxu1  ;;  %2034 = vmatprep.mubr.bf16.mxu0 %v5241_v2  ;;  %2459 = vmatprep.mubr.bf16.mxu1 %v5244_v25  ;;  %v4338_v24 = vadd.f32 %v3552_v22, %v6377_v8  ;;  %5375 = vlog2.f32 %v3571_v36  ;;  %vm3560_vm14 = vcmp.lt.f32.partialorder %v3559_v18, 0.0004427343  ;;  %v2776_v4 = vmax.f32 %v6369_v39, 0.0 }
 0x17a   : > { %v1838_v15 = vpop.f32.mrf.mxu0  ;;  %5377 = vlog2.f32 %v3580_v33  ;;  %v2874_v49 = vmul.f32 %v2678_v20, %v6369_v39  ;;  %v3574_v30 = vmul.f32 -0.5, %v6428_v28  ;;  %v3072_v63 = vand.u32 2147483647, %v6446_v12 }
 0x17b   : > { %v2263_v43 = vpop.f32.mrf.mxu1  ;;  %v5368_v34 = vpop.eup %5367  ;;  %v4448_v42 = vsel %vm4426_vm2, %v4338_v24, 0.0  ;;  %5379 = vpow2.f32 %v3285_v37  ;;  %v3568_v25 = vand.u32 2147483647, %v6417_v54  ;;  %v3583_v21 = vmul.f32 -0.5, %v6438_v46 }
 0x17c   : > { %v6451_v5 = vpop.f32.mrf.mxu0  ;;  %v3555_v51 = vmul.f32 0.6931472, %v5368_v34  ;;  %v4449_v57 = vadd.f32 %v4448_v42, %v4447_v14  ;;  %v6471_v2 = vpop.eup %5369  ;;  %v3566_v59 = vadd.f32 1.0, %v3565_v52  ;;  %v3170_v61 = vsub.f32 0.0, %v3072_v63  ;;  %v5253_v43 = vld [vmem:[%s5801_s29 + $0x4e4] ss:$16 sps:$4 sm:$0xff]  }
 0x17d   : > { %v6462_v8 = vpop.f32.mrf.mxu1  ;;  %v3589_v39 = vadd.f32 1.0, %v6471_v2  ;;  %v3073_v0 = vand.u32 2147483647, %v6460_v50  ;;  %v6486_v16 = vadd.f32 %v6443_v7, %v6400_v45  ;;  %v3577_v6 = vand.u32 2147483647, %v6428_v28 }
 0x17e   : > { %v1841_v47 = vpop.f32.mrf.mxu0  ;;  %v3561_v31 = vsel %vm3560_vm14, %v3558_v29, %v3555_v51  ;;  %v6491_v13 = vsub.f32 %v2776_v4, %v2874_v49  ;;  %v3575_v45 = vadd.f32 1.0, %v3574_v30  ;;  %v2777_v15 = vmax.f32 %v6394_v44, 0.0  ;;  %v5256_v42 = vld [vmem:[%s5801_s29 + $0x4ec] ss:$16 sps:$4 sm:$0xff]  }
 0x17f   : > { %v2266_v27 = vpop.f32.mrf.mxu1  ;;  %v4339_v14 = vadd.f32 %v3561_v31, %v6382_v19  ;;  %5381 = vlog2.f32 %v3589_v39  ;;  %v6494_v3 = vpop.eup %5371  ;;  %v3287_v22 = vmul.f32 1.442695, %v3170_v61  ;;  %vm6502_vm15 = vcmp.lt.f32.partialorder %v3568_v25, 0.0004427343  ;;  %v5262_v52 = vld [vmem:[%s5801_s29 + $0x50c] ss:$16 sps:$4 sm:$0xff]  }
 0x180   : > { %v6475_v53 = vpop.f32.mrf.mxu0  ;;  %2035 = vmatmul.mubr.bf16.gmra.mxu0 %v5239_v10  ;;  %2460 = vmatmul.mubr.bf16.gmra.mxu1 %v5242_v35  ;;  %v3584_v33 = vadd.f32 1.0, %v3583_v21  ;;  %v3586_v20 = vand.u32 2147483647, %v6438_v46  ;;  %v3598_v37 = vadd.f32 1.0, %v6494_v3  ;;  %v3567_v34 = vmul.f32 %v6417_v54, %v3566_v59 }
 0x181   : > { %v6481_v55 = vpop.f32.mrf.mxu1  ;;  %2042 = vmatprep.mubr.bf16.mxu0 %v5247_v41  ;;  %2467 = vmatprep.mubr.bf16.mxu1 %v5250_v17  ;;  %v4450_v48 = vsel %vm4426_vm2, %v4339_v14, 0.0  ;;  %5383 = vpow2.f32 %v3287_v22  ;;  %v3171_v29 = vsub.f32 0.0, %v3073_v0  ;;  %v3074_v35 = vand.u32 2147483647, %v6486_v16 }
 0x182   : > { %v1846_v19 = vpop.f32.mrf.mxu0  ;;  %v6496_v36 = vadd.f32 %v4450_v48, %v4449_v57  ;;  %v5374_v51 = vpop.eup %5373  ;;  %vm6513_vm0 = vcmp.lt.f32.partialorder %v3577_v6, 0.0004427343  ;;  %v3592_v47 = vmul.f32 -0.5, %v6471_v2  ;;  %5385 = vlog2.f32 %v3598_v37  ;;  %v2680_v48 = vld [vmem:[%s5806_s8 + $0x98] sm:$0xff] }
 0x183   : > { %v2271_v26 = vpop.f32.mrf.mxu1  ;;  %v6520_v17 = vadd.f32 %v6443_v7, %v6408_v11  ;;  %v3564_v54 = vmul.f32 0.6931472, %v5374_v51  ;;  %v3576_v4 = vmul.f32 %v6428_v28, %v3575_v45  ;;  %v3289_v49 = vmul.f32 1.442695, %v3171_v29 }
 0x184   : > { %v6499_v18 = vpop.f32.mrf.mxu0  ;;  %v3172_v27 = vsub.f32 0.0, %v3074_v35  ;;  %v3585_v63 = vmul.f32 %v6438_v46, %v3584_v33  ;;  %vm6526_vm1 = vcmp.lt.f32.partialorder %v3586_v20, 0.0004427343  ;;  %v3595_v11 = vand.u32 2147483647, %v6471_v2 }
 0x185   : > { %v6508_v10 = vpop.f32.mrf.mxu1  ;;  %v3075_v25 = vand.u32 2147483647, %v6520_v17  ;;  %v3570_v28 = vsel %vm6502_vm15, %v3567_v34, %v3564_v54  ;;  %5387 = vpow2.f32 %v3289_v49  ;;  %v3593_v19 = vadd.f32 1.0, %v3592_v47  ;;  %v5254_v33 = vld [vmem:[%s5801_s29 + $0x4e8] ss:$16 sps:$4 sm:$0xff]  }
 0x186   : > { %v1849_v41 = vpop.f32.mrf.mxu0  ;;  %v5376_v30 = vpop.eup %5375  ;;  %v3291_v46 = vmul.f32 1.442695, %v3172_v27  ;;  %v4340_v0 = vadd.f32 %v3570_v28, %v6435_v38  ;;  %v2257_v26 = vadd.f32 %v6410_v32, %v6402_v60  ;;  %v5251_v38 = vld [vmem:[%s5801_s29 + $0x4e0] ss:$16 sps:$4 sm:$0xff]   ;;  %v3601_v32 = vmul.f32 -0.5, %v6494_v3 }
 0x187   : > { %v2274_v57 = vpop.f32.mrf.mxu1  ;;  %v3573_v39 = vmul.f32 0.6931472, %v5376_v30  ;;  %v5378_v61 = vpop.eup %5377  ;;  %v3173_v6 = vsub.f32 0.0, %v3075_v25  ;;  %v5259_v35 = vld [vmem:[%s5801_s29 + $0x504] ss:$16 sps:$4 sm:$0xff]   ;;  %v2778_v49 = vmax.f32 %v6446_v12, 0.0  ;;  %v6572_v27 = vmul.f32 %v2680_v48, %v6446_v12 }
 0x188   : > { %v6523_v31 = vpop.f32.mrf.mxu0  ;;  %2043 = vmatmul.mubr.bf16.gmra.mxu0 %v5245_v1  ;;  %2468 = vmatmul.mubr.bf16.gmra.mxu1 %v5248_v62  ;;  %v2679_v1 = vld [vmem:[%s5806_s8 + $0x90] sm:$0xff]  ;;  %v3582_v22 = vmul.f32 0.6931472, %v5378_v61  ;;  %5389 = vpow2.f32 %v3291_v46  ;;  %v6549_v20 = vpop.eup %5379  ;;  %v4452_v37 = vsel %vm4426_vm2, %v4340_v0, 0.0  ;;  %v3602_v25 = vadd.f32 1.0, %v3601_v32  ;;  %v2681_v28 = vld [vmem:[%s5806_s8 + $0xa0] sm:$0xff] }
 0x189   : > { %v6532_v21 = vpop.f32.mrf.mxu1  ;;  %2050 = vmatprep.mubr.bf16.mxu0 %v5253_v43  ;;  %2475 = vmatprep.mubr.bf16.mxu1 %v5256_v42  ;;  %v3579_v45 = vsel %vm6513_vm0, %v3576_v4, %v3573_v39  ;;  %v2262_v43 = vadd.f32 %v6431_v40, %v6426_v56  ;;  %v3293_v34 = vmul.f32 1.442695, %v3173_v6  ;;  %v4453_v41 = vadd.f32 %v4452_v37, %v6496_v36 }
 0x18a   : > { %v1854_v59 = vpop.f32.mrf.mxu0  ;;  %v4341_v60 = vadd.f32 %v3579_v45, %v6441_v23  ;;  %v3588_v56 = vsel %vm6526_vm1, %v3585_v63, %v3582_v22  ;;  %v3607_v40 = vadd.f32 1.0, %v6549_v20  ;;  %v6562_v42 = vadd.f32 %v6443_v7, %v2257_v26 }
 0x18b   : > { %v2279_v62 = vpop.f32.mrf.mxu1  ;;  %v4342_v47 = vadd.f32 %v3588_v56, %v6455_v58  ;;  %v6568_v57 = vmul.f32 %v2679_v1, %v6394_v44  ;;  %5391 = vpow2.f32 %v3293_v34  ;;  %v3594_v58 = vmul.f32 %v6471_v2, %v3593_v19  ;;  %v2682_v19 = vld [vmem:[%s5806_s8 + $0xa8] sm:$0xff]  ;;  %v5263_v44 = vld [vmem:[%s5801_s29 + $0x520] ss:$16 sps:$4 sm:$0xff]  }
 0x18c   : > { %v6545_v24 = vpop.f32.mrf.mxu0  ;;  %v4454_v23 = vsel %vm4426_vm2, %v4341_v60, 0.0  ;;  %v5382_v54 = vpop.eup %5381  ;;  %5393 = vlog2.f32 %v3607_v40  ;;  %vm3596_vm3 = vcmp.lt.f32.partialorder %v3595_v11, 0.0004427343  ;;  %v3604_v59 = vand.u32 2147483647, %v6494_v3 }
 0x18d   : > { %v6554_v29 = vpop.f32.mrf.mxu1  ;;  %v4455_v4 = vadd.f32 %v4454_v23, %v4453_v41  ;;  %v4456_v63 = vsel %vm4426_vm2, %v4342_v47, 0.0  ;;  %v3591_v14 = vmul.f32 0.6931472, %v5382_v54  ;;  %v3076_v61 = vand.u32 2147483647, %v6562_v42 }
 0x18e   : > { %v1857_v51 = vpop.f32.mrf.mxu0  ;;  %v6583_v1 = vpop.eup %5383  ;;  %v2779_v2 = vmax.f32 %v6460_v50, 0.0  ;;  %v2265_v6 = vadd.f32 %v6462_v8, %v6451_v5  ;;  %v6591_v11 = vadd.f32 %v6481_v55, %v6475_v53  ;;  %v5257_v60 = vld [vmem:[%s5801_s29 + $0x500] ss:$16 sps:$4 sm:$0xff]   ;;  %v5260_v5 = vld [vmem:[%s5801_s29 + $0x508] ss:$16 sps:$4 sm:$0xff]   ;;  %v3603_v53 = vmul.f32 %v6494_v3, %v3602_v25 }
 0x18f   : > { %v2282_v36 = vpop.f32.mrf.mxu1  ;;  %v4457_v46 = vadd.f32 %v4456_v63, %v4455_v4  ;;  %v3597_v48 = vsel %vm3596_vm3, %v3594_v58, %v3591_v14  ;;  %v5386_v62 = vpop.eup %5385  ;;  %v3616_v22 = vadd.f32 1.0, %v6583_v1  ;;  %v2683_v55 = vld [vmem:[%s5806_s8 + $0xb0] sm:$0xff]  ;;  %v3174_v32 = vsub.f32 0.0, %v3076_v61  ;;  %v5268_v51 = vld [vmem:[%s5801_s29 + $0x52c] ss:$16 sps:$4 sm:$0xff]  }
 0x190   : > { %v6574_v30 = vpop.f32.mrf.mxu0  ;;  %2051 = vmatmul.mubr.bf16.gmra.mxu0 %v5251_v38  ;;  %2476 = vmatmul.mubr.bf16.gmra.mxu1 %v5254_v33  ;;  %v4343_v45 = vadd.f32 %v3597_v48, %v6457_v9  ;;  %v2877_v38 = vmul.f32 %v2681_v28, %v6460_v50  ;;  %v2780_v33 = vmax.f32 %v6486_v16, 0.0  ;;  %v3600_v8 = vmul.f32 0.6931472, %v5386_v62 }
 0x191   : > { %v6579_v39 = vpop.f32.mrf.mxu1  ;;  %2058 = vmatprep.mubr.bf16.mxu0 %v5259_v35  ;;  %2483 = vmatprep.mubr.bf16.mxu1 %v5262_v52  ;;  %v6604_v34 = vadd.f32 %v6443_v7, %v2262_v43  ;;  %v5265_v35 = vld [vmem:[%s5801_s29 + $0x524] ss:$16 sps:$4 sm:$0xff]   ;;  %vm3605_vm4 = vcmp.lt.f32.partialorder %v3604_v59, 0.0004427343  ;;  %v3610_v56 = vmul.f32 -0.5, %v6549_v20  ;;  %5395 = vlog2.f32 %v3616_v22 }
 0x192   : > { %v1862_v0 = vpop.f32.mrf.mxu0  ;;  %v4458_v41 = vsel %vm4426_vm2, %v4343_v45, 0.0  ;;  %v6612_v52 = vpop.eup %5387  ;;  %v3606_v3 = vsel %vm3605_vm4, %v3603_v53, %v3600_v8  ;;  %v2878_v47 = vmul.f32 %v2682_v19, %v6486_v16  ;;  %v3295_v36 = vmul.f32 1.442695, %v3174_v32  ;;  %v5274_v32 = vld [vmem:[%s5801_s29 + $0x54c] ss:$16 sps:$4 sm:$0xff]  }
 0x193   : > { %v2287_v26 = vpop.f32.mrf.mxu1  ;;  %v4459_v23 = vadd.f32 %v4458_v41, %v4457_v46  ;;  %v4344_v54 = vadd.f32 %v3606_v3, %v6491_v13  ;;  %v3619_v4 = vmul.f32 -0.5, %v6583_v1  ;;  %v3625_v63 = vadd.f32 1.0, %v6612_v52 }
 0x194   : > { %v6597_v37 = vpop.f32.mrf.mxu0  ;;  %v2781_v14 = vmax.f32 %v6520_v17, 0.0  ;;  %v3613_v28 = vand.u32 2147483647, %v6549_v20  ;;  %v2879_v46 = vmul.f32 %v2683_v55, %v6520_v17  ;;  %5397 = vpow2.f32 %v3295_v36 }
 0x195   : > { %v6606_v9 = vpop.f32.mrf.mxu1  ;;  %v6621_v25 = vpop.eup %5389  ;;  %v3077_v16 = vand.u32 2147483647, %v6604_v34  ;;  %v4460_v13 = vsel %vm4426_vm2, %v4344_v54, 0.0  ;;  %v3611_v61 = vadd.f32 1.0, %v3610_v56  ;;  %5399 = vlog2.f32 %v3625_v63 }
 0x196   : > { %v1865_v40 = vpop.f32.mrf.mxu0  ;;  %v3634_v0 = vadd.f32 1.0, %v6621_v25  ;;  %v4461_v19 = vadd.f32 %v4460_v13, %v4459_v23  ;;  %v2973_v17 = vsub.f32 %v2777_v15, %v6568_v57  ;;  %v6634_v26 = vadd.f32 %v6443_v7, %v2265_v6  ;;  %v5266_v15 = vld [vmem:[%s5801_s29 + $0x528] ss:$16 sps:$4 sm:$0xff]  }
 0x197   : > { %v2290_v43 = vpop.f32.mrf.mxu1  ;;  %v6641_v22 = vsub.f32 %v2778_v49, %v6572_v27  ;;  %v6649_v6 = vsub.f32 %v2779_v2, %v2877_v38  ;;  %v6651_v53 = vsub.f32 %v2780_v33, %v2878_v47  ;;  %v6653_v55 = vsub.f32 %v2781_v14, %v2879_v46  ;;  %v5271_v27 = vld [vmem:[%s5801_s29 + $0x544] ss:$16 sps:$4 sm:$0xff]   ;;  %v5269_v46 = vld [vmem:[%s5801_s29 + $0x540] ss:$16 sps:$4 sm:$0xff]  }
 0x198   : > { %v6619_v58 = vpop.f32.mrf.mxu0  ;;  %2059 = vmatmul.mubr.bf16.gmra.mxu0 %v5257_v60  ;;  %2484 = vmatmul.mubr.bf16.gmra.mxu1 %v5260_v5  ;;  %v6636_v45 = vpop.eup %5391  ;;  %v3620_v60 = vadd.f32 1.0, %v3619_v4  ;;  %5401 = vlog2.f32 %v3634_v0  ;;  %v3175_v5 = vsub.f32 0.0, %v3077_v16  ;;  %v3612_v41 = vmul.f32 %v6549_v20, %v3611_v61 }
 0x199   : > { %v6626_v59 = vpop.f32.mrf.mxu1  ;;  %2066 = vmatprep.mubr.bf16.mxu0 %v5265_v35  ;;  %2491 = vmatprep.mubr.bf16.mxu1 %v5268_v51  ;;  %v5394_v57 = vpop.eup %5393  ;;  %v3643_v12 = vadd.f32 1.0, %v6636_v45  ;;  %vm3614_vm5 = vcmp.lt.f32.partialorder %v3613_v28, 0.0004427343  ;;  %v3622_v50 = vand.u32 2147483647, %v6583_v1  ;;  %v3628_v2 = vmul.f32 -0.5, %v6612_v52 }
 0x19a   : > { %v1870_v48 = vpop.f32.mrf.mxu0  ;;  %v3609_v35 = vmul.f32 0.6931472, %v5394_v57  ;;  %v3297_v56 = vmul.f32 1.442695, %v3175_v5  ;;  %v3078_v38 = vand.u32 2147483647, %v6634_v26  ;;  %v3621_v23 = vmul.f32 %v6583_v1, %v3620_v60 }
 0x19b   : > { %v2295_v62 = vpop.f32.mrf.mxu1  ;;  %5403 = vlog2.f32 %v3643_v12  ;;  %v3631_v3 = vand.u32 2147483647, %v6612_v52  ;;  %v3637_v36 = vmul.f32 -0.5, %v6621_v25  ;;  %v6671_v54 = vadd.f32 %v6443_v7, %v6591_v11  ;;  %v5277_v48 = vld [vmem:[%s5801_s29 + $0x564] ss:$16 sps:$4 sm:$0xff]  }
 0x19c   : > { %v6643_v8 = vpop.f32.mrf.mxu0  ;;  %v3615_v51 = vsel %vm3614_vm5, %v3612_v41, %v3609_v35  ;;  %5405 = vpow2.f32 %v3297_v56  ;;  %v3176_v43 = vsub.f32 0.0, %v3078_v38  ;;  %v2273_v1 = vadd.f32 %v6508_v10, %v6499_v18  ;;  %v5280_v5 = vld [vmem:[%s5801_s29 + $0x56c] ss:$16 sps:$4 sm:$0xff]  }
 0x19d   : > { %v6656_v49 = vpop.f32.mrf.mxu1  ;;  %v4345_v20 = vadd.f32 %v3615_v51, %v2973_v17  ;;  %v2278_v63 = vadd.f32 %v6532_v21, %v6523_v31  ;;  %v6681_v14 = vadd.f32 %v6554_v29, %v6545_v24  ;;  %v6685_v28 = vadd.f32 %v6579_v39, %v6574_v30  ;;  %v5272_v21 = vld [vmem:[%s5801_s29 + $0x548] ss:$16 sps:$4 sm:$0xff]  }
 0x19e   : > { %v1873_v40 = vpop.f32.mrf.mxu0  ;;  %v5396_v16 = vpop.eup %5395  ;;  %v3629_v61 = vadd.f32 1.0, %v3628_v2  ;;  %v3646_v18 = vmul.f32 -0.5, %v6636_v45  ;;  %v3299_v10 = vmul.f32 1.442695, %v3176_v43  ;;  %v3079_v0 = vand.u32 2147483647, %v6671_v54 }
 0x19f   : > { %v2298_v33 = vpop.f32.mrf.mxu1  ;;  %v4462_v13 = vsel %vm4426_vm2, %v4345_v20, 0.0  ;;  %v3618_v29 = vmul.f32 0.6931472, %v5396_v16  ;;  %v6693_v30 = vadd.f32 %v6443_v7, %v2273_v1  ;;  %vm3623_vm6 = vcmp.lt.f32.partialorder %v3622_v50, 0.0004427343  ;;  %v2684_v40 = vld [vmem:[%s5806_s8 + $0xb8] sm:$0xff] }
 0x1a0   : > { %v6666_v47 = vpop.f32.mrf.mxu0  ;;  %2067 = vmatmul.mubr.bf16.gmra.mxu0 %v5263_v44  ;;  %2492 = vmatmul.mubr.bf16.gmra.mxu1 %v5266_v15  ;;  %v4463_v24 = vadd.f32 %v4462_v13, %v4461_v19  ;;  %v3638_v17 = vadd.f32 1.0, %v3637_v36  ;;  %v2782_v62 = vmax.f32 %v6562_v42, 0.0  ;;  %5407 = vpow2.f32 %v3299_v10 }
 0x1a1   : > { %v6673_v4 = vpop.f32.mrf.mxu1  ;;  %2074 = vmatprep.mubr.bf16.mxu0 %v5271_v27  ;;  %2499 = vmatprep.mubr.bf16.mxu1 %v5274_v32  ;;  %v6702_v44 = vpop.eup %5397  ;;  %v3624_v19 = vsel %vm3623_vm6, %v3621_v23, %v3618_v29  ;;  %vm6704_vm7 = vcmp.lt.f32.partialorder %v3631_v3, 0.0004427343  ;;  %v3640_v57 = vand.u32 2147483647, %v6621_v25  ;;  %v3177_v12 = vsub.f32 0.0, %v3079_v0 }
 0x1a2   : > { %v1878_v11 = vpop.f32.mrf.mxu0  ;;  %v5400_v32 = vpop.eup %5399  ;;  %v4346_v35 = vadd.f32 %v3624_v19, %v6641_v22  ;;  %v3630_v41 = vmul.f32 %v6612_v52, %v3629_v61  ;;  %v3647_v56 = vadd.f32 1.0, %v3646_v18  ;;  %v3652_v50 = vadd.f32 1.0, %v6702_v44  ;;  %v2685_v61 = vld [vmem:[%s5806_s8 + $0xc0] sm:$0xff] }
 0x1a3   : > { %v2303_v31 = vpop.f32.mrf.mxu1  ;;  %v3627_v38 = vmul.f32 0.6931472, %v5400_v32  ;;  %v3301_v33 = vmul.f32 1.442695, %v3177_v12  ;;  %v3080_v51 = vand.u32 2147483647, %v6693_v30  ;;  %v6715_v23 = vadd.f32 %v6443_v7, %v2278_v63 }
 0x1a4   : > { %v6695_v39 = vpop.f32.mrf.mxu0  ;;  %v4464_v22 = vsel %vm4426_vm2, %v4346_v35, 0.0  ;;  %v3639_v52 = vmul.f32 %v6621_v25, %v3638_v17  ;;  %v3649_v36 = vand.u32 2147483647, %v6636_v45  ;;  %5409 = vlog2.f32 %v3652_v50  ;;  %v5275_v31 = vld [vmem:[%s5801_s29 + $0x560] ss:$16 sps:$4 sm:$0xff]  }
 0x1a5   : > { %v6699_v60 = vpop.f32.mrf.mxu1  ;;  %v5402_v20 = vpop.eup %5401  ;;  %v4465_v1 = vadd.f32 %v4464_v22, %v4463_v24  ;;  %v3633_v63 = vsel %vm6704_vm7, %v3630_v41, %v3627_v38  ;;  %5411 = vpow2.f32 %v3301_v33  ;;  %vm6727_vm8 = vcmp.lt.f32.partialorder %v3640_v57, 0.0004427343  ;;  %v5278_v17 = vld [vmem:[%s5801_s29 + $0x568] ss:$16 sps:$4 sm:$0xff]  }
 0x1a6   : > { %v1881_v27 = vpop.f32.mrf.mxu0  ;;  %v3636_v11 = vmul.f32 0.6931472, %v5402_v20  ;;  %v4347_v25 = vadd.f32 %v3633_v63, %v6649_v6  ;;  %v2880_v13 = vmul.f32 %v2684_v40, %v6562_v42  ;;  %v3178_v18 = vsub.f32 0.0, %v3080_v51  ;;  %v5286_v40 = vld [vmem:[%s5801_s29 + $0x58c] ss:$16 sps:$4 sm:$0xff]  }
 0x1a7   : > { %v2306_v2 = vpop.f32.mrf.mxu1  ;;  %v3648_v29 = vmul.f32 %v6636_v45, %v3647_v56  ;;  %v3081_v0 = vand.u32 2147483647, %v6715_v23  ;;  %v6740_v6 = vadd.f32 %v6443_v7, %v6681_v14  ;;  %v2686_v27 = vld [vmem:[%s5806_s8 + $0xc8] sm:$0xff]  ;;  %vm3650_vm9 = vcmp.lt.f32.partialorder %v3649_v36, 0.0004427343 }
 0x1a8   : > { %v6717_v3 = vpop.f32.mrf.mxu0  ;;  %2075 = vmatmul.mubr.bf16.gmra.mxu0 %v5269_v46  ;;  %2500 = vmatmul.mubr.bf16.gmra.mxu1 %v5272_v21  ;;  %v5404_v21 = vpop.eup %5403  ;;  %v3642_v24 = vsel %vm6727_vm8, %v3639_v52, %v3636_v11  ;;  %v4466_v15 = vsel %vm4426_vm2, %v4347_v25, 0.0  ;;  %v3303_v45 = vmul.f32 1.442695, %v3178_v18  ;;  %v2783_v14 = vmax.f32 %v6604_v34, 0.0 }
 0x1a9   : > { %v6722_v43 = vpop.f32.mrf.mxu1  ;;  %2082 = vmatprep.mubr.bf16.mxu0 %v5277_v48  ;;  %2507 = vmatprep.mubr.bf16.mxu1 %v5280_v5  ;;  %v5283_v5 = vld [vmem:[%s5801_s29 + $0x584] ss:$16 sps:$4 sm:$0xff]   ;;  %v6746_v19 = vpop.eup %5405  ;;  %v4348_v57 = vadd.f32 %v3642_v24, %v6651_v53  ;;  %v3645_v12 = vmul.f32 0.6931472, %v5404_v21  ;;  %v4467_v35 = vadd.f32 %v4466_v15, %v4465_v1  ;;  %v3655_v38 = vmul.f32 -0.5, %v6702_v44 }
 0x1aa   : > { %v1886_v46 = vpop.f32.mrf.mxu0  ;;  %v3661_v41 = vadd.f32 1.0, %v6746_v19  ;;  %5413 = vpow2.f32 %v3303_v45  ;;  %v2881_v20 = vmul.f32 %v2685_v61, %v6604_v34  ;;  %v2784_v52 = vmax.f32 %v6634_v26, 0.0  ;;  %v5284_v21 = vld [vmem:[%s5801_s29 + $0x588] ss:$16 sps:$4 sm:$0xff]   ;;  %v2687_v15 = vld [vmem:[%s5806_s8 + $0xd0] sm:$0xff] }
 0x1ab   : > { %v2311_v10 = vpop.f32.mrf.mxu1  ;;  %v4468_v50 = vsel %vm4426_vm2, %v4348_v57, 0.0  ;;  %v3651_v2 = vsel %vm3650_vm9, %v3648_v29, %v3645_v12  ;;  %v2882_v36 = vmul.f32 %v2686_v27, %v6634_v26  ;;  %v3179_v1 = vsub.f32 0.0, %v3081_v0  ;;  %v5289_v12 = vld [vmem:[%s5801_s29 + $0x5a4] ss:$16 sps:$4 sm:$0xff]   ;;  %v5292_v27 = vld [vmem:[%s5801_s29 + $0x5ac] ss:$16 sps:$4 sm:$0xff]  }
 0x1ac   : > { %v6742_v48 = vpop.f32.mrf.mxu0  ;;  %v4469_v33 = vadd.f32 %v4468_v50, %v4467_v35  ;;  %v4349_v51 = vadd.f32 %v3651_v2, %v6653_v55  ;;  %5415 = vlog2.f32 %v3661_v41  ;;  %v3082_v63 = vand.u32 2147483647, %v6740_v6 }
 0x1ad   : > { %v6751_v32 = vpop.f32.mrf.mxu1  ;;  %v6767_v55 = vpop.eup %5407  ;;  %v6772_v46 = vadd.f32 %v6443_v7, %v6685_v28  ;;  %v2289_v26 = vadd.f32 %v6606_v9, %v6597_v37  ;;  %v3656_v61 = vadd.f32 1.0, %v3655_v38  ;;  %v2978_v28 = vsub.f32 %v2782_v62, %v2880_v13 }
 0x1ae   : > { %v1889_v56 = vpop.f32.mrf.mxu0  ;;  %v4470_v34 = vsel %vm4426_vm2, %v4349_v51, 0.0  ;;  %v3670_v18 = vadd.f32 1.0, %v6767_v55  ;;  %v3658_v24 = vand.u32 2147483647, %v6702_v44  ;;  %v3305_v29 = vmul.f32 1.442695, %v3179_v1 }
 0x1af   : > { %v2314_v53 = vpop.f32.mrf.mxu1  ;;  %v6776_v16 = vadd.f32 %v4470_v34, %v4469_v33  ;;  %v3180_v37 = vsub.f32 0.0, %v3082_v63  ;;  %v6786_v0 = vsub.f32 %v2783_v14, %v2881_v20  ;;  %v2785_v62 = vmax.f32 %v6671_v54, 0.0  ;;  %v2688_v33 = vld [vmem:[%s5806_s8 + $0xd8] sm:$0xff]  ;;  %v2689_v63 = vld [vmem:[%s5806_s8 + $0xe0] sm:$0xff] }
 0x1b0   : > { %v6760_v22 = vpop.f32.mrf.mxu0  ;;  %2083 = vmatmul.mubr.bf16.gmra.mxu0 %v5275_v31  ;;  %2508 = vmatmul.mubr.bf16.gmra.mxu1 %v5278_v17  ;;  %v5281_v31 = vld [vmem:[%s5801_s29 + $0x580] ss:$16 sps:$4 sm:$0xff]   ;;  %v3664_v17 = vmul.f32 -0.5, %v6746_v19  ;;  %5417 = vlog2.f32 %v3670_v18  ;;  %v3083_v45 = vand.u32 2147483647, %v6772_v46  ;;  %v3657_v56 = vmul.f32 %v6702_v44, %v3656_v61 }
 0x1b1   : > { %v6765_v11 = vpop.f32.mrf.mxu1  ;;  %2090 = vmatprep.mubr.bf16.mxu0 %v5283_v5  ;;  %2515 = vmatprep.mubr.bf16.mxu1 %v5286_v40  ;;  %v6789_v5 = vsub.f32 %v2784_v52, %v2882_v36  ;;  %v5410_v42 = vpop.eup %5409  ;;  %5419 = vpow2.f32 %v3305_v29  ;;  %v3307_v13 = vmul.f32 1.442695, %v3180_v37  ;;  %v6802_v40 = vadd.f32 %v6443_v7, %v2289_v26 }
 0x1b2   : > { %v1894_v25 = vpop.f32.mrf.mxu0  ;;  %v6798_v14 = vpop.eup %5411  ;;  %v3654_v41 = vmul.f32 0.6931472, %v5410_v42  ;;  %v2294_v50 = vadd.f32 %v6626_v59, %v6619_v58  ;;  %vm3659_vm10 = vcmp.lt.f32.partialorder %v3658_v24, 0.0004427343  ;;  %v2883_v38 = vmul.f32 %v2687_v15, %v6671_v54  ;;  %v5293_v54 = vld [vmem:[%s5801_s29 + $0x5c0] ss:$16 sps:$4 sm:$0xff]  }
 0x1b3   : > { %v2319_v10 = vpop.f32.mrf.mxu1  ;;  %v3679_v53 = vadd.f32 1.0, %v6798_v14  ;;  %5421 = vpow2.f32 %v3307_v13  ;;  %v3665_v44 = vadd.f32 1.0, %v3664_v17  ;;  %v2786_v52 = vmax.f32 %v6693_v30, 0.0  ;;  %v5287_v17 = vld [vmem:[%s5801_s29 + $0x5a0] ss:$16 sps:$4 sm:$0xff]  }
 0x1b4   : > { %v6784_v9 = vpop.f32.mrf.mxu0  ;;  %v3660_v20 = vsel %vm3659_vm10, %v3657_v56, %v3654_v41  ;;  %v3181_v36 = vsub.f32 0.0, %v3083_v45  ;;  %v3673_v59 = vmul.f32 -0.5, %v6767_v55  ;;  %v2787_v34 = vmax.f32 %v6715_v23, 0.0  ;;  %v5298_v56 = vld [vmem:[%s5801_s29 + $0x5cc] ss:$16 sps:$4 sm:$0xff]  }
 0x1b5   : > { %v6792_v57 = vpop.f32.mrf.mxu1  ;;  %v4350_v58 = vadd.f32 %v3660_v20, %v2978_v28  ;;  %5423 = vlog2.f32 %v3679_v53  ;;  %v3667_v25 = vand.u32 2147483647, %v6746_v19  ;;  %v2884_v61 = vmul.f32 %v2688_v33, %v6693_v30 }
 0x1b6   : > { %v1897_v35 = vpop.f32.mrf.mxu0  ;;  %v3309_v18 = vmul.f32 1.442695, %v3181_v36  ;;  %v3084_v10 = vand.u32 2147483647, %v6802_v40  ;;  %v6824_v24 = vadd.f32 %v6443_v7, %v2294_v50  ;;  %v2297_v29 = vadd.f32 %v6656_v49, %v6643_v8  ;;  %v5290_v8 = vld [vmem:[%s5801_s29 + $0x5a8] ss:$16 sps:$4 sm:$0xff]  }
 0x1b7   : > { %v2322_v2 = vpop.f32.mrf.mxu1  ;;  %v4472_v28 = vsel %vm4426_vm2, %v4350_v58, 0.0  ;;  %v6830_v37 = vadd.f32 %v6673_v4, %v6666_v47  ;;  %v2885_v13 = vmul.f32 %v2689_v63, %v6715_v23  ;;  %v5295_v49 = vld [vmem:[%s5801_s29 + $0x5c4] ss:$16 sps:$4 sm:$0xff]   ;;  %v3674_v47 = vadd.f32 1.0, %v3673_v59 }
 0x1b8   : > { %v6809_v51 = vpop.f32.mrf.mxu0  ;;  %2091 = vmatmul.mubr.bf16.gmra.mxu0 %v5281_v31  ;;  %2516 = vmatmul.mubr.bf16.gmra.mxu1 %v5284_v21  ;;  %v6820_v21 = vpop.eup %5413  ;;  %5425 = vpow2.f32 %v3309_v18  ;;  %v3182_v4 = vsub.f32 0.0, %v3084_v10  ;;  %vm3668_vm11 = vcmp.lt.f32.partialorder %v3667_v25, 0.0004427343  ;;  %v3676_v50 = vand.u32 2147483647, %v6767_v55  ;;  %v2690_v10 = vld [vmem:[%s5806_s8 + $0xe8] sm:$0xff] }
 0x1b9   : > { %v6812_v1 = vpop.f32.mrf.mxu1  ;;  %2098 = vmatprep.mubr.bf16.mxu0 %v5289_v12  ;;  %2523 = vmatprep.mubr.bf16.mxu1 %v5292_v27  ;;  %v5416_v15 = vpop.eup %5415  ;;  %v4473_v12 = vadd.f32 %v4472_v28, %v6776_v16  ;;  %v3666_v27 = vmul.f32 %v6746_v19, %v3665_v44  ;;  %v3688_v42 = vadd.f32 1.0, %v6820_v21  ;;  %v3682_v16 = vmul.f32 -0.5, %v6798_v14 }
 0x1ba   : > { %v1902_v26 = vpop.f32.mrf.mxu0  ;;  %v3663_v35 = vmul.f32 0.6931472, %v5416_v15  ;;  %v3311_v23 = vmul.f32 1.442695, %v3182_v4  ;;  %v3085_v53 = vand.u32 2147483647, %v6824_v24  ;;  %v6848_v33 = vadd.f32 %v6443_v7, %v2297_v29 }
 0x1bb   : > { %v2327_v31 = vpop.f32.mrf.mxu1  ;;  %5427 = vlog2.f32 %v3688_v42  ;;  %v6855_v36 = vsub.f32 %v2785_v62, %v2883_v38  ;;  %v6857_v58 = vsub.f32 %v2786_v52, %v2884_v61  ;;  %v2788_v59 = vmax.f32 %v6740_v6, 0.0  ;;  %v5301_v42 = vld [vmem:[%s5801_s29 + $0x5e4] ss:$16 sps:$4 sm:$0xff]  }
 0x1bc   : > { %v6832_v30 = vpop.f32.mrf.mxu0  ;;  %v3669_v2 = vsel %vm3668_vm11, %v3666_v27, %v3663_v35  ;;  %v3675_v25 = vmul.f32 %v6767_v55, %v3674_v47  ;;  %v6863_v18 = vsub.f32 %v2787_v34, %v2885_v13  ;;  %5429 = vpow2.f32 %v3311_v23  ;;  %v5296_v55 = vld [vmem:[%s5801_s29 + $0x5c8] ss:$16 sps:$4 sm:$0xff]  }
 0x1bd   : > { %v6839_v45 = vpop.f32.mrf.mxu1  ;;  %v4351_v44 = vadd.f32 %v3669_v2, %v6786_v0  ;;  %v5418_v26 = vpop.eup %5417  ;;  %v3183_v0 = vsub.f32 0.0, %v3085_v53  ;;  %v3683_v61 = vadd.f32 1.0, %v3682_v16  ;;  %v3086_v28 = vand.u32 2147483647, %v6848_v33 }
 0x1be   : > { %v1905_v41 = vpop.f32.mrf.mxu0  ;;  %v6867_v62 = vpop.eup %5419  ;;  %v3672_v52 = vmul.f32 0.6931472, %v5418_v26  ;;  %vm3677_vm12 = vcmp.lt.f32.partialorder %v3676_v50, 0.0004427343  ;;  %v6887_v50 = vadd.f32 %v6443_v7, %v6830_v37 }
 0x1bf   : > { %v2330_v19 = vpop.f32.mrf.mxu1  ;;  %v4474_v38 = vsel %vm4426_vm2, %v4351_v44, 0.0  ;;  %v3697_v15 = vadd.f32 1.0, %v6867_v62  ;;  %v3313_v35 = vmul.f32 1.442695, %v3183_v0  ;;  %v3184_v47 = vsub.f32 0.0, %v3086_v28 }
 0x1c0   : > { %v6850_v20 = vpop.f32.mrf.mxu0  ;;  %2099 = vmatmul.mubr.bf16.gmra.mxu0 %v5287_v17  ;;  %2524 = vmatmul.mubr.bf16.gmra.mxu1 %v5290_v8  ;;  %v4475_v34 = vadd.f32 %v4474_v38, %v4473_v12  ;;  %v3691_v17 = vmul.f32 -0.5, %v6820_v21  ;;  %v6877_v13 = vpop.eup %5421  ;;  %v3678_v8 = vsel %vm3677_vm12, %v3675_v25, %v3672_v52  ;;  %v2886_v41 = vmul.f32 %v2690_v10, %v6740_v6  ;;  %v5304_v19 = vld [vmem:[%s5801_s29 + $0x5ec] ss:$16 sps:$4 sm:$0xff]  }
 0x1c1   : > { %v6860_v63 = vpop.f32.mrf.mxu1  ;;  %2106 = vmatprep.mubr.bf16.mxu0 %v5295_v49  ;;  %2531 = vmatprep.mubr.bf16.mxu1 %v5298_v56  ;;  %v3685_v49 = vand.u32 2147483647, %v6798_v14  ;;  %v4352_v12 = vadd.f32 %v3678_v8, %v6789_v5  ;;  %5431 = vlog2.f32 %v3697_v15  ;;  %v2691_v56 = vld [vmem:[%s5806_s8 + $0xf0] sm:$0xff]  ;;  %v3684_v23 = vmul.f32 %v6798_v14, %v3683_v61  ;;  %v2692_v14 = vld [vmem:[%s5806_s8 + $0xf8] sm:$0xff] }
 0x1c2   : > { %v1910_v31 = vpop.f32.mrf.mxu0  ;;  %v5424_v2 = vpop.eup %5423  ;;  %v3706_v53 = vadd.f32 1.0, %v6877_v13  ;;  %v2789_v44 = vmax.f32 %v6772_v46, 0.0  ;;  %5433 = vpow2.f32 %v3313_v35  ;;  %v3692_v10 = vadd.f32 1.0, %v3691_v17 }
 0x1c3   : > { %v2335_v29 = vpop.f32.mrf.mxu1  ;;  %v4476_v26 = vsel %vm4426_vm2, %v4352_v12, 0.0  ;;  %v3681_v25 = vmul.f32 0.6931472, %v5424_v2  ;;  %v3315_v0 = vmul.f32 1.442695, %v3184_v47  ;;  %v2887_v37 = vmul.f32 %v2691_v56, %v6772_v46 }
 0x1c4   : > { %v6874_v27 = vpop.f32.mrf.mxu0  ;;  %v4477_v7 = vadd.f32 %v4476_v26, %v4475_v34  ;;  %vm3686_vm13 = vcmp.lt.f32.partialorder %v3685_v49, 0.0004427343  ;;  %5435 = vlog2.f32 %v3706_v53  ;;  %v3694_v61 = vand.u32 2147483647, %v6820_v21  ;;  %v5299_v12 = vld [vmem:[%s5801_s29 + $0x5e0] ss:$16 sps:$4 sm:$0xff]  }
 0x1c5   : > { %v6880_v4 = vpop.f32.mrf.mxu1  ;;  %v3687_v52 = vsel %vm3686_vm13, %v3684_v23, %v3681_v25  ;;  %5437 = vpow2.f32 %v3315_v0  ;;  %v3087_v28 = vand.u32 2147483647, %v6887_v50  ;;  %v2790_v46 = vmax.f32 %v6802_v40, 0.0  ;;  %v6919_v56 = vld [vmem:[#allocation3] ss:$0 sm:$0xff] }
 0x1c6   : > { %v1913_v16 = vpop.f32.mrf.mxu0  ;;  %v4353_v34 = vadd.f32 %v3687_v52, %v6855_v36  ;;  %v2310_v17 = vadd.f32 %v6722_v43, %v6717_v3  ;;  %v3693_v8 = vmul.f32 %v6820_v21, %v3692_v10  ;;  %v3700_v49 = vmul.f32 -0.5, %v6867_v62  ;;  %v2693_v23 = vld [vmem:[%s5806_s8 + $0x100] sm:$0xff] }
 0x1c7   : > { %v2338_v5 = vpop.f32.mrf.mxu1  ;;  %v2888_v36 = vmul.f32 %v2692_v14, %v6802_v40  ;;  %v3185_v43 = vsub.f32 0.0, %v3087_v28  ;;  %vm3695_vm14 = vcmp.lt.f32.partialorder %v3694_v61, 0.0004427343  ;;  %v3709_v40 = vmul.f32 -0.5, %v6877_v13 }
 0x1c8   : > { %v6894_v31 = vpop.f32.mrf.mxu0  ;;  %2107 = vmatmul.mubr.bf16.gmra.mxu0 %v5293_v54  ;;  %2532 = vmatmul.mubr.bf16.gmra.mxu1 %v5296_v55  ;;  %v6902_v54 = vpop.eup %5425  ;;  %v2305_v55 = vadd.f32 %v6699_v60, %v6695_v39  ;;  %v5302_v39 = vld [vmem:[%s5801_s29 + $0x5e8] ss:$16 sps:$4 sm:$0xff]   ;;  %v4478_v60 = vsel %vm4426_vm2, %v4353_v34, 0.0  ;;  %v5310_v5 = vld [vmem:[%s5801_s29 + $0x60c] ss:$16 sps:$4 sm:$0xff]   ;;  %v6934_v10 = vsub.f32 %v2788_v59, %v2886_v41  ;;  %v6936_v0 = vsub.f32 %v2789_v44, %v2887_v37 }
 0x1c9   : > { %v6898_v38 = vpop.f32.mrf.mxu1  ;;  %2114 = vmatprep.mubr.bf16.mxu0 %v5301_v42  ;;  %2539 = vmatprep.mubr.bf16.mxu1 %v5304_v19  ;;  %v5428_v42 = vpop.eup %5427  ;;  %v3715_v35 = vadd.f32 1.0, %v6902_v54  ;;  %v5307_v19 = vld [vmem:[%s5801_s29 + $0x604] ss:$16 sps:$4 sm:$0xff]   ;;  %v4479_v2 = vadd.f32 %v4478_v60, %v4477_v7  ;;  %v3317_v14 = vmul.f32 1.442695, %v3185_v43  ;;  %v3701_v61 = vadd.f32 1.0, %v3700_v49 }
 0x1ca   : > { %v1918_v29 = vpop.f32.mrf.mxu0  ;;  %v3690_v3 = vmul.f32 0.6931472, %v5428_v42  ;;  %v6922_v21 = vadd.f32 %v6919_v56, %v2305_v55  ;;  %v6930_v26 = vpop.eup %5429  ;;  %v3703_v55 = vand.u32 2147483647, %v6867_v62  ;;  %v2889_v6 = vmul.f32 %v2693_v23, %v6824_v24  ;;  %v5308_v60 = vld [vmem:[%s5801_s29 + $0x608] ss:$16 sps:$4 sm:$0xff]  }
 0x1cb   : > { %v2343_v15 = vpop.f32.mrf.mxu1  ;;  %5439 = vlog2.f32 %v3715_v35  ;;  %v3724_v28 = vadd.f32 1.0, %v6930_v26  ;;  %v2791_v29 = vmax.f32 %v6824_v24, 0.0  ;;  %v3710_v44 = vadd.f32 1.0, %v3709_v40 }
 0x1cc   : > { %v6914_v47 = vpop.f32.mrf.mxu0  ;;  %v3696_v25 = vsel %vm3695_vm14, %v3693_v8, %v3690_v3  ;;  %5441 = vpow2.f32 %v3317_v14  ;;  %v3088_v59 = vand.u32 2147483647, %v6922_v21  ;;  %v6949_v37 = vsub.f32 %v2790_v46, %v2888_v36 }
 0x1cd   : > { %v6924_v16 = vpop.f32.mrf.mxu1  ;;  %v4354_v7 = vadd.f32 %v3696_v25, %v6857_v58  ;;  %5443 = vlog2.f32 %v3724_v28  ;;  %v6952_v49 = vadd.f32 %v6919_v56, %v2310_v17  ;;  %v2313_v35 = vadd.f32 %v6751_v32, %v6742_v48  ;;  %v2694_v28 = vld [vmem:[%s5806_s8 + $0x108] sm:$0xff] }
 0x1ce   : > { %v1921_v53 = vpop.f32.mrf.mxu0  ;;  %v5432_v42 = vpop.eup %5431  ;;  %v3186_v24 = vsub.f32 0.0, %v3088_v59  ;;  %v3702_v46 = vmul.f32 %v6867_v62, %v3701_v61  ;;  %v3712_v36 = vand.u32 2147483647, %v6877_v13  ;;  %vm3704_vm15 = vcmp.lt.f32.partialorder %v3703_v55, 0.0004427343 }
 0x1cf   : > { %v2346_v52 = vpop.f32.mrf.mxu1  ;;  %v4480_v58 = vsel %vm4426_vm2, %v4354_v7, 0.0  ;;  %v6958_v3 = vpop.eup %5433  ;;  %v3699_v43 = vmul.f32 0.6931472, %v5432_v42  ;;  %v6965_v17 = vsub.f32 %v2791_v29, %v2889_v6  ;;  %v3721_v62 = vand.u32 2147483647, %v6902_v54 }
 0x1d0   : > { %v6941_v34 = vpop.f32.mrf.mxu0  ;;  %2115 = vmatmul.mubr.bf16.gmra.mxu0 %v5299_v12  ;;  %2540 = vmatmul.mubr.bf16.gmra.mxu1 %v5302_v39  ;;  %v4481_v8 = vadd.f32 %v4480_v58, %v4479_v2  ;;  %v5305_v39 = vld [vmem:[%s5801_s29 + $0x600] ss:$16 sps:$4 sm:$0xff]   ;;  %v3733_v48 = vadd.f32 1.0, %v6958_v3  ;;  %v3319_v32 = vmul.f32 1.442695, %v3186_v24  ;;  %v3727_v25 = vmul.f32 -0.5, %v6930_v26 }
 0x1d1   : > { %v6946_v41 = vpop.f32.mrf.mxu1  ;;  %2122 = vmatprep.mubr.bf16.mxu0 %v5307_v19  ;;  %2547 = vmatprep.mubr.bf16.mxu1 %v5310_v5  ;;  %v3718_v19 = vmul.f32 -0.5, %v6902_v54  ;;  %v5436_v23 = vpop.eup %5435  ;;  %v3705_v53 = vsel %vm3704_vm15, %v3702_v46, %v3699_v43  ;;  %v3711_v5 = vmul.f32 %v6877_v13, %v3710_v44  ;;  %v3089_v29 = vand.u32 2147483647, %v6952_v49 }
 0x1d2   : > { %v1926_v15 = vpop.f32.mrf.mxu0  ;;  %v6973_v52 = vpop.eup %5437  ;;  %v4355_v7 = vadd.f32 %v3705_v53, %v6863_v18  ;;  %v3708_v61 = vmul.f32 0.6931472, %v5436_v23  ;;  %5445 = vlog2.f32 %v3733_v48  ;;  %vm3713_vm0 = vcmp.lt.f32.partialorder %v3712_v36, 0.0004427343 }
 0x1d3   : > { %v2351_v12 = vpop.f32.mrf.mxu1  ;;  %v3719_v6 = vadd.f32 1.0, %v3718_v19  ;;  %v3742_v59 = vadd.f32 1.0, %v6973_v52  ;;  %v6980_v13 = vadd.f32 %v6919_v56, %v2313_v35  ;;  %v2792_v18 = vmax.f32 %v6848_v33, 0.0 }
 0x1d4   : > { %v6963_v2 = vpop.f32.mrf.mxu0  ;;  %v4482_v44 = vsel %vm4426_vm2, %v4355_v7, 0.0  ;;  %v3714_v15 = vsel %vm3713_vm0, %v3711_v5, %v3708_v61  ;;  %5447 = vpow2.f32 %v3319_v32  ;;  %v6990_v43 = vmul.f32 %v2694_v28, %v6848_v33 }
 0x1d5   : > { %v6968_v40 = vpop.f32.mrf.mxu1  ;;  %v4483_v24 = vadd.f32 %v4482_v44, %v4481_v8  ;;  %v4356_v12 = vadd.f32 %v3714_v15, %v6934_v10  ;;  %5449 = vlog2.f32 %v3742_v59  ;;  %vm6992_vm1 = vcmp.lt.f32.partialorder %v3721_v62, 0.0004427343 }
 0x1d6   : > { %v1929_v14 = vpop.f32.mrf.mxu0  ;;  %v3728_v36 = vadd.f32 1.0, %v3727_v25  ;;  %v3730_v19 = vand.u32 2147483647, %v6930_v26  ;;  %v3187_v48 = vsub.f32 0.0, %v3089_v29  ;;  %v3720_v10 = vmul.f32 %v6902_v54, %v3719_v6 }
 0x1d7   : > { %v2354_v55 = vpop.f32.mrf.mxu1  ;;  %v3090_v23 = vand.u32 2147483647, %v6980_v13  ;;  %v3736_v62 = vmul.f32 -0.5, %v6958_v3  ;;  %v2318_v25 = vadd.f32 %v6765_v11, %v6760_v22  ;;  %v2321_v54 = vadd.f32 %v6792_v57, %v6784_v9 }
 0x1d8   : > { %v6982_v58 = vpop.f32.mrf.mxu0  ;;  %2123 = vmatmul.mubr.bf16.gmra.mxu0 %v5305_v39  ;;  %2548 = vmatmul.mubr.bf16.gmra.mxu1 %v5308_v60  ;;  %v5440_v46 = vpop.eup %5439  ;;  %v4484_v60 = vsel %vm4426_vm2, %v4356_v12, 0.0  ;;  %v3321_v14 = vmul.f32 1.442695, %v3187_v48  ;;  %v2326_v55 = vadd.f32 %v6812_v1, %v6809_v51  ;;  %v3729_v22 = vmul.f32 %v6930_v26, %v3728_v36 }
 0x1d9   : > { %v6986_v42 = vpop.f32.mrf.mxu1  ;;  %v3717_v8 = vmul.f32 0.6931472, %v5440_v46  ;;  %v4485_v5 = vadd.f32 %v4484_v60, %v4483_v24  ;;  %v7007_v61 = vpop.eup %5441  ;;  %v3188_v29 = vsub.f32 0.0, %v3090_v23  ;;  %v3745_v11 = vmul.f32 -0.5, %v6973_v52 }
 0x1da   : > { %v1934_v35 = vpop.f32.mrf.mxu0  ;;  %v5444_v59 = vpop.eup %5443  ;;  %v3751_v15 = vadd.f32 1.0, %v7007_v61  ;;  %5451 = vpow2.f32 %v3321_v14  ;;  %v7020_v46 = vadd.f32 %v6919_v56, %v2318_v25  ;;  %vm3731_vm3 = vcmp.lt.f32.partialorder %v3730_v19, 0.0004427343 }
 0x1db   : > { %v2359_v32 = vpop.f32.mrf.mxu1  ;;  %v3723_v28 = vsel %vm6992_vm1, %v3720_v10, %v3717_v8  ;;  %v3726_v12 = vmul.f32 0.6931472, %v5444_v59  ;;  %v3323_v35 = vmul.f32 1.442695, %v3188_v29  ;;  %v3737_v51 = vadd.f32 1.0, %v3736_v62 }
 0x1dc   : > { %v7000_v53 = vpop.f32.mrf.mxu0  ;;  %v4357_v44 = vadd.f32 %v3723_v28, %v6936_v0  ;;  %5453 = vlog2.f32 %v3751_v15  ;;  %v3739_v39 = vand.u32 2147483647, %v6958_v3  ;;  %v3746_v32 = vadd.f32 1.0, %v3745_v11 }
 0x1dd   : > { %v7005_v7 = vpop.f32.mrf.mxu1  ;;  %v3732_v0 = vsel %vm3731_vm3, %v3729_v22, %v3726_v12  ;;  %5455 = vpow2.f32 %v3323_v35  ;;  %v2793_v60 = vmax.f32 %v6887_v50, 0.0  ;;  %v3091_v8 = vand.u32 2147483647, %v7020_v46 }
 0x1de   : > { %v1937_v6 = vpop.f32.mrf.mxu0  ;;  %v4486_v57 = vsel %vm4426_vm2, %v4357_v44, 0.0  ;;  %v4358_v48 = vadd.f32 %v3732_v0, %v6949_v37  ;;  %v3748_v23 = vand.u32 2147483647, %v6973_v52  ;;  %v7033_v62 = vadd.f32 %v6919_v56, %v2321_v54 }
 0x1df   : > { %v2362_v24 = vpop.f32.mrf.mxu1  ;;  %v4487_v26 = vadd.f32 %v4486_v57, %v4485_v5  ;;  %v5446_v19 = vpop.eup %5445  ;;  %v7037_v5 = vadd.f32 %v6839_v45, %v6832_v30  ;;  %v7041_v37 = vadd.f32 %v6860_v63, %v6850_v20  ;;  %v3738_v29 = vmul.f32 %v6958_v3, %v3737_v51  ;;  %v2695_v45 = vld [vmem:[%s5806_s8 + $0x110] sm:$0xff] }
 0x1e0   : > { %v7022_v9 = vpop.f32.mrf.mxu0  ;;  %v4488_v25 = vsel %vm4426_vm2, %v4358_v48, 0.0  ;;  %v3735_v28 = vmul.f32 0.6931472, %v5446_v19  ;;  %v3189_v6 = vsub.f32 0.0, %v3091_v8  ;;  %vm3740_vm4 = vcmp.lt.f32.partialorder %v3739_v39, 0.0004427343 }
 0x1e1   : > { %v7025_v1 = vpop.f32.mrf.mxu1  ;;  %v7049_v54 = vpop.eup %5447  ;;  %v4489_v44 = vadd.f32 %v4488_v25, %v4487_v26  ;;  %v2988_v30 = vsub.f32 %v2792_v18, %v6990_v43  ;;  %v3092_v20 = vand.u32 2147483647, %v7033_v62  ;;  %v3747_v3 = vmul.f32 %v6973_v52, %v3746_v32  ;;  %v2696_v26 = vld [vmem:[%s5806_s8 + $0x118] sm:$0xff] }
 0x1e2   : > { %v1942_v36 = vpop.f32.mrf.mxu0  ;;  %v5450_v22 = vpop.eup %5449  ;;  %v3741_v11 = vsel %vm3740_vm4, %v3738_v29, %v3735_v28  ;;  %v3754_v15 = vmul.f32 -0.5, %v7007_v61  ;;  %v3760_v24 = vadd.f32 1.0, %v7049_v54  ;;  %v3325_v51 = vmul.f32 1.442695, %v3189_v6 }
 0x1e3   : > { %v2367_v10 = vpop.f32.mrf.mxu1  ;;  %v4359_v35 = vadd.f32 %v3741_v11, %v6965_v17  ;;  %v3744_v57 = vmul.f32 0.6931472, %v5450_v22  ;;  %v7061_v33 = vadd.f32 %v6919_v56, %v2326_v55  ;;  %vm3749_vm5 = vcmp.lt.f32.partialorder %v3748_v23, 0.0004427343 }
 0x1e4   : > { %v7043_v14 = vpop.f32.mrf.mxu0  ;;  %v2891_v43 = vmul.f32 %v2695_v45, %v6887_v50  ;;  %5457 = vlog2.f32 %v3760_v24  ;;  %v3190_v52 = vsub.f32 0.0, %v3092_v20  ;;  %v2794_v17 = vmax.f32 %v6922_v21, 0.0  ;;  %v2697_v10 = vld [vmem:[%s5806_s8 + $0x120] sm:$0xff]  ;;  %v2699_v50 = vld [vmem:[%s5806_s8 + $0x130] sm:$0xff] }
 0x1e5   : > { %v7047_v59 = vpop.f32.mrf.mxu1  ;;  %v4490_v39 = vsel %vm4426_vm2, %v4359_v35, 0.0  ;;  %v3750_v36 = vsel %vm3749_vm5, %v3747_v3, %v3744_v57  ;;  %5459 = vpow2.f32 %v3325_v51  ;;  %v3755_v8 = vadd.f32 1.0, %v3754_v15 }
 0x1e6   : > { %v1945_v63 = vpop.f32.mrf.mxu0  ;;  %v4491_v55 = vadd.f32 %v4490_v39, %v4489_v44  ;;  %v4360_v32 = vadd.f32 %v3750_v36, %v2988_v30  ;;  %v3327_v19 = vmul.f32 1.442695, %v3190_v52  ;;  %v3757_v25 = vand.u32 2147483647, %v7007_v61  ;;  %v2698_v39 = vld [vmem:[%s5806_s8 + $0x128] sm:$0xff] }
 0x1e7   : > { %v2370_v12 = vpop.f32.mrf.mxu1  ;;  %v2892_v28 = vmul.f32 %v2696_v26, %v6922_v21  ;;  %v2795_v29 = vmax.f32 %v6952_v49, 0.0  ;;  %v3093_v6 = vand.u32 2147483647, %v7061_v33  ;;  %v7078_v20 = vpop.eup %5451  ;;  %v2337_v44 = vadd.f32 %v6880_v4, %v6874_v27 }
 0x1e8   : > { %v7063_v18 = vpop.f32.mrf.mxu0  ;;  %v4492_v63 = vsel %vm4426_vm2, %v4360_v32, 0.0  ;;  %5461 = vpow2.f32 %v3327_v19  ;;  %v7085_v30 = vadd.f32 %v6898_v38, %v6894_v31  ;;  %v3763_v3 = vmul.f32 -0.5, %v7049_v54 }
 0x1e9   : > { %v7067_v0 = vpop.f32.mrf.mxu1  ;;  %v5454_v21 = vpop.eup %5453  ;;  %v4493_v11 = vadd.f32 %v4492_v63, %v4491_v55  ;;  %v2893_v15 = vmul.f32 %v2697_v10, %v6952_v49  ;;  %v3769_v24 = vadd.f32 1.0, %v7078_v20  ;;  %v3756_v27 = vmul.f32 %v7007_v61, %v3755_v8 }
 0x1ea   : > { %v1950_v48 = vpop.f32.mrf.mxu0  ;;  %v7092_v35 = vpop.eup %5455  ;;  %v3753_v57 = vmul.f32 0.6931472, %v5454_v21  ;;  %v3191_v4 = vsub.f32 0.0, %v3093_v6  ;;  %v7097_v31 = vadd.f32 %v6919_v56, %v7037_v5  ;;  %v2989_v51 = vsub.f32 %v2793_v60, %v2891_v43 }
 0x1eb   : > { %v2375_v23 = vpop.f32.mrf.mxu1  ;;  %vm3758_vm6 = vcmp.lt.f32.partialorder %v3757_v25, 0.0004427343  ;;  %5463 = vlog2.f32 %v3769_v24  ;;  %v3778_v49 = vadd.f32 1.0, %v7092_v35  ;;  %v7107_v61 = vadd.f32 %v6919_v56, %v7041_v37 }
 0x1ec   : > { %v7076_v45 = vpop.f32.mrf.mxu0  ;;  %v3759_v52 = vsel %vm3758_vm6, %v3756_v27, %v3753_v57  ;;  %v3329_v36 = vmul.f32 1.442695, %v3191_v4  ;;  %v2990_v55 = vsub.f32 %v2794_v17, %v2892_v28  ;;  %v3764_v32 = vadd.f32 1.0, %v3763_v3  ;;  %v2700_v57 = vld [vmem:[%s5806_s8 + $0x138] sm:$0xff] }
 0x1ed   : > { %v7087_v22 = vpop.f32.mrf.mxu1  ;;  %v4361_v48 = vadd.f32 %v3759_v52, %v2989_v51  ;;  %5465 = vlog2.f32 %v3778_v49  ;;  %v7112_v43 = vsub.f32 %v2795_v29, %v2893_v15  ;;  %v2796_v8 = vmax.f32 %v6980_v13, 0.0 }
 0x1ee   : > { %v1953_v12 = vpop.f32.mrf.mxu0  ;;  %5467 = vpow2.f32 %v3329_v36  ;;  %v3094_v10 = vand.u32 2147483647, %v7097_v31  ;;  %v3766_v23 = vand.u32 2147483647, %v7049_v54  ;;  %v2894_v25 = vmul.f32 %v2698_v39, %v6980_v13 }
 0x1ef   : > { %v2378_v38 = vpop.f32.mrf.mxu1  ;;  %v4494_v37 = vsel %vm4426_vm2, %v4361_v48, 0.0  ;;  %v2797_v17 = vmax.f32 %v7020_v46, 0.0  ;;  %v2895_v29 = vmul.f32 %v2699_v50, %v7020_v46  ;;  %v3095_v21 = vand.u32 2147483647, %v7107_v61 }
 0x1f0   : > { %v7102_v26 = vpop.f32.mrf.mxu0  ;;  %v4495_v6 = vadd.f32 %v4494_v37, %v4493_v11  ;;  %v3192_v63 = vsub.f32 0.0, %v3094_v10  ;;  %v3765_v24 = vmul.f32 %v7049_v54, %v3764_v32  ;;  %v3772_v12 = vmul.f32 -0.5, %v7078_v20 }
 0x1f1   : > { %v7109_v5 = vpop.f32.mrf.mxu1  ;;  %v5458_v15 = vpop.eup %5457  ;;  %v2798_v13 = vmax.f32 %v7033_v62, 0.0  ;;  %v2345_v27 = vadd.f32 %v6924_v16, %v6914_v47  ;;  %v3193_v51 = vsub.f32 0.0, %v3095_v21  ;;  %v7136_v49 = vadd.f32 %v6946_v41, %v6941_v34 }
 0x1f2   : > { %v1958_v60 = vpop.f32.mrf.mxu0  ;;  %v7132_v11 = vpop.eup %5459  ;;  %v3762_v46 = vmul.f32 0.6931472, %v5458_v15  ;;  %v3331_v38 = vmul.f32 1.442695, %v3192_v63  ;;  %vm3767_vm7 = vcmp.lt.f32.partialorder %v3766_v23, 0.0004427343  ;;  %v7141_v36 = vadd.f32 %v6919_v56, %v2337_v44 }
 0x1f3   : > { %v2383_v19 = vpop.f32.mrf.mxu1  ;;  %v3781_v54 = vmul.f32 -0.5, %v7092_v35  ;;  %v3787_v39 = vadd.f32 1.0, %v7132_v11  ;;  %v2896_v48 = vmul.f32 %v2700_v57, %v7033_v62  ;;  %v3333_v32 = vmul.f32 1.442695, %v3193_v51 }
 0x1f4   : > { %v7120_v28 = vpop.f32.mrf.mxu0  ;;  %v3768_v16 = vsel %vm3767_vm7, %v3765_v24, %v3762_v46  ;;  %5469 = vpow2.f32 %v3331_v38  ;;  %v3773_v60 = vadd.f32 1.0, %v3772_v12  ;;  %v2992_v10 = vsub.f32 %v2796_v8, %v2894_v25 }
 0x1f5   : > { %v7124_v3 = vpop.f32.mrf.mxu1  ;;  %v7148_v34 = vpop.eup %5461  ;;  %v4362_v41 = vadd.f32 %v3768_v16, %v2990_v55  ;;  %5471 = vlog2.f32 %v3787_v39  ;;  %v3775_v44 = vand.u32 2147483647, %v7078_v20  ;;  %v7154_v62 = vadd.f32 %v6919_v56, %v7085_v30  ;;  %v2701_v55 = vld [vmem:[%s5806_s8 + $0x140] sm:$0xff] }
 0x1f6   : > { %v1961_v4 = vpop.f32.mrf.mxu0  ;;  %v3796_v37 = vadd.f32 1.0, %v7148_v34  ;;  %5473 = vpow2.f32 %v3333_v32  ;;  %v3782_v21 = vadd.f32 1.0, %v3781_v54  ;;  %v7157_v15 = vsub.f32 %v2797_v17, %v2895_v29 }
 0x1f7   : > { %v2386_v52 = vpop.f32.mrf.mxu1  ;;  %v4496_v63 = vsel %vm4426_vm2, %v4362_v41, 0.0  ;;  %v3096_v8 = vand.u32 2147483647, %v7141_v36  ;;  %v3784_v57 = vand.u32 2147483647, %v7092_v35  ;;  %v7164_v4 = vsub.f32 %v2798_v13, %v2896_v48 }
 0x1f8   : > { %v7143_v47 = vpop.f32.mrf.mxu0  ;;  %v5464_v24 = vpop.eup %5463  ;;  %v4497_v12 = vadd.f32 %v4496_v63, %v4495_v6  ;;  %5475 = vlog2.f32 %v3796_v37  ;;  %v3774_v38 = vmul.f32 %v7078_v20, %v3773_v60  ;;  %v3790_v17 = vmul.f32 -0.5, %v7132_v11 }
 0x1f9   : > { %v7146_v50 = vpop.f32.mrf.mxu1  ;;  %v3771_v46 = vmul.f32 0.6931472, %v5464_v24  ;;  %v3194_v29 = vsub.f32 0.0, %v3096_v8  ;;  %vm3776_vm8 = vcmp.lt.f32.partialorder %v3775_v44, 0.0004427343  ;;  %v2799_v54 = vmax.f32 %v7061_v33, 0.0 }
 0x1fa   : > { %v1966_v19 = vpop.f32.mrf.mxu0  ;;  %v5466_v52 = vpop.eup %5465  ;;  %v2897_v6 = vmul.f32 %v2701_v55, %v7061_v33  ;;  %v3097_v39 = vand.u32 2147483647, %v7154_v62  ;;  %v3783_v41 = vmul.f32 %v7092_v35, %v3782_v21  ;;  %vm3785_vm9 = vcmp.lt.f32.partialorder %v3784_v57, 0.0004427343 }
 0x1fb   : > { %v2391_v23 = vpop.f32.mrf.mxu1  ;;  %v7173_v16 = vpop.eup %5467  ;;  %v3777_v48 = vsel %vm3776_vm8, %v3774_v38, %v3771_v46  ;;  %v3780_v32 = vmul.f32 0.6931472, %v5466_v52  ;;  %v3335_v20 = vmul.f32 1.442695, %v3194_v29  ;;  %v7181_v33 = vadd.f32 %v6919_v56, %v2345_v27 }
 0x1fc   : > { %v7161_v25 = vpop.f32.mrf.mxu0  ;;  %v4363_v19 = vadd.f32 %v3777_v48, %v7112_v43  ;;  %v3805_v44 = vadd.f32 1.0, %v7173_v16  ;;  %v3791_v63 = vadd.f32 1.0, %v3790_v17  ;;  %v3195_v55 = vsub.f32 0.0, %v3097_v39  ;;  %v2702_v43 = vld [vmem:[%s5806_s8 + $0x148] sm:$0xff] }
 0x1fd   : > { %v7166_v30 = vpop.f32.mrf.mxu1  ;;  %v3786_v23 = vsel %vm3785_vm9, %v3783_v41, %v3780_v32  ;;  %5477 = vpow2.f32 %v3335_v20  ;;  %v3799_v24 = vmul.f32 -0.5, %v7148_v34  ;;  %v7188_v38 = vsub.f32 %v2799_v54, %v2897_v6 }
 0x1fe   : > { %v1969_v51 = vpop.f32.mrf.mxu0  ;;  %v4498_v35 = vsel %vm4426_vm2, %v4363_v19, 0.0  ;;  %v4364_v21 = vadd.f32 %v3786_v23, %v2992_v10  ;;  %5479 = vlog2.f32 %v3805_v44  ;;  %v3337_v27 = vmul.f32 1.442695, %v3195_v55  ;;  %v2703_v44 = vld [vmem:[%s5806_s8 + $0x150] sm:$0xff] }
 0x1ff   : > { %v2394_v13 = vpop.f32.mrf.mxu1  ;;  %v4499_v46 = vadd.f32 %v4498_v35, %v4497_v12  ;;  %v7192_v29 = vadd.f32 %v6919_v56, %v7136_v49  ;;  %v3793_v10 = vand.u32 2147483647, %v7132_v11  ;;  %v2800_v52 = vmax.f32 %v7097_v31, 0.0 }
 0x200   : > { %v7176_v60 = vpop.f32.mrf.mxu0  ;;  %v4500_v51 = vsel %vm4426_vm2, %v4364_v21, 0.0  ;;  %v3098_v39 = vand.u32 2147483647, %v7181_v33  ;;  %v3802_v6 = vand.u32 2147483647, %v7148_v34  ;;  %v2898_v49 = vmul.f32 %v2702_v43, %v7097_v31 }
 0x201   : > { %v7183_v37 = vpop.f32.mrf.mxu1  ;;  %v7202_v12 = vpop.eup %5469  ;;  %v4501_v54 = vadd.f32 %v4500_v51, %v4499_v46  ;;  %5481 = vpow2.f32 %v3337_v27  ;;  %v3792_v41 = vmul.f32 %v7132_v11, %v3791_v63  ;;  %v3800_v20 = vadd.f32 1.0, %v3799_v24 }
 0x202   : > { %v1974_v8 = vpop.f32.mrf.mxu0  ;;  %v5472_v32 = vpop.eup %5471  ;;  %v3814_v19 = vadd.f32 1.0, %v7202_v12  ;;  %v3196_v23 = vsub.f32 0.0, %v3098_v39  ;;  %v3808_v21 = vmul.f32 -0.5, %v7173_v16  ;;  %v2353_v31 = vadd.f32 %v6968_v40, %v6963_v2 }
 0x203   : > { %v2399_v57 = vpop.f32.mrf.mxu1  ;;  %v7209_v8 = vpop.eup %5473  ;;  %v3789_v35 = vmul.f32 0.6931472, %v5472_v32  ;;  %vm3794_vm10 = vcmp.lt.f32.partialorder %v3793_v10, 0.0004427343  ;;  %v2801_v11 = vmax.f32 %v7107_v61, 0.0  ;;  %v2899_v39 = vmul.f32 %v2703_v44, %v7107_v61 }
 0x204   : > { %v7194_v17 = vpop.f32.mrf.mxu0  ;;  %v3099_v57 = vand.u32 2147483647, %v7192_v29  ;;  %5483 = vlog2.f32 %v3814_v19  ;;  %v3823_v63 = vadd.f32 1.0, %v7209_v8  ;;  %vm7221_vm11 = vcmp.lt.f32.partialorder %v3802_v6, 0.0004427343 }
 0x205   : > { %v7200_v13 = vpop.f32.mrf.mxu1  ;;  %v5476_v46 = vpop.eup %5475  ;;  %v3795_v27 = vsel %vm3794_vm10, %v3792_v41, %v3789_v35  ;;  %v3801_v32 = vmul.f32 %v7148_v34, %v3800_v20  ;;  %v7235_v44 = vadd.f32 %v6919_v56, %v2353_v31  ;;  %v2358_v34 = vadd.f32 %v6986_v42, %v6982_v58 }
 0x206   : > { %v1977_v48 = vpop.f32.mrf.mxu0  ;;  %v4365_v40 = vadd.f32 %v3795_v27, %v7157_v15  ;;  %v3798_v10 = vmul.f32 0.6931472, %v5476_v46  ;;  %5485 = vlog2.f32 %v3823_v63  ;;  %v3197_v41 = vsub.f32 0.0, %v3099_v57 }
 0x207   : > { %v2402_v55 = vpop.f32.mrf.mxu1  ;;  %v3339_v48 = vmul.f32 1.442695, %v3196_v23  ;;  %v2996_v27 = vsub.f32 %v2800_v52, %v2898_v49  ;;  %v7245_v51 = vsub.f32 %v2801_v11, %v2899_v39  ;;  %v3100_v31 = vand.u32 2147483647, %v7235_v44 }
 0x208   : > { %v7215_v43 = vpop.f32.mrf.mxu0  ;;  %v3809_v55 = vadd.f32 1.0, %v3808_v21  ;;  %v4502_v35 = vsel %vm4426_vm2, %v4365_v40, 0.0  ;;  %v3804_v61 = vsel %vm7221_vm11, %v3801_v32, %v3798_v10  ;;  %v3817_v21 = vmul.f32 -0.5, %v7202_v12  ;;  %v2704_v40 = vld [vmem:[%s5806_s8 + $0x158] sm:$0xff] }
 0x209   : > { %v7219_v24 = vpop.f32.mrf.mxu1  ;;  %5487 = vpow2.f32 %v3339_v48  ;;  %v4503_v20 = vadd.f32 %v4502_v35, %v4501_v54  ;;  %v4366_v23 = vadd.f32 %v3804_v61, %v7164_v4  ;;  %v3341_v57 = vmul.f32 1.442695, %v3197_v41 }
 0x20a   : > { %8599 = vst [vmem:[#allocation7_spill] sm:$0xff] %v7219_v24  ;;  %v1982_v2 = vpop.f32.mrf.mxu0  ;;  %v3811_v24 = vand.u32 2147483647, %v7173_v16  ;;  %v7243_v46 = vpop.eup %5477  ;;  %v7249_v48 = vadd.f32 %v6919_v56, %v2358_v34  ;;  %v3820_v4 = vand.u32 2147483647, %v7202_v12  ;;  %v3810_v11 = vmul.f32 %v7173_v16, %v3809_v55 }
 0x20b   : > { %v2407_v19 = vpop.f32.mrf.mxu1  ;;  %v5480_v42 = vpop.eup %5479  ;;  %v4504_v54 = vsel %vm4426_vm2, %v4366_v23, 0.0  ;;  %v3826_v2 = vmul.f32 -0.5, %v7209_v8  ;;  %v3832_v10 = vadd.f32 1.0, %v7243_v46  ;;  %5489 = vpow2.f32 %v3341_v57 }
 0x20c   : > { %v7229_v6 = vpop.f32.mrf.mxu0  ;;  %v4505_v52 = vadd.f32 %v4504_v54, %v4503_v20  ;;  %v3807_v49 = vmul.f32 0.6931472, %v5480_v42  ;;  %vm3812_vm12 = vcmp.lt.f32.partialorder %v3811_v24, 0.0004427343  ;;  %v3818_v19 = vadd.f32 1.0, %v3817_v21 }
 0x20d   : > { %v7239_v15 = vpop.f32.mrf.mxu1  ;;  %5491 = vlog2.f32 %v3832_v10  ;;  %v3198_v41 = vsub.f32 0.0, %v3100_v31  ;;  %v2802_v23 = vmax.f32 %v7141_v36, 0.0  ;;  %v3101_v20 = vand.u32 2147483647, %v7249_v48 }
 0x20e   : > { %v1985_v63 = vpop.f32.mrf.mxu0  ;;  %v7261_v61 = vpop.eup %5481  ;;  %v3813_v34 = vsel %vm3812_vm12, %v3810_v11, %v3807_v49  ;;  %vm7267_vm13 = vcmp.lt.f32.partialorder %v3820_v4, 0.0004427343  ;;  %v3827_v24 = vadd.f32 1.0, %v3826_v2  ;;  %v3829_v31 = vand.u32 2147483647, %v7209_v8 }
 0x20f   : > { %v2410_v58 = vpop.f32.mrf.mxu1  ;;  %v2900_v63 = vmul.f32 %v2704_v40, %v7141_v36  ;;  %v4367_v16 = vadd.f32 %v3813_v34, %v7188_v38  ;;  %v3841_v21 = vadd.f32 1.0, %v7261_v61  ;;  %v2803_v42 = vmax.f32 %v7154_v62, 0.0 }
 0x210   : > { %v7256_v32 = vpop.f32.mrf.mxu0  ;;  %v3343_v36 = vmul.f32 1.442695, %v3198_v41  ;;  %v3199_v54 = vsub.f32 0.0, %v3101_v20  ;;  %v3819_v4 = vmul.f32 %v7202_v12, %v3818_v19  ;;  %v2361_v2 = vadd.f32 %v7005_v7, %v7000_v53 }
 0x211   : > { %v7259_v39 = vpop.f32.mrf.mxu1  ;;  %v5484_v10 = vpop.eup %5483  ;;  %v4506_v38 = vsel %vm4426_vm2, %v4367_v16, 0.0  ;;  %5493 = vlog2.f32 %v3841_v21  ;;  %v3835_v34 = vmul.f32 -0.5, %v7243_v46  ;;  %v2366_v12 = vadd.f32 %v7025_v1, %v7022_v9 }
 0x212   : > { %v1990_v35 = vpop.f32.mrf.mxu0  ;;  %v4507_v11 = vadd.f32 %v4506_v38, %v4505_v52  ;;  %5495 = vpow2.f32 %v3343_v36  ;;  %v7286_v16 = vadd.f32 %v6919_v56, %v2361_v2  ;;  %v2369_v21 = vadd.f32 %v7047_v59, %v7043_v14 }
 0x213   : > { %v2415_v58 = vpop.f32.mrf.mxu1  ;;  %v3816_v35 = vmul.f32 0.6931472, %v5484_v10  ;;  %v5486_v20 = vpop.eup %5485  ;;  %vm3830_vm14 = vcmp.lt.f32.partialorder %v3829_v31, 0.0004427343  ;;  %v3836_v55 = vadd.f32 1.0, %v3835_v34  ;;  %v2998_v31 = vsub.f32 %v2802_v23, %v2900_v63 }
 0x214   : > { %v7272_v57 = vpop.f32.mrf.mxu0  ;;  %v2705_v58 = vld [vmem:[%s5806_s8 + $0x160] sm:$0xff]  ;;  %v3825_v52 = vmul.f32 0.6931472, %v5486_v20  ;;  %v7321_v34 = vadd.f32 %v6919_v56, %v2366_v12 }
 0x215   : > { %8604 = vst [vmem:[#allocation8_spill] sm:$0xff] %v7272_v57  ;;  %v7276_v40 = vpop.f32.mrf.mxu1  ;;  %v3345_v57 = vmul.f32 1.442695, %v3199_v54  ;;  %v3822_v7 = vsel %vm7267_vm13, %v3819_v4, %v3816_v35  ;;  %v2901_v9 = vmul.f32 %v2705_v58, %v7154_v62  ;;  %v3838_v62 = vand.u32 2147483647, %v7243_v46 }
 0x216   : > { %8605 = vst [vmem:[#allocation9_spill] sm:$0xff] %v7276_v40  ;;  %v1993_v49 = vpop.f32.mrf.mxu0  ;;  %v3828_v40 = vmul.f32 %v7209_v8, %v3827_v24  ;;  %v7292_v53 = vpop.eup %5487  ;;  %v7300_v8 = vadd.f32 %v7067_v0, %v7063_v18  ;;  %v4368_v36 = vadd.f32 %v3822_v7, %v2996_v27  ;;  %v3844_v18 = vmul.f32 -0.5, %v7261_v61 }
 0x217   : > { %v2418_v41 = vpop.f32.mrf.mxu1  ;;  %v3850_v1 = vadd.f32 1.0, %v7292_v53  ;;  %5497 = vpow2.f32 %v3345_v57  ;;  %v3102_v4 = vand.u32 2147483647, %v7286_v16  ;;  %v2999_v49 = vsub.f32 %v2803_v42, %v2901_v9 }
 0x218   : > { %v7290_v19 = vpop.f32.mrf.mxu0  ;;  %v3831_v10 = vsel %vm3830_vm14, %v3828_v40, %v3825_v52  ;;  %v4508_v14 = vsel %vm4426_vm2, %v4368_v36, 0.0  ;;  %v7315_v57 = vpop.eup %5489  ;;  %v2804_v35 = vmax.f32 %v7181_v33, 0.0  ;;  %v3837_v58 = vmul.f32 %v7243_v46, %v3836_v55 }
 0x219   : > { %v7302_v24 = vpop.f32.mrf.mxu1  ;;  %v4369_v59 = vadd.f32 %v3831_v10, %v7245_v51  ;;  %5499 = vlog2.f32 %v3850_v1  ;;  %v4509_v27 = vadd.f32 %v4508_v14, %v4507_v11  ;;  %v2706_v51 = vld [vmem:[%s5806_s8 + $0x168] sm:$0xff]  ;;  %v3847_v41 = vand.u32 2147483647, %v7261_v61  ;;  %v2707_v1 = vld [vmem:[%s5806_s8 + $0x170] sm:$0xff] }
 0x21a   : > { %v1998_v54 = vpop.f32.mrf.mxu0  ;;  %v5492_v23 = vpop.eup %5491  ;;  %v3859_v20 = vadd.f32 1.0, %v7315_v57  ;;  %v3845_v36 = vadd.f32 1.0, %v3844_v18  ;;  %v3200_v42 = vsub.f32 0.0, %v3102_v4  ;;  %v7328_v9 = vadd.f32 %v6919_v56, %v2369_v21 }
 0x21b   : > { %v2423_v38 = vpop.f32.mrf.mxu1  ;;  %v4510_v2 = vsel %vm4426_vm2, %v4369_v59, 0.0  ;;  %v3834_v52 = vmul.f32 0.6931472, %v5492_v23  ;;  %vm3839_vm15 = vcmp.lt.f32.partialorder %v3838_v62, 0.0004427343  ;;  %v2902_v12 = vmul.f32 %v2706_v51, %v7181_v33 }
 0x21c   : > { %v7309_v0 = vpop.f32.mrf.mxu0  ;;  %v4511_v63 = vadd.f32 %v4510_v2, %v4509_v27  ;;  %5501 = vlog2.f32 %v3859_v20  ;;  %v3103_v46 = vand.u32 2147483647, %v7321_v34  ;;  %v3853_v38 = vmul.f32 -0.5, %v7292_v53 }
 0x21d   : > { %v7313_v40 = vpop.f32.mrf.mxu1  ;;  %v3840_v55 = vsel %vm3839_vm15, %v3837_v58, %v3834_v52  ;;  %v2805_v14 = vmax.f32 %v7192_v29, 0.0  ;;  %v3347_v59 = vmul.f32 1.442695, %v3200_v42  ;;  %vm7338_vm0 = vcmp.lt.f32.partialorder %v3847_v41, 0.0004427343 }
 0x21e   : > { %v2001_v11 = vpop.f32.mrf.mxu0  ;;  %v5494_v27 = vpop.eup %5493  ;;  %v4370_v21 = vadd.f32 %v3840_v55, %v2998_v31  ;;  %v2903_v33 = vmul.f32 %v2707_v1, %v7192_v29  ;;  %v3201_v62 = vsub.f32 0.0, %v3103_v46  ;;  %v3846_v23 = vmul.f32 %v7261_v61, %v3845_v36 }
 0x21f   : > { %v2426_v7 = vpop.f32.mrf.mxu1  ;;  %v7343_v51 = vpop.eup %5495  ;;  %v3843_v11 = vmul.f32 0.6931472, %v5494_v27  ;;  %5503 = vpow2.f32 %v3347_v59  ;;  %v3104_v58 = vand.u32 2147483647, %v7328_v9  ;;  %v3856_v41 = vand.u32 2147483647, %v7292_v53 }
 0x220   : > { %v7330_v54 = vpop.f32.mrf.mxu0  ;;  %v4512_v31 = vsel %vm4426_vm2, %v4370_v21, 0.0  ;;  %v3862_v7 = vmul.f32 -0.5, %v7315_v57  ;;  %v3868_v29 = vadd.f32 1.0, %v7343_v51  ;;  %v3854_v61 = vadd.f32 1.0, %v3853_v38 }
 0x221   : > { %v7334_v10 = vpop.f32.mrf.mxu1  ;;  %v4513_v1 = vadd.f32 %v4512_v31, %v4511_v63  ;;  %v3849_v42 = vsel %vm7338_vm0, %v3846_v23, %v3843_v11  ;;  %v3349_v36 = vmul.f32 1.442695, %v3201_v62  ;;  %v3865_v59 = vand.u32 2147483647, %v7315_v57 }
 0x222   : > { %v2006_v18 = vpop.f32.mrf.mxu0  ;;  %v4371_v55 = vadd.f32 %v3849_v42, %v2999_v49  ;;  %5505 = vlog2.f32 %v3868_v29  ;;  %v3202_v63 = vsub.f32 0.0, %v3104_v58  ;;  %v3001_v62 = vsub.f32 %v2805_v14, %v2903_v33 }
 0x223   : > { %v2431_v2 = vpop.f32.mrf.mxu1  ;;  %v7360_v18 = vadd.f32 %v6919_v56, %v7300_v8  ;;  %5507 = vpow2.f32 %v3349_v36  ;;  %v3863_v49 = vadd.f32 1.0, %v3862_v7  ;;  %v3855_v8 = vmul.f32 %v7292_v53, %v3854_v61 }
 0x224   : > { %v7347_v20 = vpop.f32.mrf.mxu0  ;;  %v7362_v21 = vpop.eup %5497  ;;  %v3000_v2 = vsub.f32 %v2804_v35, %v2902_v12  ;;  %v4514_v38 = vsel %vm4426_vm2, %v4371_v55, 0.0  ;;  %v3351_v42 = vmul.f32 1.442695, %v3202_v63  ;;  %vm3857_vm1 = vcmp.lt.f32.partialorder %v3856_v41, 0.0004427343 }
 0x225   : > { %v7353_v52 = vpop.f32.mrf.mxu1  ;;  %v3877_v11 = vadd.f32 1.0, %v7362_v21  ;;  %v4515_v29 = vadd.f32 %v4514_v38, %v4513_v1  ;;  %vm7371_vm3 = vcmp.lt.f32.partialorder %v3865_v59, 0.0004427343  ;;  %v3105_v12 = vand.u32 2147483647, %v7360_v18 }
 0x226   : > { %v2009_v46 = vpop.f32.mrf.mxu0  ;;  %v5500_v4 = vpop.eup %5499  ;;  %v3871_v58 = vmul.f32 -0.5, %v7343_v51  ;;  %v2377_v7 = vadd.f32 %v7087_v22, %v7076_v45  ;;  %v3864_v41 = vmul.f32 %v7315_v57, %v3863_v49  ;;  %v2382_v36 = vadd.f32 %v7109_v5, %v7102_v26 }
 0x227   : > { %v2434_v27 = vpop.f32.mrf.mxu1  ;;  %v3852_v56 = vmul.f32 0.6931472, %v5500_v4  ;;  %5509 = vlog2.f32 %v3877_v11  ;;  %v3203_v61 = vsub.f32 0.0, %v3105_v12  ;;  %v2385_v45 = vadd.f32 %v7124_v3, %v7120_v28  ;;  %v2708_v4 = vld [vmem:[%s5806_s8 + $0x178] sm:$0xff]  ;;  %v2709_v3 = vld [vmem:[%s5806_s8 + $0x180] sm:$0xff] }
 0x228   : > { %v7364_v31 = vpop.f32.mrf.mxu0  ;;  %5511 = vpow2.f32 %v3351_v42  ;;  %v7386_v27 = vld [vmem:[#allocation3] ss:$0 sm:$0xff]  ;;  %v7395_v22 = vadd.f32 %v7146_v50, %v7143_v47  ;;  %v7399_v57 = vadd.f32 %v7166_v30, %v7161_v25  ;;  %v3872_v28 = vadd.f32 1.0, %v3871_v58 }
 0x229   : > { %v7368_v23 = vpop.f32.mrf.mxu1  ;;  %v3858_v33 = vsel %vm3857_vm1, %v3855_v8, %v3852_v56  ;;  %v5502_v59 = vpop.eup %5501  ;;  %v7389_v63 = vadd.f32 %v7386_v27, %v2377_v7  ;;  %v3353_v38 = vmul.f32 1.442695, %v3203_v61  ;;  %v7404_v49 = vadd.f32 %v7386_v27, %v2382_v36 }
 0x22a   : > { %v2014_v46 = vpop.f32.mrf.mxu0  ;;  %v4372_v1 = vadd.f32 %v3858_v33, %v3000_v2  ;;  %v3861_v2 = vmul.f32 0.6931472, %v5502_v59  ;;  %v3880_v47 = vmul.f32 -0.5, %v7362_v21  ;;  %v2806_v42 = vmax.f32 %v7235_v44, 0.0 }
 0x22b   : > { %v2439_v14 = vpop.f32.mrf.mxu1  ;;  %v3106_v50 = vand.u32 2147483647, %v7389_v63  ;;  %5513 = vpow2.f32 %v3353_v38  ;;  %v2807_v7 = vmax.f32 %v7249_v48, 0.0  ;;  %v3107_v35 = vand.u32 2147483647, %v7404_v49 }
 0x22c   : > { %v7379_v53 = vpop.f32.mrf.mxu0  ;;  %v4516_v5 = vsel %vm4426_vm2, %v4372_v1, 0.0  ;;  %v7411_v25 = vpop.eup %5503  ;;  %v3867_v30 = vsel %vm7371_vm3, %v3864_v41, %v3861_v2  ;;  %v3874_v14 = vand.u32 2147483647, %v7343_v51  ;;  %v2905_v1 = vmul.f32 %v2709_v3, %v7249_v48 }
 0x22d   : > { %v7384_v55 = vpop.f32.mrf.mxu1  ;;  %v4517_v56 = vadd.f32 %v4516_v5, %v4515_v29  ;;  %v4373_v12 = vadd.f32 %v3867_v30, %v3001_v62  ;;  %v2904_v29 = vmul.f32 %v2708_v4, %v7235_v44  ;;  %v3886_v33 = vadd.f32 1.0, %v7411_v25 }
 0x22e   : > { %v2017_v26 = vpop.f32.mrf.mxu0  ;;  %v3204_v61 = vsub.f32 0.0, %v3106_v50  ;;  %v3873_v62 = vmul.f32 %v7343_v51, %v3872_v28  ;;  %v3205_v48 = vsub.f32 0.0, %v3107_v35  ;;  %vm3875_vm4 = vcmp.lt.f32.partialorder %v3874_v14, 0.0004427343  ;;  %v2711_v35 = vld [vmem:[%s5806_s8 + $0x190] sm:$0xff] }
 0x22f   : > { %v2442_v11 = vpop.f32.mrf.mxu1  ;;  %v5506_v36 = vpop.eup %5505  ;;  %v4518_v59 = vsel %vm4426_vm2, %v4373_v12, 0.0  ;;  %v3881_v26 = vadd.f32 1.0, %v3880_v47  ;;  %5515 = vlog2.f32 %v3886_v33  ;;  %v3002_v3 = vsub.f32 %v2806_v42, %v2904_v29  ;;  %v2710_v12 = vld [vmem:[%s5806_s8 + $0x188] sm:$0xff] }
 0x230   : > { %v7409_v8 = vpop.f32.mrf.mxu0  ;;  %v7428_v5 = vpop.eup %5507  ;;  %v4519_v2 = vadd.f32 %v4518_v59, %v4517_v56  ;;  %v3870_v4 = vmul.f32 0.6931472, %v5506_v36  ;;  %v3355_v38 = vmul.f32 1.442695, %v3204_v61  ;;  %v3883_v50 = vand.u32 2147483647, %v7362_v21 }
 0x231   : > { %v7416_v46 = vpop.f32.mrf.mxu1  ;;  %v3895_v51 = vadd.f32 1.0, %v7428_v5  ;;  %v3003_v30 = vsub.f32 %v2807_v7, %v2905_v1  ;;  %v3357_v33 = vmul.f32 1.442695, %v3205_v48  ;;  %v2808_v61 = vmax.f32 %v7286_v16, 0.0 }
 0x232   : > { %v2022_v58 = vpop.f32.mrf.mxu0  ;;  %v3876_v47 = vsel %vm3875_vm4, %v3873_v62, %v3870_v4  ;;  %5517 = vpow2.f32 %v3355_v38  ;;  %v7438_v42 = vadd.f32 %v7386_v27, %v2385_v45  ;;  %v3882_v7 = vmul.f32 %v7362_v21, %v3881_v26  ;;  %v2712_v21 = vld [vmem:[%s5806_s8 + $0x198] sm:$0xff] }
 0x233   : > { %v2447_v41 = vpop.f32.mrf.mxu1  ;;  %5519 = vlog2.f32 %v3895_v51  ;;  %v3889_v1 = vmul.f32 -0.5, %v7411_v25  ;;  %vm3884_vm5 = vcmp.lt.f32.partialorder %v3883_v50, 0.0004427343  ;;  %v2906_v4 = vmul.f32 %v2710_v12, %v7286_v16 }
 0x234   : > { %v7426_v44 = vpop.f32.mrf.mxu0  ;;  %v5510_v56 = vpop.eup %5509  ;;  %v4374_v41 = vadd.f32 %v3876_v47, %v3002_v3  ;;  %5521 = vpow2.f32 %v3357_v33  ;;  %v2809_v51 = vmax.f32 %v7321_v34, 0.0  ;;  %v2810_v33 = vmax.f32 %v7328_v9, 0.0 }
 0x235   : > { %v7430_v11 = vpop.f32.mrf.mxu1  ;;  %v7442_v14 = vpop.eup %5511  ;;  %v3879_v36 = vmul.f32 0.6931472, %v5510_v56  ;;  %v3890_v16 = vadd.f32 1.0, %v3889_v1  ;;  %v3898_v12 = vmul.f32 -0.5, %v7428_v5 }
 0x236   : > { %v2025_v28 = vpop.f32.mrf.mxu0  ;;  %v4520_v62 = vsel %vm4426_vm2, %v4374_v41, 0.0  ;;  %v3904_v45 = vadd.f32 1.0, %v7442_v14 }
 0x237   : > { %v2450_v58 = vpop.f32.mrf.mxu1  ;;  %v4521_v48 = vadd.f32 %v4520_v62, %v4519_v2  ;;  %v3885_v3 = vsel %vm3884_vm5, %v3882_v7, %v3879_v36  ;;  %v2907_v28 = vmul.f32 %v2711_v35, %v7321_v34  ;;  %v7461_v2 = vadd.f32 %v7386_v27, %v7395_v22 }
 0x238   : > { %v7440_v29 = vpop.f32.mrf.mxu0  ;;  %v4375_v47 = vadd.f32 %v3885_v3, %v3003_v30  ;;  %5523 = vlog2.f32 %v3904_v45  ;;  %v3108_v58 = vand.u32 2147483647, %v7438_v42  ;;  %v2398_v34 = vadd.f32 %v7183_v37, %v7176_v60  ;;  %v7467_v30 = vpop.eup %5513 }
 0x239   : > { %v7446_v59 = vpop.f32.mrf.mxu1  ;;  %v2908_v35 = vmul.f32 %v2712_v21, %v7328_v9  ;;  %v7473_v7 = vadd.f32 %v7200_v13, %v7194_v17  ;;  %v3892_v22 = vand.u32 2147483647, %v7411_v25  ;;  %v3913_v45 = vadd.f32 1.0, %v7467_v30 }
 0x23a   : > { %v2030_v38 = vpop.f32.mrf.mxu0  ;;  %v4522_v41 = vsel %vm4426_vm2, %v4375_v47, 0.0  ;;  %v3206_v36 = vsub.f32 0.0, %v3108_v58  ;;  %v7479_v60 = vadd.f32 %v7386_v27, %v7399_v57  ;;  %v3109_v9 = vand.u32 2147483647, %v7461_v2 }
 0x23b   : > { %v2455_v26 = vpop.f32.mrf.mxu1  ;;  %v4523_v62 = vadd.f32 %v4522_v41, %v4521_v48  ;;  %v3004_v38 = vsub.f32 %v2808_v61, %v2906_v4  ;;  %v3891_v17 = vmul.f32 %v7411_v25, %v3890_v16  ;;  %v3005_v13 = vsub.f32 %v2809_v51, %v2907_v28 }
 0x23c   : > { %v7456_v50 = vpop.f32.mrf.mxu0  ;;  %v3359_v3 = vmul.f32 1.442695, %v3206_v36  ;;  %v5516_v26 = vpop.eup %5515  ;;  %v3899_v48 = vadd.f32 1.0, %v3898_v12  ;;  %5525 = vlog2.f32 %v3913_v45  ;;  %v3907_v41 = vmul.f32 -0.5, %v7442_v14  ;;  %v8612_v12 = vld [vmem:[#allocation7_spill] sm:$0xff] }
 0x23d   : > { %v7465_v56 = vpop.f32.mrf.mxu1  ;;  %v3888_v58 = vmul.f32 0.6931472, %v5516_v26  ;;  %v3207_v57 = vsub.f32 0.0, %v3109_v9  ;;  %vm3893_vm6 = vcmp.lt.f32.partialorder %v3892_v22, 0.0004427343  ;;  %v3006_v4 = vsub.f32 %v2810_v33, %v2908_v35 }
 0x23e   : > { %v2033_v1 = vpop.f32.mrf.mxu0  ;;  %5527 = vpow2.f32 %v3359_v3  ;;  %v3901_v61 = vand.u32 2147483647, %v7428_v5  ;;  %v3110_v36 = vand.u32 2147483647, %v7479_v60  ;;  %v2811_v28 = vmax.f32 %v7360_v18, 0.0 }
 0x23f   : > { %v2458_v37 = vpop.f32.mrf.mxu1  ;;  %v7490_v25 = vpop.eup %5517  ;;  %v3894_v51 = vsel %vm3893_vm6, %v3891_v17, %v3888_v58  ;;  %v3361_v16 = vmul.f32 1.442695, %v3207_v57  ;;  %v2406_v45 = vadd.f32 %v8612_v12, %v7215_v43  ;;  %v3900_v26 = vmul.f32 %v7428_v5, %v3899_v48  ;;  %v2713_v57 = vld [vmem:[%s5806_s8 + $0x1a0] sm:$0xff] }
 0x240   : > { %v7482_v21 = vpop.f32.mrf.mxu0  ;;  %v5520_v9 = vpop.eup %5519  ;;  %v4376_v22 = vadd.f32 %v3894_v51, %v3004_v38  ;;  %v3916_v33 = vmul.f32 -0.5, %v7467_v30  ;;  %v3922_v35 = vadd.f32 1.0, %v7490_v25  ;;  %v3908_v58 = vadd.f32 1.0, %v3907_v41 }
 0x241   : > { %8610 = vst [vmem:[#allocation10_spill] sm:$0xff] %v7482_v21  ;;  %v7485_v47 = vpop.f32.mrf.mxu1  ;;  %v3897_v17 = vmul.f32 0.6931472, %v5520_v9  ;;  %5529 = vpow2.f32 %v3361_v16  ;;  %vm3902_vm7 = vcmp.lt.f32.partialorder %v3901_v61, 0.0004427343 }
 0x242   : > { %8611 = vst [vmem:[#allocation11_spill] sm:$0xff] %v7485_v47  ;;  %v2038_v1 = vpop.f32.mrf.mxu0  ;;  %v3208_v47 = vsub.f32 0.0, %v3110_v36  ;;  %v4524_v12 = vsel %vm4426_vm2, %v4376_v22, 0.0  ;;  %v3910_v38 = vand.u32 2147483647, %v7442_v14  ;;  %5531 = vlog2.f32 %v3922_v35 }
 0x243   : > { %v2463_v37 = vpop.f32.mrf.mxu1  ;;  %v4525_v48 = vadd.f32 %v4524_v12, %v4523_v62  ;;  %v3903_v51 = vsel %vm3902_vm7, %v3900_v26, %v3897_v17  ;;  %v2909_v36 = vmul.f32 %v2713_v57, %v7360_v18  ;;  %v3909_v35 = vmul.f32 %v7442_v14, %v3908_v58 }
 0x244   : > { %v7495_v3 = vpop.f32.mrf.mxu0  ;;  %v7502_v37 = vpop.eup %5521  ;;  %v4377_v16 = vadd.f32 %v3903_v51, %v3005_v13  ;;  %v3363_v22 = vmul.f32 1.442695, %v3208_v47  ;;  %v7519_v62 = vadd.f32 %v7386_v27, %v7473_v7  ;;  %vm3911_vm8 = vcmp.lt.f32.partialorder %v3910_v38, 0.0004427343  ;;  %v2714_v51 = vld [vmem:[%s5806_s8 + $0x1a8] sm:$0xff] }
 0x245   : > { %8613 = vst [vmem:[#allocation7_spill] sm:$0xff] %v7495_v3  ;;  %v7500_v1 = vpop.f32.mrf.mxu1  ;;  %v3931_v3 = vadd.f32 1.0, %v7502_v37  ;;  %v5524_v41 = vpop.eup %5523  ;;  %v3919_v13 = vand.u32 2147483647, %v7467_v30  ;;  %v3925_v17 = vmul.f32 -0.5, %v7490_v25  ;;  %v3007_v7 = vsub.f32 %v2811_v28, %v2909_v36 }
 0x246   : > { %8614 = vst [vmem:[#allocation12_spill] sm:$0xff] %v7500_v1  ;;  %v2041_v43 = vpop.f32.mrf.mxu0  ;;  %v7509_v1 = vadd.f32 %v7386_v27, %v2398_v34  ;;  %v3906_v21 = vmul.f32 0.6931472, %v5524_v41  ;;  %v4526_v26 = vsel %vm4426_vm2, %v4377_v16, 0.0  ;;  %v2812_v12 = vmax.f32 %v7389_v63, 0.0 }
 0x247   : > { %v2466_v5 = vpop.f32.mrf.mxu1  ;;  %v3917_v43 = vadd.f32 1.0, %v3916_v33  ;;  %5533 = vlog2.f32 %v3931_v3  ;;  %v4527_v47 = vadd.f32 %v4526_v26, %v4525_v48  ;;  %v3934_v41 = vmul.f32 -0.5, %v7502_v37 }
 0x248   : > { %v7511_v9 = vpop.f32.mrf.mxu0  ;;  %5535 = vpow2.f32 %v3363_v22  ;;  %v3912_v33 = vsel %vm3911_vm8, %v3909_v35, %v3906_v21  ;;  %v3111_v14 = vand.u32 2147483647, %v7509_v1  ;;  %v3112_v21 = vand.u32 2147483647, %v7519_v62 }
 0x249   : > { %v7514_v61 = vpop.f32.mrf.mxu1  ;;  %v4378_v58 = vadd.f32 %v3912_v33, %v3006_v4  ;;  %v3918_v57 = vmul.f32 %v7467_v30, %v3917_v43  ;;  %v5526_v38 = vpop.eup %5525  ;;  %v2409_v16 = vadd.f32 %v7239_v15, %v7229_v6  ;;  %v7540_v36 = vadd.f32 %v7386_v27, %v2406_v45 }
 0x24a   : > { %v2046_v34 = vpop.f32.mrf.mxu0  ;;  %v3209_v48 = vsub.f32 0.0, %v3111_v14  ;;  %v3915_v28 = vmul.f32 0.6931472, %v5526_v38  ;;  %v2414_v43 = vadd.f32 %v7259_v39, %v7256_v32  ;;  %vm3920_vm9 = vcmp.lt.f32.partialorder %v3919_v13, 0.0004427343  ;;  %v2715_v14 = vld [vmem:[%s5806_s8 + $0x1b0] sm:$0xff] }
 0x24b   : > { %v2471_v18 = vpop.f32.mrf.mxu1  ;;  %v7536_v4 = vpop.eup %5527  ;;  %v4528_v30 = vsel %vm4426_vm2, %v4378_v58, 0.0  ;;  %v3926_v26 = vadd.f32 1.0, %v3925_v17  ;;  %v2910_v15 = vmul.f32 %v2714_v51, %v7389_v63  ;;  %v3210_v38 = vsub.f32 0.0, %v3112_v21 }
 0x24c   : > { %v7525_v3 = vpop.f32.mrf.mxu0  ;;  %v4529_v34 = vadd.f32 %v4528_v30, %v4527_v47  ;;  %v3940_v18 = vadd.f32 1.0, %v7536_v4  ;;  %v3921_v6 = vsel %vm3920_vm9, %v3918_v57, %v3915_v28  ;;  %v3365_v58 = vmul.f32 1.442695, %v3209_v48 }
 0x24d   : > { %v7529_v5 = vpop.f32.mrf.mxu1  ;;  %v4379_v45 = vadd.f32 %v3921_v6, %v3007_v7  ;;  %v2813_v32 = vmax.f32 %v7404_v49, 0.0  ;;  %v3935_v47 = vadd.f32 1.0, %v3934_v41  ;;  %v3367_v17 = vmul.f32 1.442695, %v3210_v38 }
 0x24e   : > { %8615 = vst [vmem:[#allocation13_spill] sm:$0xff] %v7529_v5  ;;  %v2049_v22 = vpop.f32.mrf.mxu0  ;;  %v3928_v5 = vand.u32 2147483647, %v7490_v25  ;;  %5537 = vlog2.f32 %v3940_v18  ;;  %v7553_v13 = vpop.eup %5529  ;;  %v3113_v57 = vand.u32 2147483647, %v7540_v36  ;;  %v3927_v21 = vmul.f32 %v7490_v25, %v3926_v26 }
 0x24f   : > { %v2474_v35 = vpop.f32.mrf.mxu1  ;;  %5539 = vpow2.f32 %v3365_v58  ;;  %v5532_v51 = vpop.eup %5531  ;;  %v4530_v48 = vsel %vm4426_vm2, %v4379_v45, 0.0  ;;  %v2911_v7 = vmul.f32 %v2715_v14, %v7404_v49  ;;  %v3949_v30 = vadd.f32 1.0, %v7553_v13 }
 0x250   : > { %v7545_v33 = vpop.f32.mrf.mxu0  ;;  %v4531_v35 = vadd.f32 %v4530_v48, %v4529_v34  ;;  %v3924_v18 = vmul.f32 0.6931472, %v5532_v51  ;;  %v3937_v41 = vand.u32 2147483647, %v7502_v37  ;;  %5541 = vpow2.f32 %v3367_v17 }
 0x251   : > { %v7549_v22 = vpop.f32.mrf.mxu1  ;;  %v3008_v58 = vsub.f32 %v2812_v12, %v2910_v15  ;;  %vm3929_vm10 = vcmp.lt.f32.partialorder %v3928_v5, 0.0004427343  ;;  %5543 = vlog2.f32 %v3949_v30  ;;  %v3211_v38 = vsub.f32 0.0, %v3113_v57  ;;  %v2716_v30 = vld [vmem:[%s5806_s8 + $0x1b8] sm:$0xff] }
 0x252   : > { %v2054_v39 = vpop.f32.mrf.mxu0  ;;  %v3930_v25 = vsel %vm3929_vm10, %v3927_v21, %v3924_v18  ;;  %v3936_v49 = vmul.f32 %v7502_v37, %v3935_v47  ;;  %v3943_v26 = vmul.f32 -0.5, %v7536_v4  ;;  %v7570_v48 = vadd.f32 %v7386_v27, %v2409_v16 }
 0x253   : > { %v2479_v63 = vpop.f32.mrf.mxu1  ;;  %v3369_v17 = vmul.f32 1.442695, %v3211_v38  ;;  %v3009_v5 = vsub.f32 %v2813_v32, %v2911_v7  ;;  %vm3938_vm11 = vcmp.lt.f32.partialorder %v3937_v41, 0.0004427343  ;;  %v7576_v37 = vadd.f32 %v7386_v27, %v2414_v43  ;;  %v2717_v32 = vld [vmem:[%s5806_s8 + $0x1c0] sm:$0xff] }
 0x254   : > { %v7560_v28 = vpop.f32.mrf.mxu0  ;;  %v5534_v39 = vpop.eup %5533  ;;  %v4380_v63 = vadd.f32 %v3930_v25, %v3008_v58  ;;  %v3946_v18 = vand.u32 2147483647, %v7536_v4  ;;  %v2814_v41 = vmax.f32 %v7438_v42, 0.0  ;;  %v3952_v43 = vmul.f32 -0.5, %v7553_v13 }
 0x255   : > { %v7563_v6 = vpop.f32.mrf.mxu1  ;;  %v7567_v34 = vpop.eup %5535  ;;  %v3933_v51 = vmul.f32 0.6931472, %v5534_v39  ;;  %5545 = vpow2.f32 %v3369_v17  ;;  %v3114_v39 = vand.u32 2147483647, %v7570_v48 }
 0x256   : > { %v2057_v45 = vpop.f32.mrf.mxu0  ;;  %v3958_v15 = vadd.f32 1.0, %v7567_v34  ;;  %v4532_v57 = vsel %vm4426_vm2, %v4380_v63, 0.0  ;;  %v2815_v63 = vmax.f32 %v7461_v2, 0.0  ;;  %vm7595_vm12 = vcmp.lt.f32.partialorder %v3946_v18, 0.0004427343 }
 0x257   : > { %v2482_v14 = vpop.f32.mrf.mxu1  ;;  %v3939_v21 = vsel %vm3938_vm11, %v3936_v49, %v3933_v51  ;;  %v4533_v58 = vadd.f32 %v4532_v57, %v4531_v35  ;;  %v3944_v45 = vadd.f32 1.0, %v3943_v26  ;;  %v3115_v35 = vand.u32 2147483647, %v7576_v37 }
 0x258   : > { %v7572_v12 = vpop.f32.mrf.mxu0  ;;  %v4381_v38 = vadd.f32 %v3939_v21, %v3009_v5  ;;  %5547 = vlog2.f32 %v3958_v15  ;;  %v2912_v14 = vmul.f32 %v2716_v30, %v7438_v42  ;;  %v2913_v5 = vmul.f32 %v2717_v32, %v7461_v2  ;;  %v8620_v42 = vld [vmem:[#allocation8_spill] sm:$0xff]  ;;  %v8621_v30 = vld [vmem:[#allocation9_spill] sm:$0xff] }
 0x259   : > { %v7578_v47 = vpop.f32.mrf.mxu1  ;;  %v3212_v15 = vsub.f32 0.0, %v3114_v39  ;;  %v3961_v2 = vmul.f32 -0.5, %v7567_v34 }
 0x25a   : > { %v2062_v16 = vpop.f32.mrf.mxu0  ;;  %v4534_v49 = vsel %vm4426_vm2, %v4381_v38, 0.0  ;;  %v3213_v38 = vsub.f32 0.0, %v3115_v35 }
 0x25b   : > { %v2487_v7 = vpop.f32.mrf.mxu1  ;;  %v4535_v51 = vadd.f32 %v4534_v49, %v4533_v58  ;;  %v5538_v21 = vpop.eup %5537  ;;  %v3945_v16 = vmul.f32 %v7536_v4, %v3944_v45  ;;  %v3371_v32 = vmul.f32 1.442695, %v3212_v15  ;;  %v3010_v4 = vsub.f32 %v2814_v41, %v2912_v14 }
 0x25c   : > { %v7587_v25 = vpop.f32.mrf.mxu0  ;;  %v2417_v7 = vadd.f32 %v8621_v30, %v8620_v42  ;;  %v7607_v58 = vpop.eup %5539  ;;  %v3942_v49 = vmul.f32 0.6931472, %v5538_v21  ;;  %v3955_v45 = vand.u32 2147483647, %v7553_v13  ;;  %v3011_v21 = vsub.f32 %v2815_v63, %v2913_v5 }
 0x25d   : > { %8616 = vst [vmem:[#allocation14_spill] sm:$0xff] %v7587_v25  ;;  %v7593_v26 = vpop.f32.mrf.mxu1  ;;  %v7605_v25 = vadd.f32 %v7334_v10, %v7330_v54  ;;  %v3967_v35 = vadd.f32 1.0, %v7607_v58  ;;  %v7616_v54 = vpop.eup %5541  ;;  %v2816_v30 = vmax.f32 %v7479_v60, 0.0  ;;  %5549 = vpow2.f32 %v3371_v32 }
 0x25e   : > { %8617 = vst [vmem:[#allocation15_spill] sm:$0xff] %v7593_v26  ;;  %v2065_v57 = vpop.f32.mrf.mxu0  ;;  %v3953_v26 = vadd.f32 1.0, %v3952_v43  ;;  %v3948_v10 = vsel %vm7595_vm12, %v3945_v16, %v3942_v49  ;;  %v2718_v43 = vld [vmem:[%s5806_s8 + $0x1c8] sm:$0xff]  ;;  %v5544_v41 = vpop.eup %5543  ;;  %v3962_v63 = vadd.f32 1.0, %v3961_v2  ;;  %v3976_v5 = vadd.f32 1.0, %v7616_v54 }
 0x25f   : > { %v2490_v18 = vpop.f32.mrf.mxu1  ;;  %v3373_v57 = vmul.f32 1.442695, %v3213_v38  ;;  %v4382_v14 = vadd.f32 %v3948_v10, %v3010_v4  ;;  %5551 = vlog2.f32 %v3967_v35  ;;  %v2422_v38 = vadd.f32 %v7302_v24, %v7290_v19  ;;  %v2719_v4 = vld [vmem:[%s5806_s8 + $0x1d0] sm:$0xff] }
 0x260   : > { %v7610_v39 = vpop.f32.mrf.mxu0  ;;  %v7623_v18 = vadd.f32 %v7386_v27, %v2417_v7  ;;  %v3954_v17 = vmul.f32 %v7553_v13, %v3953_v26  ;;  %vm3956_vm13 = vcmp.lt.f32.partialorder %v3955_v45, 0.0004427343  ;;  %v2914_v32 = vmul.f32 %v2718_v43, %v7479_v60 }
 0x261   : > { %8622 = vst [vmem:[#allocation8_spill] sm:$0xff] %v7610_v39  ;;  %v7614_v42 = vpop.f32.mrf.mxu1  ;;  %v3951_v39 = vmul.f32 0.6931472, %v5544_v41  ;;  %v4536_v49 = vsel %vm4426_vm2, %v4382_v14, 0.0  ;;  %5553 = vpow2.f32 %v3373_v57  ;;  %v3964_v24 = vand.u32 2147483647, %v7567_v34 }
 0x262   : > { %8623 = vst [vmem:[#allocation9_spill] sm:$0xff] %v7614_v42  ;;  %v2070_v15 = vpop.f32.mrf.mxu0  ;;  %v4537_v35 = vadd.f32 %v4536_v49, %v4535_v51  ;;  %5555 = vlog2.f32 %v3976_v5  ;;  %v7637_v26 = vpop.eup %5545  ;;  %v3116_v45 = vand.u32 2147483647, %v7623_v18  ;;  %v7642_v60 = vadd.f32 %v7386_v27, %v2422_v38  ;;  %v2720_v38 = vld [vmem:[%s5806_s8 + $0x1d8] sm:$0xff] }
 0x263   : > { %v2495_v42 = vpop.f32.mrf.mxu1  ;;  %v3957_v19 = vsel %vm3956_vm13, %v3954_v17, %v3951_v39  ;;  %v3963_v51 = vmul.f32 %v7567_v34, %v3962_v63  ;;  %v2915_v39 = vmul.f32 %v2719_v4, %v7509_v1  ;;  %v3985_v43 = vadd.f32 1.0, %v7637_v26 }
 0x264   : > { %v7629_v16 = vpop.f32.mrf.mxu0  ;;  %v4383_v2 = vadd.f32 %v3957_v19, %v3011_v21  ;;  %v2817_v42 = vmax.f32 %v7509_v1, 0.0  ;;  %v2425_v15 = vadd.f32 %v7313_v40, %v7309_v0  ;;  %v3970_v17 = vmul.f32 -0.5, %v7607_v58 }
 0x265   : > { %v7634_v7 = vpop.f32.mrf.mxu1  ;;  %v5548_v10 = vpop.eup %5547  ;;  %v3214_v5 = vsub.f32 0.0, %v3116_v45  ;;  %v3012_v34 = vsub.f32 %v2816_v30, %v2914_v32  ;;  %vm3965_vm14 = vcmp.lt.f32.partialorder %v3964_v24, 0.0004427343  ;;  %5557 = vlog2.f32 %v3985_v43 }
 0x266   : > { %v2073_v13 = vpop.f32.mrf.mxu0  ;;  %v4538_v21 = vsel %vm4426_vm2, %v4383_v2, 0.0  ;;  %v3960_v14 = vmul.f32 0.6931472, %v5548_v10  ;;  %v3979_v4 = vmul.f32 -0.5, %v7616_v54  ;;  %v3117_v40 = vand.u32 2147483647, %v7642_v60 }
 0x267   : > { %v2498_v57 = vpop.f32.mrf.mxu1  ;;  %v4539_v19 = vadd.f32 %v4538_v21, %v4537_v35  ;;  %v3375_v0 = vmul.f32 1.442695, %v3214_v5  ;;  %v2916_v10 = vmul.f32 %v2720_v38, %v7519_v62  ;;  %v7661_v45 = vadd.f32 %v7386_v27, %v2425_v15 }
 0x268   : > { %v7649_v41 = vpop.f32.mrf.mxu0  ;;  %v3966_v63 = vsel %vm3965_vm14, %v3963_v51, %v3960_v14  ;;  %v2818_v57 = vmax.f32 %v7519_v62, 0.0  ;;  %v3013_v32 = vsub.f32 %v2817_v42, %v2915_v39  ;;  %v3971_v35 = vadd.f32 1.0, %v3970_v17  ;;  %v2721_v39 = vld [vmem:[%s5806_s8 + $0x1e0] sm:$0xff] }
 0x269   : > { %v7654_v49 = vpop.f32.mrf.mxu1  ;;  %v4384_v2 = vadd.f32 %v3966_v63, %v3012_v34  ;;  %5559 = vpow2.f32 %v3375_v0  ;;  %v3215_v24 = vsub.f32 0.0, %v3117_v40  ;;  %v3973_v21 = vand.u32 2147483647, %v7607_v58 }
 0x26a   : > { %8624 = vst [vmem:[#allocation16_spill] sm:$0xff] %v7654_v49  ;;  %v2078_v1 = vpop.f32.mrf.mxu0  ;;  %v3118_v14 = vand.u32 2147483647, %v7661_v45  ;;  %v7672_v62 = vadd.f32 %v7386_v27, %v7605_v25  ;;  %v7674_v38 = vpop.eup %5549  ;;  %v3980_v42 = vadd.f32 1.0, %v3979_v4  ;;  %v3988_v17 = vmul.f32 -0.5, %v7637_v26 }
 0x26b   : > { %v2503_v13 = vpop.f32.mrf.mxu1  ;;  %v4540_v43 = vsel %vm4426_vm2, %v4384_v2, 0.0  ;;  %v3377_v34 = vmul.f32 1.442695, %v3215_v24  ;;  %v3014_v0 = vsub.f32 %v2818_v57, %v2916_v10  ;;  %v3982_v40 = vand.u32 2147483647, %v7616_v54 }
 0x26c   : > { %v7663_v30 = vpop.f32.mrf.mxu0  ;;  %v4541_v5 = vadd.f32 %v4540_v43, %v4539_v19  ;;  %v5552_v63 = vpop.eup %5551  ;;  %v2819_v13 = vmax.f32 %v7540_v36, 0.0  ;;  %v3994_v2 = vadd.f32 1.0, %v7674_v38  ;;  %v3216_v19 = vsub.f32 0.0, %v3118_v14 }
 0x26d   : > { %8625 = vst [vmem:[#allocation17_spill] sm:$0xff] %v7663_v30  ;;  %v7665_v51 = vpop.f32.mrf.mxu1  ;;  %5561 = vpow2.f32 %v3377_v34  ;;  %vm3974_vm15 = vcmp.lt.f32.partialorder %v3973_v21, 0.0004427343  ;;  %v2917_v57 = vmul.f32 %v2721_v39, %v7540_v36  ;;  %v3119_v10 = vand.u32 2147483647, %v7672_v62 }
 0x26e   : > { %8626 = vst [vmem:[#allocation18_spill] sm:$0xff] %v7665_v51  ;;  %v2081_v15 = vpop.f32.mrf.mxu0  ;;  %v3972_v51 = vmul.f32 %v7607_v58, %v3971_v35  ;;  %v7686_v43 = vpop.eup %5553  ;;  %5563 = vlog2.f32 %v3994_v2  ;;  %v2433_v21 = vadd.f32 %v7353_v52, %v7347_v20  ;;  %vm3983_vm0 = vcmp.lt.f32.partialorder %v3982_v40, 0.0004427343 }
 0x26f   : > { %v2506_v1 = vpop.f32.mrf.mxu1  ;;  %v3969_v15 = vmul.f32 0.6931472, %v5552_v63  ;;  %v3989_v63 = vadd.f32 1.0, %v3988_v17  ;;  %v4003_v58 = vadd.f32 1.0, %v7686_v43  ;;  %v3991_v36 = vand.u32 2147483647, %v7637_v26 }
 0x270   : > { %v7681_v25 = vpop.f32.mrf.mxu0  ;;  %v5556_v1 = vpop.eup %5555  ;;  %v3217_v39 = vsub.f32 0.0, %v3119_v10  ;;  %v7703_v10 = vadd.f32 %v7386_v27, %v2433_v21  ;;  %v2820_v21 = vmax.f32 %v7570_v48, 0.0 }
 0x271   : > { %8627 = vst [vmem:[#allocation19_spill] sm:$0xff] %v7681_v25  ;;  %v7684_v4 = vpop.f32.mrf.mxu1  ;;  %v3975_v30 = vsel %vm3974_vm15, %v3972_v51, %v3969_v15  ;;  %v3981_v25 = vmul.f32 %v7616_v54, %v3980_v42  ;;  %v3978_v34 = vmul.f32 0.6931472, %v5556_v1  ;;  %5565 = vlog2.f32 %v4003_v58 }
 0x272   : > { %8628 = vst [vmem:[#allocation20_spill] sm:$0xff] %v7684_v4  ;;  %v2086_v24 = vpop.f32.mrf.mxu0  ;;  %v4385_v14 = vadd.f32 %v3975_v30, %v3013_v32  ;;  %v3379_v4 = vmul.f32 1.442695, %v3216_v19  ;;  %v5558_v32 = vpop.eup %5557  ;;  %v3015_v15 = vsub.f32 %v2819_v13, %v2917_v57  ;;  %v3381_v20 = vmul.f32 1.442695, %v3217_v39 }
 0x273   : > { %v2511_v35 = vpop.f32.mrf.mxu1  ;;  %v3984_v42 = vsel %vm3983_vm0, %v3981_v25, %v3978_v34  ;;  %v3987_v19 = vmul.f32 0.6931472, %v5558_v32  ;;  %v3990_v40 = vmul.f32 %v7637_v26, %v3989_v63  ;;  %v3997_v24 = vmul.f32 -0.5, %v7674_v38 }
 0x274   : > { %v7694_v49 = vpop.f32.mrf.mxu0  ;;  %v4542_v54 = vsel %vm4426_vm2, %v4385_v14, 0.0  ;;  %5567 = vpow2.f32 %v3379_v4  ;;  %v4386_v2 = vadd.f32 %v3984_v42, %v3014_v0  ;;  %vm3992_vm1 = vcmp.lt.f32.partialorder %v3991_v36, 0.0004427343  ;;  %v2722_v4 = vld [vmem:[%s5806_s8 + $0x1e8] sm:$0xff] }
 0x275   : > { %v7697_v51 = vpop.f32.mrf.mxu1  ;;  %v4543_v17 = vadd.f32 %v4542_v54, %v4541_v5  ;;  %5569 = vpow2.f32 %v3381_v20  ;;  %v2438_v5 = vadd.f32 %v7368_v23, %v7364_v31  ;;  %v3993_v57 = vsel %vm3992_vm1, %v3990_v40, %v3987_v19  ;;  %v2723_v54 = vld [vmem:[%s5806_s8 + $0x1f0] sm:$0xff] }
 0x276   : > { %v2089_v30 = vpop.f32.mrf.mxu0  ;;  %v4544_v25 = vsel %vm4426_vm2, %v4386_v2, 0.0  ;;  %v7713_v13 = vpop.eup %5559  ;;  %v4387_v58 = vadd.f32 %v3993_v57, %v3015_v15  ;;  %v4006_v35 = vmul.f32 -0.5, %v7686_v43  ;;  %v2918_v36 = vmul.f32 %v2722_v4, %v7570_v48 }
 0x277   : > { %v2514_v52 = vpop.f32.mrf.mxu1  ;;  %v4545_v26 = vadd.f32 %v4544_v25, %v4543_v17  ;;  %v4012_v14 = vadd.f32 1.0, %v7713_v13  ;;  %v3998_v39 = vadd.f32 1.0, %v3997_v24  ;;  %v3120_v31 = vand.u32 2147483647, %v7703_v10 }
 0x278   : > { %v7705_v1 = vpop.f32.mrf.mxu0  ;;  %v4546_v42 = vsel %vm4426_vm2, %v4387_v58, 0.0  ;;  %v4000_v30 = vand.u32 2147483647, %v7674_v38  ;;  %v7726_v32 = vadd.f32 %v7386_v27, %v2438_v5  ;;  %v2821_v52 = vmax.f32 %v7576_v37, 0.0 }
 0x279   : > { %v7711_v0 = vpop.f32.mrf.mxu1  ;;  %5571 = vlog2.f32 %v4012_v14  ;;  %v4547_v15 = vadd.f32 %v4546_v42, %v4545_v26  ;;  %v2919_v19 = vmul.f32 %v2723_v54, %v7576_v37  ;;  %v4007_v40 = vadd.f32 1.0, %v4006_v35 }
 0x27a   : > { %v2094_v63 = vpop.f32.mrf.mxu0  ;;  %v7730_v2 = vpop.eup %5561  ;;  %v3999_v57 = vmul.f32 %v7674_v38, %v3998_v39  ;;  %v4009_v5 = vand.u32 2147483647, %v7686_v43  ;;  %v3016_v14 = vsub.f32 %v2820_v21, %v2918_v36  ;;  %vm4001_vm3 = vcmp.lt.f32.partialorder %v4000_v30, 0.0004427343 }
 0x27b   : > { %v2519_v34 = vpop.f32.mrf.mxu1  ;;  %v5564_v20 = vpop.eup %5563  ;;  %v4021_v24 = vadd.f32 1.0, %v7730_v2  ;;  %v3218_v63 = vsub.f32 0.0, %v3120_v31  ;;  %v3121_v26 = vand.u32 2147483647, %v7726_v32  ;;  %v2441_v54 = vadd.f32 %v7384_v55, %v7379_v53 }
 0x27c   : > { %v7721_v23 = vpop.f32.mrf.mxu0  ;;  %v3996_v4 = vmul.f32 0.6931472, %v5564_v20  ;;  %v4015_v21 = vmul.f32 -0.5, %v7713_v13  ;;  %v3017_v30 = vsub.f32 %v2821_v52, %v2919_v19  ;;  %vm4010_vm4 = vcmp.lt.f32.partialorder %v4009_v5, 0.0004427343  ;;  %v2725_v52 = vld [vmem:[%s5806_s8 + $0x200] sm:$0xff] }
 0x27d   : > { %v7728_v17 = vpop.f32.mrf.mxu1  ;;  %5573 = vlog2.f32 %v4021_v24  ;;  %v3383_v24 = vmul.f32 1.442695, %v3218_v63  ;;  %v7760_v19 = vadd.f32 %v7386_v27, %v2441_v54  ;;  %v2822_v63 = vmax.f32 %v7623_v18, 0.0 }
 0x27e   : > { %v2097_v48 = vpop.f32.mrf.mxu0  ;;  %v5566_v37 = vpop.eup %5565  ;;  %v4002_v35 = vsel %vm4001_vm3, %v3999_v57, %v3996_v4  ;;  %v2724_v4 = vld [vmem:[%s5806_s8 + $0x1f8] sm:$0xff]  ;;  %v4024_v57 = vmul.f32 -0.5, %v7730_v2  ;;  %v2823_v54 = vmax.f32 %v7642_v60, 0.0 }
 0x27f   : > { %v2522_v25 = vpop.f32.mrf.mxu1  ;;  %v4388_v39 = vadd.f32 %v4002_v35, %v3016_v14  ;;  %v4005_v31 = vmul.f32 0.6931472, %v5566_v37  ;;  %v4008_v48 = vmul.f32 %v7686_v43, %v4007_v40  ;;  %v3219_v14 = vsub.f32 0.0, %v3121_v26 }
 0x280   : > { %v7737_v58 = vpop.f32.mrf.mxu0 }
 0x281   : > { %v7740_v34 = vpop.f32.mrf.mxu1  ;;  %v7744_v38 = vpop.eup %5567  ;;  %v4548_v53 = vsel %vm4426_vm2, %v4388_v39, 0.0  ;;  %v4011_v55 = vsel %vm4010_vm4, %v4008_v48, %v4005_v31  ;;  %v2920_v48 = vmul.f32 %v2724_v4, %v7623_v18  ;;  %v3385_v18 = vmul.f32 1.442695, %v3219_v14  ;;  %v7788_v14 = vld [vmem:[#allocation3] ss:$0 sm:$0xff] }
 0x282   : > { %v2102_v42 = vpop.f32.mrf.mxu0  ;;  %v4030_v20 = vadd.f32 1.0, %v7744_v38  ;;  %v7756_v43 = vpop.eup %5569  ;;  %v4549_v40 = vadd.f32 %v4548_v53, %v4547_v15  ;;  %v4389_v35 = vadd.f32 %v4011_v55, %v3017_v30  ;;  %v2446_v15 = vadd.f32 %v7416_v46, %v7409_v8  ;;  %v2726_v46 = vld [vmem:[%s5806_s8 + $0x208] sm:$0xff] }
 0x283   : > { %v2527_v36 = vpop.f32.mrf.mxu1  ;;  %v4016_v42 = vadd.f32 1.0, %v4015_v21  ;;  %v4039_v39 = vadd.f32 1.0, %v7756_v43  ;;  %v2921_v21 = vmul.f32 %v2725_v52, %v7642_v60  ;;  %v4025_v55 = vadd.f32 1.0, %v4024_v57 }
 0x284   : > { %v7749_v25 = vpop.f32.mrf.mxu0  ;;  %5575 = vlog2.f32 %v4030_v20  ;;  %v4550_v26 = vsel %vm4426_vm2, %v4389_v35, 0.0  ;;  %v4018_v36 = vand.u32 2147483647, %v7713_v13  ;;  %v3122_v4 = vand.u32 2147483647, %v7760_v19 }
 0x285   : > { %v7754_v37 = vpop.f32.mrf.mxu1  ;;  %v7771_v27 = vadd.f32 %v4550_v26, %v4549_v40  ;;  %5577 = vlog2.f32 %v4039_v39  ;;  %v4017_v8 = vmul.f32 %v7713_v13, %v4016_v42  ;;  %v2449_v40 = vadd.f32 %v7430_v11, %v7426_v44 }
 0x286   : > { %v2105_v5 = vpop.f32.mrf.mxu0  ;;  %v5572_v53 = vpop.eup %5571  ;;  %5579 = vpow2.f32 %v3383_v24  ;;  %vm7782_vm5 = vcmp.lt.f32.partialorder %v4018_v36, 0.0004427343  ;;  %v4027_v57 = vand.u32 2147483647, %v7730_v2  ;;  %v4033_v24 = vmul.f32 -0.5, %v7744_v38 }
 0x287   : > { %v2530_v31 = vpop.f32.mrf.mxu1  ;;  %v4014_v5 = vmul.f32 0.6931472, %v5572_v53  ;;  %v7791_v52 = vadd.f32 %v7788_v14, %v2446_v15  ;;  %v3018_v42 = vsub.f32 %v2822_v63, %v2920_v48  ;;  %v3019_v11 = vsub.f32 %v2823_v54, %v2921_v21 }
 0x288   : > { %v7769_v30 = vpop.f32.mrf.mxu0  ;;  %v2824_v39 = vmax.f32 %v7661_v45, 0.0  ;;  %v4026_v53 = vmul.f32 %v7730_v2, %v4025_v55  ;;  %5581 = vpow2.f32 %v3385_v18  ;;  %v3220_v15 = vsub.f32 0.0, %v3122_v4 }
 0x289   : > { %8629 = vst [vmem:[#allocation21_spill] sm:$0xff] %v7769_v30  ;;  %v7775_v20 = vpop.f32.mrf.mxu1  ;;  %v4020_v44 = vsel %vm7782_vm5, %v4017_v8, %v4014_v5  ;;  %v4042_v63 = vmul.f32 -0.5, %v7756_v43  ;;  %v7805_v48 = vadd.f32 %v7788_v14, %v2449_v40  ;;  %vm4028_vm6 = vcmp.lt.f32.partialorder %v4027_v57, 0.0004427343 }
 0x28a   : > { %8630 = vst [vmem:[#allocation22_spill] sm:$0xff] %v7775_v20  ;;  %v2110_v35 = vpop.f32.mrf.mxu0  ;;  %v5574_v36 = vpop.eup %5573  ;;  %v4390_v30 = vadd.f32 %v4020_v44, %v3018_v42  ;;  %v4034_v21 = vadd.f32 1.0, %v4033_v24  ;;  %v3123_v5 = vand.u32 2147483647, %v7791_v52  ;;  %v2454_v2 = vadd.f32 %v7446_v59, %v7440_v29 }
 0x28b   : > { %v2535_v31 = vpop.f32.mrf.mxu1  ;;  %v2922_v35 = vmul.f32 %v2726_v46, %v7661_v45  ;;  %v2825_v18 = vmax.f32 %v7672_v62, 0.0  ;;  %v3387_v40 = vmul.f32 1.442695, %v3220_v15  ;;  %v4043_v42 = vadd.f32 1.0, %v4042_v63 }
 0x28c   : > { %v7793_v13 = vpop.f32.mrf.mxu0  ;;  %v2727_v31 = vld [vmem:[%s5806_s8 + $0x210] sm:$0xff]  ;;  %v4552_v24 = vsel %vm4426_vm2, %v4390_v30, 0.0  ;;  %v4045_v29 = vand.u32 2147483647, %v7756_v43  ;;  %v3124_v59 = vand.u32 2147483647, %v7805_v48 }
 0x28d   : > { %8633 = vst [vmem:[#allocation23_spill] sm:$0xff] %v7793_v13  ;;  %v7798_v26 = vpop.f32.mrf.mxu1  ;;  %v4023_v13 = vmul.f32 0.6931472, %v5574_v36  ;;  %v2923_v4 = vmul.f32 %v2727_v31, %v7672_v62  ;;  %v4035_v36 = vmul.f32 %v7744_v38, %v4034_v21  ;;  %v7822_v62 = vadd.f32 %v7788_v14, %v2454_v2 }
 0x28e   : > { %v2113_v20 = vpop.f32.mrf.mxu0  ;;  %v3020_v15 = vsub.f32 %v2824_v39, %v2922_v35  ;;  %5583 = vpow2.f32 %v3387_v40  ;;  %v3222_v39 = vsub.f32 0.0, %v3124_v59  ;;  %vm4046_vm8 = vcmp.lt.f32.partialorder %v4045_v29, 0.0004427343 }
 0x28f   : > { %v2538_v54 = vpop.f32.mrf.mxu1  ;;  %v4029_v55 = vsel %vm4028_vm6, %v4026_v53, %v4023_v13  ;;  %v4036_v20 = vand.u32 2147483647, %v7744_v38  ;;  %v3221_v53 = vsub.f32 0.0, %v3123_v5  ;;  %v3021_v30 = vsub.f32 %v2825_v18, %v2923_v4 }
 0x290   : > { %v7810_v45 = vpop.f32.mrf.mxu0  ;;  %v4391_v46 = vadd.f32 %v4029_v55, %v3019_v11  ;;  %v4553_v55 = vadd.f32 %v4552_v24, %v7771_v27  ;;  %v2457_v38 = vadd.f32 %v7465_v56, %v7456_v50  ;;  %v3125_v4 = vand.u32 2147483647, %v7822_v62 }
 0x291   : > { %v7815_v8 = vpop.f32.mrf.mxu1  ;;  %v5576_v57 = vpop.eup %5575  ;;  %vm4037_vm7 = vcmp.lt.f32.partialorder %v4036_v20, 0.0004427343  ;;  %v3389_v18 = vmul.f32 1.442695, %v3221_v53  ;;  %v3391_v29 = vmul.f32 1.442695, %v3222_v39 }
 0x292   : > { %v2118_v60 = vpop.f32.mrf.mxu0  ;;  %v4032_v44 = vmul.f32 0.6931472, %v5576_v57  ;;  %v4554_v11 = vsel %vm4426_vm2, %v4391_v46, 0.0  ;;  %v5578_v54 = vpop.eup %5577  ;;  %v4044_v46 = vmul.f32 %v7756_v43, %v4043_v42  ;;  %v7843_v43 = vadd.f32 %v7788_v14, %v2457_v38  ;;  %v8639_v53 = vld [vmem:[#allocation11_spill] sm:$0xff] }
 0x293   : > { %v2543_v13 = vpop.f32.mrf.mxu1  ;;  %v7832_v5 = vpop.eup %5579  ;;  %v4041_v57 = vmul.f32 0.6931472, %v5578_v54  ;;  %v4555_v20 = vadd.f32 %v4554_v11, %v4553_v55  ;;  %5585 = vpow2.f32 %v3389_v18  ;;  %v3223_v55 = vsub.f32 0.0, %v3125_v4  ;;  %v8643_v18 = vld [vmem:[#allocation12_spill] sm:$0xff] }
 0x294   : > { %v7824_v31 = vpop.f32.mrf.mxu0  ;;  %v4038_v60 = vsel %vm4037_vm7, %v4035_v36, %v4032_v44  ;;  %v4048_v44 = vadd.f32 1.0, %v7832_v5  ;;  %v8638_v36 = vld [vmem:[#allocation10_spill] sm:$0xff]  ;;  %v3126_v38 = vand.u32 2147483647, %v7843_v43 }
 0x295   : > { %8634 = vst [vmem:[#allocation24_spill] sm:$0xff] %v7824_v31  ;;  %v7827_v63 = vpop.f32.mrf.mxu1  ;;  %v4392_v2 = vadd.f32 %v4038_v60, %v3020_v15  ;;  %v4047_v24 = vsel %vm4046_vm8, %v4044_v46, %v4041_v57  ;;  %v7845_v59 = vpop.eup %5581  ;;  %v2462_v11 = vadd.f32 %v8639_v53, %v8638_v36  ;;  %v2729_v36 = vld [vmem:[%s5806_s8 + $0x220] sm:$0xff] }
 0x296   : > { %8635 = vst [vmem:[#allocation25_spill] sm:$0xff] %v7827_v63  ;;  %v2121_v21 = vpop.f32.mrf.mxu0  ;;  %v4393_v13 = vadd.f32 %v4047_v24, %v3021_v30  ;;  %5587 = vlog2.f32 %v4048_v44  ;;  %v4057_v57 = vadd.f32 1.0, %v7845_v59  ;;  %v3224_v24 = vsub.f32 0.0, %v3126_v38  ;;  %v2733_v63 = vld [vmem:[%s5806_s8 + $0x240] sm:$0xff] }
 0x297   : > { %v2546_v35 = vpop.f32.mrf.mxu1  ;;  %v4556_v40 = vsel %vm4426_vm2, %v4392_v2, 0.0  ;;  %5589 = vpow2.f32 %v3391_v29  ;;  %v7859_v46 = vadd.f32 %v7788_v14, %v2462_v11  ;;  %v4051_v11 = vmul.f32 -0.5, %v7832_v5 }
 0x298   : > { %v7836_v27 = vpop.f32.mrf.mxu0  ;;  %v4557_v56 = vadd.f32 %v4556_v40, %v4555_v20  ;;  %v4558_v54 = vsel %vm4426_vm2, %v4393_v13, 0.0  ;;  %v3393_v35 = vmul.f32 1.442695, %v3223_v55  ;;  %v8642_v20 = vld [vmem:[#allocation7_spill] sm:$0xff]  ;;  %v2728_v40 = vld [vmem:[%s5806_s8 + $0x218] sm:$0xff]  ;;  %5591 = vlog2.f32 %v4057_v57  ;;  %v2731_v55 = vld [vmem:[%s5806_s8 + $0x230] sm:$0xff] }
 0x299   : > { %8636 = vst [vmem:[#allocation26_spill] sm:$0xff] %v7836_v27  ;;  %v7839_v50 = vpop.f32.mrf.mxu1  ;;  %v2465_v4 = vadd.f32 %v8643_v18, %v8642_v20  ;;  %v3127_v13 = vand.u32 2147483647, %v7859_v46  ;;  %v2924_v29 = vmul.f32 %v2728_v40, %v7703_v10  ;;  %v3395_v53 = vmul.f32 1.442695, %v3224_v24 }
 0x29a   : > { %8637 = vst [vmem:[#allocation27_spill] sm:$0xff] %v7839_v50  ;;  %v2126_v42 = vpop.f32.mrf.mxu0  ;;  %v7852_v30 = vadd.f32 %v4558_v54, %v4557_v56  ;;  %5593 = vpow2.f32 %v3393_v35  ;;  %v2470_v57 = vadd.f32 %v7514_v61, %v7511_v9  ;;  %v2925_v20 = vmul.f32 %v2729_v36, %v7726_v32 }
 0x29b   : > { %v2551_v15 = vpop.f32.mrf.mxu1  ;;  %v7864_v56 = vpop.eup %5583  ;;  %v7868_v44 = vadd.f32 %v7788_v14, %v2465_v4  ;;  %v2826_v42 = vmax.f32 %v7703_v10, 0.0  ;;  %v3225_v38 = vsub.f32 0.0, %v3127_v13  ;;  %v2827_v10 = vmax.f32 %v7726_v32, 0.0  ;;  %v2732_v13 = vld [vmem:[%s5806_s8 + $0x238] sm:$0xff] }
 0x29c   : > { %v7850_v60 = vpop.f32.mrf.mxu0  ;;  %v2730_v15 = vld [vmem:[%s5806_s8 + $0x228] sm:$0xff]  ;;  %v4066_v54 = vadd.f32 1.0, %v7864_v56  ;;  %v2828_v18 = vmax.f32 %v7760_v19, 0.0  ;;  %v2829_v40 = vmax.f32 %v7791_v52, 0.0  ;;  %v2927_v24 = vmul.f32 %v2731_v55, %v7791_v52 }
 0x29d   : > { %8640 = vst [vmem:[#allocation10_spill] sm:$0xff] %v7850_v60  ;;  %v7854_v21 = vpop.f32.mrf.mxu1  ;;  %v3022_v35 = vsub.f32 %v2826_v42, %v2924_v29  ;;  %v2926_v4 = vmul.f32 %v2730_v15, %v7760_v19  ;;  %5595 = vpow2.f32 %v3395_v53  ;;  %v4052_v60 = vadd.f32 1.0, %v4051_v11  ;;  %v8644_v19 = vld [vmem:[#allocation13_spill] sm:$0xff] }
 0x29e   : > { %8641 = vst [vmem:[#allocation11_spill] sm:$0xff] %v7854_v21  ;;  %v2129_v2 = vpop.f32.mrf.mxu0  ;;  %v4054_v9 = vand.u32 2147483647, %v7832_v5  ;;  %5597 = vlog2.f32 %v4066_v54  ;;  %v3397_v61 = vmul.f32 1.442695, %v3225_v38  ;;  %v7894_v36 = vadd.f32 %v7788_v14, %v2470_v57 }
 0x29f   : > { %v2554_v39 = vpop.f32.mrf.mxu1  ;;  %v3128_v2 = vand.u32 2147483647, %v7868_v44  ;;  %v2473_v52 = vadd.f32 %v8644_v19, %v7525_v3  ;;  %v4060_v53 = vmul.f32 -0.5, %v7845_v59  ;;  %v4063_v11 = vand.u32 2147483647, %v7845_v59 }
 0x2a0   : > { %v7880_v39 = vpop.eup %5585  ;;  %v2830_v15 = vmax.f32 %v7805_v48, 0.0  ;;  %v2928_v54 = vmul.f32 %v2732_v13, %v7805_v48  ;;  %v3023_v38 = vsub.f32 %v2827_v10, %v2925_v20  ;;  %v7902_v50 = vsub.f32 %v2828_v18, %v2926_v4 }
 0x2a1   : > { %v4075_v32 = vadd.f32 1.0, %v7880_v39  ;;  %v3226_v29 = vsub.f32 0.0, %v3128_v2  ;;  %v2478_v2 = vadd.f32 %v7549_v22, %v7545_v33  ;;  %v4053_v57 = vmul.f32 %v7832_v5, %v4052_v60  ;;  %v2736_v5 = vld [vmem:[%s5806_s8 + $0x258] sm:$0xff] }
 0x2a2   : > { %v7907_v27 = vsub.f32 %v2829_v40, %v2927_v24  ;;  %5599 = vpow2.f32 %v3397_v61  ;;  %v3129_v48 = vand.u32 2147483647, %v7894_v36  ;;  %vm7917_vm9 = vcmp.lt.f32.partialorder %v4054_v9, 0.0004427343  ;;  %v2734_v40 = vld [vmem:[%s5806_s8 + $0x248] sm:$0xff] }
 0x2a3   : > { %v5588_v21 = vpop.eup %5587  ;;  %5601 = vlog2.f32 %v4075_v32  ;;  %v3399_v31 = vmul.f32 1.442695, %v3226_v29  ;;  %v4061_v22 = vadd.f32 1.0, %v4060_v53  ;;  %vm7921_vm10 = vcmp.lt.f32.partialorder %v4063_v11, 0.0004427343  ;;  %v2735_v29 = vld [vmem:[%s5806_s8 + $0x250] sm:$0xff] }
 0x2a4   : > { %v7890_v42 = vpop.eup %5589  ;;  %v4050_v55 = vmul.f32 0.6931472, %v5588_v21  ;;  %v7913_v21 = vadd.f32 %v7788_v14, %v2473_v52  ;;  %v7925_v60 = vsub.f32 %v2830_v15, %v2928_v54  ;;  %v4069_v18 = vmul.f32 -0.5, %v7864_v56 }
 0x2a5   : > { %v4084_v3 = vadd.f32 1.0, %v7890_v42  ;;  %v5592_v19 = vpop.eup %5591  ;;  %v2831_v4 = vmax.f32 %v7822_v62, 0.0  ;;  %v7933_v24 = vadd.f32 %v7788_v14, %v2478_v2  ;;  %v2929_v9 = vmul.f32 %v2733_v63, %v7822_v62 }
 0x2a6   : > { %v4056_v20 = vsel %vm7917_vm9, %v4053_v57, %v4050_v55  ;;  %v4059_v13 = vmul.f32 0.6931472, %v5592_v19  ;;  %v2832_v61 = vmax.f32 %v7843_v43, 0.0  ;;  %v3227_v52 = vsub.f32 0.0, %v3129_v48 }
 0x2a7   : > { %v7915_v10 = vpop.eup %5593  ;;  %5603 = vlog2.f32 %v4084_v3  ;;  %v3130_v53 = vand.u32 2147483647, %v7913_v21  ;;  %v4394_v11 = vadd.f32 %v4056_v20, %v3022_v35  ;;  %v4078_v15 = vmul.f32 -0.5, %v7880_v39 }
 0x2a8   : > { %v4093_v32 = vadd.f32 1.0, %v7915_v10  ;;  %5605 = vpow2.f32 %v3399_v31  ;;  %v2930_v54 = vmul.f32 %v2734_v40, %v7843_v43  ;;  %v2481_v55 = vadd.f32 %v7563_v6, %v7560_v28 }
 0x2a9   : > { %v4062_v2 = vmul.f32 %v7845_v59, %v4061_v22  ;;  %v4070_v62 = vadd.f32 1.0, %v4069_v18  ;;  %v4072_v63 = vand.u32 2147483647, %v7864_v56  ;;  %v3131_v57 = vand.u32 2147483647, %v7933_v24 }
 0x2aa   : > { %v7947_v3 = vpop.eup %5595  ;;  %v4081_v31 = vand.u32 2147483647, %v7880_v39  ;;  %v7950_v35 = vsub.f32 %v2831_v4, %v2929_v9  ;;  %v2833_v19 = vmax.f32 %v7859_v46, 0.0  ;;  %v2931_v43 = vmul.f32 %v2735_v29, %v7859_v46 }
 0x2ab   : > { %v5598_v48 = vpop.eup %5597  ;;  %v4065_v28 = vsel %vm7921_vm10, %v4062_v2, %v4059_v13  ;;  %5607 = vlog2.f32 %v4093_v32  ;;  %v3401_v6 = vmul.f32 1.442695, %v3227_v52  ;;  %v3228_v59 = vsub.f32 0.0, %v3130_v53  ;;  %v2737_v2 = vld [vmem:[%s5806_s8 + $0x260] sm:$0xff] }
 0x2ac   : > { %v4560_v33 = vsel %vm4426_vm2, %v4394_v11, 0.0  ;;  %v4079_v22 = vadd.f32 1.0, %v4078_v15  ;;  %v7957_v20 = vsub.f32 %v2832_v61, %v2930_v54  ;;  %v7960_v18 = vadd.f32 %v7788_v14, %v2481_v55 }
 0x2ad   : > { %v4071_v4 = vmul.f32 %v7864_v56, %v4070_v62  ;;  %vm7963_vm11 = vcmp.lt.f32.partialorder %v4072_v63, 0.0004427343  ;;  %v4102_v46 = vadd.f32 1.0, %v7947_v3  ;;  %v3229_v13 = vsub.f32 0.0, %v3131_v57 }
 0x2ae   : > { %v4395_v9 = vadd.f32 %v4065_v28, %v3023_v38  ;;  %v4068_v32 = vmul.f32 0.6931472, %v5598_v48  ;;  %v4087_v29 = vmul.f32 -0.5, %v7890_v42  ;;  %v7970_v61 = vsub.f32 %v2833_v19, %v2931_v43 }
 0x2af   : > { %v7972_v52 = vpop.eup %5599  ;;  %v4561_v53 = vadd.f32 %v4560_v33, %v7852_v30  ;;  %vm7975_vm12 = vcmp.lt.f32.partialorder %v4081_v31, 0.0004427343  ;;  %5609 = vpow2.f32 %v3401_v6  ;;  %v3403_v11 = vmul.f32 1.442695, %v3228_v59 }
 0x2b0   : > { %v5602_v15 = vpop.eup %5601  ;;  %v4080_v54 = vmul.f32 %v7880_v39, %v4079_v22  ;;  %v2834_v38 = vmax.f32 %v7868_v44, 0.0  ;;  %v2932_v55 = vmul.f32 %v2736_v5, %v7868_v44  ;;  %v3132_v62 = vand.u32 2147483647, %v7960_v18 }
 0x2b1   : > { %v4090_v63 = vand.u32 2147483647, %v7890_v42  ;;  %5611 = vlog2.f32 %v4102_v46  ;;  %v3405_v30 = vmul.f32 1.442695, %v3229_v13  ;;  %v2486_v57 = vadd.f32 %v7578_v47, %v7572_v12  ;;  %v2738_v13 = vld [vmem:[%s5806_s8 + $0x268] sm:$0xff] }
 0x2b2   : > { %v4562_v31 = vsel %vm4426_vm2, %v4395_v9, 0.0  ;;  %v4074_v19 = vsel %vm7963_vm11, %v4071_v4, %v4068_v32  ;;  %v4088_v39 = vadd.f32 1.0, %v4087_v29  ;;  %v4111_v43 = vadd.f32 1.0, %v7972_v52  ;;  %v8655_v9 = vld [vmem:[#allocation14_spill] sm:$0xff]  ;;  %v8656_v32 = vld [vmem:[#allocation15_spill] sm:$0xff] }
 0x2b3   : > { %v4077_v44 = vmul.f32 0.6931472, %v5602_v15  ;;  %v2835_v28 = vmax.f32 %v7894_v36, 0.0  ;;  %v2933_v6 = vmul.f32 %v2737_v2, %v7894_v36  ;;  %5613 = vpow2.f32 %v3403_v11 }
 0x2b4   : > { %v5604_v48 = vpop.eup %5603  ;;  %v4096_v12 = vmul.f32 -0.5, %v7915_v10  ;;  %v4099_v47 = vand.u32 2147483647, %v7915_v10  ;;  %v7997_v33 = vsub.f32 %v2834_v38, %v2932_v55  ;;  %v3230_v22 = vsub.f32 0.0, %v3132_v62 }
 0x2b5   : > { %v7993_v59 = vpop.eup %5605  ;;  %v4563_v4 = vadd.f32 %v4562_v31, %v4561_v53  ;;  %v4396_v40 = vadd.f32 %v4074_v19, %v7902_v50  ;;  %5615 = vpow2.f32 %v3405_v30  ;;  %v8001_v46 = vadd.f32 %v7788_v14, %v2486_v57 }
 0x2b6   : > { %v4086_v5 = vmul.f32 0.6931472, %v5604_v48  ;;  %vm8003_vm13 = vcmp.lt.f32.partialorder %v4090_v63, 0.0004427343  ;;  %5617 = vlog2.f32 %v4111_v43  ;;  %v2489_v29 = vadd.f32 %v8656_v32, %v8655_v9 }
 0x2b7   : > { %v4083_v53 = vsel %vm7975_vm12, %v4080_v54, %v4077_v44  ;;  %v4089_v50 = vmul.f32 %v7890_v42, %v4088_v39  ;;  %v4120_v11 = vadd.f32 1.0, %v7993_v59  ;;  %v8014_v15 = vsub.f32 %v2835_v28, %v2933_v6  ;;  %v2739_v42 = vld [vmem:[%s5806_s8 + $0x270] sm:$0xff] }
 0x2b8   : > { %v5608_v38 = vpop.eup %5607  ;;  %v4097_v55 = vadd.f32 1.0, %v4096_v12  ;;  %vm8016_vm14 = vcmp.lt.f32.partialorder %v4099_v47, 0.0004427343  ;;  %v4105_v62 = vmul.f32 -0.5, %v7947_v3  ;;  %v3407_v63 = vmul.f32 1.442695, %v3230_v22 }
 0x2b9   : > { %v4564_v30 = vsel %vm4426_vm2, %v4396_v40, 0.0  ;;  %v2836_v56 = vmax.f32 %v7913_v21, 0.0  ;;  %v2934_v54 = vmul.f32 %v2738_v13, %v7913_v21  ;;  %v3133_v57 = vand.u32 2147483647, %v8001_v46  ;;  %v8659_v28 = vld [vmem:[#allocation8_spill] sm:$0xff]  ;;  %v8660_v6 = vld [vmem:[#allocation9_spill] sm:$0xff] }
 0x2ba   : > { %v4397_v31 = vadd.f32 %v4083_v53, %v7907_v27  ;;  %v4092_v19 = vsel %vm8003_vm13, %v4089_v50, %v4086_v5  ;;  %v4114_v39 = vmul.f32 -0.5, %v7972_v52  ;;  %v8031_v43 = vadd.f32 %v7788_v14, %v2489_v29 }
 0x2bb   : > { %v4095_v48 = vmul.f32 0.6931472, %v5608_v38  ;;  %v4108_v44 = vand.u32 2147483647, %v7947_v3  ;;  %5619 = vlog2.f32 %v4120_v11  ;;  %v2494_v21 = vadd.f32 %v8660_v6, %v8659_v28 }
 0x2bc   : > { %v8036_v12 = vpop.eup %5609  ;;  %v4106_v47 = vadd.f32 1.0, %v4105_v62  ;;  %v2837_v27 = vmax.f32 %v7933_v24, 0.0  ;;  %v2935_v22 = vmul.f32 %v2739_v42, %v7933_v24  ;;  %5621 = vpow2.f32 %v3407_v63  ;;  %v2740_v42 = vld [vmem:[%s5806_s8 + $0x278] sm:$0xff] }
 0x2bd   : > { %v4398_v40 = vadd.f32 %v4092_v19, %v7925_v60  ;;  %v4098_v5 = vmul.f32 %v7915_v10, %v4097_v55  ;;  %v4117_v36 = vand.u32 2147483647, %v7972_v52  ;;  %v3231_v13 = vsub.f32 0.0, %v3133_v57 }
 0x2be   : > { %v5612_v9 = vpop.eup %5611  ;;  %v4565_v32 = vadd.f32 %v4564_v30, %v4563_v4  ;;  %v4566_v29 = vsel %vm4426_vm2, %v4397_v31, 0.0  ;;  %v4115_v53 = vadd.f32 1.0, %v4114_v39  ;;  %v3134_v50 = vand.u32 2147483647, %v8031_v43 }
 0x2bf   : > { %v4101_v11 = vsel %vm8016_vm14, %v4098_v5, %v4095_v48  ;;  %v4129_v24 = vadd.f32 1.0, %v8036_v12  ;;  %v8048_v38 = vsub.f32 %v2836_v56, %v2934_v54  ;;  %v8051_v10 = vadd.f32 %v7788_v14, %v2494_v21  ;;  %v8669_v54 = vld [vmem:[#allocation18_spill] sm:$0xff] }
 0x2c0   : > { %v8053_v60 = vpop.eup %5613  ;;  %v4107_v4 = vmul.f32 %v7947_v3, %v4106_v47  ;;  %vm8056_vm15 = vcmp.lt.f32.partialorder %v4108_v44, 0.0004427343  ;;  %v4123_v62 = vmul.f32 -0.5, %v7993_v59  ;;  %v8061_v63 = vsub.f32 %v2837_v27, %v2935_v22 }
 0x2c1   : > { %v4567_v2 = vadd.f32 %v4566_v29, %v4565_v32  ;;  %v4568_v30 = vsel %vm4426_vm2, %v4398_v40, 0.0  ;;  %v4104_v56 = vmul.f32 0.6931472, %v5612_v9  ;;  %vm8064_vm0 = vcmp.lt.f32.partialorder %v4117_v36, 0.0004427343  ;;  %v2741_v40 = vld [vmem:[%s5806_s8 + $0x280] sm:$0xff] }
 0x2c2   : > { %v3409_v57 = vmul.f32 1.442695, %v3231_v13  ;;  %v8069_v3 = vpop.eup %5615  ;;  %v4399_v31 = vadd.f32 %v4101_v11, %v7950_v35  ;;  %v4116_v19 = vmul.f32 %v7972_v52, %v4115_v53  ;;  %v4126_v39 = vand.u32 2147483647, %v7993_v59 }
 0x2c3   : > { %v3232_v48 = vsub.f32 0.0, %v3134_v50  ;;  %v5618_v44 = vpop.eup %5617  ;;  %5623 = vlog2.f32 %v4129_v24  ;;  %v4138_v28 = vadd.f32 1.0, %v8053_v60  ;;  %v3135_v6 = vand.u32 2147483647, %v8051_v10 }
 0x2c4   : > { %v2497_v21 = vadd.f32 %v7634_v7, %v7629_v16  ;;  %v4569_v47 = vadd.f32 %v4568_v30, %v4567_v2  ;;  %v4124_v27 = vadd.f32 1.0, %v4123_v62  ;;  %v2838_v22 = vmax.f32 %v7960_v18, 0.0 }
 0x2c5   : > { %v2936_v35 = vmul.f32 %v2740_v42, %v7960_v18  ;;  %v4110_v52 = vsel %vm8056_vm15, %v4107_v4, %v4104_v56  ;;  %v4132_v5 = vmul.f32 -0.5, %v8036_v12  ;;  %v4147_v36 = vadd.f32 1.0, %v8069_v3  ;;  %v8667_v4 = vld [vmem:[#allocation16_spill] sm:$0xff] }
 0x2c6   : > { %5625 = vpow2.f32 %v3409_v57  ;;  %v4570_v13 = vsel %vm4426_vm2, %v4399_v31, 0.0  ;;  %v4113_v9 = vmul.f32 0.6931472, %v5618_v44  ;;  %v2839_v16 = vmax.f32 %v8001_v46, 0.0  ;;  %v2742_v57 = vld [vmem:[%s5806_s8 + $0x288] sm:$0xff] }
 0x2c7   : > { %v3411_v7 = vmul.f32 1.442695, %v3232_v48  ;;  %5627 = vlog2.f32 %v4138_v28  ;;  %v2937_v32 = vmul.f32 %v2741_v40, %v8001_v46  ;;  %v3233_v18 = vsub.f32 0.0, %v3135_v6  ;;  %v8668_v6 = vld [vmem:[#allocation17_spill] sm:$0xff] }
 0x2c8   : > { %v8089_v29 = vadd.f32 %v7788_v14, %v2497_v21  ;;  %v5620_v53 = vpop.eup %5619  ;;  %v4400_v50 = vadd.f32 %v4110_v52, %v7957_v20  ;;  %vm8092_vm1 = vcmp.lt.f32.partialorder %v4126_v39, 0.0004427343  ;;  %v8096_v24 = vsub.f32 %v2838_v22, %v2936_v35 }
 0x2c9   : > { %v2502_v55 = vadd.f32 %v8667_v4, %v7649_v41  ;;  %v8100_v62 = vpop.eup %5621  ;;  %v4125_v46 = vmul.f32 %v7993_v59, %v4124_v27  ;;  %v4135_v2 = vand.u32 2147483647, %v8036_v12  ;;  %v4141_v30 = vmul.f32 -0.5, %v8053_v60 }
 0x2ca   : > { %5629 = vlog2.f32 %v4147_v36  ;;  %v4571_v56 = vadd.f32 %v4570_v13, %v4569_v47  ;;  %v4119_v20 = vsel %vm8064_vm0, %v4116_v19, %v4113_v9  ;;  %v4133_v42 = vadd.f32 1.0, %v4132_v5  ;;  %v8672_v36 = vld [vmem:[#allocation19_spill] sm:$0xff]  ;;  %v8673_v13 = vld [vmem:[#allocation20_spill] sm:$0xff] }
 0x2cb   : > { %5631 = vpow2.f32 %v3411_v7  ;;  %v4122_v31 = vmul.f32 0.6931472, %v5620_v53  ;;  %v8108_v39 = vsub.f32 %v2839_v16, %v2937_v32  ;;  %v3413_v41 = vmul.f32 1.442695, %v3233_v18  ;;  %v2743_v7 = vld [vmem:[%s5806_s8 + $0x290] sm:$0xff] }
 0x2cc   : > { %v3136_v48 = vand.u32 2147483647, %v8089_v29  ;;  %v4572_v59 = vsel %vm4426_vm2, %v4400_v50, 0.0  ;;  %v4156_v44 = vadd.f32 1.0, %v8100_v62  ;;  %v8114_v28 = vadd.f32 %v7788_v14, %v2502_v55 }
 0x2cd   : > { %v2505_v19 = vadd.f32 %v8669_v54, %v8668_v6  ;;  %v4401_v21 = vadd.f32 %v4119_v20, %v7970_v61  ;;  %v4142_v47 = vadd.f32 1.0, %v4141_v30  ;;  %v4150_v27 = vmul.f32 -0.5, %v8069_v3 }
 0x2ce   : > { %v2840_v22 = vmax.f32 %v8031_v43, 0.0  ;;  %v4134_v35 = vmul.f32 %v8036_v12, %v4133_v42  ;;  %vm8122_vm3 = vcmp.lt.f32.partialorder %v4135_v2, 0.0004427343  ;;  %v4144_v52 = vand.u32 2147483647, %v8053_v60 }
 0x2cf   : > { %v2938_v5 = vmul.f32 %v2742_v57, %v8031_v43  ;;  %v2510_v9 = vadd.f32 %v8673_v13, %v8672_v36  ;;  %v4573_v16 = vadd.f32 %v4572_v59, %v4571_v56  ;;  %v4128_v61 = vsel %vm8092_vm1, %v4125_v46, %v4122_v31 }
 0x2d0   : > { %5633 = vpow2.f32 %v3413_v41  ;;  %v3234_v32 = vsub.f32 0.0, %v3136_v48  ;;  %v5624_v18 = vpop.eup %5623  ;;  %v3137_v12 = vand.u32 2147483647, %v8114_v28  ;;  %v8135_v53 = vadd.f32 %v7788_v14, %v2505_v19 }
 0x2d1   : > { %5635 = vlog2.f32 %v4156_v44  ;;  %v2513_v43 = vadd.f32 %v7697_v51, %v7694_v49  ;;  %v4574_v50 = vsel %vm4426_vm2, %v4401_v21, 0.0  ;;  %v8141_v4 = vmul.f32 %v8053_v60, %v4142_v47 }
 0x2d2   : > { %v4151_v11 = vadd.f32 1.0, %v4150_v27  ;;  %v4153_v55 = vand.u32 2147483647, %v8069_v3  ;;  %v4402_v2 = vadd.f32 %v4128_v61, %v7997_v33  ;;  %vm8147_vm4 = vcmp.lt.f32.partialorder %v4144_v52, 0.0004427343 }
 0x2d3   : > { %v8144_v46 = vpop.eup %5625  ;;  %v2841_v56 = vmax.f32 %v8051_v10, 0.0  ;;  %v2939_v49 = vmul.f32 %v2743_v7, %v8051_v10  ;;  %v8154_v51 = vadd.f32 %v7788_v14, %v2510_v9  ;;  %v4131_v60 = vmul.f32 0.6931472, %v5624_v18 }
 0x2d4   : > { %v4159_v20 = vmul.f32 -0.5, %v8100_v62  ;;  %v8157_v42 = vsub.f32 %v2840_v22, %v2938_v5  ;;  %v3415_v57 = vmul.f32 1.442695, %v3234_v32  ;;  %v5628_v31 = vpop.eup %5627  ;;  %v3235_v33 = vsub.f32 0.0, %v3137_v12  ;;  %v2744_v22 = vld [vmem:[%s5806_s8 + $0x298] sm:$0xff] }
 0x2d5   : > { %v3138_v41 = vand.u32 2147483647, %v8135_v53  ;;  %v8161_v48 = vadd.f32 %v7788_v14, %v2513_v43  ;;  %v2518_v10 = vadd.f32 %v7711_v0, %v7705_v1  ;;  %v4575_v59 = vadd.f32 %v4574_v50, %v4573_v16 }
 0x2d6   : > { %v4152_v44 = vmul.f32 %v8069_v3, %v4151_v11  ;;  %vm8166_vm5 = vcmp.lt.f32.partialorder %v4153_v55, 0.0004427343  ;;  %v4165_v54 = vadd.f32 1.0, %v8144_v46  ;;  %v4576_v21 = vsel %vm4426_vm2, %v4402_v2, 0.0 }
 0x2d7   : > { %v5630_v19 = vpop.eup %5629  ;;  %v4162_v47 = vand.u32 2147483647, %v8100_v62  ;;  %v8173_v27 = vsub.f32 %v2841_v56, %v2939_v49  ;;  %v3139_v52 = vand.u32 2147483647, %v8154_v51  ;;  %v4137_v0 = vsel %vm8122_vm3, %v4134_v35, %v4131_v60 }
 0x2d8   : > { %v8177_v1 = vpop.eup %5631  ;;  %v4140_v3 = vmul.f32 0.6931472, %v5628_v31  ;;  %v4160_v5 = vadd.f32 1.0, %v4159_v20  ;;  %5637 = vpow2.f32 %v3415_v57  ;;  %v3417_v36 = vmul.f32 1.442695, %v3235_v33 }
 0x2d9   : > { %v3236_v13 = vsub.f32 0.0, %v3138_v41  ;;  %v3140_v9 = vand.u32 2147483647, %v8161_v48  ;;  %v8183_v16 = vadd.f32 %v7788_v14, %v2518_v10  ;;  %5639 = vlog2.f32 %v4165_v54 }
 0x2da   : > { %v2842_v61 = vmax.f32 %v8089_v29, 0.0  ;;  %v2940_v7 = vmul.f32 %v2744_v22, %v8089_v29  ;;  %v2521_v40 = vadd.f32 %v7728_v17, %v7721_v23  ;;  %v4403_v35 = vadd.f32 %v4137_v0, %v8014_v15  ;;  %v2745_v23 = vld [vmem:[%s5806_s8 + $0x2a0] sm:$0xff] }
 0x2db   : > { %v4149_v32 = vmul.f32 0.6931472, %v5630_v19  ;;  %v4174_v18 = vadd.f32 1.0, %v8177_v1  ;;  %v3237_v12 = vsub.f32 0.0, %v3139_v52  ;;  %v4577_v43 = vadd.f32 %v4576_v21, %v4575_v59  ;;  %v2746_v59 = vld [vmem:[%s5806_s8 + $0x2a8] sm:$0xff] }
 0x2dc   : > { %v4146_v50 = vsel %vm8147_vm4, %v8141_v4, %v4140_v3  ;;  %v4161_v11 = vmul.f32 %v8100_v62, %v4160_v5  ;;  %vm8195_vm6 = vcmp.lt.f32.partialorder %v4162_v47, 0.0004427343  ;;  %5641 = vpow2.f32 %v3417_v36 }
 0x2dd   : > { %v8199_v29 = vpop.eup %5633  ;;  %v3419_v17 = vmul.f32 1.442695, %v3236_v13  ;;  %v3238_v15 = vsub.f32 0.0, %v3140_v9  ;;  %v3141_v2 = vand.u32 2147483647, %v8183_v16  ;;  %v8203_v49 = vsub.f32 %v2842_v61, %v2940_v7 }
 0x2de   : > { %v5636_v56 = vpop.eup %5635  ;;  %v2843_v4 = vmax.f32 %v8114_v28, 0.0  ;;  %v8207_v62 = vadd.f32 %v7788_v14, %v2521_v40  ;;  %v2526_v30 = vadd.f32 %v7740_v34, %v7737_v58  ;;  %v4578_v60 = vsel %vm4426_vm2, %v4403_v35, 0.0 }
 0x2df   : > { %v4155_v20 = vsel %vm8166_vm5, %v4152_v44, %v4149_v32  ;;  %5643 = vlog2.f32 %v4174_v18  ;;  %v3421_v57 = vmul.f32 1.442695, %v3237_v12  ;;  %v4404_v31 = vadd.f32 %v4146_v50, %v8048_v38  ;;  %v2747_v50 = vld [vmem:[%s5806_s8 + $0x2b0] sm:$0xff] }
 0x2e0   : > { %v4168_v33 = vmul.f32 -0.5, %v8144_v46  ;;  %v4183_v41 = vadd.f32 1.0, %v8199_v29  ;;  %v2941_v10 = vmul.f32 %v2745_v23, %v8114_v28  ;;  %v4158_v54 = vmul.f32 0.6931472, %v5636_v56 }
 0x2e1   : > { %5645 = vpow2.f32 %v3419_v17  ;;  %v3423_v19 = vmul.f32 1.442695, %v3238_v15  ;;  %v3239_v58 = vsub.f32 0.0, %v3141_v2  ;;  %v4405_v34 = vadd.f32 %v4155_v20, %v8061_v63  ;;  %v2748_v17 = vld [vmem:[%s5806_s8 + $0x2b8] sm:$0xff] }
 0x2e2   : > { %v2844_v6 = vmax.f32 %v8135_v53, 0.0  ;;  %v3142_v44 = vand.u32 2147483647, %v8207_v62  ;;  %v8223_v21 = vadd.f32 %v7788_v14, %v2526_v30  ;;  %v4171_v38 = vand.u32 2147483647, %v8144_v46  ;;  %v8682_v20 = vld [vmem:[#allocation21_spill] sm:$0xff] }
 0x2e3   : > { %v2942_v47 = vmul.f32 %v2746_v59, %v8135_v53  ;;  %5647 = vpow2.f32 %v3421_v57  ;;  %v2529_v28 = vadd.f32 %v7754_v37, %v7749_v25  ;;  %v4579_v22 = vadd.f32 %v4578_v60, %v4577_v43  ;;  %v8683_v57 = vld [vmem:[#allocation22_spill] sm:$0xff] }
 0x2e4   : > { %v4580_v52 = vsel %vm4426_vm2, %v4404_v31, 0.0  ;;  %v4169_v0 = vadd.f32 1.0, %v4168_v33  ;;  %5649 = vlog2.f32 %v4183_v41  ;;  %v4164_v3 = vsel %vm8195_vm6, %v4161_v11, %v4158_v54 }
 0x2e5   : > { %v8230_v63 = vpop.eup %5637  ;;  %v4177_v5 = vmul.f32 -0.5, %v8177_v1  ;;  %5651 = vpow2.f32 %v3423_v19  ;;  %v3425_v36 = vmul.f32 1.442695, %v3239_v58  ;;  %v4582_v53 = vsel %vm4426_vm2, %v4405_v34, 0.0 }
 0x2e6   : > { %v8236_v13 = vsub.f32 %v2843_v4, %v2941_v10  ;;  %v3240_v25 = vsub.f32 0.0, %v3142_v44  ;;  %v3143_v37 = vand.u32 2147483647, %v8223_v21  ;;  %v5640_v9 = vpop.eup %5639  ;;  %v4581_v61 = vadd.f32 %v4580_v52, %v4579_v22 }
 0x2e7   : > { %vm8239_vm7 = vcmp.lt.f32.partialorder %v4171_v38, 0.0004427343  ;;  %v8243_v40 = vsub.f32 %v2844_v6, %v2942_v47  ;;  %v8246_v35 = vadd.f32 %v7788_v14, %v2529_v28  ;;  %v4406_v32 = vadd.f32 %v4164_v3, %v8096_v24 }
 0x2e8   : > { %v4170_v18 = vmul.f32 %v8144_v46, %v4169_v0  ;;  %v4180_v12 = vand.u32 2147483647, %v8177_v1  ;;  %v4186_v43 = vmul.f32 -0.5, %v8199_v29  ;;  %v4583_v11 = vadd.f32 %v4582_v53, %v4581_v61 }
 0x2e9   : > { %v4178_v55 = vadd.f32 1.0, %v4177_v5  ;;  %v4192_v23 = vadd.f32 1.0, %v8230_v63  ;;  %5653 = vpow2.f32 %v3425_v36  ;;  %v8255_v15 = vpop.eup %5641  ;;  %v4167_v2 = vmul.f32 0.6931472, %v5640_v9  ;;  %v2749_v5 = vld [vmem:[%s5806_s8 + $0x2c0] sm:$0xff] }
 0x2ea   : > { %v2845_v56 = vmax.f32 %v8154_v51, 0.0  ;;  %v3427_v4 = vmul.f32 1.442695, %v3240_v25  ;;  %v3241_v24 = vsub.f32 0.0, %v3143_v37  ;;  %v4189_v46 = vand.u32 2147483647, %v8199_v29 }
 0x2eb   : > { %v2943_v30 = vmul.f32 %v2747_v50, %v8154_v51  ;;  %v3144_v60 = vand.u32 2147483647, %v8246_v35  ;;  %v2534_v31 = vadd.f32 %v8683_v57, %v8682_v20  ;;  %v4584_v41 = vsel %vm4426_vm2, %v4406_v32, 0.0 }
 0x2ec   : > { %v5644_v33 = vpop.eup %5643  ;;  %v4187_v10 = vadd.f32 1.0, %v4186_v43  ;;  %v2846_v59 = vmax.f32 %v8161_v48, 0.0  ;;  %v2944_v54 = vmul.f32 %v2748_v17, %v8161_v48  ;;  %5655 = vlog2.f32 %v4192_v23 }
 0x2ed   : > { %v4201_v19 = vadd.f32 1.0, %v8255_v15  ;;  %v3242_v58 = vsub.f32 0.0, %v3144_v60  ;;  %v8268_v51 = vadd.f32 %v7788_v14, %v2534_v31  ;;  %v4173_v6 = vsel %vm8239_vm7, %v4170_v18, %v4167_v2  ;;  %v8688_v18 = vld [vmem:[#allocation23_spill] sm:$0xff] }
 0x2ee   : > { %v8270_v34 = vpop.eup %5645  ;;  %v4195_v44 = vmul.f32 -0.5, %v8230_v63  ;;  %5657 = vpow2.f32 %v3427_v4  ;;  %v3429_v38 = vmul.f32 1.442695, %v3241_v24  ;;  %v4176_v47 = vmul.f32 0.6931472, %v5644_v33  ;;  %v2750_v60 = vld [vmem:[%s5806_s8 + $0x2c8] sm:$0xff] }
 0x2ef   : > { %v4179_v48 = vmul.f32 %v8177_v1, %v4178_v55  ;;  %vm8276_vm8 = vcmp.lt.f32.partialorder %v4180_v12, 0.0004427343  ;;  %v8280_v22 = vsub.f32 %v2845_v56, %v2943_v30  ;;  %v4585_v52 = vadd.f32 %v4584_v41, %v4583_v11  ;;  %v8316_v4 = vld [vmem:[#allocation3] ss:$0 sm:$0xff]  ;;  %v2751_v33 = vld [vmem:[%s5806_s8 + $0x2d0] sm:$0xff] }
 0x2f0   : > { %v8282_v14 = vpop.eup %5647  ;;  %vm8284_vm9 = vcmp.lt.f32.partialorder %v4189_v46, 0.0004427343  ;;  %v8288_v3 = vsub.f32 %v2846_v59, %v2944_v54  ;;  %v3431_v36 = vmul.f32 1.442695, %v3242_v58  ;;  %v3145_v53 = vand.u32 2147483647, %v8268_v51 }
 0x2f1   : > { %v5650_v1 = vpop.eup %5649  ;;  %v4407_v25 = vadd.f32 %v4173_v6, %v8108_v39  ;;  %v4188_v37 = vmul.f32 %v8199_v29, %v4187_v10  ;;  %5659 = vlog2.f32 %v4201_v19  ;;  %v4210_v9 = vadd.f32 1.0, %v8270_v34 }
 0x2f2   : > { %v8295_v61 = vpop.eup %5651  ;;  %v4196_v7 = vadd.f32 1.0, %v4195_v44  ;;  %v2847_v32 = vmax.f32 %v8183_v16, 0.0  ;;  %5661 = vpow2.f32 %v3429_v38  ;;  %v2537_v12 = vadd.f32 %v7798_v26, %v8688_v18 }
 0x2f3   : > { %v4182_v43 = vsel %vm8276_vm8, %v4179_v48, %v4176_v47  ;;  %v4219_v50 = vadd.f32 1.0, %v8282_v14  ;;  %v2945_v39 = vmul.f32 %v2749_v5, %v8183_v16  ;;  %v2542_v29 = vadd.f32 %v7815_v8, %v7810_v45 }
 0x2f4   : > { %v4198_v11 = vand.u32 2147483647, %v8230_v63  ;;  %v4204_v55 = vmul.f32 -0.5, %v8255_v15  ;;  %5663 = vpow2.f32 %v3431_v36  ;;  %v3243_v23 = vsub.f32 0.0, %v3145_v53  ;;  %v8693_v53 = vld [vmem:[#allocation24_spill] sm:$0xff] }
 0x2f5   : > { %v4586_v17 = vsel %vm4426_vm2, %v4407_v25, 0.0  ;;  %v4185_v26 = vmul.f32 0.6931472, %v5650_v1  ;;  %5665 = vlog2.f32 %v4210_v9  ;;  %v4228_v2 = vadd.f32 1.0, %v8295_v61  ;;  %v8694_v1 = vld [vmem:[#allocation25_spill] sm:$0xff] }
 0x2f6   : > { %v8310_v56 = vpop.eup %5653  ;;  %v4408_v16 = vadd.f32 %v4182_v43, %v8157_v42  ;;  %v8314_v45 = vmul.f32 %v8230_v63, %v4196_v7  ;;  %v3433_v8 = vmul.f32 1.442695, %v3243_v23  ;;  %v8319_v24 = vadd.f32 %v8316_v4, %v2537_v12  ;;  %v8695_v7 = vld [vmem:[#allocation26_spill] sm:$0xff] }
 0x2f7   : > { %v4213_v46 = vmul.f32 -0.5, %v8270_v34  ;;  %5667 = vlog2.f32 %v4219_v50  ;;  %v8322_v30 = vsub.f32 %v2847_v32, %v2945_v39  ;;  %v8326_v20 = vadd.f32 %v8316_v4, %v2542_v29 }
 0x2f8   : > { %v4587_v57 = vadd.f32 %v4586_v17, %v4585_v52  ;;  %vm8328_vm10 = vcmp.lt.f32.partialorder %v4198_v11, 0.0004427343  ;;  %v4207_v63 = vand.u32 2147483647, %v8255_v15  ;;  %v2848_v31 = vmax.f32 %v8207_v62, 0.0 }
 0x2f9   : > { %5669 = vpow2.f32 %v3433_v8  ;;  %v4191_v41 = vsel %vm8284_vm9, %v4188_v37, %v4185_v26  ;;  %v4205_v10 = vadd.f32 1.0, %v4204_v55  ;;  %v4237_v59 = vadd.f32 1.0, %v8310_v56  ;;  %v5656_v54 = vpop.eup %5655  ;;  %v2752_v55 = vld [vmem:[%s5806_s8 + $0x2d8] sm:$0xff] }
 0x2fa   : > { %5671 = vlog2.f32 %v4228_v2  ;;  %v4588_v19 = vsel %vm4426_vm2, %v4408_v16, 0.0  ;;  %v4216_v58 = vand.u32 2147483647, %v8270_v34  ;;  %v2946_v6 = vmul.f32 %v2750_v60, %v8207_v62 }
 0x2fb   : > { %v3146_v44 = vand.u32 2147483647, %v8319_v24  ;;  %v8342_v38 = vpop.eup %5657  ;;  %v4214_v47 = vadd.f32 1.0, %v4213_v46  ;;  %v2849_v48 = vmax.f32 %v8223_v21, 0.0  ;;  %v2947_v28 = vmul.f32 %v2751_v33, %v8223_v21  ;;  %v8696_v21 = vld [vmem:[#allocation27_spill] sm:$0xff] }
 0x2fc   : > { %v3147_v52 = vand.u32 2147483647, %v8326_v20  ;;  %v4409_v0 = vadd.f32 %v4191_v41, %v8173_v27  ;;  %vm8348_vm11 = vcmp.lt.f32.partialorder %v4207_v63, 0.0004427343  ;;  %v4222_v62 = vmul.f32 -0.5, %v8282_v14  ;;  %v8699_v41 = vld [vmem:[#allocation10_spill] sm:$0xff] }
 0x2fd   : > { %v3244_v36 = vsub.f32 0.0, %v3146_v44  ;;  %v2545_v25 = vadd.f32 %v8694_v1, %v8693_v53  ;;  %v4194_v37 = vmul.f32 0.6931472, %v5656_v54  ;;  %5673 = vlog2.f32 %v4237_v59 }
 0x2fe   : > { %v3245_v9 = vsub.f32 0.0, %v3147_v52  ;;  %v2550_v32 = vadd.f32 %v8696_v21, %v8695_v7  ;;  %v5660_v18 = vpop.eup %5659  ;;  %v4589_v12 = vadd.f32 %v4588_v19, %v4587_v57  ;;  %v4206_v27 = vmul.f32 %v8255_v15, %v4205_v10  ;;  %v8700_v10 = vld [vmem:[#allocation11_spill] sm:$0xff] }
 0x2ff   : > { %v4246_v43 = vadd.f32 1.0, %v8342_v38  ;;  %v3435_v50 = vmul.f32 1.442695, %v3244_v36  ;;  %v8359_v39 = vpop.eup %5661  ;;  %v8361_v29 = vsub.f32 %v2848_v31, %v2946_v6  ;;  %v8363_v11 = vsub.f32 %v2849_v48, %v2947_v28 }
 0x300   : > { %v3437_v23 = vmul.f32 1.442695, %v3245_v9  ;;  %v8367_v17 = vadd.f32 %v8316_v4, %v2545_v25  ;;  %v4590_v26 = vsel %vm4426_vm2, %v4409_v0, 0.0  ;;  %v4215_v2 = vmul.f32 %v8270_v34, %v4214_v47 }
 0x301   : > { %vm8371_vm12 = vcmp.lt.f32.partialorder %v4216_v58, 0.0004427343  ;;  %v4225_v16 = vand.u32 2147483647, %v8282_v14  ;;  %v8377_v8 = vadd.f32 %v8316_v4, %v2550_v32  ;;  %v8379_v46 = vpop.eup %5663  ;;  %v4200_v60 = vsel %vm8328_vm10, %v8314_v45, %v4194_v37 }
 0x302   : > { %v4203_v57 = vmul.f32 0.6931472, %v5660_v18  ;;  %v4223_v63 = vadd.f32 1.0, %v4222_v62  ;;  %5675 = vpow2.f32 %v3435_v50  ;;  %v5666_v31 = vpop.eup %5665  ;;  %v4255_v34 = vadd.f32 1.0, %v8359_v39 }
 0x303   : > { %5677 = vlog2.f32 %v4246_v43  ;;  %v2948_v33 = vmul.f32 %v2752_v55, %v8246_v35  ;;  %v2553_v59 = vadd.f32 %v8700_v10, %v8699_v41  ;;  %v4231_v54 = vmul.f32 -0.5, %v8295_v61 }
 0x304   : > { %v2850_v19 = vmax.f32 %v8246_v35, 0.0  ;;  %5679 = vpow2.f32 %v3437_v23  ;;  %v3148_v42 = vand.u32 2147483647, %v8367_v17  ;;  %v5668_v45 = vpop.eup %5667  ;;  %v4591_v58 = vadd.f32 %v4590_v26, %v4589_v12 }
 0x305   : > { %v4410_v6 = vadd.f32 %v4200_v60, %v8203_v49  ;;  %v4264_v44 = vadd.f32 1.0, %v8379_v46  ;;  %v3149_v47 = vand.u32 2147483647, %v8377_v8  ;;  %v4209_v28 = vsel %vm8348_vm11, %v4206_v27, %v4203_v57 }
 0x306   : > { %v8394_v48 = vpop.eup %5669  ;;  %v4212_v52 = vmul.f32 0.6931472, %v5666_v31  ;;  %v4224_v0 = vmul.f32 %v8282_v14, %v4223_v63  ;;  %v3246_v35 = vsub.f32 0.0, %v3148_v42  ;;  %v4240_v36 = vmul.f32 -0.5, %v8310_v56 }
 0x307   : > { %v5672_v62 = vpop.eup %5671  ;;  %5681 = vlog2.f32 %v4255_v34  ;;  %v4273_v53 = vadd.f32 1.0, %v8394_v48  ;;  %v8402_v49 = vadd.f32 %v8316_v4, %v2553_v59  ;;  %v4232_v1 = vadd.f32 1.0, %v4231_v54 }
 0x308   : > { %v4234_v25 = vand.u32 2147483647, %v8295_v61  ;;  %v3439_v37 = vmul.f32 1.442695, %v3246_v35  ;;  %v3247_v9 = vsub.f32 0.0, %v3149_v47  ;;  %v4592_v5 = vsel %vm4426_vm2, %v4410_v6, 0.0 }
 0x309   : > { %v4411_v7 = vadd.f32 %v4209_v28, %v8236_v13  ;;  %v4221_v14 = vmul.f32 0.6931472, %v5668_v45  ;;  %5683 = vlog2.f32 %v4264_v44  ;;  %v4218_v21 = vsel %vm8371_vm12, %v4215_v2, %v4212_v52 }
 0x30a   : > { %v4230_v32 = vmul.f32 0.6931472, %v5672_v62  ;;  %5685 = vpow2.f32 %v3439_v37  ;;  %v3441_v18 = vmul.f32 1.442695, %v3247_v9  ;;  %v5674_v12 = vpop.eup %5673  ;;  %v4241_v4 = vadd.f32 1.0, %v4240_v36 }
 0x30b   : > { %v4243_v27 = vand.u32 2147483647, %v8310_v56  ;;  %5687 = vlog2.f32 %v4273_v53  ;;  %v3150_v43 = vand.u32 2147483647, %v8402_v49  ;;  %vm8411_vm13 = vcmp.lt.f32.partialorder %v4225_v16, 0.0004427343 }
 0x30c   : > { %v4233_v13 = vmul.f32 %v8295_v61, %v4232_v1  ;;  %vm8416_vm14 = vcmp.lt.f32.partialorder %v4234_v25, 0.0004427343  ;;  %5689 = vpow2.f32 %v3441_v18  ;;  %v4412_v23 = vadd.f32 %v4218_v21, %v8243_v40  ;;  %v2754_v1 = vld [vmem:[%s5806_s8 + $0x2e8] sm:$0xff] }
 0x30d   : > { %v4227_v26 = vsel %vm8411_vm13, %v4224_v0, %v4221_v14  ;;  %v4249_v2 = vmul.f32 -0.5, %v8342_v38  ;;  %v3248_v15 = vsub.f32 0.0, %v3150_v43  ;;  %v4593_v16 = vadd.f32 %v4592_v5, %v4591_v58 }
 0x30e   : > { %v4236_v60 = vsel %vm8416_vm14, %v4233_v13, %v4230_v32  ;;  %v4239_v57 = vmul.f32 0.6931472, %v5674_v12  ;;  %v8426_v61 = vsub.f32 %v2850_v19, %v2948_v33  ;;  %v4594_v31 = vsel %vm4426_vm2, %v4411_v7, 0.0  ;;  %v2753_v33 = vld [vmem:[%s5806_s8 + $0x2e0] sm:$0xff] }
 0x30f   : > { %v8428_v63 = vpop.eup %5675  ;;  %v4242_v40 = vmul.f32 %v8310_v56, %v4241_v4  ;;  %vm8432_vm15 = vcmp.lt.f32.partialorder %v4243_v27, 0.0004427343  ;;  %v3443_v41 = vmul.f32 1.442695, %v3248_v15  ;;  %v4413_v59 = vadd.f32 %v4227_v26, %v8280_v22 }
 0x310   : > { %v5678_v10 = vpop.eup %5677  ;;  %v4252_v54 = vand.u32 2147483647, %v8342_v38  ;;  %v4258_v42 = vmul.f32 -0.5, %v8359_v39  ;;  %v4282_v19 = vadd.f32 1.0, %v8428_v63  ;;  %v4596_v58 = vsel %vm4426_vm2, %v4412_v23, 0.0 }
 0x311   : > { %v8441_v45 = vpop.eup %5679  ;;  %v4414_v56 = vadd.f32 %v4236_v60, %v8288_v3  ;;  %v4250_v6 = vadd.f32 1.0, %v4249_v2  ;;  %5691 = vpow2.f32 %v3443_v41  ;;  %v4245_v44 = vsel %vm8432_vm15, %v4242_v40, %v4239_v57 }
 0x312   : > { %v4267_v22 = vmul.f32 -0.5, %v8379_v46  ;;  %5693 = vlog2.f32 %v4282_v19  ;;  %v4291_v47 = vadd.f32 1.0, %v8441_v45  ;;  %v4595_v28 = vadd.f32 %v4594_v31, %v4593_v16 }
 0x313   : > { %v4248_v52 = vmul.f32 0.6931472, %v5678_v10  ;;  %v2851_v0 = vmax.f32 %v8268_v51, 0.0  ;;  %v2949_v35 = vmul.f32 %v2753_v33, %v8268_v51  ;;  %v4598_v36 = vsel %vm4426_vm2, %v4413_v59, 0.0 }
 0x314   : > { %v5682_v62 = vpop.eup %5681  ;;  %v4259_v3 = vadd.f32 1.0, %v4258_v42  ;;  %v4261_v53 = vand.u32 2147483647, %v8359_v39  ;;  %5695 = vlog2.f32 %v4291_v47  ;;  %v4597_v25 = vadd.f32 %v4596_v58, %v4595_v28 }
 0x315   : > { %v4415_v37 = vadd.f32 %v4245_v44, %v8322_v30  ;;  %v4251_v9 = vmul.f32 %v8342_v38, %v4250_v6  ;;  %vm8456_vm0 = vcmp.lt.f32.partialorder %v4252_v54, 0.0004427343  ;;  %v4600_v51 = vsel %vm4426_vm2, %v4414_v56, 0.0  ;;  %v2755_v6 = vld [vmem:[%s5806_s8 + $0x2f0] sm:$0xff] }
 0x316   : > { %v5684_v7 = vpop.eup %5683  ;;  %v4268_v14 = vadd.f32 1.0, %v4267_v22  ;;  %v4276_v21 = vmul.f32 -0.5, %v8394_v48  ;;  %v2852_v32 = vmax.f32 %v8319_v24, 0.0  ;;  %v4599_v12 = vadd.f32 %v4598_v36, %v4597_v25 }
 0x317   : > { %v8463_v18 = vpop.eup %5685  ;;  %v4254_v30 = vsel %vm8456_vm0, %v4251_v9, %v4248_v52  ;;  %v4257_v4 = vmul.f32 0.6931472, %v5682_v62  ;;  %v2950_v38 = vmul.f32 %v2754_v1, %v8319_v24  ;;  %v4260_v43 = vmul.f32 %v8359_v39, %v4259_v3  ;;  %v2756_v9 = vld [vmem:[%s5806_s8 + $0x2f8] sm:$0xff] }
 0x318   : > { %v5688_v27 = vpop.eup %5687  ;;  %vm8469_vm1 = vcmp.lt.f32.partialorder %v4261_v53, 0.0004427343  ;;  %v4270_v13 = vand.u32 2147483647, %v8379_v46  ;;  %v4300_v55 = vadd.f32 1.0, %v8463_v18  ;;  %v4601_v26 = vadd.f32 %v4600_v51, %v4599_v12  ;;  %v2757_v51 = vld [vmem:[%s5806_s8 + $0x300] sm:$0xff] }
 0x319   : > { %v8475_v23 = vpop.eup %5689  ;;  %v4602_v2 = vsel %vm4426_vm2, %v4415_v37, 0.0  ;;  %v4266_v15 = vmul.f32 0.6931472, %v5684_v7  ;;  %v4285_v16 = vmul.f32 -0.5, %v8428_v63  ;;  %v4416_v24 = vadd.f32 %v4254_v30, %v8361_v29 }
 0x31a   : > { %v4269_v39 = vmul.f32 %v8379_v46, %v4268_v14  ;;  %v4277_v60 = vadd.f32 1.0, %v4276_v21  ;;  %5697 = vlog2.f32 %v4300_v55  ;;  %v4263_v57 = vsel %vm8469_vm1, %v4260_v43, %v4257_v4 }
 0x31b   : > { %v4279_v31 = vand.u32 2147483647, %v8394_v48  ;;  %v4294_v40 = vmul.f32 -0.5, %v8441_v45  ;;  %v4309_v34 = vadd.f32 1.0, %v8475_v23  ;;  %vm8486_vm3 = vcmp.lt.f32.partialorder %v4270_v13, 0.0004427343 }
 0x31c   : > { %v3047_v10 = vsub.f32 %v2851_v0, %v2949_v35  ;;  %v4275_v29 = vmul.f32 0.6931472, %v5688_v27  ;;  %v3048_v59 = vsub.f32 %v2852_v32, %v2950_v38  ;;  %v4603_v46 = vadd.f32 %v4602_v2, %v4601_v26  ;;  %v2758_v2 = vld [vmem:[%s5806_s8 + $0x308] sm:$0xff] }
 0x31d   : > { %v4272_v54 = vsel %vm8486_vm3, %v4269_v39, %v4266_v15  ;;  %v4286_v42 = vadd.f32 1.0, %v4285_v16  ;;  %5699 = vlog2.f32 %v4309_v34  ;;  %v4604_v19 = vsel %vm4426_vm2, %v4416_v24, 0.0 }
 0x31e   : > { %v8492_v33 = vpop.eup %5691  ;;  %v4417_v58 = vadd.f32 %v4263_v57, %v8363_v11  ;;  %v4278_v56 = vmul.f32 %v8394_v48, %v4277_v60  ;;  %v4288_v44 = vand.u32 2147483647, %v8428_v63  ;;  %vm8499_vm4 = vcmp.lt.f32.partialorder %v4279_v31, 0.0004427343 }
 0x31f   : > { %v5694_v22 = vpop.eup %5693  ;;  %v4295_v28 = vadd.f32 1.0, %v4294_v40  ;;  %v4297_v52 = vand.u32 2147483647, %v8441_v45  ;;  %v4318_v0 = vadd.f32 1.0, %v8492_v33  ;;  %v4418_v35 = vadd.f32 %v4272_v54, %v8426_v61 }
 0x320   : > { %v4281_v11 = vsel %vm8499_vm4, %v4278_v56, %v4275_v29  ;;  %v4284_v48 = vmul.f32 0.6931472, %v5694_v22  ;;  %v4303_v62 = vmul.f32 -0.5, %v8463_v18  ;;  %v2853_v3 = vmax.f32 %v8326_v20, 0.0 }
 0x321   : > { %v5696_v36 = vpop.eup %5695  ;;  %v2951_v53 = vmul.f32 %v2755_v6, %v8326_v20  ;;  %v4287_v1 = vmul.f32 %v8428_v63, %v4286_v42  ;;  %5701 = vlog2.f32 %v4318_v0  ;;  %v4605_v25 = vadd.f32 %v4604_v19, %v4603_v46 }
 0x322   : > { %v4606_v37 = vsel %vm4426_vm2, %v4417_v58, 0.0  ;;  %vm8514_vm5 = vcmp.lt.f32.partialorder %v4288_v44, 0.0004427343  ;;  %v4293_v5 = vmul.f32 0.6931472, %v5696_v36  ;;  %v4419_v7 = vadd.f32 %v4281_v11, %v3047_v10 }
 0x323   : > { %v4290_v14 = vsel %vm8514_vm5, %v4287_v1, %v4284_v48  ;;  %v4296_v20 = vmul.f32 %v8441_v45, %v4295_v28  ;;  %v4312_v63 = vmul.f32 -0.5, %v8475_v23  ;;  %v2854_v21 = vmax.f32 %v8367_v17, 0.0 }
 0x324   : > { %vm8524_vm6 = vcmp.lt.f32.partialorder %v4297_v52, 0.0004427343  ;;  %v4304_v12 = vadd.f32 1.0, %v4303_v62  ;;  %v4608_v30 = vsel %vm4426_vm2, %v4418_v35, 0.0  ;;  %v2952_v4 = vmul.f32 %v2756_v9, %v8367_v17 }
 0x325   : > { %v4299_v38 = vsel %vm8524_vm6, %v4296_v20, %v4293_v5  ;;  %v4306_v27 = vand.u32 2147483647, %v8463_v18  ;;  %v4607_v43 = vadd.f32 %v4606_v37, %v4605_v25  ;;  %v3049_v45 = vsub.f32 %v2853_v3, %v2951_v53 }
 0x326   : > { %v2855_v50 = vmax.f32 %v8377_v8, 0.0  ;;  %v2953_v13 = vmul.f32 %v2757_v51, %v8377_v8  ;;  %v4420_v55 = vadd.f32 %v4290_v14, %v3048_v59  ;;  %v4313_v15 = vadd.f32 1.0, %v4312_v63 }
 0x327   : > { %v5698_v26 = vpop.eup %5697  ;;  %v4321_v16 = vmul.f32 -0.5, %v8492_v33  ;;  %v4609_v24 = vadd.f32 %v4608_v30, %v4607_v43  ;;  %v4610_v17 = vsel %vm4426_vm2, %v4419_v7, 0.0  ;;  %v4305_v60 = vmul.f32 %v8463_v18, %v4304_v12  ;;  %v4425_v7 = vld [vmem:[#allocation2] sm:$0x1] }
 0x328   : > { %v4302_v39 = vmul.f32 0.6931472, %v5698_v26  ;;  %v4315_v57 = vand.u32 2147483647, %v8475_v23  ;;  %v4421_v31 = vadd.f32 %v4299_v38, %v3049_v45  ;;  %v2856_v40 = vmax.f32 %v8402_v49, 0.0 }
 0x329   : > { %v3050_v34 = vsub.f32 %v2854_v21, %v2952_v4  ;;  %vm4307_vm7 = vcmp.lt.f32.partialorder %v4306_v27, 0.0004427343  ;;  %v2954_v41 = vmul.f32 %v2758_v2, %v8402_v49  ;;  %v4611_v29 = vadd.f32 %v4610_v17, %v4609_v24 }
 0x32a   : > { %v5700_v8 = vpop.eup %5699  ;;  %v4308_v10 = vsel %vm4307_vm7, %v4305_v60, %v4302_v39  ;;  %v4612_v59 = vsel %vm4426_vm2, %v4420_v55, 0.0  ;;  %v4314_v54 = vmul.f32 %v8475_v23, %v4313_v15  ;;  %v4322_v42 = vadd.f32 1.0, %v4321_v16 }
 0x32b   : > { %v4311_v46 = vmul.f32 0.6931472, %v5700_v8  ;;  %v4422_v19 = vadd.f32 %v4308_v10, %v3050_v34  ;;  %v3051_v18 = vsub.f32 %v2855_v50, %v2953_v13  ;;  %vm4316_vm8 = vcmp.lt.f32.partialorder %v4315_v57, 0.0004427343 }
 0x32c   : > { %v4324_v58 = vand.u32 2147483647, %v8492_v33  ;;  %v4614_v56 = vsel %vm4426_vm2, %v4421_v31, 0.0  ;;  %v4613_v44 = vadd.f32 %v4612_v59, %v4611_v29  ;;  %v4323_v52 = vmul.f32 %v8492_v33, %v4322_v42 }
 0x32d   : > { %v4317_v6 = vsel %vm4316_vm8, %v4314_v54, %v4311_v46  ;;  %v4616_v49 = vsel %vm4426_vm2, %v4422_v19, 0.0  ;;  %v3052_v35 = vsub.f32 %v2856_v40, %v2954_v41  ;;  %vm4633_vm10 = vcmask 0  }
 0x32e   : > { %v5702_v22 = vpop.eup %5701  ;;  %v4423_v47 = vadd.f32 %v4317_v6, %v3051_v18  ;;  %v4615_v0 = vadd.f32 %v4614_v56, %v4613_v44  ;;  %vm4325_vm9 = vcmp.lt.f32.partialorder %v4324_v58, 0.0004427343 }
 0x32f   : > { %v4320_v28 = vmul.f32 0.6931472, %v5702_v22 }
 0x330   : > { %v4618_v23 = vsel %vm4426_vm2, %v4423_v47, 0.0  ;;  %v4617_v48 = vadd.f32 %v4616_v49, %v4615_v0 }
 0x331   : > { %v4326_v11 = vsel %vm4325_vm9, %v4323_v52, %v4320_v28 }
 0x332   : > { %v4424_v62 = vadd.f32 %v4326_v11, %v3052_v35  ;;  %v4619_v36 = vadd.f32 %v4618_v23, %v4617_v48 }
 0x334   : > { %v4620_v3 = vsel %vm4426_vm2, %v4424_v62, 0.0 }
 0x335   : > { %v4621_v53 = vadd.f32 %v4620_v3, %v4619_v36 }
 0x337   : > { %4622 = vadd.xlane.f32.xlu0 %v4621_v53 }
 0x3c0   : > { %v4623_v1 = vpop.xlane.xlu0 %4622 }
 0x3c1   : > { %v4624_v25 = vrot.slane %v4623_v1, 4 }
 0x3c3   : > { %v4625_v37 = vadd.f32 %v4624_v25, %v4623_v1 }
 0x3c5   : > { %v4626_v9 = vrot.slane %v4625_v37, 2 }
 0x3c7   : > { %v4627_v61 = vadd.f32 %v4626_v9, %v4625_v37 }
 0x3c9   : > { %v4628_v5 = vrot.slane %v4627_v61, 1 }
 0x3cb   : > { %v4629_v33 = vadd.f32 %v4628_v5, %v4627_v61 }
 0x3cd   : > { %4964 = vpush %v4629_v33 }
 0x3fe   : > { %s4965_s29 = spop %4964  ;;  %4638 = sbr.rel (%p4958_p5) target bundleno = 1253 (0x4e5), region = 52 }
 0x3ff   : > { %v4631_v51 = vstv %s4965_s29 }
 0x400   : > { %v4632_v14 = vadd.f32 %v4631_v51, %v4425_v7 }
 0x402   : > { %4634 = vst.msk [vmem:[#allocation2] sm:$0x1] %vm4633_vm10, %v4632_v14 }
 0x403   : > { %v4640_v20 = vld [vmem:[%s8579_s5] sm:$0x3]  ;;  %vm4648_vm2 = vcmask 123904  }
 0x404   : > { %v4644_v63 = vmul.f32 1.442695, %v4640_v20  ;;  %v4639_v21 = vld [vmem:[%s8578_s4] sm:$0x3]  ;;  %v4641_v32 = vadd.f32 1.0, %v4640_v20 }
 0x405   : > { %v4642_v12 = vmul.f32 %v4639_v21, %v4639_v21 }
 0x406   : > { %5708 = vpow2.f32 %v4644_v63 }
 0x407   : > { %v4643_v30 = vsub.f32 %v4641_v32, %v4642_v12 }
 0x409   : > { %v4660_v16 = vld [vmem:[#allocation2] sm:$0x1] }
 0x413   : > { %v5709_v4 = vpop.eup %5708 }
 0x414   : > { %v4646_v38 = vsub.f32 %v4643_v30, %v5709_v4 }
 0x416   : > { %v4647_v27 = vmul.f32 -0.5, %v4646_v38 }
 0x418   : > { %v4649_v43 = vsel %vm4648_vm2, %v4647_v27, 0.0 }
 0x419   : > { %4650 = vadd.xlane.f32.xlu0 %v4649_v43 }
 0x4a2   : > { %v4651_v45 = vpop.xlane.xlu0 %4650 }
 0x4a3   : > { %v4652_v50 = vrot.slane %v4651_v45, 4 }
 0x4a5   : > { %v4653_v13 = vadd.f32 %v4652_v50, %v4651_v45 }
 0x4a7   : > { %v4654_v55 = vrot.slane %v4653_v13, 2 }
 0x4a9   : > { %v4655_v26 = vadd.f32 %v4654_v55, %v4653_v13 }
 0x4ab   : > { %v4656_v2 = vrot.slane %v4655_v26, 1 }
 0x4ad   : > { %v4657_v15 = vadd.f32 %v4656_v2, %v4655_v26 }
 0x4af   : > { %4966 = vpush %v4657_v15 }
 0x4e0   : > { %s4967_s13 = spop %4966 }
 0x4e1   : > { %v4659_v24 = vstv %s4967_s13 }
 0x4e2   : > { %v4661_v17 = vadd.f32 %v4660_v16, %v4659_v24 }
 0x4e4   : > { %4662 = vst.msk [vmem:[#allocation4] sm:$0x1] %vm4633_vm10, %v4661_v17 }
 0x4e5 PF: > { %p4972_p6 = scmp.eq.s32.totalorder %s5793_s24, 1  ;;  %s5748_s14 = smov [#allocation4]  }
 0x4e6   : > { %s4670_s15 = sshll.u32 %s5748_s14, 4  ;;  %s4671_s15 = int_to_ptr.vmem [resolvable:$true] %s4670_s15 }
 0x4e7   : > { %s5710_s16 = scalar_lea.vmem %s4671_s15, 16  ;;  %s5716_s17 = scalar_lea.vmem %s4671_s15, 32 }
 0x4e8   : > { %p5711_p7 = scmp.ne.s32.totalorder %s4671_s15, %s5710_s16  ;;  %p5717_p10 = scmp.lt.s32.totalorder %s4671_s15, %s4671_s15 }
 0x4e9   : > { %p5718_p11 = scmp.lt.s32.totalorder %s5716_s17, %s5710_s16 }
 0x4ea   : > { %p5712_p8 = pnand %p5711_p7, %p4972_p6 }
 0x4eb   : > { %p5719_p12 = por %p5718_p11, %p5717_p10 }
 0x4ec   : > { %p5713_p9 = pneg %p5712_p8 }
 0x4ee   : > { %p5720_p13 = pnand %p5719_p12, %p5713_p9 }
 0x4f0   : > { %5723 = shalt.err (!%p5720_p13)
}
 0x4f1   : > { %4969 = dma.vmem_to_hbm [thread:$0]  (%p4972_p6), %s4671_s15, 16, %s8580_s6, [#allocation5]  }
 0x4f2   : > { %5739 = dma.done.wait (%p4972_p6), [#allocation5], 16  }
 0x4f3   : > { %5741 = vsyncadd (%p4972_p6), [#allocation5], 4294967280 }
 0x4f4 PF: > { %s19_s23 = sadd.s32 1, %s5744_s23  }
 0x4f5   : > { %p16_p0 = scmp.ge.s32.totalorder %s19_s23, 4  }
 0x4f7   :  { %18 = sbr.rel (!%p16_p0) target bundleno = 4 (0x4), region = 82 }
 0x4fc   :  { %4683 = vsyncpa [#allocation5], 1 }
 0x4fd   :  { %4685 = vsyncpa [#allocation5 + $0x1], 1 }

</bundles_post_ra>
